<compile_context>
chip_gen: v5e
topology: v5e:2x2
jax: 0.10.0
libtpu: 0.0.40
codegen_flags: <defaults>
</compile_context>

<pallas_src>
import jax
import jax.numpy as jnp
from jax.experimental import pallas as pl
from jax.experimental.pallas import tpu as pltpu

LATENT_DIM = 20
BLOCK_B = 8   # batch rows per grid step; must be a multiple of 8.  Raise to 32 for large-batch
              # throughput so the conv matmuls reach M >= 128 on v6e/v7x.


# ----------------------------------------------------------------------------
# One-time weight preparation (hoisted out of the forward pass)
# ----------------------------------------------------------------------------
def _build_convT_row_mats(wt, bias, w_real, w_blocks, half_stride=None):
    """ConvTranspose2d(k=3, s=2, p=1, op=1) as two 'row-pair' matmul matrices.

    wt:   PyTorch ConvTranspose2d weight, shape (Cin, Cout, 3, 3)
    bias: (Cout,)
    Returns (A, B, bias_cols):
      A, B: (w_blocks*Cin, 2*half).  lhs lane layout is one NHWC input row, w_in*Cin + ci.
            A multiplies input row p, B multiplies input row p+1.
      output column layout: dr*half + s*Cout + co  ->  output rows 2p+dr, columns s, channel co.
    """
    cin, cout = wt.shape[0], wt.shape[1]
    wout = 2 * w_real
    half = wout * cout if half_stride is None else half_stride
    mats = [jnp.zeros((w_blocks * cin, 2 * half), jnp.float32) for _ in range(2)]
    q = jnp.arange(w_real)
    for dr in (0, 1):
        for dc in (0, 1):
            for dp in ((0,) if dr == 0 else (0, 1)):
                kh = 1 if dr == 0 else (2 if dp == 0 else 0)
                for dq in ((0,) if dc == 0 else (0, 1)):
                    kw = 1 if dc == 0 else (2 if dq == 0 else 0)
                    w_in = q + dq                      # contributing input column
                    s = 2 * q + dc                     # produced output column
                    valid = (w_in < w_real).astype(jnp.float32)
                    sel = jnp.zeros((w_blocks, wout), jnp.float32)
                    sel = sel.at[jnp.where(w_in < w_real, w_in, 0), s].add(valid)
                    block = jnp.kron(sel, wt[:, :, kh, kw].astype(jnp.float32))
                    mats[dp] = mats[dp].at[:, dr * half:dr * half + wout * cout].add(block)
    btile = jnp.tile(bias.reshape(1, cout).astype(jnp.float32), (wout, 1)).reshape(1, wout * cout)
    bias_cols = jnp.zeros((1, 2 * half), jnp.float32)
    bias_cols = bias_cols.at[:, 0:wout * cout].set(btile)
    bias_cols = bias_cols.at[:, half:half + wout * cout].set(btile)
    return mats[0], mats[1], bias_cols


def prepare_params(params):
    """One-time re-layout of PyTorch-style parameters into kernel-ready matrices.

    Matmul operands are stored in bf16 (accumulation stays f32 inside the kernel); biases stay
    f32 so all elementwise math remains f32.
    """
    f32, bf16 = jnp.float32, jnp.bfloat16

    fc1_w = params["fc1_w"].astype(f32)                              # (20, 256) - tiny, keep f32
    fc1_b = params["fc1_b"].reshape(1, 256).astype(f32)

    # fc2: permute output features from PyTorch's view(B, 64, 7, 7) order into 7 zero-padded
    # NHWC image rows of 512 lanes each (lane = w*64 + c, w in [0,8), w=7 zero weight/bias).
    w2 = params["fc2_w"].astype(f32).reshape(256, 64, 7, 7)          # (k, c, h, w)
    fc2_w = jnp.zeros((256, 7, 8, 64), f32).at[:, :, :7, :].set(
        w2.transpose(0, 2, 3, 1)).reshape(256, 7 * 512)
    b2 = params["fc2_b"].astype(f32).reshape(64, 7, 7)               # (c, h, w)
    fc2_b = jnp.zeros((7, 8, 64), f32).at[:, :7, :].set(
        b2.transpose(1, 2, 0)).reshape(1, 7 * 512)

    c1_a, c1_s1, c1_bias = _build_convT_row_mats(
        params["conv1_w"], params["conv1_b"], w_real=7, w_blocks=8, half_stride=512)
    c2_a, c2_s1, c2_bias = _build_convT_row_mats(
        params["conv2_w"], params["conv2_b"], w_real=14, w_blocks=14)

    # conv2 folded into ONE matmul: lhs lanes = [even row r0 | odd row r1 | next even row r0s]
    # (3 x 512 lane blocks), output cols = [rows 4q,4q+1 | rows 4q+2,4q+3] (2 x 56).
    c2_w = jnp.zeros((1536, 112), f32)
    c2_w = c2_w.at[0:448, 0:56].set(c2_a)            # r0  -> even output pair
    c2_w = c2_w.at[512:960, 0:56].set(c2_s1)         # r1  -> even output pair
    c2_w = c2_w.at[512:960, 56:112].set(c2_a)        # r1  -> odd  output pair
    c2_w = c2_w.at[1024:1472, 56:112].set(c2_s1)     # r0s -> odd  output pair
    c2_bias = jnp.concatenate([c2_bias, c2_bias], axis=-1)           # (1, 112)

    return {"fc1_w": fc1_w, "fc1_b": fc1_b,
            "fc2_w": fc2_w.astype(bf16), "fc2_b": fc2_b,
            "c1_a": c1_a.astype(bf16), "c1_s1": c1_s1.astype(bf16), "c1_bias": c1_bias,
            "c2_w": c2_w.astype(bf16), "c2_bias": c2_bias}


# ----------------------------------------------------------------------------
# Fused Pallas kernel: fc1 + fc2 + convT1 + relu + convT2 + sigmoid  (one batch block)
# ----------------------------------------------------------------------------
def _decoder_kernel(z_ref, fc1w_ref, fc1b_ref, fc2w_ref, fc2b_ref,
                    c1a_ref, c1s1_ref, c1b_ref, c2w_ref, c2b_ref, out_ref):
    f32, bf16 = jnp.float32, jnp.bfloat16
    g = z_ref.shape[0]                                   # batch rows in this block (static)

    # ---- fc1 (f32) + fc2 (bf16 x bf16 -> f32) ----
    h1 = jnp.maximum(
        jnp.dot(z_ref[...], fc1w_ref[...], preferred_element_type=f32) + fc1b_ref[...], 0.0)
    h2 = jnp.maximum(
        jnp.dot(h1.astype(bf16), fc2w_ref[...], preferred_element_type=f32) + fc2b_ref[...],
        0.0)                                                         # (g, 7*512)

    # ---- conv1 lhs: row-major stack of padded NHWC image rows (row q*g + b) ----
    rows = [h2[:, r * 512:(r + 1) * 512] for r in range(7)]          # 7 x (g, 512), aligned slices
    zrow = jnp.zeros((g, 512), f32)
    x0 = jnp.concatenate(rows, axis=0).astype(bf16)                  # image rows 0..6      (7g, 512)
    x1 = jnp.concatenate(rows[1:] + [zrow], axis=0).astype(bf16)     # image rows 1..7(=pad)

    # ---- conv1 (ConvTranspose2d 64->32) + ReLU: two batched row-pair matmuls ----
    y1 = jnp.dot(x0, c1a_ref[...], preferred_element_type=f32)
    y1 = y1 + jnp.dot(x1, c1s1_ref[...], preferred_element_type=f32)
    y1 = jnp.maximum(y1 + c1b_ref[...], 0.0)                         # (7g, 1024): [even|pad|odd|pad]

    # ---- conv2 (ConvTranspose2d 32->1) + sigmoid: single folded matmul ----
    y1b = y1.astype(bf16)
    shifted = jnp.concatenate(                                       # next even row (row 14 = 0)
        [y1b[g:, 0:512], jnp.zeros((g, 512), bf16)], axis=0)
    lhs2 = jnp.concatenate([y1b, shifted], axis=-1)                  # (7g, 1536)
    y2 = jax.nn.sigmoid(
        jnp.dot(lhs2, c2w_ref[...], preferred_element_type=f32) + c2b_ref[...])   # (7g, 112)

    # ---- single lane-dense store: out[b, q*112 + j*28 + w] = image row 4q+j, column w ----
    out_ref[...] = jnp.concatenate([y2[q * g:(q + 1) * g, :] for q in range(7)], axis=-1)


def decoder_forward(prep, z, *, block_b=BLOCK_B):
    B = z.shape[0]
    bp = ((B + block_b - 1) // block_b) * block_b
    if bp != B:
        z = jnp.pad(z, ((0, bp - B), (0, 0)))            # zero-padded batches are sliced off below

    def _full(arr):                                      # full-array block, constant index_map
        return pl.BlockSpec(arr.shape, lambda i: (0, 0))

    out = pl.pallas_call(
        _decoder_kernel,
        out_shape=jax.ShapeDtypeStruct((bp, 784), jnp.float32),
        grid=(bp // block_b,),
        in_specs=[pl.BlockSpec((block_b, LATENT_DIM), lambda i: (i, 0)),
                  _full(prep["fc1_w"]), _full(prep["fc1_b"]),
                  _full(prep["fc2_w"]), _full(prep["fc2_b"]),
                  _full(prep["c1_a"]), _full(prep["c1_s1"]), _full(prep["c1_bias"]),
                  _full(prep["c2_w"]), _full(prep["c2_bias"])],
        out_specs=pl.BlockSpec((block_b, 784), lambda i: (i, 0)),
        compiler_params=pltpu.CompilerParams(
            dimension_semantics=("parallel",),
            vmem_limit_bytes=32 * 1024 * 1024),
    )(z, prep["fc1_w"], prep["fc1_b"], prep["fc2_w"], prep["fc2_b"],
      prep["c1_a"], prep["c1_s1"], prep["c1_bias"], prep["c2_w"], prep["c2_bias"])
    return out[:B].reshape(B, 1, 28, 28)


# ----------------------------------------------------------------------------
# Pure-JAX reference (independent lowering: input dilation + flipped-kernel conv, all f32)
# ----------------------------------------------------------------------------
def _conv_transpose_ref(x, w_t, b):
    w_conv = jnp.flip(w_t, (2, 3)).transpose(1, 0, 2, 3)       # (Cout, Cin, 3, 3)
    y = jax.lax.conv_general_dilated(
        x, w_conv, window_strides=(1, 1), padding=((1, 2), (1, 2)),
        lhs_dilation=(2, 2), dimension_numbers=("NCHW", "OIHW", "NCHW"))
    return y + b.reshape(1, -1, 1, 1)


def decoder_reference(params, z):
    x = jnp.maximum(z @ params["fc1_w"] + params["fc1_b"], 0.0)
    x = jnp.maximum(x @ params["fc2_w"] + params["fc2_b"], 0.0)
    B = z.shape[0]
    x = x.reshape(B, 64, 7, 7)
    x = jnp.maximum(_conv_transpose_ref(x, params["conv1_w"], params["conv1_b"]), 0.0)
    return jax.nn.sigmoid(_conv_transpose_ref(x, params["conv2_w"], params["conv2_b"]))


# ----------------------------------------------------------------------------
# Parameter init (mirrors PyTorch layouts: Linear stored as (in, out), convT as (Cin, Cout, 3, 3))
# ----------------------------------------------------------------------------
def init_params(key):
    ks = jax.random.split(key, 8)
    f32 = jnp.float32

    def u(k, shape, fan_in):
        bound = 1.0 / jnp.sqrt(f32(fan_in))
        return jax.random.uniform(k, shape, f32, -bound, bound)

    return {
        "fc1_w": u(ks[0], (LATENT_DIM, 256), LATENT_DIM),
        "fc1_b": u(ks[1], (256,), LATENT_DIM),
        "fc2_w": u(ks[2], (256, 7 * 7 * 64), 256),
        "fc2_b": u(ks[3], (7 * 7 * 64,), 256),
        "conv1_w": u(ks[4], (64, 32, 3, 3), 64 * 9),
        "conv1_b": u(ks[5], (32,), 64 * 9),
        "conv2_w": u(ks[6], (32, 1, 3, 3), 32 * 9),
        "conv2_b": u(ks[7], (1,), 32 * 9),
    }


if __name__ == "__main__":
    key = jax.random.PRNGKey(0)
    pkey, zkey = jax.random.split(key)
    params = init_params(pkey)
    prep = prepare_params(params)          # one-time weight re-layout (not in the hot path)

    B = 2
    z = jax.random.normal(zkey, (B, LATENT_DIM), jnp.float32)

    out = jax.block_until_ready(jax.jit(decoder_forward)(prep, z))
    ref = jax.block_until_ready(jax.jit(decoder_reference)(params, z))

    assert out.shape == (B, 1, 28, 28), out.shape
    assert out.dtype == jnp.float32
    assert bool(jnp.all(jnp.isfinite(out)))
    assert bool(jnp.all((out > 0.0) & (out < 1.0)))            # sigmoid output range
    max_err = float(jnp.max(jnp.abs(out - ref)))
    # bf16 matmul operands (f32 accumulation) vs the pure-f32 reference -> slightly looser
    # tolerance than the old all-f32 kernel's 5e-3; structural bugs would be O(0.1) or larger.
    assert max_err < 2e-2, max_err
    print("KERNEL_OK")
</pallas_src>

<mosaic_0001>
module attributes {stable_mosaic.version = 11 : i64} {
  func.func @_decoder_kernel(%arg0: i32, %arg1: memref<8x20xf32, #tpu.memory_space<vmem>>, %arg2: memref<20x256xf32, #tpu.memory_space<vmem>>, %arg3: memref<1x256xf32, #tpu.memory_space<vmem>>, %arg4: memref<256x3584xbf16, #tpu.memory_space<vmem>>, %arg5: memref<1x3584xf32, #tpu.memory_space<vmem>>, %arg6: memref<512x1024xbf16, #tpu.memory_space<vmem>>, %arg7: memref<512x1024xbf16, #tpu.memory_space<vmem>>, %arg8: memref<1x1024xf32, #tpu.memory_space<vmem>>, %arg9: memref<1536x112xbf16, #tpu.memory_space<vmem>>, %arg10: memref<1x112xf32, #tpu.memory_space<vmem>>, %arg11: memref<8x784xf32, #tpu.memory_space<vmem>>) attributes {dimension_semantics = [#tpu.dimension_semantics<parallel>], iteration_bounds = array<i64: 1>, scalar_prefetch = 0 : i64, scratch_operands = 0 : i64, tpu.core_type = #tpu.core_type<tc>, window_params = [{transform_indices = @transform_0, window_bounds = array<i64: 8, 20>}, {pipeline_mode = #tpu.pipeline_mode<synchronous>, transform_indices = @transform_1, window_bounds = array<i64: 20, 256>}, {pipeline_mode = #tpu.pipeline_mode<synchronous>, transform_indices = @transform_2, window_bounds = array<i64: 1, 256>}, {pipeline_mode = #tpu.pipeline_mode<synchronous>, transform_indices = @transform_3, window_bounds = array<i64: 256, 3584>}, {pipeline_mode = #tpu.pipeline_mode<synchronous>, transform_indices = @transform_4, window_bounds = array<i64: 1, 3584>}, {pipeline_mode = #tpu.pipeline_mode<synchronous>, transform_indices = @transform_5, window_bounds = array<i64: 512, 1024>}, {pipeline_mode = #tpu.pipeline_mode<synchronous>, transform_indices = @transform_6, window_bounds = array<i64: 512, 1024>}, {pipeline_mode = #tpu.pipeline_mode<synchronous>, transform_indices = @transform_7, window_bounds = array<i64: 1, 1024>}, {pipeline_mode = #tpu.pipeline_mode<synchronous>, transform_indices = @transform_8, window_bounds = array<i64: 1536, 112>}, {pipeline_mode = #tpu.pipeline_mode<synchronous>, transform_indices = @transform_9, window_bounds = array<i64: 1, 112>}, {transform_indices = @transform_10, window_bounds = array<i64: 8, 784>}]} {
    %c0 = arith.constant 0 : index
    %c0_0 = arith.constant 0 : index
    %0 = vector.load %arg1[%c0, %c0_0] : memref<8x20xf32, #tpu.memory_space<vmem>>, vector<8x20xf32>
    %c0_1 = arith.constant 0 : index
    %c0_2 = arith.constant 0 : index
    %1 = vector.load %arg2[%c0_1, %c0_2] : memref<20x256xf32, #tpu.memory_space<vmem>>, vector<20x256xf32>
    %cst = arith.constant dense<0.000000e+00> : vector<8x256xf32>
    %2 = tpu.matmul %0, %1, %cst {dimension_numbers = #tpu.dot_dimension_numbers<[1], [0], [0], [1], [0, 0, 1, 1], [], []>} : vector<8x20xf32>, vector<20x256xf32>, vector<8x256xf32> -> vector<8x256xf32>
    %c0_3 = arith.constant 0 : index
    %c0_4 = arith.constant 0 : index
    %3 = vector.load %arg3[%c0_3, %c0_4] : memref<1x256xf32, #tpu.memory_space<vmem>>, vector<1x256xf32>
    %4 = vector.broadcast %3 : vector<1x256xf32> to vector<8x256xf32>
    %5 = arith.addf %2, %4 : vector<8x256xf32>
    %cst_5 = arith.constant 0.000000e+00 : f32
    %6 = vector.broadcast %cst_5 : f32 to vector<8x256xf32>
    %7 = arith.maximumf %5, %6 : vector<8x256xf32>
    %8 = arith.truncf %7 : vector<8x256xf32> to vector<8x256xbf16>
    %c0_6 = arith.constant 0 : index
    %c0_7 = arith.constant 0 : index
    %9 = vector.load %arg4[%c0_6, %c0_7] : memref<256x3584xbf16, #tpu.memory_space<vmem>>, vector<256x3584xbf16>
    %cst_8 = arith.constant dense<0.000000e+00> : vector<8x3584xf32>
    %10 = tpu.matmul %8, %9, %cst_8 {dimension_numbers = #tpu.dot_dimension_numbers<[1], [0], [0], [1], [0, 0, 1, 1], [], []>} : vector<8x256xbf16>, vector<256x3584xbf16>, vector<8x3584xf32> -> vector<8x3584xf32>
    %c0_9 = arith.constant 0 : index
    %c0_10 = arith.constant 0 : index
    %11 = vector.load %arg5[%c0_9, %c0_10] : memref<1x3584xf32, #tpu.memory_space<vmem>>, vector<1x3584xf32>
    %12 = vector.broadcast %11 : vector<1x3584xf32> to vector<8x3584xf32>
    %13 = arith.addf %10, %12 : vector<8x3584xf32>
    %cst_11 = arith.constant 0.000000e+00 : f32
    %14 = vector.broadcast %cst_11 : f32 to vector<8x3584xf32>
    %15 = arith.maximumf %13, %14 : vector<8x3584xf32>
    %16 = vector.extract_strided_slice %15 {offsets = [0, 0], sizes = [8, 512], strides = [1, 1]} : vector<8x3584xf32> to vector<8x512xf32>
    %17 = vector.extract_strided_slice %15 {offsets = [0, 512], sizes = [8, 512], strides = [1, 1]} : vector<8x3584xf32> to vector<8x512xf32>
    %18 = vector.extract_strided_slice %15 {offsets = [0, 1024], sizes = [8, 512], strides = [1, 1]} : vector<8x3584xf32> to vector<8x512xf32>
    %19 = vector.extract_strided_slice %15 {offsets = [0, 1536], sizes = [8, 512], strides = [1, 1]} : vector<8x3584xf32> to vector<8x512xf32>
    %20 = vector.extract_strided_slice %15 {offsets = [0, 2048], sizes = [8, 512], strides = [1, 1]} : vector<8x3584xf32> to vector<8x512xf32>
    %21 = vector.extract_strided_slice %15 {offsets = [0, 2560], sizes = [8, 512], strides = [1, 1]} : vector<8x3584xf32> to vector<8x512xf32>
    %22 = vector.extract_strided_slice %15 {offsets = [0, 3072], sizes = [8, 512], strides = [1, 1]} : vector<8x3584xf32> to vector<8x512xf32>
    %cst_12 = arith.constant 0.000000e+00 : f32
    %23 = vector.broadcast %cst_12 : f32 to vector<8x512xf32>
    %24 = tpu.concatenate %16, %17, %18, %19, %20, %21, %22 in 0 : vector<8x512xf32>, vector<8x512xf32>, vector<8x512xf32>, vector<8x512xf32>, vector<8x512xf32>, vector<8x512xf32>, vector<8x512xf32> -> vector<56x512xf32>
    %25 = arith.truncf %24 : vector<56x512xf32> to vector<56x512xbf16>
    %26 = tpu.concatenate %17, %18, %19, %20, %21, %22, %23 in 0 : vector<8x512xf32>, vector<8x512xf32>, vector<8x512xf32>, vector<8x512xf32>, vector<8x512xf32>, vector<8x512xf32>, vector<8x512xf32> -> vector<56x512xf32>
    %27 = arith.truncf %26 : vector<56x512xf32> to vector<56x512xbf16>
    %c0_13 = arith.constant 0 : index
    %c0_14 = arith.constant 0 : index
    %28 = vector.load %arg6[%c0_13, %c0_14] : memref<512x1024xbf16, #tpu.memory_space<vmem>>, vector<512x1024xbf16>
    %cst_15 = arith.constant dense<0.000000e+00> : vector<56x1024xf32>
    %29 = tpu.matmul %25, %28, %cst_15 {dimension_numbers = #tpu.dot_dimension_numbers<[1], [0], [0], [1], [0, 0, 1, 1], [], []>} : vector<56x512xbf16>, vector<512x1024xbf16>, vector<56x1024xf32> -> vector<56x1024xf32>
    %c0_16 = arith.constant 0 : index
    %c0_17 = arith.constant 0 : index
    %30 = vector.load %arg7[%c0_16, %c0_17] : memref<512x1024xbf16, #tpu.memory_space<vmem>>, vector<512x1024xbf16>
    %cst_18 = arith.constant dense<0.000000e+00> : vector<56x1024xf32>
    %31 = tpu.matmul %27, %30, %cst_18 {dimension_numbers = #tpu.dot_dimension_numbers<[1], [0], [0], [1], [0, 0, 1, 1], [], []>} : vector<56x512xbf16>, vector<512x1024xbf16>, vector<56x1024xf32> -> vector<56x1024xf32>
    %32 = arith.addf %29, %31 : vector<56x1024xf32>
    %c0_19 = arith.constant 0 : index
    %c0_20 = arith.constant 0 : index
    %33 = vector.load %arg8[%c0_19, %c0_20] : memref<1x1024xf32, #tpu.memory_space<vmem>>, vector<1x1024xf32>
    %34 = vector.broadcast %33 : vector<1x1024xf32> to vector<56x1024xf32>
    %35 = arith.addf %32, %34 : vector<56x1024xf32>
    %cst_21 = arith.constant 0.000000e+00 : f32
    %36 = vector.broadcast %cst_21 : f32 to vector<56x1024xf32>
    %37 = arith.maximumf %35, %36 : vector<56x1024xf32>
    %38 = arith.truncf %37 : vector<56x1024xf32> to vector<56x1024xbf16>
    %39 = vector.extract_strided_slice %38 {offsets = [8, 0], sizes = [48, 512], strides = [1, 1]} : vector<56x1024xbf16> to vector<48x512xbf16>
    %cst_22 = arith.constant 0.000000e+00 : bf16
    %40 = vector.broadcast %cst_22 : bf16 to vector<8x512xbf16>
    %41 = tpu.concatenate %39, %40 in 0 : vector<48x512xbf16>, vector<8x512xbf16> -> vector<56x512xbf16>
    %42 = tpu.concatenate %38, %41 in 1 : vector<56x1024xbf16>, vector<56x512xbf16> -> vector<56x1536xbf16>
    %c0_23 = arith.constant 0 : index
    %c0_24 = arith.constant 0 : index
    %43 = vector.load %arg9[%c0_23, %c0_24] : memref<1536x112xbf16, #tpu.memory_space<vmem>>, vector<1536x112xbf16>
    %cst_25 = arith.constant dense<0.000000e+00> : vector<56x112xf32>
    %44 = tpu.matmul %42, %43, %cst_25 {dimension_numbers = #tpu.dot_dimension_numbers<[1], [0], [0], [1], [0, 0, 1, 1], [], []>} : vector<56x1536xbf16>, vector<1536x112xbf16>, vector<56x112xf32> -> vector<56x112xf32>
    %c0_26 = arith.constant 0 : index
    %c0_27 = arith.constant 0 : index
    %45 = vector.load %arg10[%c0_26, %c0_27] : memref<1x112xf32, #tpu.memory_space<vmem>>, vector<1x112xf32>
    %46 = vector.broadcast %45 : vector<1x112xf32> to vector<56x112xf32>
    %47 = arith.addf %44, %46 : vector<56x112xf32>
    %48 = arith.negf %47 : vector<56x112xf32>
    %49 = math.exp %48 : vector<56x112xf32>
    %cst_28 = arith.constant 1.000000e+00 : f32
    %50 = vector.broadcast %cst_28 : f32 to vector<56x112xf32>
    %51 = arith.addf %50, %49 : vector<56x112xf32>
    %52 = arith.divf %50, %51 : vector<56x112xf32>
    %53 = vector.extract_strided_slice %52 {offsets = [0, 0], sizes = [8, 112], strides = [1, 1]} : vector<56x112xf32> to vector<8x112xf32>
    %54 = vector.extract_strided_slice %52 {offsets = [8, 0], sizes = [8, 112], strides = [1, 1]} : vector<56x112xf32> to vector<8x112xf32>
    %55 = vector.extract_strided_slice %52 {offsets = [16, 0], sizes = [8, 112], strides = [1, 1]} : vector<56x112xf32> to vector<8x112xf32>
    %56 = vector.extract_strided_slice %52 {offsets = [24, 0], sizes = [8, 112], strides = [1, 1]} : vector<56x112xf32> to vector<8x112xf32>
    %57 = vector.extract_strided_slice %52 {offsets = [32, 0], sizes = [8, 112], strides = [1, 1]} : vector<56x112xf32> to vector<8x112xf32>
    %58 = vector.extract_strided_slice %52 {offsets = [40, 0], sizes = [8, 112], strides = [1, 1]} : vector<56x112xf32> to vector<8x112xf32>
    %59 = vector.extract_strided_slice %52 {offsets = [48, 0], sizes = [8, 112], strides = [1, 1]} : vector<56x112xf32> to vector<8x112xf32>
    %60 = tpu.concatenate %53, %54, %55, %56, %57, %58, %59 in 1 : vector<8x112xf32>, vector<8x112xf32>, vector<8x112xf32>, vector<8x112xf32>, vector<8x112xf32>, vector<8x112xf32>, vector<8x112xf32> -> vector<8x784xf32>
    %c0_29 = arith.constant 0 : index
    %c0_30 = arith.constant 0 : index
    %61 = vector.load %arg11[%c0_29, %c0_30] : memref<8x784xf32, #tpu.memory_space<vmem>>, vector<8x784xf32>
    tpu.vector_store %arg11[%c0_29, %c0_30], %60 {strides = array<i32>} : memref<8x784xf32, #tpu.memory_space<vmem>>, vector<8x784xf32>,
    return
  }
  func.func @transform_0(%arg0: i32) -> (i32, i32) {
    %c0_i32 = arith.constant 0 : i32
    %c0_i32_0 = arith.constant 0 : i32
    return %arg0, %c0_i32 : i32, i32
  }
  func.func @transform_1(%arg0: i32) -> (i32, i32) {
    %c0_i32 = arith.constant 0 : i32
    %c0_i32_0 = arith.constant 0 : i32
    %c0_i32_1 = arith.constant 0 : i32
    return %c0_i32, %c0_i32_0 : i32, i32
  }
  func.func @transform_2(%arg0: i32) -> (i32, i32) {
    %c0_i32 = arith.constant 0 : i32
    %c0_i32_0 = arith.constant 0 : i32
    %c0_i32_1 = arith.constant 0 : i32
    return %c0_i32, %c0_i32_0 : i32, i32
  }
  func.func @transform_3(%arg0: i32) -> (i32, i32) {
    %c0_i32 = arith.constant 0 : i32
    %c0_i32_0 = arith.constant 0 : i32
    %c0_i32_1 = arith.constant 0 : i32
    return %c0_i32, %c0_i32_0 : i32, i32
  }
  func.func @transform_4(%arg0: i32) -> (i32, i32) {
    %c0_i32 = arith.constant 0 : i32
    %c0_i32_0 = arith.constant 0 : i32
    %c0_i32_1 = arith.constant 0 : i32
    return %c0_i32, %c0_i32_0 : i32, i32
  }
  func.func @transform_5(%arg0: i32) -> (i32, i32) {
    %c0_i32 = arith.constant 0 : i32
    %c0_i32_0 = arith.constant 0 : i32
    %c0_i32_1 = arith.constant 0 : i32
    return %c0_i32, %c0_i32_0 : i32, i32
  }
  func.func @transform_6(%arg0: i32) -> (i32, i32) {
    %c0_i32 = arith.constant 0 : i32
    %c0_i32_0 = arith.constant 0 : i32
    %c0_i32_1 = arith.constant 0 : i32
    return %c0_i32, %c0_i32_0 : i32, i32
  }
  func.func @transform_7(%arg0: i32) -> (i32, i32) {
    %c0_i32 = arith.constant 0 : i32
    %c0_i32_0 = arith.constant 0 : i32
    %c0_i32_1 = arith.constant 0 : i32
    return %c0_i32, %c0_i32_0 : i32, i32
  }
  func.func @transform_8(%arg0: i32) -> (i32, i32) {
    %c0_i32 = arith.constant 0 : i32
    %c0_i32_0 = arith.constant 0 : i32
    %c0_i32_1 = arith.constant 0 : i32
    return %c0_i32, %c0_i32_0 : i32, i32
  }
  func.func @transform_9(%arg0: i32) -> (i32, i32) {
    %c0_i32 = arith.constant 0 : i32
    %c0_i32_0 = arith.constant 0 : i32
    %c0_i32_1 = arith.constant 0 : i32
    return %c0_i32, %c0_i32_0 : i32, i32
  }
  func.func @transform_10(%arg0: i32) -> (i32, i32) {
    %c0_i32 = arith.constant 0 : i32
    %c0_i32_0 = arith.constant 0 : i32
    return %arg0, %c0_i32 : i32, i32
  }
}

</mosaic_0001>

<bundles_post_ra>
// kernel: decoder_forward.1
= control target key start
LH: loop header
LB: loop body
LE: loop exit
PB: predicated region body
PF: predicated region fallthrough
CT: control target
= control target key end

     0   :  { %15 = vsyncpa [#allocation3], 0  ;;  %s17529_s0 = inlined_call_operand.vmem [shape: f32[8,20], index: 0, kind: input, shape index: {}]   ;;  %s17530_s1 = inlined_call_operand.hbm [shape: f32[20,256], index: 1, kind: input, shape index: {}]   ;;  %s17531_s2 = inlined_call_operand.hbm [shape: f32[1,256], index: 2, kind: input, shape index: {}]   ;;  %s17532_s3 = inlined_call_operand.hbm [shape: bf16[256,3584], index: 3, kind: input, shape index: {}]   ;;  %s17533_s4 = inlined_call_operand.hbm [shape: f32[1,3584], index: 4, kind: input, shape index: {}]   ;;  %s17534_s5 = inlined_call_operand.hbm [shape: bf16[512,1024], index: 5, kind: input, shape index: {}]   ;;  %s17535_s6 = inlined_call_operand.hbm [shape: bf16[512,1024], index: 6, kind: input, shape index: {}]   ;;  %s17536_s7 = inlined_call_operand.hbm [shape: f32[1,1024], index: 7, kind: input, shape index: {}]   ;;  %s17537_s8 = inlined_call_operand.vmem [shape: bf16[1536,112], index: 8, kind: input, shape index: {}]   ;;  %s17538_s9 = inlined_call_operand.hbm [shape: f32[1,112], index: 9, kind: input, shape index: {}]   ;;  %s17539_s10 = inlined_call_operand.vmem [shape: f32[8,784], index: 10, kind: output, shape index: {}]  }
   0x1   :  { %16 = vsyncpa [#allocation5], 0 }
   0x2   :  { %17 = vsyncpa [#allocation8], 0 }
   0x3   :  { %18 = vsyncpa [#allocation11], 0  ;;  %s40_s15 = sshll.u32 %s17531_s2, 4  ;;  %s41_s15 = int_to_ptr.hbm [resolvable:$true] %s40_s15 }
   0x4   :  { %19 = vsyncpa [#allocation14], 0  ;;  %s15789_s16 = smov [#allocation4]   ;;  %s64_s20 = sshll.u32 %s17533_s4, 4  ;;  %s65_s20 = int_to_ptr.hbm [resolvable:$true] %s64_s20 }
   0x5   :  { %s42_s17 = sshll.u32 %s15789_s16, 4  ;;  %s15790_s21 = smov [#allocation7]   ;;  %s43_s17 = int_to_ptr.vmem [resolvable:$true] %s42_s17 }
   0x6   :  { %45 = dma.hbm_to_vmem [thread:$0]  %s41_s15, 32, %s43_s17, [#allocation5]  }
   0x7   :  { %s66_s22 = sshll.u32 %s15790_s21, 4  ;;  %s87_s25 = sshll.u32 %s17535_s6, 4  ;;  %s67_s22 = int_to_ptr.vmem [resolvable:$true] %s66_s22  ;;  %s88_s25 = int_to_ptr.hbm [resolvable:$true] %s87_s25 }
   0x8   :  { %69 = dma.hbm_to_vmem [thread:$0]  %s65_s20, 448, %s67_s22, [#allocation8]  }
   0x9   :  { %s15791_s2 = smov [#allocation10]   ;;  %s26_s29 = sshll.u32 %s17530_s1, 4  ;;  %s27_s29 = int_to_ptr.hbm [resolvable:$true] %s26_s29 }
   0xa   :  { %s89_s26 = sshll.u32 %s15791_s2, 4  ;;  %s15792_s30 = smov 512   ;;  %s90_s26 = int_to_ptr.vmem [resolvable:$true] %s89_s26 }
   0xb   :  { %s15793_s4 = smov 32   ;;  %s15794_s11 = smov [#allocation2]  }
   0xc   :  { %95 = dma.hbm_to_vmem [thread:$0]  %s88_s25, 32768, %s90_s26, [#allocation11], %s15792_s30, %s15792_s30, %s15793_s4  }
   0xd   :  { %s28_s12 = sshll.u32 %s15794_s11, 4  ;;  %s15795_s13 = smov 256   ;;  %s29_s12 = int_to_ptr.vmem [resolvable:$true] %s28_s12 }
   0xe   :  { %s15796_s14 = smov 16   ;;  %s50_s16 = sshll.u32 %s17532_s3, 4  ;;  %s51_s16 = int_to_ptr.hbm [resolvable:$true] %s50_s16 }
   0xf   :  { %34 = dma.hbm_to_vmem [thread:$0]  %s27_s29, 768, %s29_s12, [#allocation3], %s15795_s13, %s15795_s13, %s15796_s14  }
  0x10   :  { %s15797_s17 = smov [#allocation6]   ;;  %s74_s20 = sshll.u32 %s17534_s5, 4  ;;  %s75_s20 = int_to_ptr.hbm [resolvable:$true] %s74_s20 }
  0x11   :  { %s52_s18 = sshll.u32 %s15797_s17, 4  ;;  %s15798_s21 = smov 1792   ;;  %s53_s18 = int_to_ptr.vmem [resolvable:$true] %s52_s18 }
  0x12   :  { %s15799_s22 = smov 112   ;;  %s15800_s23 = smov [#allocation9]  }
  0x13   :  { %58 = dma.hbm_to_vmem [thread:$0]  %s51_s16, 57344, %s53_s18, [#allocation5], %s15798_s21, %s15798_s21, %s15799_s22  }
  0x14   :  { %s76_s24 = sshll.u32 %s15800_s23, 4  ;;  %s101_s26 = sshll.u32 %s17536_s7, 4  ;;  %s77_s24 = int_to_ptr.vmem [resolvable:$true] %s76_s24  ;;  %s102_s26 = int_to_ptr.hbm [resolvable:$true] %s101_s26 }
  0x15   :  { %82 = dma.hbm_to_vmem [thread:$0]  %s75_s20, 32768, %s77_s24, [#allocation8], %s15792_s30, %s15792_s30, %s15793_s4  }
  0x16   :  { %s114_s28 = sshll.u32 %s17538_s9, 4  ;;  %s15801_s5 = smov [#allocation12]   ;;  %s115_s28 = int_to_ptr.hbm [resolvable:$true] %s114_s28 }
  0x17   :  { %s103_s29 = sshll.u32 %s15801_s5, 4  ;;  %s15802_s11 = smov [#allocation13]   ;;  %s104_s29 = int_to_ptr.vmem [resolvable:$true] %s103_s29 }
  0x18   :  { %106 = dma.hbm_to_vmem [thread:$0]  %s102_s26, 128, %s104_s29, [#allocation11]  }
  0x19   :  { %s116_s12 = sshll.u32 %s15802_s11, 4  ;;  %s117_s12 = int_to_ptr.vmem [resolvable:$true] %s116_s12 }
  0x1a   :  { %119 = dma.hbm_to_vmem [thread:$0]  %s115_s28, 16, %s117_s12, [#allocation14]  }
  0x1b   :  { %15779 = dma.done.wait [#allocation3], 768  }
  0x1c   :  { %15780 = vsyncadd [#allocation3], 4294966528 }
  0x1d   :  { %15781 = dma.done.wait [#allocation5], 57376  }
  0x1e   :  { %15782 = vsyncadd [#allocation5], 4294909920 }
  0x1f   :  { %15783 = dma.done.wait [#allocation8], 33216  }
  0x20   :  { %15784 = vsyncadd [#allocation8], 4294934080 }
  0x21   :  { %15785 = dma.done.wait [#allocation11], 32896  }
  0x22   :  { %15786 = vsyncadd [#allocation11], 4294934400 }
  0x23   :  { %15787 = dma.done.wait [#allocation14], 16  }
  0x24   :  { %15788 = vsyncadd [#allocation14], 4294967280  ;;  %vm170_vm0 = vcmask 1043456   ;;  %v158_v0 = vld [vmem:[#allocation2 + $0x20] sm:$0xf]  ;;  %v156_v2 = vld [vmem:[#allocation2 + $0x10] sm:$0xff] }
  0x25   :  { %v159_v1 = vld [vmem:[#allocation2 + $0x28] sm:$0xf]  ;;  %10246 = vmatpush.msk.msra.mxu0 %vm170_vm0, %v158_v0  ;;  %v157_v3 = vld [vmem:[#allocation2 + $0x18] sm:$0xff]  ;;  %v154_v4 = vld [vmem:[#allocation2] sm:$0xff]  ;;  %vm166_vm1 = vcmask 162816   ;;  %s15807_s14 = smov 64  }
  0x26   :  { %10248 = vmatpush.msk.msra.mxu1 %vm170_vm0, %v159_v1  ;;  %v155_v5 = vld [vmem:[#allocation2 + $0x8] sm:$0xff]  ;;  %v153_v6 = vld [vmem:[%s17529_s0] sm:$0xff]  ;;  %v11036_v7 = vld [vmem:[#allocation6 + $0x620] sm:$0xf]  ;;  %s15808_s6 = smov 48  }
  0x27   :  { %v14691_v8 = vld [vmem:[#allocation6 + $0x68c] sm:$0xf0]  ;;  %191 = vmatpush.msra.mxu0 %v156_v2  ;;  %v11932_v10 = vld [vmem:[#allocation6 + $0xd20] sm:$0xf]  ;;  %v14677_v12 = vld [vmem:[#allocation6 + $0x624] sm:$0xf] }
  0x28   :  { %211 = vmatpush.msra.mxu1 %v157_v3  ;;  %v11037_v9 = vor.u32 %v14691_v8, %v11036_v7  ;;  %v14915_v11 = vld [vmem:[#allocation6 + $0xd8c] sm:$0xf0]  ;;  %v11038_v14 = vld [vmem:[#allocation6 + $0x690] sm:$0xf0]  ;;  %v14901_v15 = vld [vmem:[#allocation6 + $0xd24] sm:$0xf] }
  0x29   :  { %v11933_v13 = vor.u32 %v14915_v11, %v11932_v10  ;;  %v11934_v16 = vld [vmem:[#allocation6 + $0xd90] sm:$0xf0]  ;;  %192 = vmatpush.msra.mxu0 %v154_v4  ;;  %v11041_v17 = vor.u32 %v14677_v12, %v11038_v14  ;;  %v10924_v19 = vld [vmem:[#allocation6 + $0x540] sm:$0xf]  ;;  %v14663_v20 = vld [vmem:[#allocation6 + $0x5ac] sm:$0xf0] }
  0x2a   :  { %212 = vmatpush.msra.mxu1 %v155_v5  ;;  %v11937_v18 = vor.u32 %v14901_v15, %v11934_v16  ;;  %v11820_v21 = vld [vmem:[#allocation6 + $0xc40] sm:$0xf]  ;;  %10247 = vmatmul.msk.f32.vlgmr.msra.gmra.mxu0 %vm166_vm1, %v153_v6  ;;  %v14887_v22 = vld [vmem:[#allocation6 + $0xcac] sm:$0xf0]  ;;  %v14649_v23 = vld [vmem:[#allocation6 + $0x544] sm:$0xf]  ;;  %v10925_v25 = vor.u32 %v14663_v20, %v10924_v19 }
  0x2b   :  { %10249 = vmatmul.msk.f32.vlgmr.msra.gmra.mxu1 %vm166_vm1, %v153_v6  ;;  %v10926_v24 = vld [vmem:[#allocation6 + $0x5b0] sm:$0xf0]  ;;  %2973 = vmatpush.bf16.msra.mxu2 %v11037_v9  ;;  %v11821_v26 = vor.u32 %v14887_v22, %v11820_v21  ;;  %v14873_v27 = vld [vmem:[#allocation6 + $0xc44] sm:$0xf]  ;;  %v10812_v29 = vld [vmem:[#allocation6 + $0x460] sm:$0xf] }
  0x2c   :  { %2986 = vmatpush.bf16.msra.mxu3 %v11933_v13  ;;  %v11822_v28 = vld [vmem:[#allocation6 + $0xcb0] sm:$0xf0]  ;;  %2999 = vmatpush.bf16.msrb.mxu0 %v11041_v17  ;;  %v10929_v30 = vor.u32 %v14649_v23, %v10926_v24  ;;  %v14635_v32 = vld [vmem:[#allocation6 + $0x4cc] sm:$0xf0]  ;;  %v11708_v33 = vld [vmem:[#allocation6 + $0xb60] sm:$0xf] }
  0x2d   :  { %3012 = vmatpush.bf16.msrb.mxu1 %v11937_v18  ;;  %v11825_v31 = vor.u32 %v14873_v27, %v11822_v28  ;;  %v14859_v34 = vld [vmem:[#allocation6 + $0xbcc] sm:$0xf0]  ;;  %v14621_v35 = vld [vmem:[#allocation6 + $0x464] sm:$0xf]  ;;  %v10814_v36 = vld [vmem:[#allocation6 + $0x4d0] sm:$0xf0]  ;;  %v10813_v39 = vor.u32 %v14635_v32, %v10812_v29 }
  0x2e   :  { %v14845_v37 = vld [vmem:[#allocation6 + $0xb64] sm:$0xf]  ;;  %v11710_v38 = vld [vmem:[#allocation6 + $0xbd0] sm:$0xf0]  ;;  %v11709_v40 = vor.u32 %v14859_v34, %v11708_v33  ;;  %v10700_v41 = vld [vmem:[#allocation6 + $0x380] sm:$0xf]  ;;  %v10817_v43 = vor.u32 %v14621_v35, %v10814_v36 }
  0x2f   :  { %2974 = vmatpush.bf16.msra.mxu2 %v10925_v25  ;;  %v14607_v42 = vld [vmem:[#allocation6 + $0x3ec] sm:$0xf0]  ;;  %v11713_v44 = vor.u32 %v14845_v37, %v11710_v38  ;;  %v11596_v45 = vld [vmem:[#allocation6 + $0xa80] sm:$0xf]  ;;  %v14593_v47 = vld [vmem:[#allocation6 + $0x384] sm:$0xf] }
  0x30   :  { %2987 = vmatpush.bf16.msra.mxu3 %v11821_v26  ;;  %3000 = vmatpush.bf16.msrb.mxu0 %v10929_v30  ;;  %v14831_v46 = vld [vmem:[#allocation6 + $0xaec] sm:$0xf0]  ;;  %v10702_v48 = vld [vmem:[#allocation6 + $0x3f0] sm:$0xf0]  ;;  %v14817_v49 = vld [vmem:[#allocation6 + $0xa84] sm:$0xf]  ;;  %v10701_v51 = vor.u32 %v14607_v42, %v10700_v41 }
  0x31   :  { %3013 = vmatpush.bf16.msrb.mxu1 %v11825_v31  ;;  %v11598_v50 = vld [vmem:[#allocation6 + $0xaf0] sm:$0xf0]  ;;  %v11597_v52 = vor.u32 %v14831_v46, %v11596_v45  ;;  %v10588_v53 = vld [vmem:[#allocation6 + $0x2a0] sm:$0xf]  ;;  %v14579_v54 = vld [vmem:[#allocation6 + $0x30c] sm:$0xf0]  ;;  %v10705_v55 = vor.u32 %v14593_v47, %v10702_v48 }
  0x32   :  { %v11601_v56 = vor.u32 %v14817_v49, %v11598_v50  ;;  %v11484_v57 = vld [vmem:[#allocation6 + $0x9a0] sm:$0xf]  ;;  %v14803_v58 = vld [vmem:[#allocation6 + $0xa0c] sm:$0xf0]  ;;  %v14565_v59 = vld [vmem:[#allocation6 + $0x2a4] sm:$0xf]  ;;  %v10589_v63 = vor.u32 %v14579_v54, %v10588_v53 }
  0x33   :  { %2975 = vmatpush.bf16.msra.mxu2 %v10813_v39  ;;  %v10590_v60 = vld [vmem:[#allocation6 + $0x310] sm:$0xf0]  ;;  %v14789_v61 = vld [vmem:[#allocation6 + $0x9a4] sm:$0xf]  ;;  %v11485_v0 = vor.u32 %v14803_v58, %v11484_v57  ;;  %v10476_v1 = vld [vmem:[#allocation6 + $0x1c0] sm:$0xf] }
  0x34   :  { %2988 = vmatpush.bf16.msra.mxu3 %v11709_v40  ;;  %3001 = vmatpush.bf16.msrb.mxu0 %v10817_v43  ;;  %v11486_v62 = vld [vmem:[#allocation6 + $0xa10] sm:$0xf0]  ;;  %v14551_v2 = vld [vmem:[#allocation6 + $0x22c] sm:$0xf0]  ;;  %v10593_v3 = vor.u32 %v14565_v59, %v10590_v60  ;;  %v11372_v5 = vld [vmem:[#allocation6 + $0x8c0] sm:$0xf] }
  0x35   :  { %3014 = vmatpush.bf16.msrb.mxu1 %v11713_v44  ;;  %v11489_v4 = vor.u32 %v14789_v61, %v11486_v62  ;;  %v14775_v6 = vld [vmem:[#allocation6 + $0x92c] sm:$0xf0]  ;;  %v14537_v7 = vld [vmem:[#allocation6 + $0x1c4] sm:$0xf]  ;;  %v10478_v8 = vld [vmem:[#allocation6 + $0x230] sm:$0xf0]  ;;  %v10477_v11 = vor.u32 %v14551_v2, %v10476_v1 }
  0x36   :  { %v14761_v9 = vld [vmem:[#allocation6 + $0x8c4] sm:$0xf]  ;;  %v11374_v10 = vld [vmem:[#allocation6 + $0x930] sm:$0xf0]  ;;  %v11373_v12 = vor.u32 %v14775_v6, %v11372_v5  ;;  %v10364_v13 = vld [vmem:[#allocation6 + $0xe0] sm:$0xf]  ;;  %v10481_v15 = vor.u32 %v14537_v7, %v10478_v8 }
  0x37   :  { %2976 = vmatpush.bf16.msra.mxu2 %v10701_v51  ;;  %v14523_v14 = vld [vmem:[#allocation6 + $0x14c] sm:$0xf0]  ;;  %v11377_v16 = vor.u32 %v14761_v9, %v11374_v10  ;;  %v11260_v17 = vld [vmem:[#allocation6 + $0x7e0] sm:$0xf]  ;;  %v14509_v19 = vld [vmem:[#allocation6 + $0xe4] sm:$0xf] }
  0x38   :  { %2989 = vmatpush.bf16.msra.mxu3 %v11597_v52  ;;  %3002 = vmatpush.bf16.msrb.mxu0 %v10705_v55  ;;  %v14747_v18 = vld [vmem:[#allocation6 + $0x84c] sm:$0xf0]  ;;  %v10366_v20 = vld [vmem:[#allocation6 + $0x150] sm:$0xf0]  ;;  %v14733_v21 = vld [vmem:[#allocation6 + $0x7e4] sm:$0xf]  ;;  %v10365_v24 = vor.u32 %v14523_v14, %v10364_v13 }
  0x39   :  { %3015 = vmatpush.bf16.msrb.mxu1 %v11601_v56  ;;  %v11262_v22 = vld [vmem:[#allocation6 + $0x850] sm:$0xf0]  ;;  %v10252_v23 = vld [vmem:[#allocation6] sm:$0xf]  ;;  %v11261_v25 = vor.u32 %v14747_v18, %v11260_v17  ;;  %v14495_v26 = vld [vmem:[#allocation6 + $0x6c] sm:$0xf0]  ;;  %v10369_v29 = vor.u32 %v14509_v19, %v10366_v20 }
  0x3a   :  { %v11148_v27 = vld [vmem:[#allocation6 + $0x700] sm:$0xf]  ;;  %v14719_v28 = vld [vmem:[#allocation6 + $0x76c] sm:$0xf0]  ;;  %v11265_v30 = vor.u32 %v14733_v21, %v11262_v22  ;;  %v14481_v31 = vld [vmem:[#allocation6 + $0x4] sm:$0xf]  ;;  %v10253_v40 = vor.u32 %v14495_v26, %v10252_v23 }
  0x3b   :  { %2977 = vmatpush.bf16.msra.mxu2 %v10589_v63  ;;  %v10254_v32 = vld [vmem:[#allocation6 + $0x70] sm:$0xf0]  ;;  %v14705_v33 = vld [vmem:[#allocation6 + $0x704] sm:$0xf]  ;;  %v11044_v35 = vld [vmem:[#allocation6 + $0x628] sm:$0xf]  ;;  %v11149_v41 = vor.u32 %v14719_v28, %v11148_v27 }
  0x3c   :  { %2990 = vmatpush.bf16.msra.mxu3 %v11485_v0  ;;  %3003 = vmatpush.bf16.msrb.mxu0 %v10593_v3  ;;  %v11150_v34 = vld [vmem:[#allocation6 + $0x770] sm:$0xf0]  ;;  %v14692_v36 = vld [vmem:[#allocation6 + $0x694] sm:$0xf0]  ;;  %v11940_v37 = vld [vmem:[#allocation6 + $0xd28] sm:$0xf]  ;;  %v10257_v45 = vor.u32 %v14481_v31, %v10254_v32 }
  0x3d   :  { %3016 = vmatpush.bf16.msrb.mxu1 %v11489_v4  ;;  %v14916_v38 = vld [vmem:[#allocation6 + $0xd94] sm:$0xf0]  ;;  %v14678_v39 = vld [vmem:[#allocation6 + $0x62c] sm:$0xf]  ;;  %v11046_v42 = vld [vmem:[#allocation6 + $0x698] sm:$0xf0]  ;;  %v11153_v46 = vor.u32 %v14705_v33, %v11150_v34  ;;  %v11045_v47 = vor.u32 %v14692_v36, %v11044_v35 }
  0x3e   :  { %v14902_v43 = vld [vmem:[#allocation6 + $0xd2c] sm:$0xf]  ;;  %v11942_v44 = vld [vmem:[#allocation6 + $0xd98] sm:$0xf0]  ;;  %v11941_v48 = vor.u32 %v14916_v38, %v11940_v37  ;;  %v10932_v49 = vld [vmem:[#allocation6 + $0x548] sm:$0xf]  ;;  %v11049_v51 = vor.u32 %v14678_v39, %v11046_v42 }
  0x3f   :  { %2978 = vmatpush.bf16.msra.mxu2 %v10477_v11  ;;  %v14664_v50 = vld [vmem:[#allocation6 + $0x5b4] sm:$0xf0]  ;;  %v11945_v52 = vor.u32 %v14902_v43, %v11942_v44  ;;  %v11828_v53 = vld [vmem:[#allocation6 + $0xc48] sm:$0xf]  ;;  %v14650_v55 = vld [vmem:[#allocation6 + $0x54c] sm:$0xf] }
  0x40   :  { %2991 = vmatpush.bf16.msra.mxu3 %v11373_v12  ;;  %3004 = vmatpush.bf16.msrb.mxu0 %v10481_v15  ;;  %v14888_v54 = vld [vmem:[#allocation6 + $0xcb4] sm:$0xf0]  ;;  %v10934_v56 = vld [vmem:[#allocation6 + $0x5b8] sm:$0xf0]  ;;  %v14874_v57 = vld [vmem:[#allocation6 + $0xc4c] sm:$0xf]  ;;  %v10933_v59 = vor.u32 %v14664_v50, %v10932_v49 }
  0x41   :  { %3017 = vmatpush.bf16.msrb.mxu1 %v11377_v16  ;;  %v11830_v58 = vld [vmem:[#allocation6 + $0xcb8] sm:$0xf0]  ;;  %v11829_v60 = vor.u32 %v14888_v54, %v11828_v53  ;;  %v10820_v61 = vld [vmem:[#allocation6 + $0x468] sm:$0xf]  ;;  %v14636_v62 = vld [vmem:[#allocation6 + $0x4d4] sm:$0xf0]  ;;  %v10937_v63 = vor.u32 %v14650_v55, %v10934_v56 }
  0x42   :  { %v11833_v0 = vor.u32 %v14874_v57, %v11830_v58  ;;  %v11716_v1 = vld [vmem:[#allocation6 + $0xb68] sm:$0xf]  ;;  %v14860_v2 = vld [vmem:[#allocation6 + $0xbd4] sm:$0xf0]  ;;  %v14622_v3 = vld [vmem:[#allocation6 + $0x46c] sm:$0xf]  ;;  %v10821_v7 = vor.u32 %v14636_v62, %v10820_v61 }
  0x43   :  { %2979 = vmatpush.bf16.msra.mxu2 %v10365_v24  ;;  %v10822_v4 = vld [vmem:[#allocation6 + $0x4d8] sm:$0xf0]  ;;  %v14846_v5 = vld [vmem:[#allocation6 + $0xb6c] sm:$0xf]  ;;  %v11717_v8 = vor.u32 %v14860_v2, %v11716_v1  ;;  %v10708_v9 = vld [vmem:[#allocation6 + $0x388] sm:$0xf] }
  0x44   :  { %2992 = vmatpush.bf16.msra.mxu3 %v11261_v25  ;;  %3005 = vmatpush.bf16.msrb.mxu0 %v10369_v29  ;;  %v11718_v6 = vld [vmem:[#allocation6 + $0xbd8] sm:$0xf0]  ;;  %v14608_v10 = vld [vmem:[#allocation6 + $0x3f4] sm:$0xf0]  ;;  %v10825_v11 = vor.u32 %v14622_v3, %v10822_v4  ;;  %v11604_v13 = vld [vmem:[#allocation6 + $0xa88] sm:$0xf] }
  0x45   :  { %3018 = vmatpush.bf16.msrb.mxu1 %v11265_v30  ;;  %v11721_v12 = vor.u32 %v14846_v5, %v11718_v6  ;;  %v14832_v14 = vld [vmem:[#allocation6 + $0xaf4] sm:$0xf0]  ;;  %v14594_v15 = vld [vmem:[#allocation6 + $0x38c] sm:$0xf]  ;;  %v10710_v16 = vld [vmem:[#allocation6 + $0x3f8] sm:$0xf0]  ;;  %v10709_v19 = vor.u32 %v14608_v10, %v10708_v9 }
  0x46   :  { %v14818_v17 = vld [vmem:[#allocation6 + $0xa8c] sm:$0xf]  ;;  %v11606_v18 = vld [vmem:[#allocation6 + $0xaf8] sm:$0xf0]  ;;  %v11605_v20 = vor.u32 %v14832_v14, %v11604_v13  ;;  %v10596_v21 = vld [vmem:[#allocation6 + $0x2a8] sm:$0xf]  ;;  %v10713_v23 = vor.u32 %v14594_v15, %v10710_v16 }
  0x47   :  { %2980 = vmatpush.bf16.msra.mxu2 %v10253_v40  ;;  %v14580_v22 = vld [vmem:[#allocation6 + $0x314] sm:$0xf0]  ;;  %v11609_v24 = vor.u32 %v14818_v17, %v11606_v18  ;;  %v11492_v25 = vld [vmem:[#allocation6 + $0x9a8] sm:$0xf]  ;;  %v14566_v27 = vld [vmem:[#allocation6 + $0x2ac] sm:$0xf] }
  0x48   :  { %2993 = vmatpush.bf16.msra.mxu3 %v11149_v41  ;;  %3006 = vmatpush.bf16.msrb.mxu0 %v10257_v45  ;;  %v14804_v26 = vld [vmem:[#allocation6 + $0xa14] sm:$0xf0]  ;;  %v10598_v28 = vld [vmem:[#allocation6 + $0x318] sm:$0xf0]  ;;  %v14790_v29 = vld [vmem:[#allocation6 + $0x9ac] sm:$0xf]  ;;  %v10597_v31 = vor.u32 %v14580_v22, %v10596_v21 }
  0x49   :  { %3019 = vmatpush.bf16.msrb.mxu1 %v11153_v46  ;;  %v11494_v30 = vld [vmem:[#allocation6 + $0xa18] sm:$0xf0]  ;;  %v11493_v32 = vor.u32 %v14804_v26, %v11492_v25  ;;  %v10484_v33 = vld [vmem:[#allocation6 + $0x1c8] sm:$0xf]  ;;  %v14552_v34 = vld [vmem:[#allocation6 + $0x234] sm:$0xf0]  ;;  %v10601_v35 = vor.u32 %v14566_v27, %v10598_v28 }
  0x4a   :  { %v11497_v36 = vor.u32 %v14790_v29, %v11494_v30  ;;  %v11380_v37 = vld [vmem:[#allocation6 + $0x8c8] sm:$0xf]  ;;  %v14776_v38 = vld [vmem:[#allocation6 + $0x934] sm:$0xf0]  ;;  %v14538_v39 = vld [vmem:[#allocation6 + $0x1cc] sm:$0xf]  ;;  %v10485_v43 = vor.u32 %v14552_v34, %v10484_v33 }
  0x4b   :  { %3025 = vmatpush.bf16.msrb.mxu2 %v11045_v47  ;;  %v10486_v40 = vld [vmem:[#allocation6 + $0x238] sm:$0xf0]  ;;  %v14762_v41 = vld [vmem:[#allocation6 + $0x8cc] sm:$0xf]  ;;  %v11381_v44 = vor.u32 %v14776_v38, %v11380_v37  ;;  %v10372_v47 = vld [vmem:[#allocation6 + $0xe8] sm:$0xf] }
  0x4c   :  { %3038 = vmatpush.bf16.msrb.mxu3 %v11941_v48  ;;  %3051 = vmatpush.bf16.msra.mxu0 %v11049_v51  ;;  %v11382_v42 = vld [vmem:[#allocation6 + $0x938] sm:$0xf0]  ;;  %v10489_v45 = vor.u32 %v14538_v39, %v10486_v40  ;;  %v14524_v48 = vld [vmem:[#allocation6 + $0x154] sm:$0xf0]  ;;  %v11268_v50 = vld [vmem:[#allocation6 + $0x7e8] sm:$0xf] }
  0x4d   :  { %3064 = vmatpush.bf16.msra.mxu1 %v11945_v52  ;;  %v11385_v46 = vor.u32 %v14762_v41, %v11382_v42  ;;  %v10373_v49 = vor.u32 %v14524_v48, %v10372_v47  ;;  %v14748_v51 = vld [vmem:[#allocation6 + $0x854] sm:$0xf0]  ;;  %v14510_v52 = vld [vmem:[#allocation6 + $0xec] sm:$0xf]  ;;  %v10374_v54 = vld [vmem:[#allocation6 + $0x158] sm:$0xf0] }
  0x4e   :  { %v11269_v53 = vor.u32 %v14748_v51, %v11268_v50  ;;  %v14734_v55 = vld [vmem:[#allocation6 + $0x7ec] sm:$0xf]  ;;  %v11270_v56 = vld [vmem:[#allocation6 + $0x858] sm:$0xf0]  ;;  %v10377_v57 = vor.u32 %v14510_v52, %v10374_v54  ;;  %v11156_v61 = vld [vmem:[#allocation6 + $0x708] sm:$0xf] }
  0x4f   :  { %3026 = vmatpush.bf16.msrb.mxu2 %v10933_v59  ;;  %v11273_v58 = vor.u32 %v14734_v55, %v11270_v56  ;;  %v10260_v59 = vld [vmem:[#allocation6 + $0x8] sm:$0xf]  ;;  %v10262_v1 = vld [vmem:[#allocation6 + $0x78] sm:$0xf0]  ;;  %v14706_v4 = vld [vmem:[#allocation6 + $0x70c] sm:$0xf] }
  0x50   :  { %3039 = vmatpush.bf16.msrb.mxu3 %v11829_v60  ;;  %3052 = vmatpush.bf16.msra.mxu0 %v10937_v63  ;;  %v14496_v60 = vld [vmem:[#allocation6 + $0x74] sm:$0xf0]  ;;  %v11158_v5 = vld [vmem:[#allocation6 + $0x778] sm:$0xf0]  ;;  %v11052_v14 = vld [vmem:[#allocation6 + $0x630] sm:$0xf] }
  0x51   :  { %3065 = vmatpush.bf16.msra.mxu1 %v11833_v0  ;;  %v10261_v62 = vor.u32 %v14496_v60, %v10260_v59  ;;  %v14720_v63 = vld [vmem:[#allocation6 + $0x774] sm:$0xf0]  ;;  %v14482_v0 = vld [vmem:[#allocation6 + $0xc] sm:$0xf]  ;;  %v11161_v6 = vor.u32 %v14706_v4, %v11158_v5  ;;  %v14693_v15 = vld [vmem:[#allocation6 + $0x69c] sm:$0xf0] }
  0x52   :  { %v11157_v2 = vor.u32 %v14720_v63, %v11156_v61  ;;  %v10265_v3 = vor.u32 %v14482_v0, %v10262_v1  ;;  %v11948_v16 = vld [vmem:[#allocation6 + $0xd30] sm:$0xf]  ;;  %v14917_v17 = vld [vmem:[#allocation6 + $0xd9c] sm:$0xf0]  ;;  %v14679_v18 = vld [vmem:[#allocation6 + $0x634] sm:$0xf]  ;;  %v11053_v26 = vor.u32 %v14693_v15, %v11052_v14 }
  0x53   :  { %3027 = vmatpush.bf16.msrb.mxu2 %v10821_v7  ;;  %v160_v7 = vld [vmem:[#allocation4] sm:$0x3]  ;;  %v14903_v22 = vld [vmem:[#allocation6 + $0xd34] sm:$0xf]  ;;  %v11949_v27 = vor.u32 %v14917_v17, %v11948_v16  ;;  %v10940_v28 = vld [vmem:[#allocation6 + $0x550] sm:$0xf] }
  0x54   :  { %3040 = vmatpush.bf16.msrb.mxu3 %v11717_v8  ;;  %3053 = vmatpush.bf16.msra.mxu0 %v10825_v11  ;;  %v162_v8 = vperm.slane %v160_v7, 0  ;;  %v163_v9 = vperm.slane %v160_v7, 1  ;;  %v14665_v29 = vld [vmem:[#allocation6 + $0x5bc] sm:$0xf0]  ;;  %v14651_v34 = vld [vmem:[#allocation6 + $0x554] sm:$0xf] }
  0x55   :  { %3066 = vmatpush.bf16.msra.mxu1 %v11721_v12  ;;  %v14889_v33 = vld [vmem:[#allocation6 + $0xcbc] sm:$0xf0]  ;;  %v11838_v37 = vld [vmem:[#allocation6 + $0xcc0] sm:$0xf0]  ;;  %v10941_v38 = vor.u32 %v14665_v29, %v10940_v28  ;;  %v10828_v40 = vld [vmem:[#allocation6 + $0x470] sm:$0xf] }
  0x56   :  { %v14637_v41 = vld [vmem:[#allocation6 + $0x4dc] sm:$0xf0]  ;;  %v10830_v47 = vld [vmem:[#allocation6 + $0x4e0] sm:$0xf0]  ;;  %v14847_v48 = vld [vmem:[#allocation6 + $0xb74] sm:$0xf] }
  0x57   :  { %3028 = vmatpush.bf16.msrb.mxu2 %v10709_v19  ;;  %v11054_v19 = vld [vmem:[#allocation6 + $0x6a0] sm:$0xf0]  ;;  %v10829_v50 = vor.u32 %v14637_v41, %v10828_v40  ;;  %v10716_v52 = vld [vmem:[#allocation6 + $0x390] sm:$0xf]  ;;  %v14819_v60 = vld [vmem:[#allocation6 + $0xa94] sm:$0xf] }
  0x58   :  { %3041 = vmatpush.bf16.msrb.mxu3 %v11605_v20  ;;  %3054 = vmatpush.bf16.msra.mxu0 %v10713_v23  ;;  %v11950_v23 = vld [vmem:[#allocation6 + $0xda0] sm:$0xf0]  ;;  %v11057_v30 = vor.u32 %v14679_v18, %v11054_v19  ;;  %v11612_v56 = vld [vmem:[#allocation6 + $0xa90] sm:$0xf]  ;;  %v14581_v1 = vld [vmem:[#allocation6 + $0x31c] sm:$0xf0] }
  0x59   :  { %3067 = vmatpush.bf16.msra.mxu1 %v11609_v24  ;;  %v10718_v59 = vld [vmem:[#allocation6 + $0x400] sm:$0xf0]  ;;  %v10604_v0 = vld [vmem:[#allocation6 + $0x2b0] sm:$0xf]  ;;  %v14805_v5 = vld [vmem:[#allocation6 + $0xa1c] sm:$0xf0] }
  0x5a   :  { %v11614_v61 = vld [vmem:[#allocation6 + $0xb00] sm:$0xf0]  ;;  %v11500_v4 = vld [vmem:[#allocation6 + $0x9b0] sm:$0xf]  ;;  %v14777_v17 = vld [vmem:[#allocation6 + $0x93c] sm:$0xf0] }
  0x5b   :  { %3029 = vmatpush.bf16.msrb.mxu2 %v10597_v31  ;;  %v11953_v31 = vor.u32 %v14903_v22, %v11950_v23  ;;  %v10606_v7 = vld [vmem:[#allocation6 + $0x320] sm:$0xf0]  ;;  %v11388_v16 = vld [vmem:[#allocation6 + $0x8d0] sm:$0xf]  ;;  %v14539_v18 = vld [vmem:[#allocation6 + $0x1d4] sm:$0xf] }
  0x5c   :  { %3042 = vmatpush.bf16.msrb.mxu3 %v11493_v32  ;;  %3055 = vmatpush.bf16.msra.mxu0 %v10601_v35  ;;  %v11836_v32 = vld [vmem:[#allocation6 + $0xc50] sm:$0xf]  ;;  %v10942_v35 = vld [vmem:[#allocation6 + $0x5c0] sm:$0xf0]  ;;  %v11389_v23 = vor.u32 %v14777_v17, %v11388_v16  ;;  %v14721_v41 = vld [vmem:[#allocation6 + $0x77c] sm:$0xf0] }
  0x5d   :  { %3068 = vmatpush.bf16.msra.mxu1 %v11497_v36  ;;  %v14875_v36 = vld [vmem:[#allocation6 + $0xc54] sm:$0xf]  ;;  %v11837_v39 = vor.u32 %v14889_v33, %v11836_v32  ;;  %v10945_v42 = vor.u32 %v14651_v34, %v10942_v35  ;;  %v10494_v19 = vld [vmem:[#allocation6 + $0x240] sm:$0xf0]  ;;  %v11164_v40 = vld [vmem:[#allocation6 + $0x710] sm:$0xf] }
  0x5e   :  { %v10497_v28 = vor.u32 %v14539_v18, %v10494_v19  ;;  %v14511_v32 = vld [vmem:[#allocation6 + $0xf4] sm:$0xf]  ;;  %v10382_v33 = vld [vmem:[#allocation6 + $0x160] sm:$0xf0]  ;;  %v14624_v16 = vld [vmem:[#allocation6 + $0x47c] sm:$0xf] }
  0x5f   :  { %3030 = vmatpush.bf16.msrb.mxu2 %v10485_v43  ;;  %v11841_v43 = vor.u32 %v14875_v36, %v11838_v37  ;;  %v14735_v34 = vld [vmem:[#allocation6 + $0x7f4] sm:$0xf]  ;;  %v11278_v35 = vld [vmem:[#allocation6 + $0x860] sm:$0xf0]  ;;  %v10268_v36 = vld [vmem:[#allocation6 + $0x10] sm:$0xf] }
  0x60   :  { %3043 = vmatpush.bf16.msrb.mxu3 %v11381_v44  ;;  %3056 = vmatpush.bf16.msra.mxu0 %v10489_v45  ;;  %v11724_v44 = vld [vmem:[#allocation6 + $0xb70] sm:$0xf]  ;;  %v14861_v45 = vld [vmem:[#allocation6 + $0xbdc] sm:$0xf0]  ;;  %v10838_v17 = vld [vmem:[#allocation6 + $0x4e8] sm:$0xf0] }
  0x61   :  { %3069 = vmatpush.bf16.msra.mxu1 %v11385_v46  ;;  %v14623_v46 = vld [vmem:[#allocation6 + $0x474] sm:$0xf]  ;;  %v11725_v51 = vor.u32 %v14861_v45, %v11724_v44  ;;  %v10270_v45 = vld [vmem:[#allocation6 + $0x80] sm:$0xf0]  ;;  %v14848_v18 = vld [vmem:[#allocation6 + $0xb7c] sm:$0xf] }
  0x62   :  { %v10833_v54 = vor.u32 %v14623_v46, %v10830_v47  ;;  %v14483_v44 = vld [vmem:[#allocation6 + $0x14] sm:$0xf]  ;;  %v11166_v47 = vld [vmem:[#allocation6 + $0x780] sm:$0xf0]  ;;  %v11734_v19 = vld [vmem:[#allocation6 + $0xbe8] sm:$0xf0] }
  0x63   :  { %3031 = vmatpush.bf16.msrb.mxu2 %v10373_v49  ;;  %v11726_v49 = vld [vmem:[#allocation6 + $0xbe0] sm:$0xf0]  ;;  %v14707_v46 = vld [vmem:[#allocation6 + $0x714] sm:$0xf] }
  0x64   :  { %3044 = vmatpush.bf16.msrb.mxu3 %v11269_v53  ;;  %3057 = vmatpush.bf16.msra.mxu0 %v10377_v57  ;;  %v14609_v53 = vld [vmem:[#allocation6 + $0x3fc] sm:$0xf0]  ;;  %v11729_v55 = vor.u32 %v14847_v48, %v11726_v49  ;;  %v11060_v48 = vld [vmem:[#allocation6 + $0x638] sm:$0xf]  ;;  %v14694_v49 = vld [vmem:[#allocation6 + $0x6a4] sm:$0xf0] }
  0x65   :  { %3070 = vmatpush.bf16.msra.mxu1 %v11273_v58  ;;  %v14833_v57 = vld [vmem:[#allocation6 + $0xafc] sm:$0xf0]  ;;  %v14595_v58 = vld [vmem:[#allocation6 + $0x394] sm:$0xf] }
  0x66   :  { %v11613_v63 = vor.u32 %v14833_v57, %v11612_v56  ;;  %v14904_v56 = vld [vmem:[#allocation6 + $0xd3c] sm:$0xf]  ;;  %v11958_v57 = vld [vmem:[#allocation6 + $0xda8] sm:$0xf0] }
  0x67   :  { %3032 = vmatpush.bf16.msrb.mxu2 %v10261_v62  ;;  %v10717_v62 = vor.u32 %v14609_v53, %v10716_v52  ;;  %v14680_v52 = vld [vmem:[#allocation6 + $0x63c] sm:$0xf] }
  0x68   :  { %3045 = vmatpush.bf16.msrb.mxu3 %v11157_v2  ;;  %3058 = vmatpush.bf16.msra.mxu0 %v10265_v3  ;;  %v10721_v2 = vor.u32 %v14595_v58, %v10718_v59  ;;  %v11617_v3 = vor.u32 %v14819_v60, %v11614_v61  ;;  %v10273_v58 = vor.u32 %v14483_v44, %v10270_v45  ;;  %v14792_v44 = vld [vmem:[#allocation6 + $0x9bc] sm:$0xf]  ;;  %v11510_v45 = vld [vmem:[#allocation6 + $0xa28] sm:$0xf0] }
  0x69   :  { %3071 = vmatpush.bf16.msra.mxu1 %v11161_v6  ;;  %v14567_v6 = vld [vmem:[#allocation6 + $0x2b4] sm:$0xf]  ;;  %v11169_v59 = vor.u32 %v14707_v46, %v11166_v47  ;;  %v11061_v60 = vor.u32 %v14694_v49, %v11060_v48  ;;  %v10500_v48 = vld [vmem:[#allocation6 + $0x1d8] sm:$0xf]  ;;  %v14554_v49 = vld [vmem:[#allocation6 + $0x244] sm:$0xf0] }
  0x6a   :  { %v10609_v14 = vor.u32 %v14567_v6, %v10606_v7  ;;  %v14876_v6 = vld [vmem:[#allocation6 + $0xc5c] sm:$0xf]  ;;  %v11846_v7 = vld [vmem:[#allocation6 + $0xcc8] sm:$0xf0] }
  0xa7   :  { %v194_v10 = vpop.f32.mrf.mxu0 }
  0xa8   :  { %v214_v11 = vpop.f32.mrf.mxu1  ;;  %v195_v12 = vadd.f32 %v194_v10, %v162_v8  ;;  %v14791_v8 = vld [vmem:[#allocation6 + $0x9b4] sm:$0xf]  ;;  %v10605_v10 = vor.u32 %v14581_v1, %v10604_v0  ;;  %v11961_v1 = vor.u32 %v14904_v56, %v11958_v57  ;;  %v14764_v56 = vld [vmem:[#allocation6 + $0x8dc] sm:$0xf]  ;;  %v11398_v57 = vld [vmem:[#allocation6 + $0x948] sm:$0xf0] }
  0xa9   :  { %v215_v13 = vadd.f32 %v214_v11, %v163_v9  ;;  %v11502_v9 = vld [vmem:[#allocation6 + $0xa20] sm:$0xf0]  ;;  %v11501_v11 = vor.u32 %v14805_v5, %v11500_v4  ;;  %v14652_v4 = vld [vmem:[#allocation6 + $0x55c] sm:$0xf]  ;;  %v10950_v5 = vld [vmem:[#allocation6 + $0x5c8] sm:$0xf0] }
  0xaa   :  { %v217_v20 = vmax.f32 %v195_v12, 0.0  ;;  %v10492_v12 = vld [vmem:[#allocation6 + $0x1d0] sm:$0xf]  ;;  %v11505_v15 = vor.u32 %v14791_v8, %v11502_v9 }
  0xab   :  { %v218_v21 = vmax.f32 %v215_v13, 0.0  ;;  %v14553_v13 = vld [vmem:[#allocation6 + $0x23c] sm:$0xf0] }
  0xac   :  { %v15896_v24 = vpack.c.bf16 %v217_v20, %v217_v20  ;;  %v14763_v20 = vld [vmem:[#allocation6 + $0x8d4] sm:$0xf]  ;;  %v10493_v22 = vor.u32 %v14553_v13, %v10492_v12  ;;  %v10953_v12 = vor.u32 %v14652_v4, %v10950_v5  ;;  %v11849_v13 = vor.u32 %v14876_v6, %v11846_v7  ;;  %v14736_v4 = vld [vmem:[#allocation6 + $0x7fc] sm:$0xf]  ;;  %v11286_v5 = vld [vmem:[#allocation6 + $0x868] sm:$0xf0] }
  0xad   :  { %v15898_v25 = vpack.c.bf16 %v218_v21, %v218_v21  ;;  %v11390_v21 = vld [vmem:[#allocation6 + $0x940] sm:$0xf0]  ;;  %v10276_v6 = vld [vmem:[#allocation6 + $0x18] sm:$0xf] }
  0xae   :  { %2981 = vmatmul.bf16.vlgmr.msra.gmra.mxu2 %v15896_v24  ;;  %3007 = vmatmul.bf16.vlgmr.msrb.gmra.mxu0 %v15896_v24  ;;  %v11393_v29 = vor.u32 %v14763_v20, %v11390_v21 }
  0xaf   :  { %2994 = vmatmul.bf16.vlgmr.msra.gmra.mxu3 %v15898_v25  ;;  %3020 = vmatmul.bf16.vlgmr.msrb.gmra.mxu1 %v15898_v25 }
  0xb0   :  { %3077 = vmatpush.bf16.msra.mxu2 %v11053_v26  ;;  %3090 = vmatpush.bf16.msra.mxu3 %v11949_v27  ;;  %v10380_v26 = vld [vmem:[#allocation6 + $0xf0] sm:$0xf]  ;;  %v14525_v27 = vld [vmem:[#allocation6 + $0x15c] sm:$0xf0] }
  0xb1   :  { %3103 = vmatpush.bf16.msrb.mxu0 %v11057_v30  ;;  %3116 = vmatpush.bf16.msrb.mxu1 %v11953_v31  ;;  %v11276_v30 = vld [vmem:[#allocation6 + $0x7f0] sm:$0xf]  ;;  %v14749_v31 = vld [vmem:[#allocation6 + $0x85c] sm:$0xf0]  ;;  %v10381_v37 = vor.u32 %v14525_v27, %v10380_v26  ;;  %v10841_v26 = vor.u32 %v14624_v16, %v10838_v17  ;;  %v11737_v27 = vor.u32 %v14848_v18, %v11734_v19  ;;  %v14708_v16 = vld [vmem:[#allocation6 + $0x71c] sm:$0xf] }
  0xb2   :  { %v11174_v17 = vld [vmem:[#allocation6 + $0x788] sm:$0xf0]  ;;  %v11068_v18 = vld [vmem:[#allocation6 + $0x640] sm:$0xf]  ;;  %v14695_v19 = vld [vmem:[#allocation6 + $0x6ac] sm:$0xf0] }
  0xb4   :  { %3078 = vmatpush.bf16.msra.mxu2 %v10941_v38  ;;  %3091 = vmatpush.bf16.msra.mxu3 %v11837_v39  ;;  %v11277_v38 = vor.u32 %v14749_v31, %v11276_v30  ;;  %v14497_v39 = vld [vmem:[#allocation6 + $0x7c] sm:$0xf0]  ;;  %v14596_v30 = vld [vmem:[#allocation6 + $0x39c] sm:$0xf]  ;;  %v10726_v31 = vld [vmem:[#allocation6 + $0x408] sm:$0xf0] }
  0xb5   :  { %3104 = vmatpush.bf16.msrb.mxu0 %v10945_v42  ;;  %3117 = vmatpush.bf16.msrb.mxu1 %v11841_v43  ;;  %v10385_v42 = vor.u32 %v14511_v32, %v10382_v33  ;;  %v11281_v43 = vor.u32 %v14735_v34, %v11278_v35  ;;  %v10269_v53 = vor.u32 %v14497_v39, %v10268_v36  ;;  %v14820_v32 = vld [vmem:[#allocation6 + $0xa9c] sm:$0xf]  ;;  %v11622_v33 = vld [vmem:[#allocation6 + $0xb08] sm:$0xf0]  ;;  %v10612_v36 = vld [vmem:[#allocation6 + $0x2b8] sm:$0xf] }
  0xb6   :  { %v11625_v39 = vor.u32 %v14820_v32, %v11622_v33  ;;  %v11069_v32 = vor.u32 %v14695_v19, %v11068_v18  ;;  %v10508_v18 = vld [vmem:[#allocation6 + $0x1e0] sm:$0xf]  ;;  %v14555_v19 = vld [vmem:[#allocation6 + $0x24c] sm:$0xf0] }
  0xb8   :  { %3079 = vmatpush.bf16.msra.mxu2 %v10829_v50  ;;  %3092 = vmatpush.bf16.msra.mxu3 %v11725_v51  ;;  %v11956_v50 = vld [vmem:[#allocation6 + $0xd38] sm:$0xf]  ;;  %v14918_v51 = vld [vmem:[#allocation6 + $0xda4] sm:$0xf0] }
  0xb9   :  { %3105 = vmatpush.bf16.msrb.mxu0 %v10833_v54  ;;  %3118 = vmatpush.bf16.msrb.mxu1 %v11729_v55  ;;  %v11165_v54 = vor.u32 %v14721_v41, %v11164_v40  ;;  %v11062_v55 = vld [vmem:[#allocation6 + $0x6a8] sm:$0xf0]  ;;  %v11957_v61 = vor.u32 %v14918_v51, %v11956_v50  ;;  %v11508_v40 = vld [vmem:[#allocation6 + $0x9b8] sm:$0xf]  ;;  %v14806_v41 = vld [vmem:[#allocation6 + $0xa24] sm:$0xf0]  ;;  %v11513_v51 = vor.u32 %v14792_v44, %v11510_v45 }
  0xba   :  { %v11065_v0 = vor.u32 %v14680_v52, %v11062_v55  ;;  %v11509_v47 = vor.u32 %v14806_v41, %v11508_v40  ;;  %v11396_v52 = vld [vmem:[#allocation6 + $0x8d8] sm:$0xf]  ;;  %v10502_v55 = vld [vmem:[#allocation6 + $0x248] sm:$0xf0]  ;;  %v14653_v40 = vld [vmem:[#allocation6 + $0x564] sm:$0xf] }
  0xbb   :  { %v10958_v41 = vld [vmem:[#allocation6 + $0x5d0] sm:$0xf0] }
  0xbc   :  { %3080 = vmatpush.bf16.msra.mxu2 %v10717_v62  ;;  %3093 = vmatpush.bf16.msra.mxu3 %v11613_v63  ;;  %v10948_v62 = vld [vmem:[#allocation6 + $0x558] sm:$0xf]  ;;  %v14666_v63 = vld [vmem:[#allocation6 + $0x5c4] sm:$0xf0] }
  0xbd   :  { %3106 = vmatpush.bf16.msrb.mxu0 %v10721_v2  ;;  %3119 = vmatpush.bf16.msrb.mxu1 %v11617_v3  ;;  %v11844_v2 = vld [vmem:[#allocation6 + $0xc58] sm:$0xf]  ;;  %v14890_v3 = vld [vmem:[#allocation6 + $0xcc4] sm:$0xf0]  ;;  %v10949_v8 = vor.u32 %v14666_v63, %v10948_v62  ;;  %v11401_v63 = vor.u32 %v14764_v56, %v11398_v57 }
  0xbe   :  { %3033 = vmatmul.bf16.vlgmr.msrb.gmra.mxu2 %v15896_v24  ;;  %3059 = vmatmul.bf16.vlgmr.msra.gmra.mxu0 %v15896_v24  ;;  %v11845_v9 = vor.u32 %v14890_v3, %v11844_v2  ;;  %v14512_v2 = vld [vmem:[#allocation6 + $0xfc] sm:$0xf]  ;;  %v10390_v3 = vld [vmem:[#allocation6 + $0x168] sm:$0xf0] }
  0xbf   :  { %3046 = vmatmul.bf16.vlgmr.msrb.gmra.mxu3 %v15898_v25  ;;  %3072 = vmatmul.bf16.vlgmr.msra.gmra.mxu1 %v15898_v25 }
  0xc0   :  { %3081 = vmatpush.bf16.msra.mxu2 %v10605_v10  ;;  %3094 = vmatpush.bf16.msra.mxu3 %v11501_v11  ;;  %v10836_v10 = vld [vmem:[#allocation6 + $0x478] sm:$0xf]  ;;  %v14638_v11 = vld [vmem:[#allocation6 + $0x4e4] sm:$0xf0] }
  0xc1   :  { %3107 = vmatpush.bf16.msrb.mxu0 %v10609_v14  ;;  %3120 = vmatpush.bf16.msrb.mxu1 %v11505_v15  ;;  %v11732_v14 = vld [vmem:[#allocation6 + $0xb78] sm:$0xf]  ;;  %v14862_v15 = vld [vmem:[#allocation6 + $0xbe4] sm:$0xf0]  ;;  %v10837_v20 = vor.u32 %v14638_v11, %v10836_v10 }
  0xc2   :  { %v11733_v21 = vor.u32 %v14862_v15, %v11732_v14  ;;  %v11172_v10 = vld [vmem:[#allocation6 + $0x718] sm:$0xf]  ;;  %v14722_v11 = vld [vmem:[#allocation6 + $0x784] sm:$0xf0]  ;;  %v14484_v14 = vld [vmem:[#allocation6 + $0x1c] sm:$0xf] }
  0xc3   :  { %v10278_v15 = vld [vmem:[#allocation6 + $0x88] sm:$0xf0] }
  0xc4   :  { %3082 = vmatpush.bf16.msra.mxu2 %v10493_v22  ;;  %3095 = vmatpush.bf16.msra.mxu3 %v11389_v23  ;;  %v10724_v22 = vld [vmem:[#allocation6 + $0x398] sm:$0xf]  ;;  %v14610_v23 = vld [vmem:[#allocation6 + $0x404] sm:$0xf0] }
  0xc5   :  { %3108 = vmatpush.bf16.msrb.mxu0 %v10497_v28  ;;  %3121 = vmatpush.bf16.msrb.mxu1 %v11393_v29  ;;  %v11620_v28 = vld [vmem:[#allocation6 + $0xa98] sm:$0xf]  ;;  %v14834_v29 = vld [vmem:[#allocation6 + $0xb04] sm:$0xf0]  ;;  %v10725_v34 = vor.u32 %v14610_v23, %v10724_v22  ;;  %v14681_v22 = vld [vmem:[#allocation6 + $0x644] sm:$0xf] }
  0xc6   :  { %v11621_v35 = vor.u32 %v14834_v29, %v11620_v28  ;;  %v14905_v28 = vld [vmem:[#allocation6 + $0xd44] sm:$0xf]  ;;  %v11966_v29 = vld [vmem:[#allocation6 + $0xdb0] sm:$0xf0] }
  0xc8   :  { %3083 = vmatpush.bf16.msra.mxu2 %v10381_v37  ;;  %3096 = vmatpush.bf16.msra.mxu3 %v11277_v38  ;;  %v14582_v37 = vld [vmem:[#allocation6 + $0x324] sm:$0xf0]  ;;  %v10729_v38 = vor.u32 %v14596_v30, %v10726_v31  ;;  %v10281_v30 = vor.u32 %v14484_v14, %v10278_v15  ;;  %v11177_v31 = vor.u32 %v14708_v16, %v11174_v17  ;;  %v14793_v14 = vld [vmem:[#allocation6 + $0x9c4] sm:$0xf]  ;;  %v11518_v15 = vld [vmem:[#allocation6 + $0xa30] sm:$0xf0] }
  0xc9   :  { %3109 = vmatpush.bf16.msrb.mxu0 %v10385_v42  ;;  %3122 = vmatpush.bf16.msrb.mxu1 %v11281_v43  ;;  %v14568_v42 = vld [vmem:[#allocation6 + $0x2bc] sm:$0xf]  ;;  %v10614_v43 = vld [vmem:[#allocation6 + $0x328] sm:$0xf0]  ;;  %v10613_v46 = vor.u32 %v14582_v37, %v10612_v36  ;;  %v11969_v37 = vor.u32 %v14905_v28, %v11966_v29  ;;  %v14765_v28 = vld [vmem:[#allocation6 + $0x8e4] sm:$0xf] }
  0xca   :  { %v10617_v50 = vor.u32 %v14568_v42, %v10614_v43  ;;  %v14877_v42 = vld [vmem:[#allocation6 + $0xc64] sm:$0xf]  ;;  %v11854_v43 = vld [vmem:[#allocation6 + $0xcd0] sm:$0xf0] }
  0xcb   :  { %v11406_v29 = vld [vmem:[#allocation6 + $0x950] sm:$0xf0] }
  0xcc   :  { %3084 = vmatpush.bf16.msra.mxu2 %v10269_v53  ;;  %3097 = vmatpush.bf16.msra.mxu3 %v11165_v54  ;;  %v14778_v53 = vld [vmem:[#allocation6 + $0x944] sm:$0xf0]  ;;  %v14540_v54 = vld [vmem:[#allocation6 + $0x1dc] sm:$0xf] }
  0xcd   :  { %3110 = vmatpush.bf16.msrb.mxu0 %v10273_v58  ;;  %3123 = vmatpush.bf16.msrb.mxu1 %v11169_v59  ;;  %v10501_v58 = vor.u32 %v14554_v49, %v10500_v48  ;;  %v11397_v59 = vor.u32 %v14778_v53, %v11396_v52  ;;  %v10505_v62 = vor.u32 %v14540_v54, %v10502_v55  ;;  %v14625_v52 = vld [vmem:[#allocation6 + $0x484] sm:$0xf]  ;;  %v10846_v53 = vld [vmem:[#allocation6 + $0x4f0] sm:$0xf0] }
  0xce   :  { %v10961_v48 = vor.u32 %v14653_v40, %v10958_v41  ;;  %v11857_v49 = vor.u32 %v14877_v42, %v11854_v43  ;;  %v14849_v54 = vld [vmem:[#allocation6 + $0xb84] sm:$0xf]  ;;  %v11742_v55 = vld [vmem:[#allocation6 + $0xbf0] sm:$0xf0]  ;;  %v10284_v42 = vld [vmem:[#allocation6 + $0x20] sm:$0xf] }
  0xcf   :  { %3085 = vmatmul.bf16.vlgmr.msra.gmra.mxu2 %v15896_v24  ;;  %3098 = vmatmul.bf16.vlgmr.msra.gmra.mxu3 %v15898_v25  ;;  %v14737_v40 = vld [vmem:[#allocation6 + $0x804] sm:$0xf]  ;;  %v11294_v41 = vld [vmem:[#allocation6 + $0x870] sm:$0xf0] }
  0xd0   :  { %3129 = vmatpush.bf16.msrb.mxu2 %v11061_v60  ;;  %3142 = vmatpush.bf16.msrb.mxu3 %v11957_v61  ;;  %v10388_v60 = vld [vmem:[#allocation6 + $0xf8] sm:$0xf]  ;;  %v14526_v61 = vld [vmem:[#allocation6 + $0x164] sm:$0xf0] }
  0xd1   :  { %3155 = vmatpush.bf16.msra.mxu0 %v11065_v0  ;;  %3168 = vmatpush.bf16.msra.mxu1 %v11961_v1  ;;  %v11284_v0 = vld [vmem:[#allocation6 + $0x7f8] sm:$0xf]  ;;  %v14750_v1 = vld [vmem:[#allocation6 + $0x864] sm:$0xf0]  ;;  %v10389_v7 = vor.u32 %v14526_v61, %v10388_v60  ;;  %v10849_v60 = vor.u32 %v14625_v52, %v10846_v53  ;;  %v11745_v61 = vor.u32 %v14849_v54, %v11742_v55  ;;  %v14709_v52 = vld [vmem:[#allocation6 + $0x724] sm:$0xf] }
  0xd2   :  { %3111 = vmatmul.bf16.vlgmr.msrb.gmra.mxu0 %v15896_v24  ;;  %3124 = vmatmul.bf16.vlgmr.msrb.gmra.mxu1 %v15898_v25  ;;  %v11182_v53 = vld [vmem:[#allocation6 + $0x790] sm:$0xf0]  ;;  %v11076_v54 = vld [vmem:[#allocation6 + $0x648] sm:$0xf]  ;;  %v14696_v55 = vld [vmem:[#allocation6 + $0x6b4] sm:$0xf0] }
  0xd4   :  { %3130 = vmatpush.bf16.msrb.mxu2 %v10949_v8  ;;  %3143 = vmatpush.bf16.msrb.mxu3 %v11845_v9  ;;  %v11285_v8 = vor.u32 %v14750_v1, %v11284_v0  ;;  %v14498_v9 = vld [vmem:[#allocation6 + $0x84] sm:$0xf0]  ;;  %v14597_v0 = vld [vmem:[#allocation6 + $0x3a4] sm:$0xf]  ;;  %v10734_v1 = vld [vmem:[#allocation6 + $0x410] sm:$0xf0] }
  0xd5   :  { %3156 = vmatpush.bf16.msra.mxu0 %v10953_v12  ;;  %3169 = vmatpush.bf16.msra.mxu1 %v11849_v13  ;;  %v10393_v12 = vor.u32 %v14512_v2, %v10390_v3  ;;  %v11289_v13 = vor.u32 %v14736_v4, %v11286_v5  ;;  %v10277_v23 = vor.u32 %v14498_v9, %v10276_v6  ;;  %v14821_v2 = vld [vmem:[#allocation6 + $0xaa4] sm:$0xf]  ;;  %v11630_v3 = vld [vmem:[#allocation6 + $0xb10] sm:$0xf0]  ;;  %v10620_v6 = vld [vmem:[#allocation6 + $0x2c0] sm:$0xf] }
  0xd6   :  { %v11633_v9 = vor.u32 %v14821_v2, %v11630_v3  ;;  %v11077_v2 = vor.u32 %v14696_v55, %v11076_v54  ;;  %v10516_v54 = vld [vmem:[#allocation6 + $0x1e8] sm:$0xf]  ;;  %v14556_v55 = vld [vmem:[#allocation6 + $0x254] sm:$0xf0] }
  0xd8   :  { %3131 = vmatpush.bf16.msrb.mxu2 %v10837_v20  ;;  %3144 = vmatpush.bf16.msrb.mxu3 %v11733_v21  ;;  %v11964_v20 = vld [vmem:[#allocation6 + $0xd40] sm:$0xf]  ;;  %v14919_v21 = vld [vmem:[#allocation6 + $0xdac] sm:$0xf0] }
  0xd9   :  { %3157 = vmatpush.bf16.msra.mxu0 %v10841_v26  ;;  %3170 = vmatpush.bf16.msra.mxu1 %v11737_v27  ;;  %v11173_v26 = vor.u32 %v14722_v11, %v11172_v10  ;;  %v11070_v27 = vld [vmem:[#allocation6 + $0x6b0] sm:$0xf0]  ;;  %v11965_v33 = vor.u32 %v14919_v21, %v11964_v20  ;;  %v11516_v10 = vld [vmem:[#allocation6 + $0x9c0] sm:$0xf]  ;;  %v14807_v11 = vld [vmem:[#allocation6 + $0xa2c] sm:$0xf0]  ;;  %v11521_v21 = vor.u32 %v14793_v14, %v11518_v15 }
  0xda   :  { %v11073_v36 = vor.u32 %v14681_v22, %v11070_v27  ;;  %v11517_v17 = vor.u32 %v14807_v11, %v11516_v10  ;;  %v11404_v22 = vld [vmem:[#allocation6 + $0x8e0] sm:$0xf]  ;;  %v10510_v27 = vld [vmem:[#allocation6 + $0x250] sm:$0xf0]  ;;  %v14654_v10 = vld [vmem:[#allocation6 + $0x56c] sm:$0xf] }
  0xdb   :  { %v10966_v11 = vld [vmem:[#allocation6 + $0x5d8] sm:$0xf0] }
  0xdc   :  { %3132 = vmatpush.bf16.msrb.mxu2 %v10725_v34  ;;  %3145 = vmatpush.bf16.msrb.mxu3 %v11621_v35  ;;  %v10956_v34 = vld [vmem:[#allocation6 + $0x560] sm:$0xf]  ;;  %v14667_v35 = vld [vmem:[#allocation6 + $0x5cc] sm:$0xf0] }
  0xdd   :  { %3158 = vmatpush.bf16.msra.mxu0 %v10729_v38  ;;  %3171 = vmatpush.bf16.msra.mxu1 %v11625_v39  ;;  %v11852_v38 = vld [vmem:[#allocation6 + $0xc60] sm:$0xf]  ;;  %v14891_v39 = vld [vmem:[#allocation6 + $0xccc] sm:$0xf0]  ;;  %v10957_v44 = vor.u32 %v14667_v35, %v10956_v34  ;;  %v11409_v35 = vor.u32 %v14765_v28, %v11406_v29 }
  0xde   :  { %v11853_v45 = vor.u32 %v14891_v39, %v11852_v38  ;;  %v14513_v38 = vld [vmem:[#allocation6 + $0x104] sm:$0xf]  ;;  %v10398_v39 = vld [vmem:[#allocation6 + $0x170] sm:$0xf0] }
  0xe0   :  { %3133 = vmatpush.bf16.msrb.mxu2 %v10613_v46  ;;  %3146 = vmatpush.bf16.msrb.mxu3 %v11509_v47  ;;  %v10844_v46 = vld [vmem:[#allocation6 + $0x480] sm:$0xf]  ;;  %v14639_v47 = vld [vmem:[#allocation6 + $0x4ec] sm:$0xf0] }
  0xe1   :  { %3159 = vmatpush.bf16.msra.mxu0 %v10617_v50  ;;  %3172 = vmatpush.bf16.msra.mxu1 %v11513_v51  ;;  %v11740_v50 = vld [vmem:[#allocation6 + $0xb80] sm:$0xf]  ;;  %v14863_v51 = vld [vmem:[#allocation6 + $0xbec] sm:$0xf0]  ;;  %v10845_v56 = vor.u32 %v14639_v47, %v10844_v46 }
  0xe2   :  { %v11741_v57 = vor.u32 %v14863_v51, %v11740_v50  ;;  %v11180_v46 = vld [vmem:[#allocation6 + $0x720] sm:$0xf]  ;;  %v14723_v47 = vld [vmem:[#allocation6 + $0x78c] sm:$0xf0]  ;;  %v14485_v50 = vld [vmem:[#allocation6 + $0x24] sm:$0xf] }
  0xe3   :  { %v10286_v51 = vld [vmem:[#allocation6 + $0x90] sm:$0xf0] }
  0xe4   :  { %3134 = vmatpush.bf16.msrb.mxu2 %v10501_v58  ;;  %3147 = vmatpush.bf16.msrb.mxu3 %v11397_v59  ;;  %v10732_v58 = vld [vmem:[#allocation6 + $0x3a0] sm:$0xf]  ;;  %v14611_v59 = vld [vmem:[#allocation6 + $0x40c] sm:$0xf0] }
  0xe5   :  { %3160 = vmatpush.bf16.msra.mxu0 %v10505_v62  ;;  %3173 = vmatpush.bf16.msra.mxu1 %v11401_v63  ;;  %v11628_v62 = vld [vmem:[#allocation6 + $0xaa0] sm:$0xf]  ;;  %v14835_v63 = vld [vmem:[#allocation6 + $0xb0c] sm:$0xf0]  ;;  %v10733_v4 = vor.u32 %v14611_v59, %v10732_v58  ;;  %v14682_v58 = vld [vmem:[#allocation6 + $0x64c] sm:$0xf] }
  0xe6   :  { %v11629_v5 = vor.u32 %v14835_v63, %v11628_v62  ;;  %v14906_v62 = vld [vmem:[#allocation6 + $0xd4c] sm:$0xf]  ;;  %v11974_v63 = vld [vmem:[#allocation6 + $0xdb8] sm:$0xf0] }
  0xe8   :  { %3135 = vmatpush.bf16.msrb.mxu2 %v10389_v7  ;;  %3148 = vmatpush.bf16.msrb.mxu3 %v11285_v8  ;;  %v14583_v7 = vld [vmem:[#allocation6 + $0x32c] sm:$0xf0]  ;;  %v10737_v8 = vor.u32 %v14597_v0, %v10734_v1  ;;  %v10289_v0 = vor.u32 %v14485_v50, %v10286_v51  ;;  %v11185_v1 = vor.u32 %v14709_v52, %v11182_v53  ;;  %v14794_v50 = vld [vmem:[#allocation6 + $0x9cc] sm:$0xf]  ;;  %v11526_v51 = vld [vmem:[#allocation6 + $0xa38] sm:$0xf0] }
  0xe9   :  { %3161 = vmatpush.bf16.msra.mxu0 %v10393_v12  ;;  %3174 = vmatpush.bf16.msra.mxu1 %v11289_v13  ;;  %v14569_v12 = vld [vmem:[#allocation6 + $0x2c4] sm:$0xf]  ;;  %v10622_v13 = vld [vmem:[#allocation6 + $0x330] sm:$0xf0]  ;;  %v10621_v16 = vor.u32 %v14583_v7, %v10620_v6  ;;  %v11977_v7 = vor.u32 %v14906_v62, %v11974_v63  ;;  %v14766_v62 = vld [vmem:[#allocation6 + $0x8ec] sm:$0xf] }
  0xea   :  { %v10625_v20 = vor.u32 %v14569_v12, %v10622_v13  ;;  %v14878_v12 = vld [vmem:[#allocation6 + $0xc6c] sm:$0xf]  ;;  %v11862_v13 = vld [vmem:[#allocation6 + $0xcd8] sm:$0xf0] }
  0xeb   :  { %v11414_v63 = vld [vmem:[#allocation6 + $0x958] sm:$0xf0] }
  0xec   :  { %3136 = vmatpush.bf16.msrb.mxu2 %v10277_v23  ;;  %3149 = vmatpush.bf16.msrb.mxu3 %v11173_v26  ;;  %v14779_v23 = vld [vmem:[#allocation6 + $0x94c] sm:$0xf0]  ;;  %v14541_v26 = vld [vmem:[#allocation6 + $0x1e4] sm:$0xf] }
  0xed   :  { %3162 = vmatpush.bf16.msra.mxu0 %v10281_v30  ;;  %3175 = vmatpush.bf16.msra.mxu1 %v11177_v31  ;;  %v10509_v30 = vor.u32 %v14555_v19, %v10508_v18  ;;  %v11405_v31 = vor.u32 %v14779_v23, %v11404_v22  ;;  %v10513_v34 = vor.u32 %v14541_v26, %v10510_v27  ;;  %v14626_v22 = vld [vmem:[#allocation6 + $0x48c] sm:$0xf]  ;;  %v10854_v23 = vld [vmem:[#allocation6 + $0x4f8] sm:$0xf0] }
  0xee   :  { %v10969_v18 = vor.u32 %v14654_v10, %v10966_v11  ;;  %v11865_v19 = vor.u32 %v14878_v12, %v11862_v13  ;;  %v14850_v26 = vld [vmem:[#allocation6 + $0xb8c] sm:$0xf]  ;;  %v11750_v27 = vld [vmem:[#allocation6 + $0xbf8] sm:$0xf0]  ;;  %v10292_v12 = vld [vmem:[#allocation6 + $0x28] sm:$0xf] }
  0xef   :  { %3137 = vmatmul.bf16.vlgmr.msrb.gmra.mxu2 %v15896_v24  ;;  %3150 = vmatmul.bf16.vlgmr.msrb.gmra.mxu3 %v15898_v25  ;;  %v14738_v10 = vld [vmem:[#allocation6 + $0x80c] sm:$0xf]  ;;  %v11302_v11 = vld [vmem:[#allocation6 + $0x878] sm:$0xf0] }
  0xf0   :  { %3181 = vmatpush.bf16.msra.mxu2 %v11069_v32  ;;  %3194 = vmatpush.bf16.msra.mxu3 %v11965_v33  ;;  %v10396_v32 = vld [vmem:[#allocation6 + $0x100] sm:$0xf]  ;;  %v14527_v33 = vld [vmem:[#allocation6 + $0x16c] sm:$0xf0] }
  0xf1   :  { %3207 = vmatpush.bf16.msrb.mxu0 %v11073_v36  ;;  %3220 = vmatpush.bf16.msrb.mxu1 %v11969_v37  ;;  %v11292_v36 = vld [vmem:[#allocation6 + $0x800] sm:$0xf]  ;;  %v14751_v37 = vld [vmem:[#allocation6 + $0x86c] sm:$0xf0]  ;;  %v10397_v43 = vor.u32 %v14527_v33, %v10396_v32  ;;  %v10857_v32 = vor.u32 %v14626_v22, %v10854_v23  ;;  %v11753_v33 = vor.u32 %v14850_v26, %v11750_v27  ;;  %v14710_v22 = vld [vmem:[#allocation6 + $0x72c] sm:$0xf] }
  0xf2   :  { %3163 = vmatmul.bf16.vlgmr.msra.gmra.mxu0 %v15896_v24  ;;  %3176 = vmatmul.bf16.vlgmr.msra.gmra.mxu1 %v15898_v25  ;;  %v11190_v23 = vld [vmem:[#allocation6 + $0x798] sm:$0xf0]  ;;  %v11084_v26 = vld [vmem:[#allocation6 + $0x650] sm:$0xf]  ;;  %v14697_v27 = vld [vmem:[#allocation6 + $0x6bc] sm:$0xf0] }
  0xf4   :  { %3182 = vmatpush.bf16.msra.mxu2 %v10957_v44  ;;  %3195 = vmatpush.bf16.msra.mxu3 %v11853_v45  ;;  %v11293_v44 = vor.u32 %v14751_v37, %v11292_v36  ;;  %v14499_v45 = vld [vmem:[#allocation6 + $0x8c] sm:$0xf0]  ;;  %v14598_v36 = vld [vmem:[#allocation6 + $0x3ac] sm:$0xf]  ;;  %v10742_v37 = vld [vmem:[#allocation6 + $0x418] sm:$0xf0] }
  0xf5   :  { %3208 = vmatpush.bf16.msrb.mxu0 %v10961_v48  ;;  %3221 = vmatpush.bf16.msrb.mxu1 %v11857_v49  ;;  %v10401_v48 = vor.u32 %v14513_v38, %v10398_v39  ;;  %v11297_v49 = vor.u32 %v14737_v40, %v11294_v41  ;;  %v10285_v59 = vor.u32 %v14499_v45, %v10284_v42  ;;  %v14822_v38 = vld [vmem:[#allocation6 + $0xaac] sm:$0xf]  ;;  %v11638_v39 = vld [vmem:[#allocation6 + $0xb18] sm:$0xf0]  ;;  %v10628_v42 = vld [vmem:[#allocation6 + $0x2c8] sm:$0xf] }
  0xf6   :  { %v11641_v45 = vor.u32 %v14822_v38, %v11638_v39  ;;  %v11085_v38 = vor.u32 %v14697_v27, %v11084_v26  ;;  %v11532_v27 = vld [vmem:[#allocation6 + $0x9d0] sm:$0xf] }
  0xf8   :  { %3183 = vmatpush.bf16.msra.mxu2 %v10845_v56  ;;  %3196 = vmatpush.bf16.msra.mxu3 %v11741_v57  ;;  %v11972_v56 = vld [vmem:[#allocation6 + $0xd48] sm:$0xf]  ;;  %v14920_v57 = vld [vmem:[#allocation6 + $0xdb4] sm:$0xf0] }
  0xf9   :  { %3209 = vmatpush.bf16.msrb.mxu0 %v10849_v60  ;;  %3222 = vmatpush.bf16.msrb.mxu1 %v11745_v61  ;;  %v11181_v60 = vor.u32 %v14723_v47, %v11180_v46  ;;  %v11078_v61 = vld [vmem:[#allocation6 + $0x6b8] sm:$0xf0]  ;;  %v11973_v3 = vor.u32 %v14920_v57, %v11972_v56  ;;  %v11524_v46 = vld [vmem:[#allocation6 + $0x9c8] sm:$0xf]  ;;  %v14808_v47 = vld [vmem:[#allocation6 + $0xa34] sm:$0xf0]  ;;  %v11529_v57 = vor.u32 %v14794_v50, %v11526_v51 }
  0xfa   :  { %v11081_v6 = vor.u32 %v14682_v58, %v11078_v61  ;;  %v11525_v53 = vor.u32 %v14808_v47, %v11524_v46  ;;  %v11412_v58 = vld [vmem:[#allocation6 + $0x8e8] sm:$0xf]  ;;  %v10518_v61 = vld [vmem:[#allocation6 + $0x258] sm:$0xf0]  ;;  %v14655_v46 = vld [vmem:[#allocation6 + $0x574] sm:$0xf] }
  0xfb   :  { %v10974_v47 = vld [vmem:[#allocation6 + $0x5e0] sm:$0xf0] }
  0xfc   :  { %3184 = vmatpush.bf16.msra.mxu2 %v10733_v4  ;;  %3197 = vmatpush.bf16.msra.mxu3 %v11629_v5  ;;  %v10964_v4 = vld [vmem:[#allocation6 + $0x568] sm:$0xf]  ;;  %v14668_v5 = vld [vmem:[#allocation6 + $0x5d4] sm:$0xf0]  ;;  %v15920_v50 = vld [vmem:[#allocation7] sm:$0xff] }
  0xfd   :  { %3210 = vmatpush.bf16.msrb.mxu0 %v10737_v8  ;;  %3223 = vmatpush.bf16.msrb.mxu1 %v11633_v9  ;;  %v11860_v8 = vld [vmem:[#allocation6 + $0xc68] sm:$0xf]  ;;  %v14892_v9 = vld [vmem:[#allocation6 + $0xcd4] sm:$0xf0]  ;;  %v10965_v14 = vor.u32 %v14668_v5, %v10964_v4  ;;  %v11417_v5 = vor.u32 %v14766_v62, %v11414_v63  ;;  %v14851_v62 = vld [vmem:[#allocation6 + $0xb94] sm:$0xf] }
  0xfe   :  { %v11861_v15 = vor.u32 %v14892_v9, %v11860_v8  ;;  %v14514_v8 = vld [vmem:[#allocation6 + $0x10c] sm:$0xf]  ;;  %v10406_v9 = vld [vmem:[#allocation6 + $0x178] sm:$0xf0]  ;;  %v11758_v63 = vld [vmem:[#allocation6 + $0xc00] sm:$0xf0] }
 0x100   :  { %3185 = vmatpush.bf16.msra.mxu2 %v10621_v16  ;;  %3198 = vmatpush.bf16.msra.mxu3 %v11517_v17  ;;  %v10852_v16 = vld [vmem:[#allocation6 + $0x488] sm:$0xf]  ;;  %v14640_v17 = vld [vmem:[#allocation6 + $0x4f4] sm:$0xf0] }
 0x101   :  { %3211 = vmatpush.bf16.msrb.mxu0 %v10625_v20  ;;  %3224 = vmatpush.bf16.msrb.mxu1 %v11521_v21  ;;  %v11748_v20 = vld [vmem:[#allocation6 + $0xb88] sm:$0xf]  ;;  %v14864_v21 = vld [vmem:[#allocation6 + $0xbf4] sm:$0xf0]  ;;  %v10853_v28 = vor.u32 %v14640_v17, %v10852_v16 }
 0x102   :  { %v11749_v29 = vor.u32 %v14864_v21, %v11748_v20  ;;  %v11188_v16 = vld [vmem:[#allocation6 + $0x728] sm:$0xf]  ;;  %v14724_v17 = vld [vmem:[#allocation6 + $0x794] sm:$0xf0]  ;;  %v14486_v20 = vld [vmem:[#allocation6 + $0x2c] sm:$0xf] }
 0x103   :  { %v10294_v21 = vld [vmem:[#allocation6 + $0x98] sm:$0xf0] }
 0x104   :  { %3186 = vmatpush.bf16.msra.mxu2 %v10509_v30  ;;  %3199 = vmatpush.bf16.msra.mxu3 %v11405_v31  ;;  %v10740_v30 = vld [vmem:[#allocation6 + $0x3a8] sm:$0xf]  ;;  %v14612_v31 = vld [vmem:[#allocation6 + $0x414] sm:$0xf0] }
 0x105   :  { %3212 = vmatpush.bf16.msrb.mxu0 %v10513_v34  ;;  %3225 = vmatpush.bf16.msrb.mxu1 %v11409_v35  ;;  %v11636_v34 = vld [vmem:[#allocation6 + $0xaa8] sm:$0xf]  ;;  %v14836_v35 = vld [vmem:[#allocation6 + $0xb14] sm:$0xf0]  ;;  %v10741_v40 = vor.u32 %v14612_v31, %v10740_v30  ;;  %v14683_v30 = vld [vmem:[#allocation6 + $0x654] sm:$0xf] }
 0x106   :  { %v11637_v41 = vor.u32 %v14836_v35, %v11636_v34  ;;  %v14907_v34 = vld [vmem:[#allocation6 + $0xd54] sm:$0xf]  ;;  %v11982_v35 = vld [vmem:[#allocation6 + $0xdc0] sm:$0xf0] }
 0x108   :  { %3187 = vmatpush.bf16.msra.mxu2 %v10397_v43  ;;  %3200 = vmatpush.bf16.msra.mxu3 %v11293_v44  ;;  %v14584_v43 = vld [vmem:[#allocation6 + $0x334] sm:$0xf0]  ;;  %v10745_v44 = vor.u32 %v14598_v36, %v10742_v37  ;;  %v10297_v36 = vor.u32 %v14486_v20, %v10294_v21  ;;  %v11193_v37 = vor.u32 %v14710_v22, %v11190_v23  ;;  %v14585_v20 = vld [vmem:[#allocation6 + $0x33c] sm:$0xf0] }
 0x109   :  { %3213 = vmatpush.bf16.msrb.mxu0 %v10401_v48  ;;  %3226 = vmatpush.bf16.msrb.mxu1 %v11297_v49  ;;  %v14570_v48 = vld [vmem:[#allocation6 + $0x2cc] sm:$0xf]  ;;  %v10630_v49 = vld [vmem:[#allocation6 + $0x338] sm:$0xf0]  ;;  %v10629_v52 = vor.u32 %v14584_v43, %v10628_v42  ;;  %v11868_v42 = vld [vmem:[#allocation6 + $0xc70] sm:$0xf] }
 0x10a   :  { %v10633_v56 = vor.u32 %v14570_v48, %v10630_v49  ;;  %v14879_v48 = vld [vmem:[#allocation6 + $0xc74] sm:$0xf]  ;;  %v11870_v49 = vld [vmem:[#allocation6 + $0xce0] sm:$0xf0] }
 0x10c   :  { %3188 = vmatpush.bf16.msra.mxu2 %v10285_v59  ;;  %3201 = vmatpush.bf16.msra.mxu3 %v11181_v60  ;;  %v14780_v59 = vld [vmem:[#allocation6 + $0x954] sm:$0xf0]  ;;  %v14542_v60 = vld [vmem:[#allocation6 + $0x1ec] sm:$0xf] }
 0x10d   :  { %3214 = vmatpush.bf16.msrb.mxu0 %v10289_v0  ;;  %3227 = vmatpush.bf16.msrb.mxu1 %v11185_v1  ;;  %v10517_v0 = vor.u32 %v14556_v55, %v10516_v54  ;;  %v11413_v1 = vor.u32 %v14780_v59, %v11412_v58  ;;  %v10521_v4 = vor.u32 %v14542_v60, %v10518_v61  ;;  %v14641_v54 = vld [vmem:[#allocation6 + $0x4fc] sm:$0xf0]  ;;  %v11756_v55 = vld [vmem:[#allocation6 + $0xb90] sm:$0xf]  ;;  %v14627_v59 = vld [vmem:[#allocation6 + $0x494] sm:$0xf] }
 0x10e   :  { %v14865_v58 = vld [vmem:[#allocation6 + $0xbfc] sm:$0xf0]  ;;  %v678_v60 = vperm.slane %v15920_v50, 1  ;;  %v10862_v61 = vld [vmem:[#allocation6 + $0x500] sm:$0xf0] }
 0x10f   :  { %3189 = vmatmul.bf16.vlgmr.msra.gmra.mxu2 %v15896_v24  ;;  %3202 = vmatmul.bf16.vlgmr.msra.gmra.mxu3 %v15898_v25 }
 0x110   :  { %3233 = vmatpush.bf16.msrb.mxu2 %v11077_v2  ;;  %3246 = vmatpush.bf16.msrb.mxu3 %v11973_v3  ;;  %v10404_v2 = vld [vmem:[#allocation6 + $0x108] sm:$0xf]  ;;  %v14528_v3 = vld [vmem:[#allocation6 + $0x174] sm:$0xf0] }
 0x111   :  { %3259 = vmatpush.bf16.msra.mxu0 %v11081_v6  ;;  %3272 = vmatpush.bf16.msra.mxu1 %v11977_v7  ;;  %v11300_v6 = vld [vmem:[#allocation6 + $0x808] sm:$0xf]  ;;  %v14752_v7 = vld [vmem:[#allocation6 + $0x874] sm:$0xf0]  ;;  %v10405_v13 = vor.u32 %v14528_v3, %v10404_v2 }
 0x112   :  { %3215 = vmatmul.bf16.vlgmr.msrb.gmra.mxu0 %v15896_v24  ;;  %3228 = vmatmul.bf16.vlgmr.msrb.gmra.mxu1 %v15898_v25 }
 0x114   :  { %3234 = vmatpush.bf16.msrb.mxu2 %v10965_v14  ;;  %3247 = vmatpush.bf16.msrb.mxu3 %v11861_v15  ;;  %v11301_v14 = vor.u32 %v14752_v7, %v11300_v6  ;;  %v14500_v15 = vld [vmem:[#allocation6 + $0x94] sm:$0xf0]  ;;  %v11644_v6 = vld [vmem:[#allocation6 + $0xab0] sm:$0xf]  ;;  %v10865_v7 = vor.u32 %v14627_v59, %v10862_v61  ;;  %v14753_v59 = vld [vmem:[#allocation6 + $0x87c] sm:$0xf0] }
 0x115   :  { %3260 = vmatpush.bf16.msra.mxu0 %v10969_v18  ;;  %3273 = vmatpush.bf16.msra.mxu1 %v11865_v19  ;;  %v10409_v18 = vor.u32 %v14514_v8, %v10406_v9  ;;  %v11305_v19 = vor.u32 %v14738_v10, %v11302_v11  ;;  %v10293_v31 = vor.u32 %v14500_v15, %v10292_v12  ;;  %v14837_v10 = vld [vmem:[#allocation6 + $0xb1c] sm:$0xf0]  ;;  %v14599_v11 = vld [vmem:[#allocation6 + $0x3b4] sm:$0xf]  ;;  %v10750_v12 = vld [vmem:[#allocation6 + $0x420] sm:$0xf0] }
 0x116   :  { %v11761_v8 = vor.u32 %v14851_v62, %v11758_v63  ;;  %v677_v15 = vperm.slane %v15920_v50, 0  ;;  %v10753_v21 = vor.u32 %v14599_v11, %v10750_v12  ;;  %v680_v61 = vperm.slane %v15920_v50, 3  ;;  %v10414_v62 = vld [vmem:[#allocation6 + $0x180] sm:$0xf0]  ;;  %v14739_v63 = vld [vmem:[#allocation6 + $0x814] sm:$0xf] }
 0x118   :  { %3235 = vmatpush.bf16.msrb.mxu2 %v10853_v28  ;;  %3248 = vmatpush.bf16.msrb.mxu3 %v11749_v29  ;;  %v11980_v28 = vld [vmem:[#allocation6 + $0xd50] sm:$0xf]  ;;  %v14921_v29 = vld [vmem:[#allocation6 + $0xdbc] sm:$0xf0] }
 0x119   :  { %3261 = vmatpush.bf16.msra.mxu0 %v10857_v32  ;;  %3274 = vmatpush.bf16.msra.mxu1 %v11753_v33  ;;  %v11189_v32 = vor.u32 %v14724_v17, %v11188_v16  ;;  %v11086_v33 = vld [vmem:[#allocation6 + $0x6c0] sm:$0xf0]  ;;  %v11981_v39 = vor.u32 %v14921_v29, %v11980_v28  ;;  %v14809_v28 = vld [vmem:[#allocation6 + $0xa3c] sm:$0xf0]  ;;  %v14571_v29 = vld [vmem:[#allocation6 + $0x2d4] sm:$0xf] }
 0x11a   :  { %v11089_v43 = vor.u32 %v14683_v30, %v11086_v33  ;;  %v11534_v33 = vld [vmem:[#allocation6 + $0xa40] sm:$0xf0] }
 0x11c   :  { %3236 = vmatpush.bf16.msrb.mxu2 %v10741_v40  ;;  %3249 = vmatpush.bf16.msrb.mxu3 %v11637_v41  ;;  %v10972_v40 = vld [vmem:[#allocation6 + $0x570] sm:$0xf]  ;;  %v14669_v41 = vld [vmem:[#allocation6 + $0x5dc] sm:$0xf0] }
 0x11d   :  { %3262 = vmatpush.bf16.msra.mxu0 %v10745_v44  ;;  %3275 = vmatpush.bf16.msra.mxu1 %v11641_v45  ;;  %v11985_v44 = vor.u32 %v14907_v34, %v11982_v35  ;;  %v14893_v45 = vld [vmem:[#allocation6 + $0xcdc] sm:$0xf0]  ;;  %v10973_v51 = vor.u32 %v14669_v41, %v10972_v40 }
 0x11e   :  { %v14557_v40 = vld [vmem:[#allocation6 + $0x25c] sm:$0xf0] }
 0x120   :  { %3237 = vmatpush.bf16.msrb.mxu2 %v10629_v52  ;;  %3250 = vmatpush.bf16.msrb.mxu3 %v11525_v53  ;;  %v11869_v52 = vor.u32 %v14893_v45, %v11868_v42  ;;  %v10860_v53 = vld [vmem:[#allocation6 + $0x490] sm:$0xf]  ;;  %v14543_v45 = vld [vmem:[#allocation6 + $0x1f4] sm:$0xf] }
 0x121   :  { %3263 = vmatpush.bf16.msra.mxu0 %v10633_v56  ;;  %3276 = vmatpush.bf16.msra.mxu1 %v11529_v57  ;;  %v10977_v56 = vor.u32 %v14655_v46, %v10974_v47  ;;  %v11873_v57 = vor.u32 %v14879_v48, %v11870_v49  ;;  %v10526_v46 = vld [vmem:[#allocation6 + $0x260] sm:$0xf0]  ;;  %v14767_v47 = vld [vmem:[#allocation6 + $0x8f4] sm:$0xf] }
 0x122   :  { %v11422_v48 = vld [vmem:[#allocation6 + $0x960] sm:$0xf0] }
 0x124   :  { %3238 = vmatpush.bf16.msrb.mxu2 %v10517_v0  ;;  %3251 = vmatpush.bf16.msrb.mxu3 %v11413_v1  ;;  %v10861_v0 = vor.u32 %v14641_v54, %v10860_v53  ;;  %v11757_v1 = vor.u32 %v14865_v58, %v11756_v55  ;;  %v14529_v53 = vld [vmem:[#allocation6 + $0x17c] sm:$0xf0]  ;;  %v11308_v54 = vld [vmem:[#allocation6 + $0x810] sm:$0xf]  ;;  %v10529_v55 = vor.u32 %v14543_v45, %v10526_v46  ;;  %v14656_v45 = vld [vmem:[#allocation6 + $0x57c] sm:$0xf] }
 0x125   :  { %3264 = vmatpush.bf16.msra.mxu0 %v10521_v4  ;;  %3277 = vmatpush.bf16.msra.mxu1 %v11417_v5  ;;  %v10748_v4 = vld [vmem:[#allocation6 + $0x3b0] sm:$0xf]  ;;  %v14613_v5 = vld [vmem:[#allocation6 + $0x41c] sm:$0xf0] }
 0x126   :  { %v10749_v17 = vor.u32 %v14613_v5, %v10748_v4  ;;  %v11309_v4 = vor.u32 %v14753_v59, %v11308_v54  ;;  %v11764_v59 = vld [vmem:[#allocation6 + $0xb98] sm:$0xf] }
 0x128   :  { %3239 = vmatpush.bf16.msrb.mxu2 %v10405_v13  ;;  %3252 = vmatpush.bf16.msrb.mxu3 %v11301_v14  ;;  %v14823_v13 = vld [vmem:[#allocation6 + $0xab4] sm:$0xf]  ;;  %v11646_v14 = vld [vmem:[#allocation6 + $0xb20] sm:$0xf0] }
 0x129   :  { %3265 = vmatpush.bf16.msra.mxu0 %v10409_v18  ;;  %3278 = vmatpush.bf16.msra.mxu1 %v11305_v19  ;;  %v11645_v18 = vor.u32 %v14837_v10, %v11644_v6  ;;  %v10636_v19 = vld [vmem:[#allocation6 + $0x2d0] sm:$0xf]  ;;  %v11649_v22 = vor.u32 %v14823_v13, %v11646_v14  ;;  %v10302_v13 = vld [vmem:[#allocation6 + $0xa0] sm:$0xf0]  ;;  %v14711_v14 = vld [vmem:[#allocation6 + $0x734] sm:$0xf] }
 0x12a   :  { %v10637_v35 = vor.u32 %v14585_v20, %v10636_v19  ;;  %v679_v19 = vperm.slane %v15920_v50, 2 }
 0x12b   :  { %v3008_v2 = vpop.f32.mrf.mxu0 }
 0x12c   :  { %3240 = vmatpush.bf16.msrb.mxu2 %v10293_v31  ;;  %3253 = vmatpush.bf16.msrb.mxu3 %v11189_v32  ;;  %v3021_v3 = vpop.f32.mrf.mxu1  ;;  %v3009_v9 = vadd.f32 %v3008_v2, %v678_v60  ;;  %v10638_v31 = vld [vmem:[#allocation6 + $0x340] sm:$0xf0]  ;;  %v14795_v32 = vld [vmem:[#allocation6 + $0x9d4] sm:$0xf]  ;;  %v14501_v2 = vld [vmem:[#allocation6 + $0x9c] sm:$0xf0] }
 0x12d   :  { %3266 = vmatpush.bf16.msra.mxu0 %v10297_v36  ;;  %3279 = vmatpush.bf16.msra.mxu1 %v11193_v37  ;;  %v11533_v36 = vor.u32 %v14809_v28, %v11532_v27  ;;  %v10641_v41 = vor.u32 %v14571_v29, %v10638_v31  ;;  %v11537_v42 = vor.u32 %v14795_v32, %v11534_v33  ;;  %v14515_v60 = vld [vmem:[#allocation6 + $0x114] sm:$0xf]  ;;  %v11094_v28 = vld [vmem:[#allocation6 + $0x6c8] sm:$0xf0]  ;;  %v14908_v29 = vld [vmem:[#allocation6 + $0xd5c] sm:$0xf] }
 0x12e   :  { %v15928_v16 = vadd.f32 %v3021_v3, %v3009_v9  ;;  %v14487_v9 = vld [vmem:[#allocation6 + $0x34] sm:$0xf]  ;;  %v10417_v10 = vor.u32 %v14515_v60, %v10414_v62  ;;  %v14866_v60 = vld [vmem:[#allocation6 + $0xc04] sm:$0xf0]  ;;  %v10870_v62 = vld [vmem:[#allocation6 + $0x508] sm:$0xf0] }
 0x12f   :  { %3241 = vmatmul.bf16.vlgmr.msrb.gmra.mxu2 %v15896_v24  ;;  %3254 = vmatmul.bf16.vlgmr.msrb.gmra.mxu3 %v15898_v25  ;;  %v10305_v31 = vor.u32 %v14487_v9, %v10302_v13  ;;  %v10758_v13 = vld [vmem:[#allocation6 + $0x428] sm:$0xf0] }
 0x130   :  { %3285 = vmatpush.bf16.msra.mxu2 %v11085_v38  ;;  %3298 = vmatpush.bf16.msra.mxu3 %v11981_v39  ;;  %v10524_v39 = vld [vmem:[#allocation6 + $0x1f0] sm:$0xf] }
 0x131   :  { %3311 = vmatpush.bf16.msrb.mxu0 %v11089_v43  ;;  %3324 = vmatpush.bf16.msrb.mxu1 %v11985_v44  ;;  %v2982_v23 = vpop.f32.mrf.mxu2  ;;  %v11420_v43 = vld [vmem:[#allocation6 + $0x8f0] sm:$0xf]  ;;  %v14781_v44 = vld [vmem:[#allocation6 + $0x95c] sm:$0xf0]  ;;  %v10525_v49 = vor.u32 %v14557_v40, %v10524_v39  ;;  %v10980_v39 = vld [vmem:[#allocation6 + $0x578] sm:$0xf] }
 0x132   :  { %3267 = vmatmul.bf16.vlgmr.msra.gmra.mxu0 %v15896_v24  ;;  %3280 = vmatmul.bf16.vlgmr.msra.gmra.mxu1 %v15898_v25  ;;  %v2995_v26 = vpop.f32.mrf.mxu3  ;;  %v2983_v30 = vadd.f32 %v2982_v23, %v677_v15  ;;  %v11198_v15 = vld [vmem:[#allocation6 + $0x7a0] sm:$0xf0]  ;;  %v14684_v23 = vld [vmem:[#allocation6 + $0x65c] sm:$0xf]  ;;  %v14670_v40 = vld [vmem:[#allocation6 + $0x5e4] sm:$0xf0] }
 0x133   :  { %v3010_v37 = vpop.f32.mrf.mxu0  ;;  %v11201_v32 = vor.u32 %v14711_v14, %v11198_v15  ;;  %v14824_v14 = vld [vmem:[#allocation6 + $0xabc] sm:$0xf]  ;;  %v11654_v15 = vld [vmem:[#allocation6 + $0xb28] sm:$0xf0] }
 0x134   :  { %3286 = vmatpush.bf16.msra.mxu2 %v10973_v51  ;;  %3299 = vmatpush.bf16.msra.mxu3 %v11869_v52  ;;  %v15930_v34 = vadd.f32 %v2995_v26, %v2983_v30  ;;  %v3023_v38 = vpop.f32.mrf.mxu1  ;;  %v11421_v51 = vor.u32 %v14781_v44, %v11420_v43  ;;  %v10412_v52 = vld [vmem:[#allocation6 + $0x110] sm:$0xf]  ;;  %v11990_v30 = vld [vmem:[#allocation6 + $0xdc8] sm:$0xf0]  ;;  %v11876_v43 = vld [vmem:[#allocation6 + $0xc78] sm:$0xf] }
 0x135   :  { %3312 = vmatpush.bf16.msrb.mxu0 %v10977_v56  ;;  %3325 = vmatpush.bf16.msrb.mxu1 %v11873_v57  ;;  %v11425_v56 = vor.u32 %v14767_v47, %v11422_v48  ;;  %v10413_v3 = vor.u32 %v14529_v53, %v10412_v52  ;;  %v14894_v44 = vld [vmem:[#allocation6 + $0xce4] sm:$0xf0]  ;;  %v11878_v52 = vld [vmem:[#allocation6 + $0xce8] sm:$0xf0]  ;;  %v10981_v53 = vor.u32 %v14670_v40, %v10980_v39  ;;  %v10532_v40 = vld [vmem:[#allocation6 + $0x1f8] sm:$0xf] }
 0x136   :  { %v11877_v54 = vor.u32 %v14894_v44, %v11876_v43  ;;  %v3702_v43 = vmax.f32 %v15928_v16, 0.0 }
 0x138   :  { %3287 = vmatpush.bf16.msra.mxu2 %v10861_v0  ;;  %3300 = vmatpush.bf16.msra.mxu3 %v11757_v1  ;;  %v11310_v0 = vld [vmem:[#allocation6 + $0x880] sm:$0xf0]  ;;  %v10300_v1 = vld [vmem:[#allocation6 + $0x30] sm:$0xf] }
 0x139   :  { %3313 = vmatpush.bf16.msrb.mxu0 %v10865_v7  ;;  %3326 = vmatpush.bf16.msrb.mxu1 %v11761_v8  ;;  %v2984_v57 = vpop.f32.mrf.mxu2  ;;  %v11196_v7 = vld [vmem:[#allocation6 + $0x730] sm:$0xf]  ;;  %v14725_v8 = vld [vmem:[#allocation6 + $0x79c] sm:$0xf0]  ;;  %v11313_v11 = vor.u32 %v14739_v63, %v11310_v0  ;;  %v10301_v26 = vor.u32 %v14501_v2, %v10300_v1  ;;  %v14852_v63 = vld [vmem:[#allocation6 + $0xb9c] sm:$0xf] }
 0x13a   :  { %v2997_v58 = vpop.f32.mrf.mxu3  ;;  %v11197_v27 = vor.u32 %v14725_v8, %v11196_v7  ;;  %v11766_v0 = vld [vmem:[#allocation6 + $0xc08] sm:$0xf0]  ;;  %v14614_v7 = vld [vmem:[#allocation6 + $0x424] sm:$0xf0] }
 0x13b   :  { %v3060_v5 = vpop.f32.mrf.mxu0  ;;  %v11769_v9 = vor.u32 %v14852_v63, %v11766_v0  ;;  %v14530_v63 = vld [vmem:[#allocation6 + $0x184] sm:$0xf0]  ;;  %v11316_v0 = vld [vmem:[#allocation6 + $0x818] sm:$0xf] }
 0x13c   :  { %3288 = vmatpush.bf16.msra.mxu2 %v10749_v17  ;;  %3301 = vmatpush.bf16.msra.mxu3 %v11645_v18  ;;  %v3073_v6 = vpop.f32.mrf.mxu1  ;;  %v3061_v12 = vadd.f32 %v3060_v5, %v680_v61  ;;  %v11092_v17 = vld [vmem:[#allocation6 + $0x658] sm:$0xf]  ;;  %v14698_v18 = vld [vmem:[#allocation6 + $0x6c4] sm:$0xf0]  ;;  %v14628_v61 = vld [vmem:[#allocation6 + $0x49c] sm:$0xf] }
 0x13d   :  { %3314 = vmatpush.bf16.msrb.mxu0 %v10753_v21  ;;  %3327 = vmatpush.bf16.msrb.mxu1 %v11649_v22  ;;  %v11988_v21 = vld [vmem:[#allocation6 + $0xd58] sm:$0xf]  ;;  %v14922_v22 = vld [vmem:[#allocation6 + $0xdc4] sm:$0xf0]  ;;  %v682_v5 = vperm.slane %v15920_v50, 5  ;;  %v10873_v8 = vor.u32 %v14628_v61, %v10870_v62 }
 0x13e   :  { %v15934_v20 = vadd.f32 %v3073_v6, %v3061_v12  ;;  %v11989_v37 = vor.u32 %v14922_v22, %v11988_v21  ;;  %v10756_v6 = vld [vmem:[#allocation6 + $0x3b8] sm:$0xf]  ;;  %v14600_v12 = vld [vmem:[#allocation6 + $0x3bc] sm:$0xf] }
 0x13f   :  { %v10644_v22 = vld [vmem:[#allocation6 + $0x2d8] sm:$0xf] }
 0x140   :  { %3289 = vmatpush.bf16.msra.mxu2 %v10637_v35  ;;  %3302 = vmatpush.bf16.msra.mxu3 %v11533_v36  ;;  %v11093_v36 = vor.u32 %v14698_v18, %v11092_v17  ;;  %v10420_v62 = vld [vmem:[#allocation6 + $0x118] sm:$0xf] }
 0x141   :  { %3315 = vmatpush.bf16.msrb.mxu0 %v10641_v41  ;;  %3328 = vmatpush.bf16.msrb.mxu1 %v11537_v42  ;;  %v3034_v33 = vpop.f32.mrf.mxu2  ;;  %v11097_v41 = vor.u32 %v14684_v23, %v11094_v28  ;;  %v11993_v42 = vor.u32 %v14908_v29, %v11990_v30  ;;  %v14586_v23 = vld [vmem:[#allocation6 + $0x344] sm:$0xf0]  ;;  %v10761_v28 = vor.u32 %v14600_v12, %v10758_v13 }
 0x142   :  { %v3047_v35 = vpop.f32.mrf.mxu3  ;;  %v3035_v38 = vadd.f32 %v3034_v33, %v679_v19  ;;  %v10757_v19 = vor.u32 %v14614_v7, %v10756_v6  ;;  %v11657_v29 = vor.u32 %v14824_v14, %v11654_v15  ;;  %v14810_v30 = vld [vmem:[#allocation6 + $0xa44] sm:$0xf0]  ;;  %v14796_v33 = vld [vmem:[#allocation6 + $0x9dc] sm:$0xf]  ;;  %v3701_v6 = vmax.f32 %v15930_v34, 0.0 }
 0x143   :  { %v3062_v47 = vpop.f32.mrf.mxu0  ;;  %v10421_v12 = vor.u32 %v14530_v63, %v10420_v62  ;;  %v14502_v14 = vld [vmem:[#allocation6 + $0xa4] sm:$0xf0]  ;;  %v11204_v15 = vld [vmem:[#allocation6 + $0x738] sm:$0xf] }
 0x144   :  { %3290 = vmatpush.bf16.msra.mxu2 %v10525_v49  ;;  %3303 = vmatpush.bf16.msra.mxu3 %v11421_v51  ;;  %v15936_v46 = vadd.f32 %v3047_v35, %v3035_v38  ;;  %v3075_v48 = vpop.f32.mrf.mxu1  ;;  %v10982_v49 = vld [vmem:[#allocation6 + $0x5e8] sm:$0xf0]  ;;  %v14880_v51 = vld [vmem:[#allocation6 + $0xc7c] sm:$0xf]  ;;  %v10645_v38 = vor.u32 %v14586_v23, %v10644_v22 }
 0x145   :  { %3316 = vmatpush.bf16.msrb.mxu0 %v10529_v55  ;;  %3329 = vmatpush.bf16.msrb.mxu1 %v11425_v56  ;;  %v10868_v55 = vld [vmem:[#allocation6 + $0x498] sm:$0xf]  ;;  %v14642_v56 = vld [vmem:[#allocation6 + $0x504] sm:$0xf0]  ;;  %v10985_v57 = vor.u32 %v14656_v45, %v10982_v49  ;;  %v11881_v58 = vor.u32 %v14880_v51, %v11878_v52  ;;  %v11542_v35 = vld [vmem:[#allocation6 + $0xa48] sm:$0xf0] }
 0x146   :  { %v11545_v47 = vor.u32 %v14796_v33, %v11542_v35  ;;  %v14782_v51 = vld [vmem:[#allocation6 + $0x964] sm:$0xf0]  ;;  %v14544_v52 = vld [vmem:[#allocation6 + $0x1fc] sm:$0xf]  ;;  %v10310_v23 = vld [vmem:[#allocation6 + $0xa8] sm:$0xf0] }
 0x147   :  { %v14488_v22 = vld [vmem:[#allocation6 + $0x3c] sm:$0xf] }
 0x148   :  { %3291 = vmatpush.bf16.msra.mxu2 %v10413_v3  ;;  %3304 = vmatpush.bf16.msra.mxu3 %v11309_v4  ;;  %v10869_v3 = vor.u32 %v14642_v56, %v10868_v55  ;;  %v11765_v4 = vor.u32 %v14866_v60, %v11764_v59  ;;  %v14768_v55 = vld [vmem:[#allocation6 + $0x8fc] sm:$0xf]  ;;  %v11430_v56 = vld [vmem:[#allocation6 + $0x968] sm:$0xf0] }
 0x149   :  { %3317 = vmatpush.bf16.msrb.mxu0 %v10417_v10  ;;  %3330 = vmatpush.bf16.msrb.mxu1 %v11313_v11  ;;  %v3036_v1 = vpop.f32.mrf.mxu2  ;;  %v11652_v10 = vld [vmem:[#allocation6 + $0xab8] sm:$0xf]  ;;  %v14838_v11 = vld [vmem:[#allocation6 + $0xb24] sm:$0xf0] }
 0x14a   :  { %v3049_v2 = vpop.f32.mrf.mxu3  ;;  %v11653_v21 = vor.u32 %v14838_v11, %v11652_v10  ;;  %v10308_v10 = vld [vmem:[#allocation6 + $0x38] sm:$0xf] }
 0x14b   :  { %v11433_v2 = vor.u32 %v14768_v55, %v11430_v56  ;;  %v10309_v33 = vor.u32 %v14502_v14, %v10308_v10  ;;  %v14881_v55 = vld [vmem:[#allocation6 + $0xc84] sm:$0xf]  ;;  %v11886_v56 = vld [vmem:[#allocation6 + $0xcf0] sm:$0xf0]  ;;  %v10764_v10 = vld [vmem:[#allocation6 + $0x3c0] sm:$0xf] }
 0x14c   :  { %3292 = vmatpush.bf16.msra.mxu2 %v10301_v26  ;;  %3305 = vmatpush.bf16.msra.mxu3 %v11197_v27  ;;  %v11540_v26 = vld [vmem:[#allocation6 + $0x9d8] sm:$0xf]  ;;  %v11889_v63 = vor.u32 %v14881_v55, %v11886_v56 }
 0x14d   :  { %3318 = vmatpush.bf16.msrb.mxu0 %v10305_v31  ;;  %3331 = vmatpush.bf16.msrb.mxu1 %v11201_v32  ;;  %v14572_v31 = vld [vmem:[#allocation6 + $0x2dc] sm:$0xf]  ;;  %v10646_v32 = vld [vmem:[#allocation6 + $0x348] sm:$0xf0]  ;;  %v11541_v39 = vor.u32 %v14810_v30, %v11540_v26  ;;  %v11996_v30 = vld [vmem:[#allocation6 + $0xd60] sm:$0xf] }
 0x14e   :  { %v10649_v45 = vor.u32 %v14572_v31, %v10646_v32  ;;  %v14712_v26 = vld [vmem:[#allocation6 + $0x73c] sm:$0xf]  ;;  %v14923_v31 = vld [vmem:[#allocation6 + $0xdcc] sm:$0xf0]  ;;  %v14685_v32 = vld [vmem:[#allocation6 + $0x664] sm:$0xf] }
 0x14f   :  { %3293 = vmatmul.bf16.vlgmr.msra.gmra.mxu2 %v15896_v24  ;;  %3306 = vmatmul.bf16.vlgmr.msra.gmra.mxu3 %v15898_v25  ;;  %v3112_v17 = vpop.f32.mrf.mxu0  ;;  %v3125_v18 = vpop.f32.mrf.mxu1 }
 0x150   :  { %3337 = vmatpush.bf16.msrb.mxu2 %v11093_v36  ;;  %3350 = vmatpush.bf16.msrb.mxu3 %v11989_v37  ;;  %v3113_v27 = vadd.f32 %v3112_v17, %v682_v5  ;;  %v681_v36 = vperm.slane %v15920_v50, 4  ;;  %v10422_v5 = vld [vmem:[#allocation6 + $0x188] sm:$0xf0]  ;;  %v14726_v17 = vld [vmem:[#allocation6 + $0x7a4] sm:$0xf0] }
 0x151   :  { %3363 = vmatpush.bf16.msra.mxu0 %v11097_v41  ;;  %3376 = vmatpush.bf16.msra.mxu1 %v11993_v42  ;;  %v14558_v41 = vld [vmem:[#allocation6 + $0x264] sm:$0xf0]  ;;  %v11428_v42 = vld [vmem:[#allocation6 + $0x8f8] sm:$0xf]  ;;  %v11205_v35 = vor.u32 %v14726_v17, %v11204_v15  ;;  %v11660_v15 = vld [vmem:[#allocation6 + $0xac0] sm:$0xf] }
 0x152   :  { %3319 = vmatmul.bf16.vlgmr.msrb.gmra.mxu0 %v15896_v24  ;;  %3332 = vmatmul.bf16.vlgmr.msrb.gmra.mxu1 %v15898_v25  ;;  %v15944_v37 = vadd.f32 %v3125_v18, %v3113_v27  ;;  %v3086_v48 = vpop.f32.mrf.mxu2  ;;  %v3099_v49 = vpop.f32.mrf.mxu3  ;;  %v10533_v60 = vor.u32 %v14558_v41, %v10532_v40  ;;  %v11429_v61 = vor.u32 %v14782_v51, %v11428_v42  ;;  %v11206_v27 = vld [vmem:[#allocation6 + $0x7a8] sm:$0xf0]  ;;  %v11884_v51 = vld [vmem:[#allocation6 + $0xc80] sm:$0xf]  ;;  %v14839_v17 = vld [vmem:[#allocation6 + $0xb2c] sm:$0xf0] }
 0x153   :  { %v10313_v40 = vor.u32 %v14488_v22, %v10310_v23  ;;  %v11209_v41 = vor.u32 %v14712_v26, %v11206_v27  ;;  %v11661_v27 = vor.u32 %v14839_v17, %v11660_v15  ;;  %v14741_v17 = vld [vmem:[#allocation6 + $0x824] sm:$0xf] }
 0x154   :  { %3338 = vmatpush.bf16.msrb.mxu2 %v10981_v53  ;;  %3351 = vmatpush.bf16.msrb.mxu3 %v11877_v54  ;;  %v3706_v44 = vmax.f32 %v15944_v37, 0.0  ;;  %v3087_v53 = vadd.f32 %v3086_v48, %v681_v36  ;;  %v10534_v54 = vld [vmem:[#allocation6 + $0x268] sm:$0xf0]  ;;  %v11102_v36 = vld [vmem:[#allocation6 + $0x6d0] sm:$0xf0] }
 0x155   :  { %3364 = vmatpush.bf16.msra.mxu0 %v10985_v57  ;;  %3377 = vmatpush.bf16.msra.mxu1 %v11881_v58  ;;  %v10537_v1 = vor.u32 %v14544_v52, %v10534_v54  ;;  %v11105_v48 = vor.u32 %v14685_v32, %v11102_v36  ;;  %v14895_v52 = vld [vmem:[#allocation6 + $0xcec] sm:$0xf0]  ;;  %v10990_v54 = vld [vmem:[#allocation6 + $0x5f0] sm:$0xf0]  ;;  %v14573_v36 = vld [vmem:[#allocation6 + $0x2e4] sm:$0xf] }
 0x156   :  { %v15950_v57 = vpack.c.bf16 %v3706_v44, %v3702_v43  ;;  %v15952_v16 = vadd.f32 %v3099_v49, %v3087_v53  ;;  %v11997_v43 = vor.u32 %v14923_v31, %v11996_v30  ;;  %v14657_v53 = vld [vmem:[#allocation6 + $0x584] sm:$0xf]  ;;  %v11548_v30 = vld [vmem:[#allocation6 + $0x9e0] sm:$0xf]  ;;  %v14756_v37 = vld [vmem:[#allocation6 + $0x894] sm:$0xf0] }
 0x157   :  { %v3114_v58 = vpop.f32.mrf.mxu0  ;;  %v3127_v59 = vpop.f32.mrf.mxu1  ;;  %v10993_v62 = vor.u32 %v14657_v53, %v10990_v54 }
 0x158   :  { %3339 = vmatpush.bf16.msrb.mxu2 %v10869_v3  ;;  %3352 = vmatpush.bf16.msrb.mxu3 %v11765_v4  ;;  %v14754_v3 = vld [vmem:[#allocation6 + $0x884] sm:$0xf0]  ;;  %v14516_v4 = vld [vmem:[#allocation6 + $0x11c] sm:$0xf]  ;;  %v3705_v7 = vmax.f32 %v15952_v16, 0.0  ;;  %v11885_v59 = vor.u32 %v14895_v52, %v11884_v51  ;;  %v3704_v51 = vmax.f32 %v15934_v20, 0.0 }
 0x159   :  { %3365 = vmatpush.bf16.msra.mxu0 %v10873_v8  ;;  %3378 = vmatpush.bf16.msra.mxu1 %v11769_v9  ;;  %v14740_v8 = vld [vmem:[#allocation6 + $0x81c] sm:$0xf]  ;;  %v11318_v9 = vld [vmem:[#allocation6 + $0x888] sm:$0xf0]  ;;  %v11317_v13 = vor.u32 %v14754_v3, %v11316_v0  ;;  %v10425_v18 = vor.u32 %v14516_v4, %v10422_v5  ;;  %v11772_v0 = vld [vmem:[#allocation6 + $0xba0] sm:$0xf] }
 0x15a   :  { %v15958_v11 = vpack.c.bf16 %v3705_v7, %v3701_v6  ;;  %v11321_v34 = vor.u32 %v14740_v8, %v11318_v9  ;;  %v10878_v3 = vld [vmem:[#allocation6 + $0x510] sm:$0xf0]  ;;  %v14853_v4 = vld [vmem:[#allocation6 + $0xba4] sm:$0xf]  ;;  %v684_v9 = vperm.slane %v15920_v50, 7 }
 0x15b   :  { %v11774_v5 = vld [vmem:[#allocation6 + $0xc10] sm:$0xf0]  ;;  %v14714_v16 = vld [vmem:[#allocation6 + $0x74c] sm:$0xf] }
 0x15c   :  { %3340 = vmatpush.bf16.msrb.mxu2 %v10757_v19  ;;  %3353 = vmatpush.bf16.msrb.mxu3 %v11653_v21  ;;  %v3088_v19 = vpop.f32.mrf.mxu2  ;;  %v3101_v21 = vpop.f32.mrf.mxu3  ;;  %v11777_v14 = vor.u32 %v14853_v4, %v11774_v5  ;;  %v10428_v4 = vld [vmem:[#allocation6 + $0x120] sm:$0xf]  ;;  %v14531_v5 = vld [vmem:[#allocation6 + $0x18c] sm:$0xf0] }
 0x15d   :  { %3366 = vmatpush.bf16.msra.mxu0 %v10761_v28  ;;  %3379 = vmatpush.bf16.msra.mxu1 %v11657_v29  ;;  %v11100_v28 = vld [vmem:[#allocation6 + $0x660] sm:$0xf]  ;;  %v14699_v29 = vld [vmem:[#allocation6 + $0x6cc] sm:$0xf0]  ;;  %v14825_v19 = vld [vmem:[#allocation6 + $0xac4] sm:$0xf] }
 0x15e   :  { %v11101_v42 = vor.u32 %v14699_v29, %v11100_v28  ;;  %v11662_v21 = vld [vmem:[#allocation6 + $0xb30] sm:$0xf0]  ;;  %v10652_v28 = vld [vmem:[#allocation6 + $0x2e0] sm:$0xf]  ;;  %v14587_v29 = vld [vmem:[#allocation6 + $0x34c] sm:$0xf0] }
 0x160   :  { %3341 = vmatpush.bf16.msrb.mxu2 %v10645_v38  ;;  %3354 = vmatpush.bf16.msrb.mxu3 %v11541_v39  ;;  %v14909_v38 = vld [vmem:[#allocation6 + $0xd64] sm:$0xf]  ;;  %v11998_v39 = vld [vmem:[#allocation6 + $0xdd0] sm:$0xf0] }
 0x161   :  { %3367 = vmatpush.bf16.msra.mxu0 %v10649_v45  ;;  %3380 = vmatpush.bf16.msra.mxu1 %v11545_v47  ;;  %v10988_v45 = vld [vmem:[#allocation6 + $0x580] sm:$0xf]  ;;  %v14671_v47 = vld [vmem:[#allocation6 + $0x5ec] sm:$0xf0]  ;;  %v12001_v49 = vor.u32 %v14909_v38, %v11998_v39  ;;  %v10654_v38 = vld [vmem:[#allocation6 + $0x350] sm:$0xf0] }
 0x162   :  { %v10989_v58 = vor.u32 %v14671_v47, %v10988_v45  ;;  %v14797_v39 = vld [vmem:[#allocation6 + $0x9e4] sm:$0xf]  ;;  %v10540_v47 = vld [vmem:[#allocation6 + $0x200] sm:$0xf]  ;;  %v10657_v53 = vor.u32 %v14573_v36, %v10654_v38  ;;  %v11108_v36 = vld [vmem:[#allocation6 + $0x668] sm:$0xf] }
 0x163   :  { %v14700_v38 = vld [vmem:[#allocation6 + $0x6d4] sm:$0xf0] }
 0x164   :  { %3342 = vmatpush.bf16.msrb.mxu2 %v10533_v60  ;;  %3355 = vmatpush.bf16.msrb.mxu3 %v11429_v61  ;;  %v10876_v60 = vld [vmem:[#allocation6 + $0x4a0] sm:$0xf]  ;;  %v14643_v61 = vld [vmem:[#allocation6 + $0x50c] sm:$0xf0] }
 0x165   :  { %3368 = vmatpush.bf16.msra.mxu0 %v10537_v1  ;;  %3381 = vmatpush.bf16.msra.mxu1 %v11433_v2  ;;  %v14867_v1 = vld [vmem:[#allocation6 + $0xc0c] sm:$0xf0]  ;;  %v14629_v2 = vld [vmem:[#allocation6 + $0x4a4] sm:$0xf]  ;;  %v10877_v6 = vor.u32 %v14643_v61, %v10876_v60  ;;  %v10542_v60 = vld [vmem:[#allocation6 + $0x270] sm:$0xf0] }
 0x166   :  { %v11773_v8 = vor.u32 %v14867_v1, %v11772_v0  ;;  %v14769_v61 = vld [vmem:[#allocation6 + $0x904] sm:$0xf] }
 0x168   :  { %3343 = vmatpush.bf16.msrb.mxu2 %v10421_v12  ;;  %3356 = vmatpush.bf16.msrb.mxu3 %v11317_v13  ;;  %v14615_v12 = vld [vmem:[#allocation6 + $0x42c] sm:$0xf0]  ;;  %v10881_v13 = vor.u32 %v14629_v2, %v10878_v3 }
 0x169   :  { %3369 = vmatpush.bf16.msra.mxu0 %v10425_v18  ;;  %3382 = vmatpush.bf16.msra.mxu1 %v11321_v34  ;;  %v14601_v18 = vld [vmem:[#allocation6 + $0x3c4] sm:$0xf]  ;;  %v10766_v34 = vld [vmem:[#allocation6 + $0x430] sm:$0xf0]  ;;  %v10765_v26 = vor.u32 %v14615_v12, %v10764_v10  ;;  %v14755_v10 = vld [vmem:[#allocation6 + $0x88c] sm:$0xf0] }
 0x16a   :  { %v10769_v32 = vor.u32 %v14601_v18, %v10766_v34  ;;  %v14517_v12 = vld [vmem:[#allocation6 + $0x124] sm:$0xf]  ;;  %v11326_v18 = vld [vmem:[#allocation6 + $0x890] sm:$0xf0]  ;;  %v10316_v34 = vld [vmem:[#allocation6 + $0x40] sm:$0xf] }
 0x16c   :  { %3344 = vmatpush.bf16.msrb.mxu2 %v10309_v33  ;;  %3357 = vmatpush.bf16.msrb.mxu3 %v11205_v35  ;;  %v11665_v33 = vor.u32 %v14825_v19, %v11662_v21  ;;  %v14811_v35 = vld [vmem:[#allocation6 + $0xa4c] sm:$0xf0]  ;;  %v10429_v21 = vor.u32 %v14531_v5, %v10428_v4  ;;  %v10884_v5 = vld [vmem:[#allocation6 + $0x4a8] sm:$0xf] }
 0x16d   :  { %3370 = vmatpush.bf16.msra.mxu0 %v10313_v40  ;;  %3383 = vmatpush.bf16.msra.mxu1 %v11209_v41  ;;  %v11550_v40 = vld [vmem:[#allocation6 + $0xa50] sm:$0xf0]  ;;  %v683_v41 = vperm.slane %v15920_v50, 6  ;;  %v11549_v45 = vor.u32 %v14811_v35, %v11548_v30  ;;  %v14783_v50 = vld [vmem:[#allocation6 + $0x96c] sm:$0xf0] }
 0x16e   :  { %v11553_v54 = vor.u32 %v14797_v39, %v11550_v40  ;;  %v11214_v35 = vld [vmem:[#allocation6 + $0x7b0] sm:$0xf0]  ;;  %v12004_v39 = vld [vmem:[#allocation6 + $0xd68] sm:$0xf]  ;;  %v14924_v40 = vld [vmem:[#allocation6 + $0xdd4] sm:$0xf0] }
 0x16f   :  { %3345 = vmatmul.bf16.vlgmr.msrb.gmra.mxu2 %v15896_v24  ;;  %3358 = vmatmul.bf16.vlgmr.msrb.gmra.mxu3 %v15898_v25  ;;  %v3164_v22 = vpop.f32.mrf.mxu0  ;;  %v3177_v23 = vpop.f32.mrf.mxu1 }
 0x170   :  { %3389 = vmatpush.bf16.msra.mxu2 %v11101_v42  ;;  %3402 = vmatpush.bf16.msra.mxu3 %v11997_v43  ;;  %v3165_v31 = vadd.f32 %v3164_v22, %v684_v9  ;;  %v10653_v43 = vor.u32 %v14587_v29, %v10652_v28 }
 0x171   :  { %3415 = vmatpush.bf16.msrb.mxu0 %v11105_v48  ;;  %3428 = vmatpush.bf16.msrb.mxu1 %v12001_v49  ;;  %v14559_v48 = vld [vmem:[#allocation6 + $0x26c] sm:$0xf0]  ;;  %v11436_v49 = vld [vmem:[#allocation6 + $0x900] sm:$0xf] }
 0x172   :  { %3371 = vmatmul.bf16.vlgmr.msra.gmra.mxu0 %v15896_v24  ;;  %3384 = vmatmul.bf16.vlgmr.msra.gmra.mxu1 %v15898_v25  ;;  %v15966_v42 = vadd.f32 %v3177_v23, %v3165_v31  ;;  %v3138_v55 = vpop.f32.mrf.mxu2  ;;  %v3151_v56 = vpop.f32.mrf.mxu3  ;;  %v10541_v2 = vor.u32 %v14559_v48, %v10540_v47  ;;  %v11437_v3 = vor.u32 %v14783_v50, %v11436_v49  ;;  %v14503_v23 = vld [vmem:[#allocation6 + $0xac] sm:$0xf0]  ;;  %v14489_v31 = vld [vmem:[#allocation6 + $0x44] sm:$0xf]  ;;  %v11110_v47 = vld [vmem:[#allocation6 + $0x6d8] sm:$0xf0] }
 0x173   :  { %v14910_v48 = vld [vmem:[#allocation6 + $0xd6c] sm:$0xf]  ;;  %v12006_v49 = vld [vmem:[#allocation6 + $0xdd8] sm:$0xf0]  ;;  %v14672_v50 = vld [vmem:[#allocation6 + $0x5f4] sm:$0xf0] }
 0x174   :  { %3390 = vmatpush.bf16.msra.mxu2 %v10989_v58  ;;  %3403 = vmatpush.bf16.msra.mxu3 %v11885_v59  ;;  %v3708_v52 = vmax.f32 %v15966_v42, 0.0  ;;  %v14545_v58 = vld [vmem:[#allocation6 + $0x204] sm:$0xf]  ;;  %v3139_v59 = vadd.f32 %v3138_v55, %v683_v41  ;;  %v14686_v41 = vld [vmem:[#allocation6 + $0x66c] sm:$0xf]  ;;  %v12005_v55 = vor.u32 %v14924_v40, %v12004_v39 }
 0x175   :  { %3416 = vmatpush.bf16.msrb.mxu0 %v10993_v62  ;;  %3429 = vmatpush.bf16.msrb.mxu1 %v11889_v63  ;;  %v11438_v62 = vld [vmem:[#allocation6 + $0x970] sm:$0xf0]  ;;  %v14757_v42 = vld [vmem:[#allocation6 + $0x89c] sm:$0xf0] }
 0x176   :  { %v15972_v63 = vpack.c.bf16 %v3708_v52, %v3704_v51  ;;  %v15974_v20 = vadd.f32 %v3151_v56, %v3139_v59  ;;  %v11441_v9 = vor.u32 %v14769_v61, %v11438_v62  ;;  %v10996_v56 = vld [vmem:[#allocation6 + $0x588] sm:$0xf]  ;;  %v12009_v59 = vor.u32 %v14910_v48, %v12006_v49  ;;  %v14896_v61 = vld [vmem:[#allocation6 + $0xcf4] sm:$0xf0]  ;;  %v14658_v62 = vld [vmem:[#allocation6 + $0x58c] sm:$0xf] }
 0x177   :  { %v3166_v0 = vpop.f32.mrf.mxu0  ;;  %v3179_v1 = vpop.f32.mrf.mxu1 }
 0x178   :  { %3391 = vmatpush.bf16.msra.mxu2 %v10877_v6  ;;  %3404 = vmatpush.bf16.msra.mxu3 %v11773_v8  ;;  %v11324_v6 = vld [vmem:[#allocation6 + $0x820] sm:$0xf]  ;;  %v10545_v8 = vor.u32 %v14545_v58, %v10542_v60  ;;  %v3707_v15 = vmax.f32 %v15974_v20, 0.0  ;;  %v11113_v58 = vor.u32 %v14686_v41, %v11110_v47  ;;  %v11892_v60 = vld [vmem:[#allocation6 + $0xc88] sm:$0xf] }
 0x179   :  { %3417 = vmatpush.bf16.msrb.mxu0 %v10881_v13  ;;  %3430 = vmatpush.bf16.msrb.mxu1 %v11777_v14  ;;  %v10430_v13 = vld [vmem:[#allocation6 + $0x190] sm:$0xf0]  ;;  %v3703_v14 = vmax.f32 %v15936_v46, 0.0  ;;  %v11325_v22 = vor.u32 %v14755_v10, %v11324_v6  ;;  %v11329_v46 = vor.u32 %v14741_v17, %v11326_v18  ;;  %v10998_v0 = vld [vmem:[#allocation6 + $0x5f8] sm:$0xf0]  ;;  %v11893_v4 = vor.u32 %v14896_v61, %v11892_v60 }
 0x17a   :  { %v10433_v28 = vor.u32 %v14517_v12, %v10430_v13  ;;  %v3140_v29 = vpop.f32.mrf.mxu2  ;;  %v3153_v30 = vpop.f32.mrf.mxu3  ;;  %v14882_v1 = vld [vmem:[#allocation6 + $0xc8c] sm:$0xf]  ;;  %v14644_v6 = vld [vmem:[#allocation6 + $0x514] sm:$0xf0]  ;;  %v10886_v17 = vld [vmem:[#allocation6 + $0x518] sm:$0xf0] }
 0x17b   :  { %v15980_v19 = vpack.c.bf16 %v3707_v15, %v3703_v14  ;;  %v14868_v12 = vld [vmem:[#allocation6 + $0xc14] sm:$0xf0]  ;;  %v14630_v13 = vld [vmem:[#allocation6 + $0x4ac] sm:$0xf]  ;;  %v11668_v29 = vld [vmem:[#allocation6 + $0xac8] sm:$0xf] }
 0x17c   :  { %3392 = vmatpush.bf16.msra.mxu2 %v10765_v26  ;;  %3405 = vmatpush.bf16.msra.mxu3 %v11661_v27  ;;  %v11212_v26 = vld [vmem:[#allocation6 + $0x740] sm:$0xf]  ;;  %v14727_v27 = vld [vmem:[#allocation6 + $0x7ac] sm:$0xf0]  ;;  %v15982_v14 = vld [vmem:[#allocation7 + $0x8] sm:$0xff] }
 0x17d   :  { %3418 = vmatpush.bf16.msrb.mxu0 %v10769_v32  ;;  %3431 = vmatpush.bf16.msrb.mxu1 %v11665_v33  ;;  %v10318_v32 = vld [vmem:[#allocation6 + $0xb0] sm:$0xf0]  ;;  %v14713_v33 = vld [vmem:[#allocation6 + $0x744] sm:$0xf]  ;;  %v14854_v18 = vld [vmem:[#allocation6 + $0xbac] sm:$0xf] }
 0x17e   :  { %v10321_v51 = vor.u32 %v14489_v31, %v10318_v32  ;;  %v14840_v30 = vld [vmem:[#allocation6 + $0xb34] sm:$0xf0]  ;;  %v14602_v31 = vld [vmem:[#allocation6 + $0x3cc] sm:$0xf]  ;;  %v10774_v32 = vld [vmem:[#allocation6 + $0x438] sm:$0xf0] }
 0x17f   :  { %v11669_v40 = vor.u32 %v14840_v30, %v11668_v29  ;;  %v10660_v41 = vld [vmem:[#allocation6 + $0x2e8] sm:$0xf]  ;;  %v10777_v48 = vor.u32 %v14602_v31, %v10774_v32  ;;  %v14518_v30 = vld [vmem:[#allocation6 + $0x12c] sm:$0xf]  ;;  %v10438_v31 = vld [vmem:[#allocation6 + $0x198] sm:$0xf0] }
 0x180   :  { %3393 = vmatpush.bf16.msra.mxu2 %v10653_v43  ;;  %3406 = vmatpush.bf16.msra.mxu3 %v11549_v45  ;;  %v10317_v43 = vor.u32 %v14503_v23, %v10316_v34  ;;  %v11213_v45 = vor.u32 %v14727_v27, %v11212_v26  ;;  %v11782_v34 = vld [vmem:[#allocation6 + $0xc18] sm:$0xf0]  ;;  %v686_v23 = vperm.slane %v15982_v14, 1  ;;  %v10772_v26 = vld [vmem:[#allocation6 + $0x3c8] sm:$0xf] }
 0x181   :  { %3419 = vmatpush.bf16.msrb.mxu0 %v10657_v53  ;;  %3432 = vmatpush.bf16.msrb.mxu1 %v11553_v54  ;;  %v11217_v53 = vor.u32 %v14713_v33, %v11214_v35  ;;  %v11109_v54 = vor.u32 %v14700_v38, %v11108_v36  ;;  %v14616_v27 = vld [vmem:[#allocation6 + $0x434] sm:$0xf0]  ;;  %v14826_v33 = vld [vmem:[#allocation6 + $0xacc] sm:$0xf]  ;;  %v11670_v35 = vld [vmem:[#allocation6 + $0xb38] sm:$0xf0] }
 0x182   :  { %v10773_v39 = vor.u32 %v14616_v27, %v10772_v26  ;;  %v11673_v49 = vor.u32 %v14826_v33, %v11670_v35  ;;  %v10548_v61 = vld [vmem:[#allocation6 + $0x208] sm:$0xf]  ;;  %v14532_v27 = vld [vmem:[#allocation6 + $0x194] sm:$0xf0]  ;;  %v14742_v32 = vld [vmem:[#allocation6 + $0x82c] sm:$0xf] }
 0x183   :  { %v10436_v26 = vld [vmem:[#allocation6 + $0x128] sm:$0xf]  ;;  %v11334_v33 = vld [vmem:[#allocation6 + $0x898] sm:$0xf0]  ;;  %v14715_v20 = vld [vmem:[#allocation6 + $0x754] sm:$0xf] }
 0x184   :  { %3394 = vmatpush.bf16.msra.mxu2 %v10541_v2  ;;  %3407 = vmatpush.bf16.msra.mxu3 %v11437_v3  ;;  %v11894_v2 = vld [vmem:[#allocation6 + $0xcf8] sm:$0xf0]  ;;  %v10997_v3 = vor.u32 %v14672_v50, %v10996_v56  ;;  %v685_v50 = vperm.slane %v15982_v14, 0  ;;  %v10324_v35 = vld [vmem:[#allocation6 + $0x48] sm:$0xf] }
 0x185   :  { %3420 = vmatpush.bf16.msrb.mxu0 %v10545_v8  ;;  %3433 = vmatpush.bf16.msrb.mxu1 %v11441_v9  ;;  %v11780_v8 = vld [vmem:[#allocation6 + $0xba8] sm:$0xf]  ;;  %v11001_v9 = vor.u32 %v14658_v62, %v10998_v0  ;;  %v11897_v10 = vor.u32 %v14882_v1, %v11894_v2  ;;  %v11558_v56 = vld [vmem:[#allocation6 + $0xa58] sm:$0xf0]  ;;  %v14560_v62 = vld [vmem:[#allocation6 + $0x274] sm:$0xf0] }
 0x186   :  { %v11444_v0 = vld [vmem:[#allocation6 + $0x908] sm:$0xf] }
 0x188   :  { %3395 = vmatpush.bf16.msra.mxu2 %v10429_v21  ;;  %3408 = vmatpush.bf16.msra.mxu3 %v11325_v22  ;;  %v10885_v21 = vor.u32 %v14644_v6, %v10884_v5  ;;  %v11781_v22 = vor.u32 %v14868_v12, %v11780_v8  ;;  %v14784_v6 = vld [vmem:[#allocation6 + $0x974] sm:$0xf0]  ;;  %v14546_v8 = vld [vmem:[#allocation6 + $0x20c] sm:$0xf] }
 0x189   :  { %3421 = vmatpush.bf16.msrb.mxu0 %v10433_v28  ;;  %3434 = vmatpush.bf16.msrb.mxu1 %v11329_v46  ;;  %v10889_v28 = vor.u32 %v14630_v13, %v10886_v17  ;;  %v11785_v46 = vor.u32 %v14854_v18, %v11782_v34  ;;  %v14770_v12 = vld [vmem:[#allocation6 + $0x90c] sm:$0xf]  ;;  %v11446_v13 = vld [vmem:[#allocation6 + $0x978] sm:$0xf0] }
 0x18a   :  { %v11449_v29 = vor.u32 %v14770_v12, %v11446_v13  ;;  %v11900_v13 = vld [vmem:[#allocation6 + $0xc90] sm:$0xf] }
 0x18c   :  { %3396 = vmatpush.bf16.msra.mxu2 %v10317_v43  ;;  %3409 = vmatpush.bf16.msra.mxu3 %v11213_v45  ;;  %v14588_v43 = vld [vmem:[#allocation6 + $0x354] sm:$0xf0]  ;;  %v11556_v45 = vld [vmem:[#allocation6 + $0x9e8] sm:$0xf] }
 0x18d   :  { %3422 = vmatpush.bf16.msrb.mxu0 %v10321_v51  ;;  %3435 = vmatpush.bf16.msrb.mxu1 %v11217_v53  ;;  %v14812_v51 = vld [vmem:[#allocation6 + $0xa54] sm:$0xf0]  ;;  %v14574_v53 = vld [vmem:[#allocation6 + $0x2ec] sm:$0xf] }
 0x18e   :  { %v11557_v60 = vor.u32 %v14812_v51, %v11556_v45  ;;  %v10441_v45 = vor.u32 %v14518_v30, %v10438_v31  ;;  %v14490_v51 = vld [vmem:[#allocation6 + $0x4c] sm:$0xf]  ;;  %v11788_v31 = vld [vmem:[#allocation6 + $0xbb0] sm:$0xf] }
 0x18f   :  { %3397 = vmatmul.bf16.vlgmr.msra.gmra.mxu2 %v15896_v24  ;;  %3410 = vmatmul.bf16.vlgmr.msra.gmra.mxu3 %v15898_v25  ;;  %v3216_v36 = vpop.f32.mrf.mxu0  ;;  %v3229_v38 = vpop.f32.mrf.mxu1 }
 0x190   :  { %3441 = vmatpush.bf16.msrb.mxu2 %v11109_v54  ;;  %3454 = vmatpush.bf16.msrb.mxu3 %v12005_v55  ;;  %v3217_v47 = vadd.f32 %v3216_v36, %v686_v23  ;;  %v10662_v54 = vld [vmem:[#allocation6 + $0x358] sm:$0xf0]  ;;  %v14798_v55 = vld [vmem:[#allocation6 + $0x9ec] sm:$0xf]  ;;  %v11445_v23 = vor.u32 %v14784_v6, %v11444_v0  ;;  %v14911_v0 = vld [vmem:[#allocation6 + $0xd74] sm:$0xf] }
 0x191   :  { %3467 = vmatpush.bf16.msra.mxu0 %v11113_v58  ;;  %3480 = vmatpush.bf16.msra.mxu1 %v12009_v59  ;;  %v10661_v59 = vor.u32 %v14588_v43, %v10660_v41  ;;  %v10665_v2 = vor.u32 %v14574_v53, %v10662_v54  ;;  %v11220_v41 = vld [vmem:[#allocation6 + $0x748] sm:$0xf]  ;;  %v14728_v43 = vld [vmem:[#allocation6 + $0x7b4] sm:$0xf0]  ;;  %v10326_v53 = vld [vmem:[#allocation6 + $0xb8] sm:$0xf0] }
 0x192   :  { %3423 = vmatmul.bf16.vlgmr.msrb.gmra.mxu0 %v15896_v24  ;;  %3436 = vmatmul.bf16.vlgmr.msrb.gmra.mxu1 %v15898_v25  ;;  %v15990_v58 = vadd.f32 %v3229_v38, %v3217_v47  ;;  %v3203_v5 = vpop.f32.mrf.mxu3  ;;  %v10437_v38 = vor.u32 %v14532_v27, %v10436_v26  ;;  %v11337_v47 = vor.u32 %v14742_v32, %v11334_v33  ;;  %v11222_v54 = vld [vmem:[#allocation6 + $0x7b8] sm:$0xf0]  ;;  %v11902_v26 = vld [vmem:[#allocation6 + $0xd00] sm:$0xf0]  ;;  %v14869_v32 = vld [vmem:[#allocation6 + $0xc1c] sm:$0xf0] }
 0x193   :  { %v14631_v33 = vld [vmem:[#allocation6 + $0x4b4] sm:$0xf] }
 0x194   :  { %3442 = vmatpush.bf16.msrb.mxu2 %v10997_v3  ;;  %3455 = vmatpush.bf16.msrb.mxu3 %v11893_v4  ;;  %v3710_v1 = vmax.f32 %v15990_v58, 0.0  ;;  %v11561_v3 = vor.u32 %v14798_v55, %v11558_v56  ;;  %v3190_v4 = vpop.f32.mrf.mxu2  ;;  %v11116_v55 = vld [vmem:[#allocation6 + $0x670] sm:$0xf]  ;;  %v14758_v58 = vld [vmem:[#allocation6 + $0x8a4] sm:$0xf0] }
 0x195   :  { %3468 = vmatpush.bf16.msra.mxu0 %v11001_v9  ;;  %3481 = vmatpush.bf16.msra.mxu1 %v11897_v10  ;;  %v3191_v9 = vadd.f32 %v3190_v4, %v685_v50  ;;  %v10550_v10 = vld [vmem:[#allocation6 + $0x278] sm:$0xf0]  ;;  %v12012_v56 = vld [vmem:[#allocation6 + $0xd70] sm:$0xf]  ;;  %v14925_v50 = vld [vmem:[#allocation6 + $0xddc] sm:$0xf0]  ;;  %v11225_v4 = vor.u32 %v14714_v16, %v11222_v54 }
 0x196   :  { %v15997_v17 = vpack.c.bf16 %v3710_v1, %v3706_v44  ;;  %v12013_v6 = vor.u32 %v14925_v50, %v12012_v56  ;;  %v14603_v16 = vld [vmem:[#allocation6 + $0x3d4] sm:$0xf]  ;;  %v10782_v54 = vld [vmem:[#allocation6 + $0x440] sm:$0xf0] }
 0x197   :  { %v15999_v18 = vadd.f32 %v3203_v5, %v3191_v9  ;;  %v3218_v34 = vpop.f32.mrf.mxu0  ;;  %v14673_v9 = vld [vmem:[#allocation6 + $0x5fc] sm:$0xf0] }
 0x198   :  { %3443 = vmatpush.bf16.msrb.mxu2 %v10885_v21  ;;  %3456 = vmatpush.bf16.msrb.mxu3 %v11781_v22  ;;  %v3231_v21 = vpop.f32.mrf.mxu1  ;;  %v10549_v22 = vor.u32 %v14560_v62, %v10548_v61  ;;  %v11221_v61 = vor.u32 %v14728_v43, %v11220_v41  ;;  %v11118_v62 = vld [vmem:[#allocation6 + $0x6e0] sm:$0xf0]  ;;  %v14897_v34 = vld [vmem:[#allocation6 + $0xcfc] sm:$0xf0]  ;;  %v11789_v41 = vor.u32 %v14869_v32, %v11788_v31  ;;  %v688_v43 = vperm.slane %v15982_v14, 3 }
 0x199   :  { %3469 = vmatpush.bf16.msra.mxu0 %v10889_v28  ;;  %3482 = vmatpush.bf16.msra.mxu1 %v11785_v46  ;;  %v11332_v28 = vld [vmem:[#allocation6 + $0x828] sm:$0xf]  ;;  %v10553_v46 = vor.u32 %v14546_v8, %v10550_v10  ;;  %v3709_v44 = vmax.f32 %v15999_v18, 0.0  ;;  %v11004_v8 = vld [vmem:[#allocation6 + $0x590] sm:$0xf] }
 0x19a   :  { %v14659_v21 = vld [vmem:[#allocation6 + $0x594] sm:$0xf]  ;;  %v11005_v27 = vor.u32 %v14673_v9, %v11004_v8  ;;  %v10670_v8 = vld [vmem:[#allocation6 + $0x360] sm:$0xf0]  ;;  %v14716_v18 = vld [vmem:[#allocation6 + $0x75c] sm:$0xf] }
 0x19b   :  { %v16006_v36 = vpack.c.bf16 %v3709_v44, %v3705_v7  ;;  %v14701_v7 = vld [vmem:[#allocation6 + $0x6dc] sm:$0xf0]  ;;  %v14799_v9 = vld [vmem:[#allocation6 + $0x9f4] sm:$0xf] }
 0x19c   :  { %3444 = vmatpush.bf16.msrb.mxu2 %v10773_v39  ;;  %3457 = vmatpush.bf16.msrb.mxu3 %v11669_v40  ;;  %v11333_v39 = vor.u32 %v14756_v37, %v11332_v28  ;;  %v14504_v40 = vld [vmem:[#allocation6 + $0xb4] sm:$0xf0]  ;;  %v11117_v5 = vor.u32 %v14701_v7, %v11116_v55  ;;  %v11901_v28 = vor.u32 %v14897_v34, %v11900_v13  ;;  %v14827_v55 = vld [vmem:[#allocation6 + $0xad4] sm:$0xf]  ;;  %v11678_v7 = vld [vmem:[#allocation6 + $0xb40] sm:$0xf0] }
 0x19d   :  { %3470 = vmatpush.bf16.msra.mxu0 %v10777_v48  ;;  %3483 = vmatpush.bf16.msra.mxu1 %v11673_v49  ;;  %v3192_v48 = vpop.f32.mrf.mxu2  ;;  %v3205_v49 = vpop.f32.mrf.mxu3  ;;  %v14547_v31 = vld [vmem:[#allocation6 + $0x214] sm:$0xf] }
 0x1a0   :  { %3445 = vmatpush.bf16.msrb.mxu2 %v10661_v59  ;;  %3458 = vmatpush.bf16.msrb.mxu3 %v11557_v60  ;;  %v14687_v59 = vld [vmem:[#allocation6 + $0x674] sm:$0xf]  ;;  %v10325_v60 = vor.u32 %v14504_v40, %v10324_v35  ;;  %v10894_v35 = vld [vmem:[#allocation6 + $0x520] sm:$0xf0] }
 0x1a1   :  { %3471 = vmatpush.bf16.msra.mxu0 %v10665_v2  ;;  %3484 = vmatpush.bf16.msra.mxu1 %v11561_v3  ;;  %v12014_v2 = vld [vmem:[#allocation6 + $0xde0] sm:$0xf0]  ;;  %v10329_v3 = vor.u32 %v14490_v51, %v10326_v53  ;;  %v11121_v10 = vor.u32 %v14687_v59, %v11118_v62  ;;  %v10897_v48 = vor.u32 %v14631_v33, %v10894_v35  ;;  %v11676_v51 = vld [vmem:[#allocation6 + $0xad0] sm:$0xf]  ;;  %v14841_v53 = vld [vmem:[#allocation6 + $0xb3c] sm:$0xf0] }
 0x1a2   :  { %v12017_v12 = vor.u32 %v14911_v0, %v12014_v2  ;;  %v14589_v62 = vld [vmem:[#allocation6 + $0x35c] sm:$0xf0]  ;;  %v11564_v0 = vld [vmem:[#allocation6 + $0x9f0] sm:$0xf]  ;;  %v10558_v33 = vld [vmem:[#allocation6 + $0x280] sm:$0xf0] }
 0x1a3   :  { %v14771_v35 = vld [vmem:[#allocation6 + $0x914] sm:$0xf] }
 0x1a4   :  { %3446 = vmatpush.bf16.msrb.mxu2 %v10549_v22  ;;  %3459 = vmatpush.bf16.msrb.mxu3 %v11445_v23  ;;  %v11006_v22 = vld [vmem:[#allocation6 + $0x600] sm:$0xf0]  ;;  %v14883_v23 = vld [vmem:[#allocation6 + $0xc94] sm:$0xf] }
 0x1a5   :  { %3472 = vmatpush.bf16.msra.mxu0 %v10553_v46  ;;  %3485 = vmatpush.bf16.msra.mxu1 %v11449_v29  ;;  %v10892_v46 = vld [vmem:[#allocation6 + $0x4b0] sm:$0xf]  ;;  %v14645_v29 = vld [vmem:[#allocation6 + $0x51c] sm:$0xf0]  ;;  %v11009_v37 = vor.u32 %v14659_v21, %v11006_v22  ;;  %v11905_v30 = vor.u32 %v14883_v23, %v11902_v26 }
 0x1a6   :  { %v10893_v40 = vor.u32 %v14645_v29, %v10892_v46  ;;  %v10556_v22 = vld [vmem:[#allocation6 + $0x210] sm:$0xf]  ;;  %v14561_v23 = vld [vmem:[#allocation6 + $0x27c] sm:$0xf0] }
 0x1a7   :  { %v11452_v26 = vld [vmem:[#allocation6 + $0x910] sm:$0xf] }
 0x1a8   :  { %3447 = vmatpush.bf16.msrb.mxu2 %v10437_v38  ;;  %3460 = vmatpush.bf16.msrb.mxu3 %v11333_v39  ;;  %v14855_v38 = vld [vmem:[#allocation6 + $0xbb4] sm:$0xf]  ;;  %v11790_v39 = vld [vmem:[#allocation6 + $0xc20] sm:$0xf0] }
 0x1a9   :  { %3473 = vmatpush.bf16.msra.mxu0 %v10441_v45  ;;  %3486 = vmatpush.bf16.msra.mxu1 %v11337_v47  ;;  %v10780_v45 = vld [vmem:[#allocation6 + $0x3d0] sm:$0xf]  ;;  %v14617_v47 = vld [vmem:[#allocation6 + $0x43c] sm:$0xf0]  ;;  %v11793_v49 = vor.u32 %v14855_v38, %v11790_v39  ;;  %v11454_v38 = vld [vmem:[#allocation6 + $0x980] sm:$0xf0] }
 0x1aa   :  { %v10781_v59 = vor.u32 %v14617_v47, %v10780_v45  ;;  %v10557_v45 = vor.u32 %v14561_v23, %v10556_v22  ;;  %v14688_v22 = vld [vmem:[#allocation6 + $0x67c] sm:$0xf] }
 0x1ac   :  { %3448 = vmatpush.bf16.msrb.mxu2 %v10325_v60  ;;  %3461 = vmatpush.bf16.msrb.mxu3 %v11221_v61  ;;  %v11677_v60 = vor.u32 %v14841_v53, %v11676_v51  ;;  %v10668_v61 = vld [vmem:[#allocation6 + $0x2f0] sm:$0xf]  ;;  %v10561_v53 = vor.u32 %v14547_v31, %v10558_v33  ;;  %v11012_v33 = vld [vmem:[#allocation6 + $0x598] sm:$0xf] }
 0x1ad   :  { %3474 = vmatpush.bf16.msra.mxu0 %v10329_v3  ;;  %3487 = vmatpush.bf16.msra.mxu1 %v11225_v4  ;;  %v10785_v3 = vor.u32 %v14603_v16, %v10782_v54  ;;  %v11681_v4 = vor.u32 %v14827_v55, %v11678_v7  ;;  %v10669_v34 = vor.u32 %v14589_v62, %v10668_v61  ;;  %v11340_v51 = vld [vmem:[#allocation6 + $0x830] sm:$0xf]  ;;  %v14519_v54 = vld [vmem:[#allocation6 + $0x134] sm:$0xf]  ;;  %v10446_v55 = vld [vmem:[#allocation6 + $0x1a0] sm:$0xf0] }
 0x1ae   :  { %v11457_v16 = vor.u32 %v14771_v35, %v11454_v38  ;;  %v14743_v7 = vld [vmem:[#allocation6 + $0x834] sm:$0xf]  ;;  %v11341_v61 = vor.u32 %v14757_v42, %v11340_v51  ;;  %v14505_v62 = vld [vmem:[#allocation6 + $0xbc] sm:$0xf0]  ;;  %v14674_v35 = vld [vmem:[#allocation6 + $0x604] sm:$0xf0] }
 0x1af   :  { %3449 = vmatmul.bf16.vlgmr.msrb.gmra.mxu2 %v15896_v24  ;;  %3462 = vmatmul.bf16.vlgmr.msrb.gmra.mxu3 %v15898_v25  ;;  %v3268_v56 = vpop.f32.mrf.mxu0  ;;  %v3281_v50 = vpop.f32.mrf.mxu1  ;;  %v11910_v51 = vld [vmem:[#allocation6 + $0xd08] sm:$0xf0]  ;;  %v10900_v42 = vld [vmem:[#allocation6 + $0x4b8] sm:$0xf] }
 0x1b0   :  { %3493 = vmatpush.bf16.msra.mxu2 %v11117_v5  ;;  %3506 = vmatpush.bf16.msra.mxu3 %v12013_v6  ;;  %v3269_v2 = vadd.f32 %v3268_v56, %v688_v43  ;;  %v14813_v5 = vld [vmem:[#allocation6 + $0xa5c] sm:$0xf0]  ;;  %v14575_v6 = vld [vmem:[#allocation6 + $0x2f4] sm:$0xf]  ;;  %v11342_v56 = vld [vmem:[#allocation6 + $0x8a0] sm:$0xf0] }
 0x1b1   :  { %3519 = vmatpush.bf16.msrb.mxu0 %v11121_v10  ;;  %3532 = vmatpush.bf16.msrb.mxu1 %v12017_v12  ;;  %v11566_v10 = vld [vmem:[#allocation6 + $0xa60] sm:$0xf0]  ;;  %v687_v12 = vperm.slane %v15982_v14, 2  ;;  %v11565_v21 = vor.u32 %v14813_v5, %v11564_v0  ;;  %v11228_v0 = vld [vmem:[#allocation6 + $0x750] sm:$0xf] }
 0x1b2   :  { %3475 = vmatmul.bf16.vlgmr.msra.gmra.mxu0 %v15896_v24  ;;  %3488 = vmatmul.bf16.vlgmr.msra.gmra.mxu1 %v15898_v25  ;;  %v16014_v13 = vadd.f32 %v3281_v50, %v3269_v2  ;;  %v11569_v46 = vor.u32 %v14799_v9, %v11566_v10  ;;  %v3242_v29 = vpop.f32.mrf.mxu2  ;;  %v10332_v50 = vld [vmem:[#allocation6 + $0x50] sm:$0xf]  ;;  %v14729_v2 = vld [vmem:[#allocation6 + $0x7bc] sm:$0xf0]  ;;  %v10334_v9 = vld [vmem:[#allocation6 + $0xc0] sm:$0xf0] }
 0x1b3   :  { %v3243_v32 = vadd.f32 %v3242_v29, %v687_v12  ;;  %v11230_v10 = vld [vmem:[#allocation6 + $0x7c0] sm:$0xf0]  ;;  %v11124_v12 = vld [vmem:[#allocation6 + $0x678] sm:$0xf]  ;;  %v10333_v23 = vor.u32 %v14505_v62, %v10332_v50  ;;  %v12022_v29 = vld [vmem:[#allocation6 + $0xde8] sm:$0xf0] }
 0x1b4   :  { %3494 = vmatpush.bf16.msra.mxu2 %v11005_v27  ;;  %3507 = vmatpush.bf16.msra.mxu3 %v11901_v28  ;;  %v3712_v27 = vmax.f32 %v16014_v13, 0.0  ;;  %v10673_v28 = vor.u32 %v14575_v6, %v10670_v8  ;;  %v14491_v8 = vld [vmem:[#allocation6 + $0x54] sm:$0xf]  ;;  %v14870_v50 = vld [vmem:[#allocation6 + $0xc24] sm:$0xf0] }
 0x1b5   :  { %3520 = vmatpush.bf16.msrb.mxu0 %v11009_v37  ;;  %3533 = vmatpush.bf16.msrb.mxu1 %v11905_v30  ;;  %v3255_v37 = vpop.f32.mrf.mxu3  ;;  %v14785_v30 = vld [vmem:[#allocation6 + $0x97c] sm:$0xf0]  ;;  %v14856_v62 = vld [vmem:[#allocation6 + $0xbbc] sm:$0xf]  ;;  %v14759_v13 = vld [vmem:[#allocation6 + $0x8ac] sm:$0xf0] }
 0x1b6   :  { %v16021_v39 = vpack.c.bf16 %v3712_v27, %v3708_v52  ;;  %v11453_v47 = vor.u32 %v14785_v30, %v11452_v26  ;;  %v11229_v26 = vor.u32 %v14729_v2, %v11228_v0  ;;  %v11233_v30 = vor.u32 %v14715_v20, %v11230_v10  ;;  %v11798_v0 = vld [vmem:[#allocation6 + $0xc28] sm:$0xf0]  ;;  %v11684_v20 = vld [vmem:[#allocation6 + $0xad8] sm:$0xf]  ;;  %v14842_v10 = vld [vmem:[#allocation6 + $0xb44] sm:$0xf0] }
 0x1b7   :  { %v3283_v43 = vpop.f32.mrf.mxu1 }
 0x1b8   :  { %3495 = vmatpush.bf16.msra.mxu2 %v10893_v40  ;;  %3508 = vmatpush.bf16.msra.mxu3 %v11789_v41  ;;  %v16023_v40 = vadd.f32 %v3255_v37, %v3243_v32  ;;  %v3270_v41 = vpop.f32.mrf.mxu0  ;;  %v10337_v37 = vor.u32 %v14491_v8, %v10334_v9  ;;  %v11908_v43 = vld [vmem:[#allocation6 + $0xc98] sm:$0xf]  ;;  %v11801_v9 = vor.u32 %v14856_v62, %v11798_v0  ;;  %v10566_v62 = vld [vmem:[#allocation6 + $0x288] sm:$0xf0]  ;;  %v14772_v0 = vld [vmem:[#allocation6 + $0x91c] sm:$0xf] }
 0x1b9   :  { %3521 = vmatpush.bf16.msrb.mxu0 %v10897_v48  ;;  %3534 = vmatpush.bf16.msrb.mxu1 %v11793_v49  ;;  %v10444_v48 = vld [vmem:[#allocation6 + $0x130] sm:$0xf]  ;;  %v14533_v49 = vld [vmem:[#allocation6 + $0x19c] sm:$0xf0] }
 0x1ba   :  { %v3711_v52 = vmax.f32 %v16023_v40, 0.0  ;;  %v3244_v5 = vpop.f32.mrf.mxu2  ;;  %v14717_v40 = vld [vmem:[#allocation6 + $0x764] sm:$0xf] }
 0x1bb   :  { %v10788_v5 = vld [vmem:[#allocation6 + $0x3d8] sm:$0xf] }
 0x1bc   :  { %3496 = vmatpush.bf16.msra.mxu2 %v10781_v59  ;;  %3509 = vmatpush.bf16.msra.mxu3 %v11677_v60  ;;  %v16030_v59 = vpack.c.bf16 %v3711_v52, %v3707_v15  ;;  %v10445_v60 = vor.u32 %v14533_v49, %v10444_v48  ;;  %v14702_v15 = vld [vmem:[#allocation6 + $0x6e4] sm:$0xf0]  ;;  %v11014_v48 = vld [vmem:[#allocation6 + $0x608] sm:$0xf0]  ;;  %v14884_v49 = vld [vmem:[#allocation6 + $0xc9c] sm:$0xf] }
 0x1bd   :  { %3522 = vmatpush.bf16.msrb.mxu0 %v10785_v3  ;;  %3535 = vmatpush.bf16.msrb.mxu1 %v11681_v4  ;;  %v10449_v3 = vor.u32 %v14519_v54, %v10446_v55  ;;  %v11345_v4 = vor.u32 %v14743_v7, %v11342_v56  ;;  %v3257_v6 = vpop.f32.mrf.mxu3  ;;  %v11125_v31 = vor.u32 %v14702_v15, %v11124_v12  ;;  %v14646_v54 = vld [vmem:[#allocation6 + $0x524] sm:$0xf0]  ;;  %v11796_v56 = vld [vmem:[#allocation6 + $0xbb8] sm:$0xf]  ;;  %v14604_v12 = vld [vmem:[#allocation6 + $0x3dc] sm:$0xf] }
 0x1be   :  { %v11913_v7 = vor.u32 %v14884_v49, %v11910_v51  ;;  %v10901_v2 = vor.u32 %v14646_v54, %v10900_v42  ;;  %v14618_v6 = vld [vmem:[#allocation6 + $0x444] sm:$0xf0]  ;;  %v10790_v15 = vld [vmem:[#allocation6 + $0x448] sm:$0xf0]  ;;  %v10564_v51 = vld [vmem:[#allocation6 + $0x218] sm:$0xf] }
 0x1c0   :  { %3497 = vmatpush.bf16.msra.mxu2 %v10669_v34  ;;  %3510 = vmatpush.bf16.msra.mxu3 %v11565_v21  ;;  %v12020_v34 = vld [vmem:[#allocation6 + $0xd78] sm:$0xf]  ;;  %v14926_v21 = vld [vmem:[#allocation6 + $0xde4] sm:$0xf0] }
 0x1c1   :  { %3523 = vmatpush.bf16.msrb.mxu0 %v10673_v28  ;;  %3536 = vmatpush.bf16.msrb.mxu1 %v11569_v46  ;;  %v11126_v28 = vld [vmem:[#allocation6 + $0x6e8] sm:$0xf0]  ;;  %v14912_v46 = vld [vmem:[#allocation6 + $0xd7c] sm:$0xf]  ;;  %v12021_v32 = vor.u32 %v14926_v21, %v12020_v34 }
 0x1c2   :  { %v11129_v38 = vor.u32 %v14688_v22, %v11126_v28  ;;  %v12025_v41 = vor.u32 %v14912_v46, %v12022_v29  ;;  %v14828_v34 = vld [vmem:[#allocation6 + $0xadc] sm:$0xf]  ;;  %v11686_v21 = vld [vmem:[#allocation6 + $0xb48] sm:$0xf0]  ;;  %v11685_v28 = vor.u32 %v14842_v10, %v11684_v20  ;;  %v10676_v46 = vld [vmem:[#allocation6 + $0x2f8] sm:$0xf] }
 0x1c3   :  { %v14590_v29 = vld [vmem:[#allocation6 + $0x364] sm:$0xf0]  ;;  %v10452_v20 = vld [vmem:[#allocation6 + $0x138] sm:$0xf] }
 0x1c4   :  { %3498 = vmatpush.bf16.msra.mxu2 %v10557_v45  ;;  %3511 = vmatpush.bf16.msra.mxu3 %v11453_v47  ;;  %v14898_v45 = vld [vmem:[#allocation6 + $0xd04] sm:$0xf0]  ;;  %v14660_v47 = vld [vmem:[#allocation6 + $0x59c] sm:$0xf] }
 0x1c5   :  { %3524 = vmatpush.bf16.msrb.mxu0 %v10561_v53  ;;  %3537 = vmatpush.bf16.msrb.mxu1 %v11457_v16  ;;  %v11013_v53 = vor.u32 %v14674_v35, %v11012_v33  ;;  %v11909_v16 = vor.u32 %v14898_v45, %v11908_v43  ;;  %v11017_v55 = vor.u32 %v14660_v47, %v11014_v48  ;;  %v14814_v33 = vld [vmem:[#allocation6 + $0xa64] sm:$0xf0]  ;;  %v14576_v35 = vld [vmem:[#allocation6 + $0x2fc] sm:$0xf]  ;;  %v11574_v43 = vld [vmem:[#allocation6 + $0xa68] sm:$0xf0] }
 0x1c6   :  { %v689_v45 = vperm.slane %v15982_v14, 4  ;;  %v10677_v48 = vor.u32 %v14590_v29, %v10676_v46  ;;  %v14534_v10 = vld [vmem:[#allocation6 + $0x1a4] sm:$0xf0] }
 0x1c7   :  { %v10453_v29 = vor.u32 %v14534_v10, %v10452_v20  ;;  %v14899_v20 = vld [vmem:[#allocation6 + $0xd0c] sm:$0xf0]  ;;  %v14661_v10 = vld [vmem:[#allocation6 + $0x5a4] sm:$0xf] }
 0x1c8   :  { %3499 = vmatpush.bf16.msra.mxu2 %v10445_v60  ;;  %3512 = vmatpush.bf16.msra.mxu3 %v11341_v61  ;;  %v14632_v60 = vld [vmem:[#allocation6 + $0x4bc] sm:$0xf]  ;;  %v10902_v61 = vld [vmem:[#allocation6 + $0x528] sm:$0xf0] }
 0x1c9   :  { %3525 = vmatpush.bf16.msrb.mxu0 %v10449_v3  ;;  %3538 = vmatpush.bf16.msrb.mxu1 %v11345_v4  ;;  %v11797_v3 = vor.u32 %v14870_v50, %v11796_v56  ;;  %v690_v4 = vperm.slane %v15982_v14, 5  ;;  %v10905_v8 = vor.u32 %v14632_v60, %v10902_v61  ;;  %v14786_v50 = vld [vmem:[#allocation6 + $0x984] sm:$0xf0]  ;;  %v14548_v60 = vld [vmem:[#allocation6 + $0x21c] sm:$0xf] }
 0x1cc   :  { %3500 = vmatpush.bf16.msra.mxu2 %v10333_v23  ;;  %3513 = vmatpush.bf16.msra.mxu3 %v11229_v26  ;;  %v10789_v26 = vor.u32 %v14618_v6, %v10788_v5 }
 0x1cd   :  { %3526 = vmatpush.bf16.msrb.mxu0 %v10337_v37  ;;  %3539 = vmatpush.bf16.msrb.mxu1 %v11233_v30  ;;  %v11572_v37 = vld [vmem:[#allocation6 + $0x9f8] sm:$0xf] }
 0x1ce   :  { %v11573_v49 = vor.u32 %v14814_v33, %v11572_v37 }
 0x1cf   :  { %3501 = vmatmul.bf16.vlgmr.msra.gmra.mxu2 %v15896_v24  ;;  %3514 = vmatmul.bf16.vlgmr.msra.gmra.mxu3 %v15898_v25  ;;  %v3320_v22 = vpop.f32.mrf.mxu0  ;;  %v3333_v23 = vpop.f32.mrf.mxu1 }
 0x1d0   :  { %3545 = vmatpush.bf16.msrb.mxu2 %v11125_v31  ;;  %3558 = vmatpush.bf16.msrb.mxu3 %v12021_v32  ;;  %v3321_v30 = vadd.f32 %v3320_v22, %v690_v4  ;;  %v10793_v31 = vor.u32 %v14604_v12, %v10790_v15  ;;  %v11689_v32 = vor.u32 %v14828_v34, %v11686_v21  ;;  %v11348_v12 = vld [vmem:[#allocation6 + $0x838] sm:$0xf]  ;;  %v14520_v21 = vld [vmem:[#allocation6 + $0x13c] sm:$0xf]  ;;  %v10454_v22 = vld [vmem:[#allocation6 + $0x1a8] sm:$0xf0] }
 0x1d1   :  { %3571 = vmatpush.bf16.msra.mxu0 %v11129_v38  ;;  %3584 = vmatpush.bf16.msra.mxu1 %v12025_v41  ;;  %v10678_v38 = vld [vmem:[#allocation6 + $0x368] sm:$0xf0]  ;;  %v14800_v41 = vld [vmem:[#allocation6 + $0x9fc] sm:$0xf]  ;;  %v10569_v15 = vor.u32 %v14548_v60, %v10566_v62  ;;  %v11349_v37 = vor.u32 %v14758_v58, %v11348_v12  ;;  %v10457_v33 = vor.u32 %v14520_v21, %v10454_v22  ;;  %v11022_v12 = vld [vmem:[#allocation6 + $0x610] sm:$0xf0] }
 0x1d2   :  { %3527 = vmatmul.bf16.vlgmr.msrb.gmra.mxu0 %v15896_v24  ;;  %3540 = vmatmul.bf16.vlgmr.msrb.gmra.mxu1 %v15898_v25  ;;  %v16038_v47 = vadd.f32 %v3333_v23, %v3321_v30  ;;  %v10681_v54 = vor.u32 %v14576_v35, %v10678_v38  ;;  %v3307_v56 = vpop.f32.mrf.mxu3  ;;  %v14744_v23 = vld [vmem:[#allocation6 + $0x83c] sm:$0xf]  ;;  %v14506_v30 = vld [vmem:[#allocation6 + $0xc4] sm:$0xf0]  ;;  %v10908_v22 = vld [vmem:[#allocation6 + $0x4c0] sm:$0xf] }
 0x1d4   :  { %3546 = vmatpush.bf16.msrb.mxu2 %v11013_v53  ;;  %3559 = vmatpush.bf16.msrb.mxu3 %v11909_v16  ;;  %v14562_v53 = vld [vmem:[#allocation6 + $0x284] sm:$0xf0]  ;;  %v11460_v16 = vld [vmem:[#allocation6 + $0x918] sm:$0xf]  ;;  %v3714_v42 = vmax.f32 %v16038_v47, 0.0 }
 0x1d5   :  { %3572 = vmatpush.bf16.msra.mxu0 %v11017_v55  ;;  %3585 = vmatpush.bf16.msra.mxu1 %v11913_v7  ;;  %v11577_v55 = vor.u32 %v14800_v41, %v11574_v43  ;;  %v3294_v7 = vpop.f32.mrf.mxu2  ;;  %v14492_v43 = vld [vmem:[#allocation6 + $0x5c] sm:$0xf] }
 0x1d6   :  { %v3295_v61 = vadd.f32 %v3294_v7, %v689_v45  ;;  %v10342_v45 = vld [vmem:[#allocation6 + $0xc8] sm:$0xf0]  ;;  %v11134_v7 = vld [vmem:[#allocation6 + $0x6f0] sm:$0xf0] }
 0x1d7   :  { %v3322_v5 = vpop.f32.mrf.mxu0  ;;  %v3335_v6 = vpop.f32.mrf.mxu1  ;;  %v10345_v60 = vor.u32 %v14492_v43, %v10342_v45  ;;  %v10796_v43 = vld [vmem:[#allocation6 + $0x3e0] sm:$0xf]  ;;  %v14619_v45 = vld [vmem:[#allocation6 + $0x44c] sm:$0xf0] }
 0x1d8   :  { %3547 = vmatpush.bf16.msrb.mxu2 %v10901_v2  ;;  %3560 = vmatpush.bf16.msrb.mxu3 %v11797_v3  ;;  %v11462_v2 = vld [vmem:[#allocation6 + $0x988] sm:$0xf0]  ;;  %v16045_v3 = vpack.c.bf16 %v3714_v42, %v3710_v1  ;;  %v16047_v4 = vadd.f32 %v3307_v56, %v3295_v61  ;;  %v14913_v56 = vld [vmem:[#allocation6 + $0xd84] sm:$0xf]  ;;  %v14675_v5 = vld [vmem:[#allocation6 + $0x60c] sm:$0xf0] }
 0x1d9   :  { %3573 = vmatpush.bf16.msra.mxu0 %v10905_v8  ;;  %3586 = vmatpush.bf16.msra.mxu1 %v11801_v9  ;;  %v10565_v8 = vor.u32 %v14562_v53, %v10564_v51  ;;  %v11461_v9 = vor.u32 %v14786_v50, %v11460_v16  ;;  %v11465_v34 = vor.u32 %v14772_v0, %v11462_v2  ;;  %v12028_v51 = vld [vmem:[#allocation6 + $0xd80] sm:$0xf]  ;;  %v14927_v53 = vld [vmem:[#allocation6 + $0xdec] sm:$0xf0]  ;;  %v14689_v16 = vld [vmem:[#allocation6 + $0x684] sm:$0xf] }
 0x1da   :  { %v3713_v1 = vmax.f32 %v16047_v4, 0.0  ;;  %v3309_v41 = vpop.f32.mrf.mxu3  ;;  %v12030_v50 = vld [vmem:[#allocation6 + $0xdf0] sm:$0xf0]  ;;  %v12029_v0 = vor.u32 %v14927_v53, %v12028_v51  ;;  %v11020_v2 = vld [vmem:[#allocation6 + $0x5a0] sm:$0xf]  ;;  %v11137_v6 = vor.u32 %v14689_v16, %v11134_v7 }
 0x1db   :  { %v11021_v58 = vor.u32 %v14675_v5, %v11020_v2  ;;  %v692_v41 = vperm.slane %v15982_v14, 7  ;;  %v14605_v51 = vld [vmem:[#allocation6 + $0x3e4] sm:$0xf]  ;;  %v10798_v53 = vld [vmem:[#allocation6 + $0x450] sm:$0xf0] }
 0x1dc   :  { %3548 = vmatpush.bf16.msrb.mxu2 %v10789_v26  ;;  %3561 = vmatpush.bf16.msrb.mxu3 %v11685_v28  ;;  %v11350_v26 = vld [vmem:[#allocation6 + $0x8a8] sm:$0xf0]  ;;  %v10340_v28 = vld [vmem:[#allocation6 + $0x58] sm:$0xf]  ;;  %v16054_v46 = vpack.c.bf16 %v3713_v1, %v3709_v44  ;;  %v14703_v44 = vld [vmem:[#allocation6 + $0x6ec] sm:$0xf0]  ;;  %v10801_v2 = vor.u32 %v14605_v51, %v10798_v53 }
 0x1dd   :  { %3574 = vmatpush.bf16.msra.mxu0 %v10793_v31  ;;  %3587 = vmatpush.bf16.msra.mxu1 %v11689_v32  ;;  %v11236_v31 = vld [vmem:[#allocation6 + $0x758] sm:$0xf]  ;;  %v14730_v32 = vld [vmem:[#allocation6 + $0x7c4] sm:$0xf0]  ;;  %v11353_v35 = vor.u32 %v14744_v23, %v11350_v26  ;;  %v3296_v38 = vpop.f32.mrf.mxu2  ;;  %v14647_v23 = vld [vmem:[#allocation6 + $0x52c] sm:$0xf0]  ;;  %v11025_v26 = vor.u32 %v14661_v10, %v11022_v12 }
 0x1de   :  { %v14829_v16 = vld [vmem:[#allocation6 + $0xae4] sm:$0xf]  ;;  %v11582_v10 = vld [vmem:[#allocation6 + $0xa70] sm:$0xf0]  ;;  %v691_v12 = vperm.slane %v15982_v14, 6 }
 0x1df   :  { %v14535_v51 = vld [vmem:[#allocation6 + $0x1ac] sm:$0xf0]  ;;  %v11356_v53 = vld [vmem:[#allocation6 + $0x840] sm:$0xf] }
 0x1e0   :  { %3549 = vmatpush.bf16.msrb.mxu2 %v10677_v48  ;;  %3562 = vmatpush.bf16.msrb.mxu3 %v11573_v49  ;;  %v11238_v48 = vld [vmem:[#allocation6 + $0x7c8] sm:$0xf0]  ;;  %v11132_v49 = vld [vmem:[#allocation6 + $0x680] sm:$0xf] }
 0x1e1   :  { %3575 = vmatpush.bf16.msra.mxu0 %v10681_v54  ;;  %3588 = vmatpush.bf16.msra.mxu1 %v11577_v55  ;;  %v10341_v54 = vor.u32 %v14506_v30, %v10340_v28  ;;  %v11237_v55 = vor.u32 %v14730_v32, %v11236_v31  ;;  %v11241_v61 = vor.u32 %v14716_v18, %v11238_v48  ;;  %v14633_v30 = vld [vmem:[#allocation6 + $0x4c4] sm:$0xf]  ;;  %v10910_v31 = vld [vmem:[#allocation6 + $0x530] sm:$0xf0] }
 0x1e2   :  { %v11133_v62 = vor.u32 %v14703_v44, %v11132_v49  ;;  %v14857_v32 = vld [vmem:[#allocation6 + $0xbc4] sm:$0xf]  ;;  %v10913_v18 = vor.u32 %v14633_v30, %v10910_v31  ;;  %v11692_v49 = vld [vmem:[#allocation6 + $0xae0] sm:$0xf]  ;;  %v14843_v44 = vld [vmem:[#allocation6 + $0xb4c] sm:$0xf0] }
 0x1e3   :  { %v14787_v31 = vld [vmem:[#allocation6 + $0x98c] sm:$0xf0] }
 0x1e4   :  { %3550 = vmatpush.bf16.msrb.mxu2 %v10565_v8  ;;  %3563 = vmatpush.bf16.msrb.mxu3 %v11461_v9  ;;  %v12033_v8 = vor.u32 %v14913_v56, %v12030_v50  ;;  %v11916_v9 = vld [vmem:[#allocation6 + $0xca0] sm:$0xf]  ;;  %v10797_v56 = vor.u32 %v14619_v45, %v10796_v43  ;;  %v11693_v50 = vor.u32 %v14843_v44, %v11692_v49 }
 0x1e5   :  { %3576 = vmatpush.bf16.msra.mxu0 %v10569_v15  ;;  %3589 = vmatpush.bf16.msra.mxu1 %v11465_v34  ;;  %v14885_v15 = vld [vmem:[#allocation6 + $0xca4] sm:$0xf]  ;;  %v11918_v34 = vld [vmem:[#allocation6 + $0xd10] sm:$0xf0]  ;;  %v11917_v21 = vor.u32 %v14899_v20, %v11916_v9  ;;  %v10460_v44 = vld [vmem:[#allocation6 + $0x140] sm:$0xf] }
 0x1e6   :  { %v11921_v28 = vor.u32 %v14885_v15, %v11918_v34  ;;  %v10686_v9 = vld [vmem:[#allocation6 + $0x370] sm:$0xf0]  ;;  %v14801_v20 = vld [vmem:[#allocation6 + $0xa04] sm:$0xf] }
 0x1e8   :  { %3551 = vmatpush.bf16.msrb.mxu2 %v10453_v29  ;;  %3564 = vmatpush.bf16.msrb.mxu3 %v11349_v37  ;;  %v11804_v29 = vld [vmem:[#allocation6 + $0xbc0] sm:$0xf]  ;;  %v14871_v37 = vld [vmem:[#allocation6 + $0xc2c] sm:$0xf0] }
 0x1e9   :  { %3577 = vmatpush.bf16.msra.mxu0 %v10457_v33  ;;  %3590 = vmatpush.bf16.msra.mxu1 %v11353_v35  ;;  %v11806_v33 = vld [vmem:[#allocation6 + $0xc30] sm:$0xf0]  ;;  %v10909_v35 = vor.u32 %v14647_v23, %v10908_v22  ;;  %v11805_v38 = vor.u32 %v14871_v37, %v11804_v29  ;;  %v14563_v22 = vld [vmem:[#allocation6 + $0x28c] sm:$0xf0]  ;;  %v11468_v23 = vld [vmem:[#allocation6 + $0x920] sm:$0xf]  ;;  %v11585_v29 = vor.u32 %v14801_v20, %v11582_v10 }
 0x1ea   :  { %v11809_v48 = vor.u32 %v14857_v32, %v11806_v33  ;;  %v14549_v32 = vld [vmem:[#allocation6 + $0x224] sm:$0xf]  ;;  %v10574_v33 = vld [vmem:[#allocation6 + $0x290] sm:$0xf0]  ;;  %v11469_v49 = vor.u32 %v14787_v31, %v11468_v23  ;;  %v14928_v23 = vld [vmem:[#allocation6 + $0xdf4] sm:$0xf0] }
 0x1eb   :  { %v14914_v31 = vld [vmem:[#allocation6 + $0xd8c] sm:$0xf] }
 0x1ec   :  { %3552 = vmatpush.bf16.msrb.mxu2 %v10341_v54  ;;  %3565 = vmatpush.bf16.msrb.mxu3 %v11237_v55  ;;  %v11694_v54 = vld [vmem:[#allocation6 + $0xb50] sm:$0xf0] }
 0x1ed   :  { %3578 = vmatpush.bf16.msra.mxu0 %v10345_v60  ;;  %3591 = vmatpush.bf16.msra.mxu1 %v11241_v61  ;;  %v10684_v60 = vld [vmem:[#allocation6 + $0x300] sm:$0xf]  ;;  %v14591_v61 = vld [vmem:[#allocation6 + $0x36c] sm:$0xf0]  ;;  %v11697_v5 = vor.u32 %v14829_v16, %v11694_v54  ;;  %v10577_v16 = vor.u32 %v14549_v32, %v10574_v33  ;;  %v12038_v32 = vld [vmem:[#allocation6 + $0xdf8] sm:$0xf0] }
 0x1ee   :  { %v10685_v34 = vor.u32 %v14591_v61, %v10684_v60  ;;  %v10348_v60 = vld [vmem:[#allocation6 + $0x60] sm:$0xf] }
 0x1ef   :  { %3553 = vmatmul.bf16.vlgmr.msrb.gmra.mxu2 %v15896_v24  ;;  %3566 = vmatmul.bf16.vlgmr.msrb.gmra.mxu3 %v15898_v25  ;;  %v3372_v55 = vpop.f32.mrf.mxu0  ;;  %v3385_v7 = vpop.f32.mrf.mxu1 }
 0x1f0   :  { %3597 = vmatpush.bf16.msra.mxu2 %v11133_v62  ;;  %3610 = vmatpush.bf16.msra.mxu3 %v12029_v0  ;;  %v11580_v62 = vld [vmem:[#allocation6 + $0xa00] sm:$0xf]  ;;  %v3373_v0 = vadd.f32 %v3372_v55, %v692_v41  ;;  %v14521_v55 = vld [vmem:[#allocation6 + $0x144] sm:$0xf] }
 0x1f1   :  { %3623 = vmatpush.bf16.msrb.mxu0 %v11137_v6  ;;  %3636 = vmatpush.bf16.msrb.mxu1 %v12033_v8  ;;  %v14815_v6 = vld [vmem:[#allocation6 + $0xa6c] sm:$0xf0]  ;;  %v14577_v8 = vld [vmem:[#allocation6 + $0x304] sm:$0xf] }
 0x1f2   :  { %3579 = vmatmul.bf16.vlgmr.msra.gmra.mxu0 %v15896_v24  ;;  %3592 = vmatmul.bf16.vlgmr.msra.gmra.mxu1 %v15898_v25  ;;  %v16062_v15 = vadd.f32 %v3385_v7, %v3373_v0  ;;  %v3346_v37 = vpop.f32.mrf.mxu2  ;;  %v3359_v30 = vpop.f32.mrf.mxu3  ;;  %v10462_v7 = vld [vmem:[#allocation6 + $0x1b0] sm:$0xf0]  ;;  %v11357_v0 = vor.u32 %v14759_v13, %v11356_v53  ;;  %v14662_v53 = vld [vmem:[#allocation6 + $0x5ac] sm:$0xf]  ;;  %v11926_v13 = vld [vmem:[#allocation6 + $0xd18] sm:$0xf0] }
 0x1f3   :  { %v3347_v14 = vadd.f32 %v3346_v37, %v691_v12  ;;  %v14493_v12 = vld [vmem:[#allocation6 + $0x64] sm:$0xf] }
 0x1f4   :  { %3598 = vmatpush.bf16.msra.mxu2 %v11021_v58  ;;  %3611 = vmatpush.bf16.msra.mxu3 %v11917_v21  ;;  %v11581_v58 = vor.u32 %v14815_v6, %v11580_v62  ;;  %v10572_v21 = vld [vmem:[#allocation6 + $0x220] sm:$0xf]  ;;  %v10461_v62 = vor.u32 %v14535_v51, %v10460_v44  ;;  %v14731_v6 = vld [vmem:[#allocation6 + $0x7cc] sm:$0xf0]  ;;  %v11924_v44 = vld [vmem:[#allocation6 + $0xca8] sm:$0xf] }
 0x1f5   :  { %3624 = vmatpush.bf16.msrb.mxu0 %v11025_v26  ;;  %3637 = vmatpush.bf16.msrb.mxu1 %v11921_v28  ;;  %v3716_v26 = vmax.f32 %v16062_v15, 0.0  ;;  %v10689_v28 = vor.u32 %v14577_v8, %v10686_v9  ;;  %v16071_v43 = vadd.f32 %v3359_v30, %v3347_v14  ;;  %v10465_v8 = vor.u32 %v14521_v55, %v10462_v7  ;;  %v11142_v30 = vld [vmem:[#allocation6 + $0x6f8] sm:$0xf0]  ;;  %v14900_v51 = vld [vmem:[#allocation6 + $0xd14] sm:$0xf0] }
 0x1f6   :  { %v11925_v7 = vor.u32 %v14900_v51, %v11924_v44  ;;  %v14802_v44 = vld [vmem:[#allocation6 + $0xa0c] sm:$0xf]  ;;  %v11590_v51 = vld [vmem:[#allocation6 + $0xa78] sm:$0xf0] }
 0x1f7   :  { %v16069_v41 = vpack.c.bf16 %v3716_v26, %v3712_v27  ;;  %v3374_v45 = vpop.f32.mrf.mxu0  ;;  %v3715_v27 = vmax.f32 %v16071_v43, 0.0 }
 0x1f8   :  { %3599 = vmatpush.bf16.msra.mxu2 %v10909_v35  ;;  %3612 = vmatpush.bf16.msra.mxu3 %v11805_v38  ;;  %v14773_v35 = vld [vmem:[#allocation6 + $0x924] sm:$0xf]  ;;  %v11470_v38 = vld [vmem:[#allocation6 + $0x990] sm:$0xf0]  ;;  %v11028_v45 = vld [vmem:[#allocation6 + $0x5a8] sm:$0xf] }
 0x1f9   :  { %3625 = vmatpush.bf16.msrb.mxu0 %v10913_v18  ;;  %3638 = vmatpush.bf16.msrb.mxu1 %v11809_v48  ;;  %v3387_v18 = vpop.f32.mrf.mxu1  ;;  %v10573_v48 = vor.u32 %v14563_v22, %v10572_v21  ;;  %v11473_v54 = vor.u32 %v14773_v35, %v11470_v38  ;;  %v16078_v61 = vpack.c.bf16 %v3715_v27, %v3711_v52  ;;  %v11140_v21 = vld [vmem:[#allocation6 + $0x688] sm:$0xf]  ;;  %v14704_v52 = vld [vmem:[#allocation6 + $0x6f4] sm:$0xf0] }
 0x1fa   :  { %v3348_v20 = vpop.f32.mrf.mxu2  ;;  %v3361_v10 = vpop.f32.mrf.mxu3  ;;  %v12036_v22 = vld [vmem:[#allocation6 + $0xd88] sm:$0xf]  ;;  %v11141_v35 = vor.u32 %v14704_v52, %v11140_v21  ;;  %v14676_v18 = vld [vmem:[#allocation6 + $0x614] sm:$0xf0] }
 0x1fb   :  { %v12037_v38 = vor.u32 %v14928_v23, %v12036_v22  ;;  %v11029_v55 = vor.u32 %v14676_v18, %v11028_v45  ;;  %v11700_v21 = vld [vmem:[#allocation6 + $0xae8] sm:$0xf]  ;;  %v14844_v52 = vld [vmem:[#allocation6 + $0xb54] sm:$0xf0]  ;;  %v14606_v22 = vld [vmem:[#allocation6 + $0x3ec] sm:$0xf] }
 0x1fc   :  { %3600 = vmatpush.bf16.msra.mxu2 %v10797_v56  ;;  %3613 = vmatpush.bf16.msra.mxu3 %v11693_v50  ;;  %v14745_v56 = vld [vmem:[#allocation6 + $0x844] sm:$0xf]  ;;  %v11358_v50 = vld [vmem:[#allocation6 + $0x8b0] sm:$0xf0]  ;;  %v10806_v23 = vld [vmem:[#allocation6 + $0x458] sm:$0xf0] }
 0x1fd   :  { %3626 = vmatpush.bf16.msrb.mxu0 %v10801_v2  ;;  %3639 = vmatpush.bf16.msrb.mxu1 %v11697_v5  ;;  %v14507_v2 = vld [vmem:[#allocation6 + $0xcc] sm:$0xf0]  ;;  %v11244_v5 = vld [vmem:[#allocation6 + $0x760] sm:$0xf]  ;;  %v11361_v9 = vor.u32 %v14745_v56, %v11358_v50  ;;  %v10916_v56 = vld [vmem:[#allocation6 + $0x4c8] sm:$0xf] }
 0x1fe   :  { %v11245_v37 = vor.u32 %v14731_v6, %v11244_v5  ;;  %v14648_v50 = vld [vmem:[#allocation6 + $0x534] sm:$0xf0]  ;;  %v14634_v5 = vld [vmem:[#allocation6 + $0x4cc] sm:$0xf]  ;;  %v10918_v6 = vld [vmem:[#allocation6 + $0x538] sm:$0xf0] }
 0x1ff   :  { %v10917_v20 = vor.u32 %v14648_v50, %v10916_v56  ;;  %v11588_v45 = vld [vmem:[#allocation6 + $0xa08] sm:$0xf]  ;;  %v14816_v18 = vld [vmem:[#allocation6 + $0xa74] sm:$0xf0] }
 0x200   :  { %3601 = vmatpush.bf16.msra.mxu2 %v10685_v34  ;;  %3614 = vmatpush.bf16.msra.mxu3 %v11581_v58  ;;  %v10350_v34 = vld [vmem:[#allocation6 + $0xd0] sm:$0xf0] }
 0x201   :  { %3627 = vmatpush.bf16.msrb.mxu0 %v10689_v28  ;;  %3640 = vmatpush.bf16.msrb.mxu1 %v11585_v29  ;;  %v11246_v58 = vld [vmem:[#allocation6 + $0x7d0] sm:$0xf0]  ;;  %v14690_v28 = vld [vmem:[#allocation6 + $0x68c] sm:$0xf]  ;;  %v10349_v29 = vor.u32 %v14507_v2, %v10348_v60  ;;  %v10353_v14 = vor.u32 %v14493_v12, %v10350_v34  ;;  %v14872_v2 = vld [vmem:[#allocation6 + $0xc34] sm:$0xf0] }
 0x202   :  { %v11249_v33 = vor.u32 %v14717_v40, %v11246_v58  ;;  %v10804_v12 = vld [vmem:[#allocation6 + $0x3e8] sm:$0xf]  ;;  %v14620_v34 = vld [vmem:[#allocation6 + $0x454] sm:$0xf0]  ;;  %v10921_v40 = vor.u32 %v14634_v5, %v10918_v6  ;;  %v14774_v5 = vld [vmem:[#allocation6 + $0x92c] sm:$0xf] }
 0x203   :  { %v11478_v6 = vld [vmem:[#allocation6 + $0x998] sm:$0xf0] }
 0x204   :  { %3602 = vmatpush.bf16.msra.mxu2 %v10573_v48  ;;  %3615 = vmatpush.bf16.msra.mxu3 %v11469_v49  ;;  %v11145_v48 = vor.u32 %v14690_v28, %v11142_v30  ;;  %v12041_v49 = vor.u32 %v14914_v31, %v12038_v32  ;;  %v14830_v28 = vld [vmem:[#allocation6 + $0xaec] sm:$0xf]  ;;  %v10805_v31 = vor.u32 %v14620_v34, %v10804_v12  ;;  %v10468_v12 = vld [vmem:[#allocation6 + $0x148] sm:$0xf]  ;;  %v14536_v34 = vld [vmem:[#allocation6 + $0x1b4] sm:$0xf0] }
 0x205   :  { %3628 = vmatpush.bf16.msrb.mxu0 %v10577_v16  ;;  %3641 = vmatpush.bf16.msrb.mxu1 %v11473_v54  ;;  %v11030_v16 = vld [vmem:[#allocation6 + $0x618] sm:$0xf0]  ;;  %v14886_v54 = vld [vmem:[#allocation6 + $0xcac] sm:$0xf]  ;;  %v11701_v32 = vor.u32 %v14844_v52, %v11700_v21  ;;  %v11364_v21 = vld [vmem:[#allocation6 + $0x848] sm:$0xf] }
 0x206   :  { %v11033_v60 = vor.u32 %v14662_v53, %v11030_v16  ;;  %v11589_v16 = vor.u32 %v14816_v18, %v11588_v45  ;;  %v14760_v52 = vld [vmem:[#allocation6 + $0x8b4] sm:$0xf0] }
 0x208   :  { %3603 = vmatpush.bf16.msra.mxu2 %v10461_v62  ;;  %3616 = vmatpush.bf16.msra.mxu3 %v11357_v0  ;;  %v11929_v62 = vor.u32 %v14886_v54, %v11926_v13  ;;  %v11812_v0 = vld [vmem:[#allocation6 + $0xbc8] sm:$0xf]  ;;  %v14564_v13 = vld [vmem:[#allocation6 + $0x294] sm:$0xf0] }
 0x209   :  { %3629 = vmatpush.bf16.msrb.mxu0 %v10465_v8  ;;  %3642 = vmatpush.bf16.msrb.mxu1 %v11361_v9  ;;  %v14858_v8 = vld [vmem:[#allocation6 + $0xbcc] sm:$0xf]  ;;  %v11814_v9 = vld [vmem:[#allocation6 + $0xc38] sm:$0xf0]  ;;  %v11813_v10 = vor.u32 %v14872_v2, %v11812_v0  ;;  %v10580_v54 = vld [vmem:[#allocation6 + $0x228] sm:$0xf] }
 0x20a   :  { %v11817_v58 = vor.u32 %v14858_v8, %v11814_v9  ;;  %v14550_v0 = vld [vmem:[#allocation6 + $0x22c] sm:$0xf]  ;;  %v10582_v2 = vld [vmem:[#allocation6 + $0x298] sm:$0xf0] }
 0x20c   :  { %3604 = vmatpush.bf16.msra.mxu2 %v10349_v29  ;;  %3617 = vmatpush.bf16.msra.mxu3 %v11245_v37  ;;  %v11702_v29 = vld [vmem:[#allocation6 + $0xb58] sm:$0xf0] }
 0x20d   :  { %3630 = vmatpush.bf16.msrb.mxu0 %v10353_v14  ;;  %3643 = vmatpush.bf16.msrb.mxu1 %v11249_v33  ;;  %v10692_v14 = vld [vmem:[#allocation6 + $0x308] sm:$0xf]  ;;  %v14592_v33 = vld [vmem:[#allocation6 + $0x374] sm:$0xf0] }
 0x20e   :  { %v10693_v53 = vor.u32 %v14592_v33, %v10692_v14  ;;  %v11365_v14 = vor.u32 %v14760_v52, %v11364_v21  ;;  %v14508_v33 = vld [vmem:[#allocation6 + $0xd4] sm:$0xf0]  ;;  %v12492_v21 = vld [vmem:[#allocation10 + $0x380] sm:$0xf] }
 0x20f   :  { %3605 = vmatmul.bf16.vlgmr.msra.gmra.mxu2 %v15896_v24  ;;  %3618 = vmatmul.bf16.vlgmr.msra.gmra.mxu3 %v15898_v25  ;;  %v16084_v37 = vpop.f32.mrf.mxu0  ;;  %v16086_v30 = vpop.f32.mrf.mxu1  ;;  %v15301_v52 = vld [vmem:[#allocation10 + $0x39c] sm:$0xf0] }
 0x210   :  { %3649 = vmatpush.bf16.msrb.mxu2 %v11141_v35  ;;  %3662 = vmatpush.bf16.msrb.mxu3 %v12037_v38  ;;  %v10809_v35 = vor.u32 %v14606_v22, %v10806_v23  ;;  %v11705_v38 = vor.u32 %v14830_v28, %v11702_v29  ;;  %v14522_v22 = vld [vmem:[#allocation6 + $0x14c] sm:$0xf]  ;;  %v10470_v23 = vld [vmem:[#allocation6 + $0x1b8] sm:$0xf0] }
 0x211   :  { %3675 = vmatpush.bf16.msra.mxu0 %v11145_v48  ;;  %3688 = vmatpush.bf16.msra.mxu1 %v12041_v49  ;;  %v14578_v48 = vld [vmem:[#allocation6 + $0x30c] sm:$0xf]  ;;  %v10694_v49 = vld [vmem:[#allocation6 + $0x378] sm:$0xf0]  ;;  %v10473_v45 = vor.u32 %v14522_v22, %v10470_v23 }
 0x212   :  { %3631 = vmatmul.bf16.vlgmr.msrb.gmra.mxu0 %v15896_v24  ;;  %3644 = vmatmul.bf16.vlgmr.msrb.gmra.mxu1 %v15898_v25  ;;  %v16088_v56 = vpop.f32.mrf.mxu2  ;;  %v16090_v50 = vpop.f32.mrf.mxu3  ;;  %v14746_v28 = vld [vmem:[#allocation6 + $0x84c] sm:$0xf]  ;;  %v11366_v29 = vld [vmem:[#allocation6 + $0x8b8] sm:$0xf0] }
 0x213   :  { %v11369_v18 = vor.u32 %v14746_v28, %v11366_v29  ;;  %v12748_v22 = vld [vmem:[#allocation10 + $0x580] sm:$0xf] }
 0x214   :  { %3650 = vmatpush.bf16.msrb.mxu2 %v11029_v55  ;;  %3663 = vmatpush.bf16.msrb.mxu3 %v11925_v7  ;;  %v10697_v55 = vor.u32 %v14578_v48, %v10694_v49  ;;  %v11593_v7 = vor.u32 %v14802_v44, %v11590_v51  ;;  %v14494_v44 = vld [vmem:[#allocation6 + $0x6c] sm:$0xf]  ;;  %v10358_v51 = vld [vmem:[#allocation6 + $0xd8] sm:$0xf0] }
 0x215   :  { %3676 = vmatpush.bf16.msra.mxu0 %v11033_v60  ;;  %3689 = vmatpush.bf16.msra.mxu1 %v11929_v62  ;;  %v11476_v60 = vld [vmem:[#allocation6 + $0x928] sm:$0xf]  ;;  %v14788_v62 = vld [vmem:[#allocation6 + $0x994] sm:$0xf0]  ;;  %v15365_v23 = vld [vmem:[#allocation10 + $0x59c] sm:$0xf0] }
 0x216   :  { %v13004_v28 = vld [vmem:[#allocation10 + $0x780] sm:$0xf] }
 0x217   :  { %v3426_v8 = vpop.f32.mrf.mxu0  ;;  %v3439_v9 = vpop.f32.mrf.mxu1  ;;  %v15429_v29 = vld [vmem:[#allocation10 + $0x79c] sm:$0xf0] }
 0x218   :  { %3651 = vmatpush.bf16.msrb.mxu2 %v10917_v20  ;;  %3664 = vmatpush.bf16.msrb.mxu3 %v11813_v10  ;;  %v10581_v20 = vor.u32 %v14564_v13, %v10580_v54  ;;  %v11477_v10 = vor.u32 %v14788_v62, %v11476_v60  ;;  %v12268_v54 = vld [vmem:[#allocation10 + $0x1c0] sm:$0xf]  ;;  %v10361_v8 = vor.u32 %v14494_v44, %v10358_v51 }
 0x219   :  { %3677 = vmatpush.bf16.msra.mxu0 %v10921_v40  ;;  %3690 = vmatpush.bf16.msra.mxu1 %v11817_v58  ;;  %v10585_v40 = vor.u32 %v14550_v0, %v10582_v2  ;;  %v11481_v58 = vor.u32 %v14774_v5, %v11478_v6  ;;  %v15245_v13 = vld [vmem:[#allocation10 + $0x1dc] sm:$0xf0] }
 0x21a   :  { %v3400_v48 = vpop.f32.mrf.mxu2  ;;  %v3413_v49 = vpop.f32.mrf.mxu3  ;;  %v12780_v60 = vld [vmem:[#allocation10 + $0x5c0] sm:$0xf] }
 0x21b   :  { %v15373_v2 = vld [vmem:[#allocation10 + $0x5dc] sm:$0xf0] }
 0x21c   :  { %3652 = vmatpush.bf16.msrb.mxu2 %v10805_v31  ;;  %3665 = vmatpush.bf16.msrb.mxu3 %v11701_v32  ;;  %v10356_v31 = vld [vmem:[#allocation6 + $0x68] sm:$0xf]  ;;  %v10469_v32 = vor.u32 %v14536_v34, %v10468_v12  ;;  %v13036_v5 = vld [vmem:[#allocation10 + $0x7c0] sm:$0xf] }
 0x21d   :  { %3678 = vmatpush.bf16.msra.mxu0 %v10809_v35  ;;  %3691 = vmatpush.bf16.msra.mxu1 %v11705_v38  ;;  %v11252_v35 = vld [vmem:[#allocation6 + $0x768] sm:$0xf]  ;;  %v14732_v38 = vld [vmem:[#allocation6 + $0x7d4] sm:$0xf0]  ;;  %v10357_v62 = vor.u32 %v14508_v33, %v10356_v31  ;;  %v15437_v6 = vld [vmem:[#allocation10 + $0x7dc] sm:$0xf0] }
 0x21e   :  { %v11253_v0 = vor.u32 %v14732_v38, %v11252_v35  ;;  %v12236_v12 = vld [vmem:[#allocation10 + $0x180] sm:$0xf]  ;;  %v12749_v35 = vor.u32 %v15365_v23, %v12748_v22  ;;  %v13005_v38 = vor.u32 %v15429_v29, %v13004_v28 }
 0x21f   :  { %v15237_v34 = vld [vmem:[#allocation10 + $0x19c] sm:$0xf0] }
 0x220   :  { %3653 = vmatpush.bf16.msrb.mxu2 %v10693_v53  ;;  %3666 = vmatpush.bf16.msrb.mxu3 %v11589_v16  ;;  %v14718_v53 = vld [vmem:[#allocation6 + $0x76c] sm:$0xf]  ;;  %v11254_v16 = vld [vmem:[#allocation6 + $0x7d8] sm:$0xf0]  ;;  %v12237_v31 = vor.u32 %v15237_v34, %v12236_v12 }
 0x221   :  { %3679 = vmatpush.bf16.msra.mxu0 %v10697_v55  ;;  %3692 = vmatpush.bf16.msra.mxu1 %v11593_v7  ;;  %v12524_v55 = vld [vmem:[#allocation10 + $0x3c0] sm:$0xf]  ;;  %v11257_v9 = vor.u32 %v14718_v53, %v11254_v16 }
 0x222   :  { %v15309_v7 = vld [vmem:[#allocation10 + $0x3dc] sm:$0xf0] }
 0x223   :  { %v15229_v33 = vld [vmem:[#allocation10 + $0x15c] sm:$0xf0] }
 0x224   :  { %3654 = vmatpush.bf16.msrb.mxu2 %v10581_v20  ;;  %3667 = vmatpush.bf16.msrb.mxu3 %v11477_v10  ;;  %v12269_v20 = vor.u32 %v15245_v13, %v12268_v54  ;;  %v12525_v10 = vor.u32 %v15309_v7, %v12524_v55  ;;  %v12716_v48 = vld [vmem:[#allocation10 + $0x540] sm:$0xf] }
 0x225   :  { %3680 = vmatpush.bf16.msra.mxu0 %v10585_v40  ;;  %3693 = vmatpush.bf16.msra.mxu1 %v11481_v58  ;;  %v12781_v40 = vor.u32 %v15373_v2, %v12780_v60  ;;  %v13037_v58 = vor.u32 %v15437_v6, %v13036_v5  ;;  %v15357_v49 = vld [vmem:[#allocation10 + $0x55c] sm:$0xf0] }
 0x226   :  { %v12972_v44 = vld [vmem:[#allocation10 + $0x740] sm:$0xf]  ;;  %v12717_v55 = vor.u32 %v15357_v49, %v12716_v48 }
 0x227   :  { %v15421_v51 = vld [vmem:[#allocation10 + $0x75c] sm:$0xf0] }
 0x228   :  { %3655 = vmatpush.bf16.msrb.mxu2 %v10469_v32  ;;  %3668 = vmatpush.bf16.msrb.mxu3 %v11365_v14  ;;  %v12493_v32 = vor.u32 %v15301_v52, %v12492_v21  ;;  %v12204_v14 = vld [vmem:[#allocation10 + $0x140] sm:$0xf]  ;;  %v12973_v7 = vor.u32 %v15421_v51, %v12972_v44 }
 0x229   :  { %3681 = vmatpush.bf16.msra.mxu0 %v10473_v45  ;;  %3694 = vmatpush.bf16.msra.mxu1 %v11369_v18  ;;  %v12460_v45 = vld [vmem:[#allocation10 + $0x340] sm:$0xf]  ;;  %v12205_v53 = vor.u32 %v15229_v33, %v12204_v14 }
 0x22a   :  { %v15293_v18 = vld [vmem:[#allocation10 + $0x35c] sm:$0xf0] }
 0x22b   :  { %v12461_v16 = vor.u32 %v15293_v18, %v12460_v45  ;;  %v12172_v54 = vld [vmem:[#allocation10 + $0x100] sm:$0xf] }
 0x22c   :  { %3656 = vmatpush.bf16.msrb.mxu2 %v10357_v62  ;;  %3669 = vmatpush.bf16.msrb.mxu3 %v11253_v0  ;;  %v15221_v13 = vld [vmem:[#allocation10 + $0x11c] sm:$0xf0] }
 0x22d   :  { %3682 = vmatpush.bf16.msra.mxu0 %v10361_v8  ;;  %3695 = vmatpush.bf16.msra.mxu1 %v11257_v9  ;;  %v12428_v60 = vld [vmem:[#allocation10 + $0x300] sm:$0xf]  ;;  %v12173_v8 = vor.u32 %v15221_v13, %v12172_v54 }
 0x22e   :  { %v15285_v62 = vld [vmem:[#allocation10 + $0x31c] sm:$0xf0] }
 0x22f   :  { %3657 = vmatmul.bf16.vlgmr.msrb.gmra.mxu2 %v15896_v24  ;;  %3670 = vmatmul.bf16.vlgmr.msrb.gmra.mxu3 %v15898_v25  ;;  %v12684_v0 = vld [vmem:[#allocation10 + $0x500] sm:$0xf]  ;;  %v12429_v9 = vor.u32 %v15285_v62, %v12428_v60 }
 0x230   :  { %5550 = vmatpush.bf16.msra.mxu2 %v12269_v20  ;;  %5578 = vmatpush.bf16.msra.mxu3 %v12525_v10  ;;  %v15349_v2 = vld [vmem:[#allocation10 + $0x51c] sm:$0xf0] }
 0x231   :  { %5606 = vmatpush.bf16.msrb.mxu0 %v12781_v40  ;;  %5634 = vmatpush.bf16.msrb.mxu1 %v13037_v58  ;;  %v12940_v5 = vld [vmem:[#allocation10 + $0x700] sm:$0xf]  ;;  %v12685_v12 = vor.u32 %v15349_v2, %v12684_v0 }
 0x232   :  { %3683 = vmatmul.bf16.vlgmr.msra.gmra.mxu0 %v15896_v24  ;;  %3696 = vmatmul.bf16.vlgmr.msra.gmra.mxu1 %v15898_v25  ;;  %v15413_v6 = vld [vmem:[#allocation10 + $0x71c] sm:$0xf0]  ;;  %v16096_v24 = vpop.f32.mrf.mxu0  ;;  %v16098_v25 = vpop.f32.mrf.mxu1 }
 0x233   :  { %v12140_v20 = vld [vmem:[#allocation10 + $0xc0] sm:$0xf]  ;;  %v12941_v34 = vor.u32 %v15413_v6, %v12940_v5 }
 0x234   :  { %5551 = vmatpush.bf16.msra.mxu2 %v12237_v31  ;;  %5579 = vmatpush.bf16.msra.mxu3 %v12493_v32  ;;  %v15213_v10 = vld [vmem:[#allocation10 + $0xdc] sm:$0xf0] }
 0x235   :  { %5607 = vmatpush.bf16.msrb.mxu0 %v12749_v35  ;;  %5635 = vmatpush.bf16.msrb.mxu1 %v13005_v38  ;;  %v12396_v40 = vld [vmem:[#allocation10 + $0x2c0] sm:$0xf]  ;;  %v12141_v28 = vor.u32 %v15213_v10, %v12140_v20  ;;  %v16100_v35 = vpop.f32.mrf.mxu2  ;;  %v16102_v38 = vpop.f32.mrf.mxu3 }
 0x236   :  { %v15277_v58 = vld [vmem:[#allocation10 + $0x2dc] sm:$0xf0] }
 0x237   :  { %v12652_v21 = vld [vmem:[#allocation10 + $0x4c0] sm:$0xf]  ;;  %v12397_v29 = vor.u32 %v15277_v58, %v12396_v40 }
 0x238   :  { %5552 = vmatpush.bf16.msra.mxu2 %v12205_v53  ;;  %5580 = vmatpush.bf16.msra.mxu3 %v12461_v16  ;;  %v15341_v52 = vld [vmem:[#allocation10 + $0x4dc] sm:$0xf0] }
 0x239   :  { %5608 = vmatpush.bf16.msrb.mxu0 %v12717_v55  ;;  %5636 = vmatpush.bf16.msrb.mxu1 %v12973_v7  ;;  %v12908_v22 = vld [vmem:[#allocation10 + $0x6c0] sm:$0xf]  ;;  %v12653_v14 = vor.u32 %v15341_v52, %v12652_v21 }
 0x23a   :  { %v15405_v23 = vld [vmem:[#allocation10 + $0x6dc] sm:$0xf0]  ;;  %v3478_v53 = vpop.f32.mrf.mxu0  ;;  %v3491_v16 = vpop.f32.mrf.mxu1 }
 0x23b   :  { %v12108_v31 = vld [vmem:[#allocation10 + $0x80] sm:$0xf]  ;;  %v12909_v33 = vor.u32 %v15405_v23, %v12908_v22 }
 0x23c   :  { %5553 = vmatpush.bf16.msra.mxu2 %v12173_v8  ;;  %5581 = vmatpush.bf16.msra.mxu3 %v12429_v9  ;;  %v15205_v32 = vld [vmem:[#allocation10 + $0x9c] sm:$0xf0] }
 0x23d   :  { %5609 = vmatpush.bf16.msrb.mxu0 %v12685_v12  ;;  %5637 = vmatpush.bf16.msrb.mxu1 %v12941_v34  ;;  %v12364_v45 = vld [vmem:[#allocation10 + $0x280] sm:$0xf]  ;;  %v12109_v54 = vor.u32 %v15205_v32, %v12108_v31  ;;  %v3452_v21 = vpop.f32.mrf.mxu2  ;;  %v3465_v52 = vpop.f32.mrf.mxu3 }
 0x23e   :  { %v15269_v18 = vld [vmem:[#allocation10 + $0x29c] sm:$0xf0] }
 0x23f   :  { %v12620_v48 = vld [vmem:[#allocation10 + $0x480] sm:$0xf]  ;;  %v12365_v13 = vor.u32 %v15269_v18, %v12364_v45 }
 0x240   :  { %v15333_v49 = vld [vmem:[#allocation10 + $0x49c] sm:$0xf0]  ;;  %5554 = vmatpush.bf16.msra.mxu2 %v12141_v28  ;;  %5582 = vmatpush.bf16.msra.mxu3 %v12397_v29 }
 0x241   :  { %v12876_v44 = vld [vmem:[#allocation10 + $0x680] sm:$0xf]  ;;  %5610 = vmatpush.bf16.msrb.mxu0 %v12653_v14  ;;  %5638 = vmatpush.bf16.msrb.mxu1 %v12909_v33  ;;  %v12621_v60 = vor.u32 %v15333_v49, %v12620_v48  ;;  %v16104_v48 = vld [vmem:[#allocation7 + $0x10] sm:$0xff] }
 0x242   :  { %v15397_v51 = vld [vmem:[#allocation10 + $0x69c] sm:$0xf0]  ;;  %v694_v49 = vperm.slane %v16104_v48, 1  ;;  %v695_v53 = vperm.slane %v16104_v48, 2  ;;  %v700_v43 = vperm.slane %v16104_v48, 7 }
 0x243   :  { %v12076_v55 = vld [vmem:[#allocation10 + $0x40] sm:$0xf]  ;;  %v12877_v62 = vor.u32 %v15397_v51, %v12876_v44  ;;  %v693_v44 = vperm.slane %v16104_v48, 0  ;;  %v696_v51 = vperm.slane %v16104_v48, 3 }
 0x244   :  { %v15197_v7 = vld [vmem:[#allocation10 + $0x5c] sm:$0xf0]  ;;  %5555 = vmatpush.bf16.msra.mxu2 %v12109_v54  ;;  %5583 = vmatpush.bf16.msra.mxu3 %v12365_v13  ;;  %v3425_v16 = vadd.f32 %v16084_v37, %v694_v49  ;;  %v697_v37 = vperm.slane %v16104_v48, 4  ;;  %v15305_v49 = vld [vmem:[#allocation10 + $0x3c4] sm:$0xf] }
 0x245   :  { %v12332_v0 = vld [vmem:[#allocation10 + $0x240] sm:$0xf]  ;;  %v12077_v20 = vor.u32 %v15197_v7, %v12076_v55  ;;  %5611 = vmatpush.bf16.msrb.mxu0 %v12621_v60  ;;  %5639 = vmatpush.bf16.msrb.mxu1 %v12877_v62  ;;  %v3399_v54 = vadd.f32 %v16088_v56, %v693_v44  ;;  %v3477_v13 = vadd.f32 %v16096_v24, %v696_v51  ;;  %v698_v7 = vperm.slane %v16104_v48, 5  ;;  %v12526_v44 = vld [vmem:[#allocation10 + $0x3e0] sm:$0xf0] }
 0x246   :  { %v15261_v2 = vld [vmem:[#allocation10 + $0x25c] sm:$0xf0]  ;;  %v3451_v55 = vadd.f32 %v16100_v35, %v695_v53  ;;  %v3438_v60 = vadd.f32 %v16086_v30, %v3425_v16  ;;  %v12529_v53 = vor.u32 %v15305_v49, %v12526_v44  ;;  %v15217_v49 = vld [vmem:[#allocation10 + $0x104] sm:$0xf] }
 0x247   :  { %v12588_v5 = vld [vmem:[#allocation10 + $0x440] sm:$0xf]  ;;  %v12333_v10 = vor.u32 %v15261_v2, %v12332_v0  ;;  %v3412_v62 = vadd.f32 %v16090_v50, %v3399_v54  ;;  %v3490_v0 = vadd.f32 %v16098_v25, %v3477_v13  ;;  %v12174_v44 = vld [vmem:[#allocation10 + $0x120] sm:$0xf0] }
 0x248   :  { %v15325_v6 = vld [vmem:[#allocation10 + $0x45c] sm:$0xf0]  ;;  %5556 = vmatpush.bf16.msra.mxu2 %v12077_v20  ;;  %v3464_v2 = vadd.f32 %v16102_v38, %v3451_v55  ;;  %v3718_v56 = vmax.f32 %v3438_v60, 0.0  ;;  %v15233_v55 = vld [vmem:[#allocation10 + $0x184] sm:$0xf] }
 0x249   :  { %v12844_v8 = vld [vmem:[#allocation10 + $0x640] sm:$0xf]  ;;  %v12589_v40 = vor.u32 %v15325_v6, %v12588_v5  ;;  %5584 = vmatpush.bf16.msra.mxu3 %v12333_v10  ;;  %v3720_v35 = vmax.f32 %v3490_v0, 0.0  ;;  %v12494_v0 = vld [vmem:[#allocation10 + $0x3a0] sm:$0xf0] }
 0x24a   :  { %v15389_v9 = vld [vmem:[#allocation10 + $0x65c] sm:$0xf0]  ;;  %v3719_v20 = vmax.f32 %v3464_v2, 0.0  ;;  %v16129_v25 = vpack.c.bf16 %v3718_v56, %v3714_v42  ;;  %v15369_v2 = vld [vmem:[#allocation10 + $0x5c4] sm:$0xf] }
 0x24b   :  { %v12044_v12 = vld [vmem:[#allocation10] sm:$0xf]  ;;  %v12845_v58 = vor.u32 %v15389_v9, %v12844_v8  ;;  %5612 = vmatpush.bf16.msrb.mxu0 %v12589_v40  ;;  %v3717_v9 = vmax.f32 %v3412_v62, 0.0  ;;  %v16141_v40 = vpack.c.bf16 %v3720_v35, %v3716_v26  ;;  %v15297_v62 = vld [vmem:[#allocation10 + $0x384] sm:$0xf] }
 0x24c   :  { %v15189_v34 = vld [vmem:[#allocation10 + $0x1c] sm:$0xf0] }
 0x24d   :  { %v12300_v22 = vld [vmem:[#allocation10 + $0x200] sm:$0xf]  ;;  %v12045_v14 = vor.u32 %v15189_v34, %v12044_v12  ;;  %5640 = vmatpush.bf16.msrb.mxu1 %v12845_v58  ;;  %v16133_v38 = vpack.c.bf16 %v3717_v9, %v3713_v1  ;;  %v16145_v58 = vpack.c.bf16 %v3719_v20, %v3715_v27 }
 0x24e   :  { %v15253_v23 = vld [vmem:[#allocation10 + $0x21c] sm:$0xf0] }
 0x24f   :  { %v12556_v28 = vld [vmem:[#allocation10 + $0x400] sm:$0xf]  ;;  %v12301_v33 = vor.u32 %v15253_v23, %v12300_v22  ;;  %5557 = vmatpush.bf16.msra.mxu2 %v12045_v14  ;;  %v3528_v5 = vpop.f32.mrf.mxu0  ;;  %v3541_v6 = vpop.f32.mrf.mxu1  ;;  %v699_v23 = vperm.slane %v16104_v48, 6  ;;  %v15241_v14 = vld [vmem:[#allocation10 + $0x1c4] sm:$0xf] }
 0x250   :  { %v15317_v29 = vld [vmem:[#allocation10 + $0x41c] sm:$0xf0]  ;;  %v3529_v8 = vadd.f32 %v3528_v5, %v698_v7  ;;  %v12238_v7 = vld [vmem:[#allocation10 + $0x1a0] sm:$0xf0] }
 0x251   :  { %v12812_v31 = vld [vmem:[#allocation10 + $0x600] sm:$0xf]  ;;  %v12557_v45 = vor.u32 %v15317_v29, %v12556_v28  ;;  %5585 = vmatpush.bf16.msra.mxu3 %v12301_v33  ;;  %v12270_v33 = vld [vmem:[#allocation10 + $0x1e0] sm:$0xf0]  ;;  %v12241_v60 = vor.u32 %v15233_v55, %v12238_v7  ;;  %v12177_v55 = vor.u32 %v15217_v49, %v12174_v44 }
 0x252   :  { %v15381_v32 = vld [vmem:[#allocation10 + $0x61c] sm:$0xf0]  ;;  %5558 = vmatmul.bf16.vlgmr.msra.gmra.mxu2 %v16006_v36  ;;  %v16124_v24 = vadd.f32 %v3541_v6, %v3529_v8  ;;  %v3502_v30 = vpop.f32.mrf.mxu2  ;;  %v3515_v12 = vpop.f32.mrf.mxu3  ;;  %v12497_v6 = vor.u32 %v15297_v62, %v12494_v0  ;;  %v12782_v8 = vld [vmem:[#allocation10 + $0x5e0] sm:$0xf0] }
 0x253   :  { %v12813_v18 = vor.u32 %v15381_v32, %v12812_v31  ;;  %5613 = vmatpush.bf16.msrb.mxu0 %v12557_v45  ;;  %v3503_v50 = vadd.f32 %v3502_v30, %v697_v37  ;;  %v15433_v37 = vld [vmem:[#allocation10 + $0x7c4] sm:$0xf]  ;;  %v12785_v30 = vor.u32 %v15369_v2, %v12782_v8 }
 0x254   :  { %5586 = vmatmul.bf16.vlgmr.msra.gmra.mxu3 %v15997_v17  ;;  %v3722_v10 = vmax.f32 %v16124_v24, 0.0  ;;  %v12718_v7 = vld [vmem:[#allocation10 + $0x560] sm:$0xf0] }
 0x255   :  { %5641 = vmatpush.bf16.msrb.mxu1 %v12813_v18  ;;  %v16147_v21 = vadd.f32 %v3515_v12, %v3503_v50  ;;  %v12273_v18 = vor.u32 %v15241_v14, %v12270_v33  ;;  %5690 = vmatpush.bf16.msrb.mxu3 %v12529_v53  ;;  %v15225_v50 = vld [vmem:[#allocation10 + $0x144] sm:$0xf] }
 0x256   :  { %5614 = vmatmul.bf16.vlgmr.msrb.gmra.mxu0 %v16030_v59  ;;  %v16137_v34 = vpack.c.bf16 %v3722_v10, %v3718_v56  ;;  %v13038_v56 = vld [vmem:[#allocation10 + $0x7e0] sm:$0xf0] }
 0x257   :  { %v3530_v47 = vpop.f32.mrf.mxu0  ;;  %v3543_v42 = vpop.f32.mrf.mxu1  ;;  %v3721_v4 = vmax.f32 %v16147_v21, 0.0  ;;  %5662 = vmatpush.bf16.msrb.mxu2 %v12273_v18  ;;  %v13041_v12 = vor.u32 %v15433_v37, %v13038_v56  ;;  %5718 = vmatpush.bf16.msra.mxu0 %v12785_v30  ;;  %v12398_v18 = vld [vmem:[#allocation10 + $0x2e0] sm:$0xf0] }
 0x258   :  { %5642 = vmatmul.bf16.vlgmr.msrb.gmra.mxu1 %v16021_v39  ;;  %v12206_v47 = vld [vmem:[#allocation10 + $0x160] sm:$0xf0] }
 0x259   :  { %v16156_v1 = vpack.c.bf16 %v3721_v4, %v3717_v9  ;;  %v15289_v42 = vld [vmem:[#allocation10 + $0x344] sm:$0xf]  ;;  %5691 = vmatpush.bf16.msrb.mxu3 %v12497_v6  ;;  %5746 = vmatpush.bf16.msra.mxu1 %v13041_v12 }
 0x25a   :  { %v3504_v15 = vpop.f32.mrf.mxu2  ;;  %v3517_v26 = vpop.f32.mrf.mxu3  ;;  %v15265_v62 = vld [vmem:[#allocation10 + $0x284] sm:$0xf] }
 0x25b   :  { %5663 = vmatpush.bf16.msrb.mxu2 %v12241_v60  ;;  %v12209_v15 = vor.u32 %v15225_v50, %v12206_v47  ;;  %v12462_v26 = vld [vmem:[#allocation10 + $0x360] sm:$0xf0] }
 0x25c   :  { %v12366_v0 = vld [vmem:[#allocation10 + $0x2a0] sm:$0xf0] }
 0x25d   :  { %v12369_v6 = vor.u32 %v15265_v62, %v12366_v0  ;;  %v15209_v8 = vld [vmem:[#allocation10 + $0xc4] sm:$0xf] }
 0x25e   :  { %v12142_v37 = vld [vmem:[#allocation10 + $0xe0] sm:$0xf0] }
 0x25f   :  { %5664 = vmatpush.bf16.msrb.mxu2 %v12209_v15  ;;  %v12145_v56 = vor.u32 %v15209_v8, %v12142_v37  ;;  %v15257_v30 = vld [vmem:[#allocation10 + $0x244] sm:$0xf] }
 0x260   :  { %v12334_v12 = vld [vmem:[#allocation10 + $0x260] sm:$0xf0] }
 0x261   :  { %v12337_v47 = vor.u32 %v15257_v30, %v12334_v12  ;;  %v15201_v15 = vld [vmem:[#allocation10 + $0x84] sm:$0xf] }
 0x262   :  { %5563 = vmatmul.bf16.gmra.mxu2 %v16133_v38  ;;  %v15193_v49 = vld [vmem:[#allocation10 + $0x44] sm:$0xf] }
 0x263   :  { %5665 = vmatpush.bf16.msrb.mxu2 %v12177_v55  ;;  %v12078_v44 = vld [vmem:[#allocation10 + $0x60] sm:$0xf0] }
 0x264   :  { %5591 = vmatmul.bf16.gmra.mxu3 %v16129_v25  ;;  %v15345_v0 = vld [vmem:[#allocation10 + $0x504] sm:$0xf] }
 0x265   :  { %v15409_v8 = vld [vmem:[#allocation10 + $0x704] sm:$0xf] }
 0x266   :  { %5619 = vmatmul.bf16.gmra.mxu0 %v16145_v58  ;;  %v12942_v37 = vld [vmem:[#allocation10 + $0x720] sm:$0xf0] }
 0x267   :  { %5666 = vmatpush.bf16.msrb.mxu2 %v12145_v56  ;;  %v15185_v24 = vld [vmem:[#allocation10 + $0x4] sm:$0xf]  ;;  %v12945_v56 = vor.u32 %v15409_v8, %v12942_v37 }
 0x268   :  { %5647 = vmatmul.bf16.gmra.mxu1 %v16141_v40  ;;  %v12654_v30 = vld [vmem:[#allocation10 + $0x4e0] sm:$0xf0] }
 0x269   :  { %v12622_v21 = vld [vmem:[#allocation10 + $0x4a0] sm:$0xf0] }
 0x26f   :  { %v3580_v27 = vpop.f32.mrf.mxu0  ;;  %v3593_v52 = vpop.f32.mrf.mxu1 }
 0x270   :  { %v3581_v22 = vadd.f32 %v3580_v27, %v700_v43  ;;  %v15361_v43 = vld [vmem:[#allocation10 + $0x584] sm:$0xf] }
 0x271   :  { %v12750_v27 = vld [vmem:[#allocation10 + $0x5a0] sm:$0xf0] }
 0x272   :  { %v16160_v28 = vadd.f32 %v3593_v52, %v3581_v22  ;;  %v3554_v31 = vpop.f32.mrf.mxu2  ;;  %v3567_v32 = vpop.f32.mrf.mxu3  ;;  %v12753_v52 = vor.u32 %v15361_v43, %v12750_v27  ;;  %v15281_v22 = vld [vmem:[#allocation10 + $0x304] sm:$0xf] }
 0x273   :  { %v3555_v45 = vadd.f32 %v3554_v31, %v699_v23  ;;  %v12430_v23 = vld [vmem:[#allocation10 + $0x320] sm:$0xf0] }
 0x274   :  { %v3724_v29 = vmax.f32 %v16160_v28, 0.0  ;;  %v15425_v31 = vld [vmem:[#allocation10 + $0x784] sm:$0xf]  ;;  %v12433_v33 = vor.u32 %v15281_v22, %v12430_v23  ;;  %5719 = vmatpush.bf16.msra.mxu0 %v12753_v52 }
 0x275   :  { %v16167_v16 = vadd.f32 %v3567_v32, %v3555_v45  ;;  %v13006_v32 = vld [vmem:[#allocation10 + $0x7a0] sm:$0xf0] }
 0x276   :  { %v16165_v51 = vpack.c.bf16 %v3724_v29, %v3720_v35  ;;  %v13009_v14 = vor.u32 %v15425_v31, %v13006_v32  ;;  %v15273_v45 = vld [vmem:[#allocation10 + $0x2c4] sm:$0xf] }
 0x277   :  { %v3582_v48 = vpop.f32.mrf.mxu0  ;;  %v3595_v54 = vpop.f32.mrf.mxu1  ;;  %v3723_v13 = vmax.f32 %v16167_v16, 0.0  ;;  %v12401_v53 = vor.u32 %v15273_v45, %v12398_v18  ;;  %v12302_v52 = vld [vmem:[#allocation10 + $0x220] sm:$0xf0] }
 0x278   :  { %5747 = vmatpush.bf16.msra.mxu1 %v13009_v14  ;;  %v15353_v48 = vld [vmem:[#allocation10 + $0x544] sm:$0xf]  ;;  %v16174_v54 = vld [vmem:[#allocation7 + $0x18] sm:$0xf] }
 0x279   :  { %v16172_v5 = vpack.c.bf16 %v3723_v13, %v3719_v20  ;;  %v12465_v20 = vor.u32 %v15289_v42, %v12462_v26  ;;  %v12721_v60 = vor.u32 %v15353_v48, %v12718_v7  ;;  %v702_v2 = vperm.slane %v16174_v54, 1  ;;  %v12110_v26 = vld [vmem:[#allocation10 + $0xa0] sm:$0xf0] }
 0x27a   :  { %v3556_v9 = vpop.f32.mrf.mxu2  ;;  %v3569_v35 = vpop.f32.mrf.mxu3  ;;  %v701_v42 = vperm.slane %v16174_v54, 0  ;;  %v12113_v27 = vor.u32 %v15201_v15, %v12110_v26  ;;  %v15417_v32 = vld [vmem:[#allocation10 + $0x744] sm:$0xf]  ;;  %v12081_v48 = vor.u32 %v15193_v49, %v12078_v44 }
 0x27b   :  { %5692 = vmatpush.bf16.msrb.mxu3 %v12465_v20  ;;  %5720 = vmatpush.bf16.msra.mxu0 %v12721_v60  ;;  %v15249_v20 = vld [vmem:[#allocation10 + $0x204] sm:$0xf] }
 0x27c   :  { %v12974_v14 = vld [vmem:[#allocation10 + $0x760] sm:$0xf0]  ;;  %5667 = vmatpush.bf16.msrb.mxu2 %v12113_v27 }
 0x27d   :  { %v12977_v18 = vor.u32 %v15417_v32, %v12974_v14  ;;  %v15401_v15 = vld [vmem:[#allocation10 + $0x6c4] sm:$0xf]  ;;  %v704_v32 = vperm.slane %v16174_v54, 3 }
 0x27e   :  { %v12910_v26 = vld [vmem:[#allocation10 + $0x6e0] sm:$0xf0] }
 0x27f   :  { %5693 = vmatpush.bf16.msrb.mxu3 %v12433_v33  ;;  %v12305_v33 = vor.u32 %v15249_v20, %v12302_v52  ;;  %5748 = vmatpush.bf16.msra.mxu1 %v12977_v18  ;;  %v15329_v27 = vld [vmem:[#allocation10 + $0x484] sm:$0xf] }
 0x280   :  { %5668 = vmatpush.bf16.msrb.mxu2 %v12081_v48  ;;  %v15393_v20 = vld [vmem:[#allocation10 + $0x684] sm:$0xf] }
 0x281   :  { %v12878_v52 = vld [vmem:[#allocation10 + $0x6a0] sm:$0xf0] }
 0x282   :  { %v15321_v14 = vld [vmem:[#allocation10 + $0x444] sm:$0xf] }
 0x283   :  { %5694 = vmatpush.bf16.msrb.mxu3 %v12401_v53  ;;  %5749 = vmatpush.bf16.msra.mxu1 %v12945_v56  ;;  %v12846_v49 = vld [vmem:[#allocation10 + $0x660] sm:$0xf0] }
 0x287   :  { %5695 = vmatpush.bf16.msrb.mxu3 %v12369_v6 }
 0x28b   :  { %5696 = vmatpush.bf16.msrb.mxu3 %v12337_v47 }
 0x28f   :  { %v3632_v9 = vpop.f32.mrf.mxu0  ;;  %v3645_v35 = vpop.f32.mrf.mxu1  ;;  %5697 = vmatpush.bf16.msrb.mxu3 %v12305_v33  ;;  %v12590_v33 = vld [vmem:[#allocation10 + $0x460] sm:$0xf0] }
 0x290   :  { %v3633_v50 = vadd.f32 %v3632_v9, %v702_v2  ;;  %v12686_v2 = vld [vmem:[#allocation10 + $0x520] sm:$0xf0]  ;;  %v12593_v18 = vor.u32 %v15321_v14, %v12590_v33  ;;  %v12500_v33 = vld [vmem:[#allocation10 + $0x388] sm:$0xf] }
 0x291   :  { %v12689_v6 = vor.u32 %v15345_v0, %v12686_v2  ;;  %v12046_v9 = vld [vmem:[#allocation10 + $0x20] sm:$0xf0] }
 0x292   :  { %v3646_v43 = vadd.f32 %v3645_v35, %v3633_v50  ;;  %v3606_v23 = vpop.f32.mrf.mxu2  ;;  %v3619_v31 = vpop.f32.mrf.mxu3  ;;  %v15337_v35 = vld [vmem:[#allocation10 + $0x4c4] sm:$0xf]  ;;  %v12049_v47 = vor.u32 %v15185_v24, %v12046_v9  ;;  %v12276_v9 = vld [vmem:[#allocation10 + $0x1c8] sm:$0xf] }
 0x293   :  { %v3607_v45 = vadd.f32 %v3606_v23, %v701_v42  ;;  %5721 = vmatpush.bf16.msra.mxu0 %v12689_v6  ;;  %v12657_v42 = vor.u32 %v15337_v35, %v12654_v30  ;;  %v12881_v23 = vor.u32 %v15393_v20, %v12878_v52  ;;  %v15377_v2 = vld [vmem:[#allocation10 + $0x604] sm:$0xf]  ;;  %v15246_v35 = vld [vmem:[#allocation10 + $0x1e4] sm:$0xf0] }
 0x294   :  { %v16178_v22 = vmax.f32 %v3646_v43, 0.0  ;;  %v12913_v43 = vor.u32 %v15401_v15, %v12910_v26  ;;  %5669 = vmatpush.bf16.msrb.mxu2 %v12049_v47  ;;  %v12814_v6 = vld [vmem:[#allocation10 + $0x620] sm:$0xf0]  ;;  %v15310_v26 = vld [vmem:[#allocation10 + $0x3e4] sm:$0xf0] }
 0x295   :  { %v3620_v55 = vadd.f32 %v3619_v31, %v3607_v45  ;;  %v17540_v31 = vmov 0.0|0.0   ;;  %v15385_v45 = vld [vmem:[#allocation10 + $0x644] sm:$0xf]  ;;  %v12817_v8 = vor.u32 %v15377_v2, %v12814_v6  ;;  %v12212_v2 = vld [vmem:[#allocation10 + $0x148] sm:$0xf] }
 0x296   :  { %v16183_v53 = vpack.c.bf16 %v16178_v22, %v3722_v10  ;;  %5750 = vmatpush.bf16.msra.mxu1 %v12913_v43  ;;  %v12558_v47 = vld [vmem:[#allocation10 + $0x420] sm:$0xf0]  ;;  %v15230_v6 = vld [vmem:[#allocation10 + $0x164] sm:$0xf0] }
 0x297   :  { %v3634_v7 = vpop.f32.mrf.mxu0  ;;  %v3647_v60 = vpop.f32.mrf.mxu1  ;;  %v16186_v62 = vmax.f32 %v3620_v55, 0.0  ;;  %5722 = vmatpush.bf16.msra.mxu0 %v12657_v42  ;;  %v12849_v55 = vor.u32 %v15385_v45, %v12846_v49  ;;  %v12532_v42 = vld [vmem:[#allocation10 + $0x3c8] sm:$0xf] }
 0x298   :  { %5596 = vmatmul.bf16.gmra.mxu3 %v16183_v53  ;;  %v703_v60 = vperm.slane %v16174_v54, 2  ;;  %v15302_v45 = vld [vmem:[#allocation10 + $0x3a4] sm:$0xf0] }
 0x299   :  { %v16191_v10 = vpack.c.bf16 %v16186_v62, %v3721_v4  ;;  %v12625_v4 = vor.u32 %v15329_v27, %v12622_v21  ;;  %v12501_v49 = vor.u32 %v15302_v45, %v12500_v33  ;;  %v15270_v33 = vld [vmem:[#allocation10 + $0x2a4] sm:$0xf0] }
 0x29a   :  { %v3608_v12 = vpop.f32.mrf.mxu2  ;;  %v3621_v50 = vpop.f32.mrf.mxu3  ;;  %5751 = vmatpush.bf16.msra.mxu1 %v12881_v23  ;;  %v12244_v23 = vld [vmem:[#allocation10 + $0x188] sm:$0xf] }
 0x29b   :  { %5568 = vmatmul.bf16.gmra.mxu2 %v16191_v10  ;;  %5723 = vmatpush.bf16.msra.mxu0 %v12625_v4  ;;  %v12277_v12 = vor.u32 %v15246_v35, %v12276_v9  ;;  %v15313_v50 = vld [vmem:[#allocation10 + $0x404] sm:$0xf]  ;;  %v12533_v4 = vor.u32 %v15310_v26, %v12532_v42  ;;  %v12436_v9 = vld [vmem:[#allocation10 + $0x308] sm:$0xf] }
 0x29c   :  { %v12561_v15 = vor.u32 %v15313_v50, %v12558_v47  ;;  %v15286_v35 = vld [vmem:[#allocation10 + $0x324] sm:$0xf0] }
 0x29d   :  { %5774 = vmatpush.bf16.msra.mxu2 %v12277_v12  ;;  %5802 = vmatpush.bf16.msra.mxu3 %v12533_v4  ;;  %v12437_v12 = vor.u32 %v15286_v35, %v12436_v9  ;;  %v13012_v50 = vld [vmem:[#allocation10 + $0x788] sm:$0xf] }
 0x29e   :  { %5752 = vmatpush.bf16.msra.mxu1 %v12849_v55  ;;  %v15438_v55 = vld [vmem:[#allocation10 + $0x7e4] sm:$0xf0] }
 0x29f   :  { %5724 = vmatpush.bf16.msra.mxu0 %v12593_v18  ;;  %v12788_v18 = vld [vmem:[#allocation10 + $0x5c8] sm:$0xf] }
 0x2a0   :  { %v15430_v47 = vld [vmem:[#allocation10 + $0x7a4] sm:$0xf0] }
 0x2a1   :  { %5803 = vmatpush.bf16.msra.mxu3 %v12501_v49  ;;  %v13013_v42 = vor.u32 %v15430_v47, %v13012_v50  ;;  %v15278_v26 = vld [vmem:[#allocation10 + $0x2e4] sm:$0xf0] }
 0x2a2   :  { %5753 = vmatpush.bf16.msra.mxu1 %v12817_v8  ;;  %v12756_v8 = vld [vmem:[#allocation10 + $0x588] sm:$0xf] }
 0x2a3   :  { %5725 = vmatpush.bf16.msra.mxu0 %v12561_v15  ;;  %v12404_v15 = vld [vmem:[#allocation10 + $0x2c8] sm:$0xf] }
 0x2a4   :  { %v12980_v45 = vld [vmem:[#allocation10 + $0x748] sm:$0xf] }
 0x2a5   :  { %v15350_v9 = vld [vmem:[#allocation10 + $0x524] sm:$0xf0] }
 0x2a6   :  { %v12308_v47 = vld [vmem:[#allocation10 + $0x208] sm:$0xf] }
 0x2a8   :  { %5601 = vmatmul.bf16.gmra.mxu3 %v17540_v31 }
 0x2ab   :  { %5573 = vmatmul.bf16.gmra.mxu2 %v17540_v31 }
 0x2af   :  { %v3684_v44 = vpop.f32.mrf.mxu0  ;;  %v3697_v48 = vpop.f32.mrf.mxu1 }
 0x2b0   :  { %v3685_v7 = vadd.f32 %v3684_v44, %v704_v32  ;;  %v15238_v32 = vld [vmem:[#allocation10 + $0x1a4] sm:$0xf0] }
 0x2b1   :  { %v12245_v14 = vor.u32 %v15238_v32, %v12244_v23  ;;  %v15374_v44 = vld [vmem:[#allocation10 + $0x5e4] sm:$0xf0] }
 0x2b2   :  { %v3698_v0 = vadd.f32 %v3697_v48, %v3685_v7  ;;  %v3658_v24 = vpop.f32.mrf.mxu2  ;;  %v3671_v56 = vpop.f32.mrf.mxu3  ;;  %v13044_v48 = vld [vmem:[#allocation10 + $0x7c8] sm:$0xf]  ;;  %v12789_v16 = vor.u32 %v15374_v44, %v12788_v18 }
 0x2b3   :  { %v3659_v30 = vadd.f32 %v3658_v24, %v703_v60  ;;  %v13045_v7 = vor.u32 %v15438_v55, %v13044_v48  ;;  %5775 = vmatpush.bf16.msra.mxu2 %v12245_v14  ;;  %v15294_v60 = vld [vmem:[#allocation10 + $0x364] sm:$0xf0]  ;;  %v12213_v24 = vor.u32 %v15230_v6, %v12212_v2 }
 0x2b4   :  { %v16198_v37 = vmax.f32 %v3698_v0, 0.0  ;;  %5830 = vmatpush.bf16.msrb.mxu0 %v12789_v16  ;;  %v12372_v23 = vld [vmem:[#allocation10 + $0x288] sm:$0xf] }
 0x2b5   :  { %v3672_v43 = vadd.f32 %v3671_v56, %v3659_v30  ;;  %5858 = vmatpush.bf16.msrb.mxu1 %v13045_v7  ;;  %v15366_v56 = vld [vmem:[#allocation10 + $0x5a4] sm:$0xf0]  ;;  %v12373_v49 = vor.u32 %v15270_v33, %v12372_v23 }
 0x2b6   :  { %v16203_v54 = vpack.c.bf16 %v16198_v37, %v3724_v29  ;;  %v12757_v30 = vor.u32 %v15366_v56, %v12756_v8  ;;  %v15422_v18 = vld [vmem:[#allocation10 + $0x764] sm:$0xf0] }
 0x2b7   :  { %v3686_v27 = vpop.f32.mrf.mxu0  ;;  %v3699_v21 = vpop.f32.mrf.mxu1  ;;  %v16206_v20 = vmax.f32 %v3672_v43, 0.0  ;;  %5776 = vmatpush.bf16.msra.mxu2 %v12213_v24  ;;  %v12405_v43 = vor.u32 %v15278_v26, %v12404_v15  ;;  %v12981_v44 = vor.u32 %v15422_v18, %v12980_v45  ;;  %v12148_v48 = vld [vmem:[#allocation10 + $0xc8] sm:$0xf] }
 0x2b8   :  { %5652 = vmatmul.bf16.gmra.mxu1 %v16203_v54  ;;  %5698 = vmatmul.bf16.vlgmr.msrb.gmra.mxu3 %v15997_v17  ;;  %v12180_v27 = vld [vmem:[#allocation10 + $0x108] sm:$0xf] }
 0x2b9   :  { %v16212_v28 = vpack.c.bf16 %v16206_v20, %v3723_v13  ;;  %v12468_v13 = vld [vmem:[#allocation10 + $0x348] sm:$0xf]  ;;  %5831 = vmatpush.bf16.msrb.mxu0 %v12757_v30  ;;  %5859 = vmatpush.bf16.msrb.mxu1 %v13013_v42 }
 0x2ba   :  { %v3660_v29 = vpop.f32.mrf.mxu2  ;;  %v3673_v52 = vpop.f32.mrf.mxu3  ;;  %v12469_v0 = vor.u32 %v15294_v60, %v12468_v13  ;;  %v15222_v21 = vld [vmem:[#allocation10 + $0x124] sm:$0xf0] }
 0x2bb   :  { %5624 = vmatmul.bf16.gmra.mxu0 %v16212_v28  ;;  %5670 = vmatmul.bf16.vlgmr.msrb.gmra.mxu2 %v16006_v36  ;;  %v12181_v4 = vor.u32 %v15222_v21, %v12180_v27  ;;  %v12724_v29 = vld [vmem:[#allocation10 + $0x548] sm:$0xf] }
 0x2bc   :  { %5804 = vmatpush.bf16.msra.mxu3 %v12469_v0  ;;  %v15358_v52 = vld [vmem:[#allocation10 + $0x564] sm:$0xf0] }
 0x2bd   :  { %5777 = vmatpush.bf16.msra.mxu2 %v12181_v4  ;;  %v12725_v14 = vor.u32 %v15358_v52, %v12724_v29  ;;  %v15214_v55 = vld [vmem:[#allocation10 + $0xe4] sm:$0xf0]  ;;  %5860 = vmatpush.bf16.msrb.mxu1 %v12981_v44 }
 0x2be   :  { %v12340_v16 = vld [vmem:[#allocation10 + $0x248] sm:$0xf]  ;;  %v12149_v13 = vor.u32 %v15214_v55, %v12148_v48 }
 0x2bf   :  { %5832 = vmatpush.bf16.msrb.mxu0 %v12725_v14  ;;  %v15262_v60 = vld [vmem:[#allocation10 + $0x264] sm:$0xf0] }
 0x2c0   :  { %5805 = vmatpush.bf16.msra.mxu3 %v12437_v12  ;;  %v12116_v0 = vld [vmem:[#allocation10 + $0x88] sm:$0xf]  ;;  %v12341_v24 = vor.u32 %v15262_v60, %v12340_v16 }
 0x2c1   :  { %v15206_v2 = vld [vmem:[#allocation10 + $0xa4] sm:$0xf0]  ;;  %5778 = vmatpush.bf16.msra.mxu2 %v12149_v13 }
 0x2c2   :  { %v12692_v56 = vld [vmem:[#allocation10 + $0x508] sm:$0xf]  ;;  %v12117_v30 = vor.u32 %v15206_v2, %v12116_v0 }
 0x2c3   :  { %v12693_v12 = vor.u32 %v15350_v9, %v12692_v56  ;;  %v15254_v42 = vld [vmem:[#allocation10 + $0x224] sm:$0xf0] }
 0x2c4   :  { %5806 = vmatpush.bf16.msra.mxu3 %v12405_v43  ;;  %v12309_v15 = vor.u32 %v15254_v42, %v12308_v47  ;;  %v12084_v43 = vld [vmem:[#allocation10 + $0x48] sm:$0xf] }
 0x2c5   :  { %5833 = vmatpush.bf16.msrb.mxu0 %v12693_v12  ;;  %5779 = vmatpush.bf16.msra.mxu2 %v12117_v30  ;;  %v15198_v27 = vld [vmem:[#allocation10 + $0x64] sm:$0xf0] }
 0x2c6   :  { %v12948_v4 = vld [vmem:[#allocation10 + $0x708] sm:$0xf]  ;;  %v12085_v52 = vor.u32 %v15198_v27, %v12084_v43 }
 0x2c7   :  { %v15414_v29 = vld [vmem:[#allocation10 + $0x724] sm:$0xf0] }
 0x2c8   :  { %5657 = vmatmul.bf16.gmra.mxu1 %v17540_v31  ;;  %5703 = vmatmul.bf16.gmra.mxu3 %v16129_v25  ;;  %v12949_v14 = vor.u32 %v15414_v29, %v12948_v4  ;;  %v12052_v45 = vld [vmem:[#allocation10 + $0x8] sm:$0xf] }
 0x2c9   :  { %5807 = vmatpush.bf16.msra.mxu3 %v12373_v49  ;;  %5780 = vmatpush.bf16.msra.mxu2 %v12085_v52  ;;  %v15190_v18 = vld [vmem:[#allocation10 + $0x24] sm:$0xf0]  ;;  %v15242_v52 = vld [vmem:[#allocation10 + $0x1cc] sm:$0xf] }
 0x2ca   :  { %5861 = vmatpush.bf16.msrb.mxu1 %v12949_v14  ;;  %v12053_v49 = vor.u32 %v15190_v18, %v12052_v45  ;;  %v12660_v44 = vld [vmem:[#allocation10 + $0x4c8] sm:$0xf]  ;;  %v12278_v14 = vld [vmem:[#allocation10 + $0x1e8] sm:$0xf0] }
 0x2cb   :  { %5629 = vmatmul.bf16.gmra.mxu0 %v17540_v31  ;;  %5675 = vmatmul.bf16.gmra.mxu2 %v16133_v38  ;;  %v15342_v48 = vld [vmem:[#allocation10 + $0x4e4] sm:$0xf0]  ;;  %v12281_v18 = vor.u32 %v15242_v52, %v12278_v14  ;;  %v15362_v14 = vld [vmem:[#allocation10 + $0x58c] sm:$0xf] }
 0x2cc   :  { %v12916_v55 = vld [vmem:[#allocation10 + $0x6c8] sm:$0xf]  ;;  %v12661_v16 = vor.u32 %v15342_v48, %v12660_v44 }
 0x2cd   :  { %5808 = vmatpush.bf16.msra.mxu3 %v12341_v24  ;;  %5781 = vmatpush.bf16.msra.mxu2 %v12053_v49  ;;  %v12628_v60 = vld [vmem:[#allocation10 + $0x488] sm:$0xf] }
 0x2ce   :  { %v15334_v0 = vld [vmem:[#allocation10 + $0x4a4] sm:$0xf0]  ;;  %5834 = vmatpush.bf16.msrb.mxu0 %v12661_v16 }
 0x2cf   :  { %v12629_v2 = vor.u32 %v15334_v0, %v12628_v60  ;;  %v12884_v12 = vld [vmem:[#allocation10 + $0x688] sm:$0xf]  ;;  %v15234_v0 = vld [vmem:[#allocation10 + $0x18c] sm:$0xf] }
 0x2d0   :  { %v12596_v42 = vld [vmem:[#allocation10 + $0x448] sm:$0xf] }
 0x2d1   :  { %5809 = vmatpush.bf16.msra.mxu3 %v12309_v15  ;;  %v15326_v15 = vld [vmem:[#allocation10 + $0x464] sm:$0xf0]  ;;  %5886 = vmatpush.bf16.msrb.mxu2 %v12281_v18  ;;  %v15282_v18 = vld [vmem:[#allocation10 + $0x30c] sm:$0xf] }
 0x2d2   :  { %5835 = vmatpush.bf16.msrb.mxu0 %v12629_v2  ;;  %v12852_v43 = vld [vmem:[#allocation10 + $0x648] sm:$0xf]  ;;  %v12597_v27 = vor.u32 %v15326_v15, %v12596_v42  ;;  %v12246_v2 = vld [vmem:[#allocation10 + $0x1a8] sm:$0xf0] }
 0x2d3   :  { %v5615_v32 = vpop.f32.mrf.mxu0  ;;  %v15390_v4 = vld [vmem:[#allocation10 + $0x664] sm:$0xf0]  ;;  %v15290_v15 = vld [vmem:[#allocation10 + $0x34c] sm:$0xf] }
 0x2d4   :  { %v12853_v29 = vor.u32 %v15390_v4, %v12852_v43  ;;  %v12820_v45 = vld [vmem:[#allocation10 + $0x608] sm:$0xf]  ;;  %v12470_v43 = vld [vmem:[#allocation10 + $0x368] sm:$0xf0] }
 0x2d5   :  { %v5643_v7 = vpop.f32.mrf.mxu1  ;;  %v5559_v6 = vpop.f32.mrf.mxu2  ;;  %v15382_v49 = vld [vmem:[#allocation10 + $0x624] sm:$0xf0]  ;;  %v15226_v4 = vld [vmem:[#allocation10 + $0x14c] sm:$0xf] }
 0x2d6   :  { %5836 = vmatpush.bf16.msrb.mxu0 %v12597_v27  ;;  %v12564_v44 = vld [vmem:[#allocation10 + $0x408] sm:$0xf]  ;;  %v12473_v27 = vor.u32 %v15290_v15, %v12470_v43  ;;  %v15210_v43 = vld [vmem:[#allocation10 + $0xcc] sm:$0xf] }
 0x2d7   :  { %v5587_v8 = vpop.f32.mrf.mxu3  ;;  %v15318_v48 = vld [vmem:[#allocation10 + $0x424] sm:$0xf0] }
 0x2d8   :  { %v5588_v35 = vadd.f32 %v5587_v8, %v5559_v6  ;;  %5754 = vmatmul.bf16.vlgmr.msra.gmra.mxu1 %v16021_v39  ;;  %5708 = vmatmul.bf16.gmra.mxu3 %v16183_v53  ;;  %v12565_v16 = vor.u32 %v15318_v48, %v12564_v44  ;;  %v12438_v44 = vld [vmem:[#allocation10 + $0x328] sm:$0xf0] }
 0x2d9   :  { %v12441_v48 = vor.u32 %v15282_v18, %v12438_v44  ;;  %v12118_v18 = vld [vmem:[#allocation10 + $0xa8] sm:$0xf0] }
 0x2da   :  { %v5616_v50 = vadd.f32 %v5615_v32, %v5588_v35  ;;  %5837 = vmatpush.bf16.msrb.mxu0 %v12565_v16  ;;  %v13014_v16 = vld [vmem:[#allocation10 + $0x7a8] sm:$0xf0] }
 0x2db   :  { %v16222_v21 = vpop.f32.mrf.mxu0  ;;  %5726 = vmatmul.bf16.vlgmr.msra.gmra.mxu0 %v16030_v59  ;;  %5680 = vmatmul.bf16.gmra.mxu2 %v16191_v10 }
 0x2dc   :  { %v16220_v26 = vadd.f32 %v5643_v7, %v5616_v50  ;;  %v15406_v7 = vld [vmem:[#allocation10 + $0x6e4] sm:$0xf0] }
 0x2dd   :  { %v16225_v23 = vpop.f32.mrf.mxu2  ;;  %v16230_v33 = vpop.f32.mrf.mxu1  ;;  %v12917_v13 = vor.u32 %v15406_v7, %v12916_v55  ;;  %v15398_v50 = vld [vmem:[#allocation10 + $0x6a4] sm:$0xf0]  ;;  %v12821_v55 = vor.u32 %v15382_v49, %v12820_v45  ;;  %v15306_v7 = vld [vmem:[#allocation10 + $0x3cc] sm:$0xf] }
 0x2de   :  { %v12885_v47 = vor.u32 %v15398_v50, %v12884_v12  ;;  %v15434_v12 = vld [vmem:[#allocation10 + $0x7cc] sm:$0xf] }
 0x2df   :  { %v16227_v32 = vpop.f32.mrf.mxu3  ;;  %5862 = vmatpush.bf16.msrb.mxu1 %v12917_v13  ;;  %v12534_v13 = vld [vmem:[#allocation10 + $0x3e8] sm:$0xf0] }
 0x2e0   :  { %v12537_v60 = vor.u32 %v15306_v7, %v12534_v13  ;;  %v13046_v50 = vld [vmem:[#allocation10 + $0x7e8] sm:$0xf0] }
 0x2e1   :  { %v13049_v42 = vor.u32 %v15434_v12, %v13046_v50  ;;  %v12758_v45 = vld [vmem:[#allocation10 + $0x5a8] sm:$0xf0] }
 0x2e2   :  { %5914 = vmatpush.bf16.msrb.mxu3 %v12537_v60  ;;  %v12761_v49 = vor.u32 %v15362_v14, %v12758_v45  ;;  %v15274_v13 = vld [vmem:[#allocation10 + $0x2cc] sm:$0xf] }
 0x2e3   :  { %v5620_v56 = vpop.f32.mrf.mxu0  ;;  %5863 = vmatpush.bf16.msrb.mxu1 %v12885_v47  ;;  %v12406_v60 = vld [vmem:[#allocation10 + $0x2e8] sm:$0xf0] }
 0x2e4   :  { %v12374_v12 = vld [vmem:[#allocation10 + $0x2a8] sm:$0xf0] }
 0x2e5   :  { %v5564_v6 = vpop.f32.mrf.mxu2  ;;  %v5648_v35 = vpop.f32.mrf.mxu1  ;;  %v15418_v50 = vld [vmem:[#allocation10 + $0x74c] sm:$0xf] }
 0x2e6   :  { %v15202_v45 = vld [vmem:[#allocation10 + $0x8c] sm:$0xf] }
 0x2e7   :  { %v5592_v8 = vpop.f32.mrf.mxu3  ;;  %5864 = vmatpush.bf16.msrb.mxu1 %v12853_v29  ;;  %v12214_v29 = vld [vmem:[#allocation10 + $0x168] sm:$0xf0] }
 0x2e8   :  { %v5593_v24 = vadd.f32 %v5592_v8, %v5564_v6  ;;  %5759 = vmatmul.bf16.gmra.mxu1 %v16141_v40  ;;  %5713 = vmatmul.bf16.gmra.mxu3 %v17540_v31  ;;  %v12249_v6 = vor.u32 %v15234_v0, %v12246_v2  ;;  %v15298_v8 = vld [vmem:[#allocation10 + $0x38c] sm:$0xf]  ;;  %v12217_v52 = vor.u32 %v15226_v4, %v12214_v29 }
 0x2e9   :  { %v12409_v0 = vor.u32 %v15274_v13, %v12406_v60  ;;  %v15218_v2 = vld [vmem:[#allocation10 + $0x10c] sm:$0xf] }
 0x2ea   :  { %v5621_v9 = vadd.f32 %v5620_v56, %v5593_v24  ;;  %5887 = vmatpush.bf16.msrb.mxu2 %v12249_v6  ;;  %v12502_v24 = vld [vmem:[#allocation10 + $0x3a8] sm:$0xf0] }
 0x2eb   :  { %5731 = vmatmul.bf16.gmra.mxu0 %v16145_v58  ;;  %5685 = vmatmul.bf16.gmra.mxu2 %v17540_v31  ;;  %v15370_v56 = vld [vmem:[#allocation10 + $0x5cc] sm:$0xf] }
 0x2ec   :  { %v16234_v30 = vadd.f32 %v5648_v35, %v5621_v9  ;;  %5865 = vmatpush.bf16.msrb.mxu1 %v12821_v55  ;;  %v12505_v9 = vor.u32 %v15298_v8, %v12502_v24  ;;  %v12790_v35 = vld [vmem:[#allocation10 + $0x5e8] sm:$0xf0] }
 0x2ed   :  { %v12793_v47 = vor.u32 %v15370_v56, %v12790_v35  ;;  %v15426_v55 = vld [vmem:[#allocation10 + $0x78c] sm:$0xf] }
 0x2ee   :  { %5915 = vmatpush.bf16.msrb.mxu3 %v12505_v9  ;;  %5888 = vmatpush.bf16.msrb.mxu2 %v12217_v52  ;;  %v13017_v7 = vor.u32 %v15426_v55, %v13014_v16  ;;  %v12182_v6 = vld [vmem:[#allocation10 + $0x128] sm:$0xf0] }
 0x2ef   :  { %5942 = vmatpush.bf16.msra.mxu0 %v12793_v47  ;;  %v12185_v8 = vor.u32 %v15218_v2, %v12182_v6  ;;  %v15354_v24 = vld [vmem:[#allocation10 + $0x54c] sm:$0xf]  ;;  %v16248_v44 = vpop.f32.mrf.mxu3 }
 0x2f0   :  { %5970 = vmatpush.bf16.msra.mxu1 %v13049_v42  ;;  %v12726_v56 = vld [vmem:[#allocation10 + $0x568] sm:$0xf0] }
 0x2f1   :  { %v15266_v9 = vld [vmem:[#allocation10 + $0x28c] sm:$0xf]  ;;  %v12729_v35 = vor.u32 %v15354_v24, %v12726_v56 }
 0x2f2   :  { %5916 = vmatpush.bf16.msrb.mxu3 %v12473_v27  ;;  %5889 = vmatpush.bf16.msrb.mxu2 %v12185_v8  ;;  %v12982_v47 = vld [vmem:[#allocation10 + $0x768] sm:$0xf0]  ;;  %v12377_v42 = vor.u32 %v15266_v9, %v12374_v12  ;;  %v16251_v9 = vpop.f32.mrf.mxu2 }
 0x2f3   :  { %5943 = vmatpush.bf16.msra.mxu0 %v12761_v49  ;;  %v12985_v15 = vor.u32 %v15418_v50, %v12982_v47  ;;  %v12150_v27 = vld [vmem:[#allocation10 + $0xe8] sm:$0xf0]  ;;  %v12121_v49 = vor.u32 %v15202_v45, %v12118_v18 }
 0x2f4   :  { %5971 = vmatpush.bf16.msra.mxu1 %v13017_v7  ;;  %v12153_v4 = vor.u32 %v15210_v43, %v12150_v27  ;;  %v15258_v29 = vld [vmem:[#allocation10 + $0x24c] sm:$0xf] }
 0x2f5   :  { %v12342_v52 = vld [vmem:[#allocation10 + $0x268] sm:$0xf0] }
 0x2f6   :  { %5917 = vmatpush.bf16.msrb.mxu3 %v12441_v48  ;;  %5890 = vmatpush.bf16.msrb.mxu2 %v12153_v4  ;;  %v12345_v14 = vor.u32 %v15258_v29, %v12342_v52  ;;  %v15346_v48 = vld [vmem:[#allocation10 + $0x50c] sm:$0xf] }
 0x2f7   :  { %5944 = vmatpush.bf16.msra.mxu0 %v12729_v35  ;;  %v12694_v55 = vld [vmem:[#allocation10 + $0x528] sm:$0xf0] }
 0x2f8   :  { %5764 = vmatmul.bf16.gmra.mxu1 %v16203_v54  ;;  %5810 = vmatmul.bf16.vlgmr.msra.gmra.mxu3 %v15997_v17  ;;  %v15250_v16 = vld [vmem:[#allocation10 + $0x20c] sm:$0xf]  ;;  %v12697_v7 = vor.u32 %v15346_v48, %v12694_v55 }
 0x2f9   :  { %5972 = vmatpush.bf16.msra.mxu1 %v12985_v15  ;;  %v12310_v13 = vld [vmem:[#allocation10 + $0x228] sm:$0xf0] }
 0x2fa   :  { %5918 = vmatpush.bf16.msrb.mxu3 %v12409_v0  ;;  %5891 = vmatpush.bf16.msrb.mxu2 %v12121_v49  ;;  %v12313_v60 = vor.u32 %v15250_v16, %v12310_v13  ;;  %v15194_v0 = vld [vmem:[#allocation10 + $0x4c] sm:$0xf] }
 0x2fb   :  { %5736 = vmatmul.bf16.gmra.mxu0 %v16212_v28  ;;  %5782 = vmatmul.bf16.vlgmr.msra.gmra.mxu2 %v16006_v36  ;;  %v12086_v2 = vld [vmem:[#allocation10 + $0x68] sm:$0xf0] }
 0x2fc   :  { %5945 = vmatpush.bf16.msra.mxu0 %v12697_v7  ;;  %v15410_v6 = vld [vmem:[#allocation10 + $0x70c] sm:$0xf]  ;;  %v12089_v24 = vor.u32 %v15194_v0, %v12086_v2  ;;  %v16260_v0 = vpop.f32.mrf.mxu1 }
 0x2fd   :  { %v12950_v8 = vld [vmem:[#allocation10 + $0x728] sm:$0xf0] }
 0x2fe   :  { %5919 = vmatpush.bf16.msrb.mxu3 %v12377_v42  ;;  %v12953_v56 = vor.u32 %v15410_v6, %v12950_v8  ;;  %5892 = vmatpush.bf16.msrb.mxu2 %v12089_v24  ;;  %v15186_v35 = vld [vmem:[#allocation10 + $0xc] sm:$0xf] }
 0x2ff   :  { %v12054_v12 = vld [vmem:[#allocation10 + $0x28] sm:$0xf0] }
 0x300   :  { %5973 = vmatpush.bf16.msra.mxu1 %v12953_v56  ;;  %v12057_v50 = vor.u32 %v15186_v35, %v12054_v12  ;;  %v15338_v42 = vld [vmem:[#allocation10 + $0x4cc] sm:$0xf] }
 0x301   :  { %v12662_v15 = vld [vmem:[#allocation10 + $0x4e8] sm:$0xf0] }
 0x302   :  { %5920 = vmatpush.bf16.msrb.mxu3 %v12345_v14  ;;  %v15402_v43 = vld [vmem:[#allocation10 + $0x6cc] sm:$0xf]  ;;  %5893 = vmatpush.bf16.msrb.mxu2 %v12057_v50  ;;  %v12665_v27 = vor.u32 %v15338_v42, %v12662_v15  ;;  %v16264_v50 = vpop.f32.mrf.mxu0 }
 0x303   :  { %v12918_v4 = vld [vmem:[#allocation10 + $0x6e8] sm:$0xf0] }
 0x304   :  { %v12921_v29 = vor.u32 %v15402_v43, %v12918_v4  ;;  %5946 = vmatpush.bf16.msra.mxu0 %v12665_v27  ;;  %v15330_v18 = vld [vmem:[#allocation10 + $0x48c] sm:$0xf]  ;;  %v12284_v27 = vld [vmem:[#allocation10 + $0x1d0] sm:$0xf] }
 0x305   :  { %v12630_v49 = vld [vmem:[#allocation10 + $0x4a8] sm:$0xf0]  ;;  %v15247_v4 = vld [vmem:[#allocation10 + $0x1ec] sm:$0xf0] }
 0x306   :  { %5921 = vmatpush.bf16.msrb.mxu3 %v12313_v60  ;;  %5974 = vmatpush.bf16.msra.mxu1 %v12921_v29  ;;  %v12633_v48 = vor.u32 %v15330_v18, %v12630_v49  ;;  %v15394_v55 = vld [vmem:[#allocation10 + $0x68c] sm:$0xf] }
 0x307   :  { %v12886_v16 = vld [vmem:[#allocation10 + $0x6a8] sm:$0xf0] }
 0x308   :  { %5769 = vmatmul.bf16.gmra.mxu1 %v17540_v31  ;;  %5815 = vmatmul.bf16.gmra.mxu3 %v16129_v25  ;;  %v12889_v7 = vor.u32 %v15394_v55, %v12886_v16  ;;  %v15322_v6 = vld [vmem:[#allocation10 + $0x44c] sm:$0xf]  ;;  %v12540_v55 = vld [vmem:[#allocation10 + $0x3d0] sm:$0xf] }
 0x309   :  { %5947 = vmatpush.bf16.msra.mxu0 %v12633_v48  ;;  %v12598_v8 = vld [vmem:[#allocation10 + $0x468] sm:$0xf0] }
 0x30a   :  { %5975 = vmatpush.bf16.msra.mxu1 %v12889_v7  ;;  %v15386_v24 = vld [vmem:[#allocation10 + $0x64c] sm:$0xf]  ;;  %v12601_v56 = vor.u32 %v15322_v6, %v12598_v8  ;;  %v15311_v7 = vld [vmem:[#allocation10 + $0x3ec] sm:$0xf0] }
 0x30b   :  { %5741 = vmatmul.bf16.gmra.mxu0 %v17540_v31  ;;  %5787 = vmatmul.bf16.gmra.mxu2 %v16133_v38  ;;  %v12854_v35 = vld [vmem:[#allocation10 + $0x668] sm:$0xf0] }
 0x30c   :  { %v12857_v12 = vor.u32 %v15386_v24, %v12854_v35  ;;  %v15378_v42 = vld [vmem:[#allocation10 + $0x60c] sm:$0xf]  ;;  %v12252_v24 = vld [vmem:[#allocation10 + $0x190] sm:$0xf] }
 0x30d   :  { %5948 = vmatpush.bf16.msra.mxu0 %v12601_v56  ;;  %v12822_v15 = vld [vmem:[#allocation10 + $0x628] sm:$0xf0]  ;;  %v15239_v56 = vld [vmem:[#allocation10 + $0x1ac] sm:$0xf0] }
 0x30e   :  { %5976 = vmatpush.bf16.msra.mxu1 %v12857_v12  ;;  %v12825_v29 = vor.u32 %v15378_v42, %v12822_v15  ;;  %v15314_v49 = vld [vmem:[#allocation10 + $0x40c] sm:$0xf]  ;;  %v12253_v35 = vor.u32 %v15239_v56, %v12252_v24  ;;  %v12508_v42 = vld [vmem:[#allocation10 + $0x390] sm:$0xf] }
 0x30f   :  { %v12566_v48 = vld [vmem:[#allocation10 + $0x428] sm:$0xf0]  ;;  %v15303_v15 = vld [vmem:[#allocation10 + $0x3ac] sm:$0xf0] }
 0x310   :  { %v12569_v16 = vor.u32 %v15314_v49, %v12566_v48  ;;  %v15439_v49 = vld [vmem:[#allocation10 + $0x7ec] sm:$0xf0] }
 0x311   :  { %v15231_v24 = vld [vmem:[#allocation10 + $0x16c] sm:$0xf0] }
 0x312   :  { %5977 = vmatpush.bf16.msra.mxu1 %v12825_v29  ;;  %5949 = vmatpush.bf16.msra.mxu0 %v12569_v16  ;;  %v12509_v29 = vor.u32 %v15303_v15, %v12508_v42  ;;  %v15295_v16 = vld [vmem:[#allocation10 + $0x36c] sm:$0xf0] }
 0x313   :  { %v12764_v15 = vld [vmem:[#allocation10 + $0x590] sm:$0xf] }
 0x318   :  { %5866 = vmatmul.bf16.vlgmr.msrb.gmra.mxu1 %v16021_v39  ;;  %5820 = vmatmul.bf16.gmra.mxu3 %v16183_v53 }
 0x31b   :  { %v5597_v47 = vpop.f32.mrf.mxu3  ;;  %5838 = vmatmul.bf16.vlgmr.msrb.gmra.mxu0 %v16030_v59  ;;  %5792 = vmatmul.bf16.gmra.mxu2 %v16191_v10 }
 0x31e   :  { %v5569_v52 = vpop.f32.mrf.mxu2 }
 0x31f   :  { %v5598_v14 = vadd.f32 %v5597_v47, %v5569_v52  ;;  %v12285_v52 = vor.u32 %v15247_v4, %v12284_v27  ;;  %v12796_v27 = vld [vmem:[#allocation10 + $0x5d0] sm:$0xf] }
 0x321   :  { %5998 = vmatpush.bf16.msra.mxu2 %v12285_v52  ;;  %v15375_v52 = vld [vmem:[#allocation10 + $0x5ec] sm:$0xf0] }
 0x323   :  { %v5599_v45 = vpop.f32.mrf.mxu3 }
 0x325   :  { %5999 = vmatpush.bf16.msra.mxu2 %v12253_v35 }
 0x326   :  { %v5571_v13 = vpop.f32.mrf.mxu2 }
 0x327   :  { %v16258_v60 = vadd.f32 %v5599_v45, %v5571_v13  ;;  %v12541_v13 = vor.u32 %v15311_v7, %v12540_v55  ;;  %v12476_v55 = vld [vmem:[#allocation10 + $0x350] sm:$0xf] }
 0x328   :  { %5871 = vmatmul.bf16.gmra.mxu1 %v16141_v40  ;;  %5825 = vmatmul.bf16.gmra.mxu3 %v17540_v31 }
 0x329   :  { %6026 = vmatpush.bf16.msra.mxu3 %v12541_v13 }
 0x32b   :  { %v5602_v2 = vpop.f32.mrf.mxu3  ;;  %5843 = vmatmul.bf16.gmra.mxu0 %v16145_v58  ;;  %5797 = vmatmul.bf16.gmra.mxu2 %v17540_v31 }
 0x32d   :  { %6027 = vmatpush.bf16.msra.mxu3 %v12509_v29  ;;  %v12444_v29 = vld [vmem:[#allocation10 + $0x310] sm:$0xf] }
 0x32e   :  { %v5574_v47 = vpop.f32.mrf.mxu2 }
 0x32f   :  { %v16266_v43 = vadd.f32 %v5602_v2, %v5574_v47 }
 0x333   :  { %v5604_v18 = vpop.f32.mrf.mxu3 }
 0x334   :  { %v13052_v18 = vld [vmem:[#allocation10 + $0x7d0] sm:$0xf] }
 0x335   :  { %v5653_v45 = vpop.f32.mrf.mxu1  ;;  %v13053_v48 = vor.u32 %v15439_v49, %v13052_v18  ;;  %v15287_v49 = vld [vmem:[#allocation10 + $0x32c] sm:$0xf0] }
 0x336   :  { %v5576_v6 = vpop.f32.mrf.mxu2 }
 0x337   :  { %6082 = vmatpush.bf16.msrb.mxu1 %v13053_v48 }
 0x338   :  { %5876 = vmatmul.bf16.gmra.mxu1 %v16203_v54  ;;  %v5625_v2 = vpop.f32.mrf.mxu0  ;;  %5922 = vmatmul.bf16.vlgmr.msrb.gmra.mxu3 %v15997_v17 }
 0x339   :  { %v5626_v8 = vadd.f32 %v5625_v2, %v5598_v14  ;;  %v12797_v14 = vor.u32 %v15375_v52, %v12796_v27  ;;  %v12477_v2 = vor.u32 %v15295_v16, %v12476_v55  ;;  %v15367_v27 = vld [vmem:[#allocation10 + $0x5ac] sm:$0xf0] }
 0x33a   :  { %v12765_v18 = vor.u32 %v15367_v27, %v12764_v15  ;;  %v12412_v55 = vld [vmem:[#allocation10 + $0x2d0] sm:$0xf] }
 0x33b   :  { %v5699_v47 = vpop.f32.mrf.mxu3  ;;  %5848 = vmatmul.bf16.gmra.mxu0 %v16212_v28  ;;  %v16271_v4 = vadd.f32 %v5653_v45, %v5626_v8  ;;  %5894 = vmatmul.bf16.vlgmr.msrb.gmra.mxu2 %v16006_v36  ;;  %v12220_v8 = vld [vmem:[#allocation10 + $0x150] sm:$0xf] }
 0x33c   :  { %6054 = vmatpush.bf16.msrb.mxu0 %v12797_v14  ;;  %v12221_v56 = vor.u32 %v15231_v24, %v12220_v8  ;;  %6028 = vmatpush.bf16.msra.mxu3 %v12477_v2  ;;  %v12445_v14 = vor.u32 %v15287_v49, %v12444_v29  ;;  %v15279_v16 = vld [vmem:[#allocation10 + $0x2ec] sm:$0xf0] }
 0x33d   :  { %v5655_v12 = vpop.f32.mrf.mxu1  ;;  %v12413_v2 = vor.u32 %v15279_v16, %v12412_v55  ;;  %v12188_v8 = vld [vmem:[#allocation10 + $0x110] sm:$0xf] }
 0x33e   :  { %v5671_v13 = vpop.f32.mrf.mxu2  ;;  %6000 = vmatpush.bf16.msra.mxu2 %v12221_v56  ;;  %v15223_v24 = vld [vmem:[#allocation10 + $0x12c] sm:$0xf0] }
 0x33f   :  { %v16275_v6 = vadd.f32 %v5699_v47, %v5671_v13  ;;  %v15431_v47 = vld [vmem:[#allocation10 + $0x7ac] sm:$0xf0]  ;;  %v12189_v56 = vor.u32 %v15223_v24, %v12188_v8 }
 0x340   :  { %v5627_v7 = vpop.f32.mrf.mxu0  ;;  %6055 = vmatpush.bf16.msrb.mxu0 %v12765_v18  ;;  %6029 = vmatpush.bf16.msra.mxu3 %v12445_v14  ;;  %v12732_v29 = vld [vmem:[#allocation10 + $0x550] sm:$0xf] }
 0x341   :  { %v5628_v45 = vadd.f32 %v5627_v7, %v16258_v60  ;;  %v13020_v60 = vld [vmem:[#allocation10 + $0x790] sm:$0xf] }
 0x342   :  { %v13021_v48 = vor.u32 %v15431_v47, %v13020_v60  ;;  %v15359_v18 = vld [vmem:[#allocation10 + $0x56c] sm:$0xf0]  ;;  %6001 = vmatpush.bf16.msra.mxu2 %v12189_v56 }
 0x343   :  { %v5701_v42 = vpop.f32.mrf.mxu3  ;;  %v16277_v52 = vadd.f32 %v5655_v12, %v5628_v45  ;;  %v12380_v49 = vld [vmem:[#allocation10 + $0x290] sm:$0xf]  ;;  %v12733_v60 = vor.u32 %v15359_v18, %v12732_v29 }
 0x344   :  { %6083 = vmatpush.bf16.msrb.mxu1 %v13021_v48  ;;  %6030 = vmatpush.bf16.msra.mxu3 %v12413_v2  ;;  %v15271_v47 = vld [vmem:[#allocation10 + $0x2ac] sm:$0xf0] }
 0x345   :  { %v5658_v35 = vpop.f32.mrf.mxu1  ;;  %17544 = vst [vmem:[#allocation20_spill] sm:$0xff] %v16277_v52  ;;  %v12381_v48 = vor.u32 %v15271_v47, %v12380_v49  ;;  %v12156_v16 = vld [vmem:[#allocation10 + $0xd0] sm:$0xf]  ;;  %6056 = vmatpush.bf16.msrb.mxu0 %v12733_v60 }
 0x346   :  { %v5673_v13 = vpop.f32.mrf.mxu2  ;;  %v12348_v2 = vld [vmem:[#allocation10 + $0x250] sm:$0xf] }
 0x347   :  { %v16282_v45 = vadd.f32 %v5701_v42, %v5673_v13  ;;  %v15423_v42 = vld [vmem:[#allocation10 + $0x76c] sm:$0xf0] }
 0x348   :  { %5881 = vmatmul.bf16.gmra.mxu1 %v17540_v31  ;;  %v5630_v7 = vpop.f32.mrf.mxu0  ;;  %5927 = vmatmul.bf16.gmra.mxu3 %v16129_v25  ;;  %v15263_v8 = vld [vmem:[#allocation10 + $0x26c] sm:$0xf0] }
 0x349   :  { %v5631_v12 = vadd.f32 %v5630_v7, %v16266_v43  ;;  %v12988_v43 = vld [vmem:[#allocation10 + $0x750] sm:$0xf]  ;;  %6031 = vmatpush.bf16.msra.mxu3 %v12381_v48 }
 0x34a   :  { %v12989_v55 = vor.u32 %v15423_v42, %v12988_v43  ;;  %v15215_v7 = vld [vmem:[#allocation10 + $0xec] sm:$0xf0] }
 0x34b   :  { %v5704_v27 = vpop.f32.mrf.mxu3  ;;  %5853 = vmatmul.bf16.gmra.mxu0 %v17540_v31  ;;  %v16285_v14 = vadd.f32 %v5658_v35, %v5631_v12  ;;  %5899 = vmatmul.bf16.gmra.mxu2 %v16133_v38  ;;  %v12157_v13 = vor.u32 %v15215_v7, %v12156_v16  ;;  %v12349_v12 = vor.u32 %v15263_v8, %v12348_v2  ;;  %v15207_v29 = vld [vmem:[#allocation10 + $0xac] sm:$0xf0] }
 0x34c   :  { %6084 = vmatpush.bf16.msrb.mxu1 %v12989_v55  ;;  %v12700_v47 = vld [vmem:[#allocation10 + $0x510] sm:$0xf] }
 0x34d   :  { %v5660_v15 = vpop.f32.mrf.mxu1  ;;  %17545 = vst [vmem:[#allocation21_spill] sm:$0xff] %v16285_v14  ;;  %6002 = vmatpush.bf16.msra.mxu2 %v12157_v13  ;;  %6032 = vmatpush.bf16.msra.mxu3 %v12349_v12  ;;  %v15351_v43 = vld [vmem:[#allocation10 + $0x52c] sm:$0xf0] }
 0x34e   :  { %v5676_v35 = vpop.f32.mrf.mxu2  ;;  %v12124_v15 = vld [vmem:[#allocation10 + $0x90] sm:$0xf]  ;;  %v12701_v42 = vor.u32 %v15351_v43, %v12700_v47 }
 0x34f   :  { %v16288_v56 = vadd.f32 %v5704_v27, %v5676_v35  ;;  %v12125_v18 = vor.u32 %v15207_v29, %v12124_v15  ;;  %v12316_v60 = vld [vmem:[#allocation10 + $0x210] sm:$0xf] }
 0x350   :  { %v5632_v24 = vpop.f32.mrf.mxu0  ;;  %v15255_v48 = vld [vmem:[#allocation10 + $0x22c] sm:$0xf0]  ;;  %6057 = vmatpush.bf16.msrb.mxu0 %v12701_v42 }
 0x351   :  { %6003 = vmatpush.bf16.msra.mxu2 %v12125_v18  ;;  %v12317_v55 = vor.u32 %v15255_v48, %v12316_v60  ;;  %v12092_v16 = vld [vmem:[#allocation10 + $0x50] sm:$0xf] }
 0x352   :  { %v15199_v7 = vld [vmem:[#allocation10 + $0x6c] sm:$0xf0] }
 0x353   :  { %v5706_v49 = vpop.f32.mrf.mxu3  ;;  %v12956_v27 = vld [vmem:[#allocation10 + $0x710] sm:$0xf]  ;;  %v12093_v2 = vor.u32 %v15199_v7, %v12092_v16  ;;  %6033 = vmatpush.bf16.msra.mxu3 %v12317_v55 }
 0x354   :  { %v15415_v13 = vld [vmem:[#allocation10 + $0x72c] sm:$0xf0] }
 0x355   :  { %v5755_v31 = vpop.f32.mrf.mxu1  ;;  %v12957_v8 = vor.u32 %v15415_v13, %v12956_v27  ;;  %6004 = vmatpush.bf16.msra.mxu2 %v12093_v2  ;;  %v12060_v29 = vld [vmem:[#allocation10 + $0x10] sm:$0xf] }
 0x356   :  { %v5678_v35 = vpop.f32.mrf.mxu2  ;;  %v15191_v18 = vld [vmem:[#allocation10 + $0x2c] sm:$0xf0] }
 0x357   :  { %v5707_v15 = vadd.f32 %v5706_v49, %v5678_v35  ;;  %6085 = vmatpush.bf16.msrb.mxu1 %v12957_v8  ;;  %v12061_v47 = vor.u32 %v15191_v18, %v12060_v29  ;;  %v12668_v42 = vld [vmem:[#allocation10 + $0x4d0] sm:$0xf] }
 0x358   :  { %5978 = vmatmul.bf16.vlgmr.msra.gmra.mxu1 %v16021_v39  ;;  %v5727_v24 = vpop.f32.mrf.mxu0  ;;  %5932 = vmatmul.bf16.gmra.mxu3 %v16183_v53  ;;  %v15343_v48 = vld [vmem:[#allocation10 + $0x4ec] sm:$0xf0] }
 0x359   :  { %v5728_v12 = vadd.f32 %v5727_v24, %v16275_v6  ;;  %v12924_v55 = vld [vmem:[#allocation10 + $0x6d0] sm:$0xf]  ;;  %6005 = vmatpush.bf16.msra.mxu2 %v12061_v47  ;;  %v12669_v7 = vor.u32 %v15343_v48, %v12668_v42 }
 0x35a   :  { %v15407_v27 = vld [vmem:[#allocation10 + $0x6ec] sm:$0xf0] }
 0x35b   :  { %v5709_v60 = vpop.f32.mrf.mxu3  ;;  %5950 = vmatmul.bf16.vlgmr.msra.gmra.mxu0 %v16030_v59  ;;  %v16294_v16 = vadd.f32 %v5755_v31, %v5728_v12  ;;  %5904 = vmatmul.bf16.gmra.mxu2 %v16191_v10  ;;  %v12925_v6 = vor.u32 %v15407_v27, %v12924_v55  ;;  %v12636_v29 = vld [vmem:[#allocation10 + $0x490] sm:$0xf]  ;;  %v17548_v55 = vmov 0.0|0.0  }
 0x35c   :  { %6058 = vmatpush.bf16.msrb.mxu0 %v12669_v7  ;;  %v15335_v18 = vld [vmem:[#allocation10 + $0x4ac] sm:$0xf0] }
 0x35d   :  { %v5757_v43 = vpop.f32.mrf.mxu1  ;;  %17546 = vst [vmem:[#allocation22_spill] sm:$0xff] %v16294_v16  ;;  %6086 = vmatpush.bf16.msrb.mxu1 %v12925_v6  ;;  %v12637_v31 = vor.u32 %v15335_v18, %v12636_v29  ;;  %v12892_v12 = vld [vmem:[#allocation10 + $0x690] sm:$0xf] }
 0x35e   :  { %v5681_v13 = vpop.f32.mrf.mxu2  ;;  %v15399_v47 = vld [vmem:[#allocation10 + $0x6ac] sm:$0xf0] }
 0x35f   :  { %v5710_v8 = vadd.f32 %v5709_v60, %v5681_v13  ;;  %v12893_v42 = vor.u32 %v15399_v47, %v12892_v12  ;;  %v12860_v13 = vld [vmem:[#allocation10 + $0x650] sm:$0xf] }
 0x360   :  { %v5729_v49 = vpop.f32.mrf.mxu0  ;;  %6059 = vmatpush.bf16.msrb.mxu0 %v12637_v31  ;;  %v15391_v18 = vld [vmem:[#allocation10 + $0x66c] sm:$0xf0] }
 0x361   :  { %v5730_v2 = vadd.f32 %v5729_v49, %v16282_v45  ;;  %6087 = vmatpush.bf16.msrb.mxu1 %v12893_v42  ;;  %v15327_v49 = vld [vmem:[#allocation10 + $0x46c] sm:$0xf0]  ;;  %v12861_v31 = vor.u32 %v15391_v18, %v12860_v13  ;;  %v12542_v18 = vld [vmem:[#allocation10 + $0x3f0] sm:$0xf0] }
 0x362   :  { %v12828_v12 = vld [vmem:[#allocation10 + $0x610] sm:$0xf] }
 0x363   :  { %v5711_v35 = vpop.f32.mrf.mxu3  ;;  %v16298_v14 = vadd.f32 %v5757_v43, %v5730_v2  ;;  %v12604_v43 = vld [vmem:[#allocation10 + $0x450] sm:$0xf] }
 0x364   :  { %v12605_v29 = vor.u32 %v15327_v49, %v12604_v43  ;;  %v15383_v47 = vld [vmem:[#allocation10 + $0x62c] sm:$0xf0] }
 0x365   :  { %v5760_v24 = vpop.f32.mrf.mxu1  ;;  %17547 = vst [vmem:[#allocation23_spill] sm:$0xff] %v16298_v14  ;;  %6088 = vmatpush.bf16.msrb.mxu1 %v12861_v31  ;;  %v12286_v14 = vld [vmem:[#allocation10 + $0x1f0] sm:$0xf0]  ;;  %v12829_v16 = vor.u32 %v15383_v47, %v12828_v12  ;;  %v12572_v43 = vld [vmem:[#allocation10 + $0x410] sm:$0xf] }
 0x366   :  { %v5683_v7 = vpop.f32.mrf.mxu2  ;;  %6060 = vmatpush.bf16.msrb.mxu0 %v12605_v29  ;;  %v15319_v49 = vld [vmem:[#allocation10 + $0x42c] sm:$0xf0] }
 0x367   :  { %v16303_v60 = vadd.f32 %v5711_v35, %v5683_v7  ;;  %v15243_v7 = vld [vmem:[#allocation10 + $0x1d4] sm:$0xf]  ;;  %v12573_v29 = vor.u32 %v15319_v49, %v12572_v43 }
 0x368   :  { %5983 = vmatmul.bf16.gmra.mxu1 %v16141_v40  ;;  %v5732_v48 = vpop.f32.mrf.mxu0  ;;  %5937 = vmatmul.bf16.gmra.mxu3 %v17548_v55  ;;  %v12289_v52 = vor.u32 %v15243_v7, %v12286_v14  ;;  %v15435_v43 = vld [vmem:[#allocation10 + $0x7d4] sm:$0xf] }
 0x369   :  { %v5733_v45 = vadd.f32 %v5732_v48, %v16288_v56  ;;  %6089 = vmatpush.bf16.msrb.mxu1 %v12829_v16  ;;  %v12254_v16 = vld [vmem:[#allocation10 + $0x1b0] sm:$0xf0] }
 0x36a   :  { %6110 = vmatpush.bf16.msrb.mxu2 %v12289_v52  ;;  %6061 = vmatpush.bf16.msrb.mxu0 %v12573_v29  ;;  %v15299_v52 = vld [vmem:[#allocation10 + $0x394] sm:$0xf] }
 0x36b   :  { %v5714_v6 = vpop.f32.mrf.mxu3  ;;  %5955 = vmatmul.bf16.gmra.mxu0 %v16145_v58  ;;  %v16306_v2 = vadd.f32 %v5760_v24, %v5733_v45  ;;  %5909 = vmatmul.bf16.gmra.mxu2 %v17548_v55  ;;  %v13054_v49 = vld [vmem:[#allocation10 + $0x7f0] sm:$0xf0] }
 0x36c   :  { %v13057_v29 = vor.u32 %v15435_v43, %v13054_v49 }
 0x36d   :  { %v5762_v27 = vpop.f32.mrf.mxu1  ;;  %17549 = vst [vmem:[#allocation24_spill] sm:$0xff] %v16306_v2  ;;  %v15307_v2 = vld [vmem:[#allocation10 + $0x3d4] sm:$0xf] }
 0x36e   :  { %v5686_v35 = vpop.f32.mrf.mxu2  ;;  %v12545_v31 = vor.u32 %v15307_v2, %v12542_v18  ;;  %6194 = vmatpush.bf16.msra.mxu1 %v13057_v29  ;;  %v15291_v18 = vld [vmem:[#allocation10 + $0x354] sm:$0xf] }
 0x36f   :  { %v16309_v48 = vadd.f32 %v5714_v6, %v5686_v35 }
 0x370   :  { %v5734_v56 = vpop.f32.mrf.mxu0  ;;  %6138 = vmatpush.bf16.msrb.mxu3 %v12545_v31  ;;  %v12478_v31 = vld [vmem:[#allocation10 + $0x370] sm:$0xf0] }
 0x371   :  { %v5735_v42 = vadd.f32 %v5734_v56, %v5707_v15  ;;  %v15235_v56 = vld [vmem:[#allocation10 + $0x194] sm:$0xf] }
 0x372   :  { %v12257_v35 = vor.u32 %v15235_v56, %v12254_v16  ;;  %v12481_v56 = vor.u32 %v15291_v18, %v12478_v31  ;;  %v15227_v16 = vld [vmem:[#allocation10 + $0x154] sm:$0xf] }
 0x373   :  { %v5716_v45 = vpop.f32.mrf.mxu3  ;;  %v16311_v13 = vadd.f32 %v5762_v27, %v5735_v42  ;;  %v12510_v27 = vld [vmem:[#allocation10 + $0x3b0] sm:$0xf0] }
 0x374   :  { %v15371_v42 = vld [vmem:[#allocation10 + $0x5d4] sm:$0xf]  ;;  %6111 = vmatpush.bf16.msrb.mxu2 %v12257_v35  ;;  %v12513_v7 = vor.u32 %v15299_v52, %v12510_v27 }
 0x375   :  { %v5765_v24 = vpop.f32.mrf.mxu1  ;;  %17550 = vst [vmem:[#allocation25_spill] sm:$0xff] %v16311_v13  ;;  %v12798_v45 = vld [vmem:[#allocation10 + $0x5f0] sm:$0xf0] }
 0x376   :  { %v5688_v14 = vpop.f32.mrf.mxu2  ;;  %6139 = vmatpush.bf16.msrb.mxu3 %v12513_v7  ;;  %v12222_v35 = vld [vmem:[#allocation10 + $0x170] sm:$0xf0] }
 0x377   :  { %v12225_v52 = vor.u32 %v15227_v16, %v12222_v35  ;;  %v15283_v7 = vld [vmem:[#allocation10 + $0x314] sm:$0xf] }
 0x378   :  { %5988 = vmatmul.bf16.gmra.mxu1 %v16203_v54  ;;  %v5737_v15 = vpop.f32.mrf.mxu0  ;;  %6034 = vmatmul.bf16.vlgmr.msra.gmra.mxu3 %v15997_v17  ;;  %v15275_v31 = vld [vmem:[#allocation10 + $0x2d4] sm:$0xf] }
 0x379   :  { %v5738_v6 = vadd.f32 %v5737_v15, %v5710_v8  ;;  %v12801_v8 = vor.u32 %v15371_v42, %v12798_v45  ;;  %v15363_v42 = vld [vmem:[#allocation10 + $0x594] sm:$0xf]  ;;  %6112 = vmatpush.bf16.msrb.mxu2 %v12225_v52 }
 0x37a   :  { %6140 = vmatpush.bf16.msrb.mxu3 %v12481_v56  ;;  %v12766_v45 = vld [vmem:[#allocation10 + $0x5b0] sm:$0xf0] }
 0x37b   :  { %v5811_v47 = vpop.f32.mrf.mxu3  ;;  %5960 = vmatmul.bf16.gmra.mxu0 %v16212_v28  ;;  %v16316_v2 = vadd.f32 %v5765_v24, %v5738_v6  ;;  %6006 = vmatmul.bf16.vlgmr.msra.gmra.mxu2 %v16006_v36  ;;  %v12769_v49 = vor.u32 %v15363_v42, %v12766_v45  ;;  %v15219_v35 = vld [vmem:[#allocation10 + $0x114] sm:$0xf] }
 0x37c   :  { %6166 = vmatpush.bf16.msra.mxu0 %v12801_v8  ;;  %v12446_v8 = vld [vmem:[#allocation10 + $0x330] sm:$0xf0] }
 0x37d   :  { %v5767_v12 = vpop.f32.mrf.mxu1  ;;  %17551 = vst [vmem:[#allocation26_spill] sm:$0xff] %v16316_v2  ;;  %v12449_v29 = vor.u32 %v15283_v7, %v12446_v8  ;;  %v12190_v52 = vld [vmem:[#allocation10 + $0x130] sm:$0xf0] }
 0x37e   :  { %v5783_v14 = vpop.f32.mrf.mxu2  ;;  %v12193_v42 = vor.u32 %v15219_v35, %v12190_v52  ;;  %v12734_v8 = vld [vmem:[#allocation10 + $0x570] sm:$0xf0] }
 0x37f   :  { %v16320_v6 = vadd.f32 %v5811_v47, %v5783_v14  ;;  %v13022_v47 = vld [vmem:[#allocation10 + $0x7b0] sm:$0xf0]  ;;  %6141 = vmatpush.bf16.msrb.mxu3 %v12449_v29 }
 0x380   :  { %v5739_v15 = vpop.f32.mrf.mxu0  ;;  %6167 = vmatpush.bf16.msra.mxu0 %v12769_v49  ;;  %v15355_v49 = vld [vmem:[#allocation10 + $0x554] sm:$0xf]  ;;  %6113 = vmatpush.bf16.msrb.mxu2 %v12193_v42 }
 0x381   :  { %v5740_v24 = vadd.f32 %v5739_v15, %v16303_v60  ;;  %v15427_v60 = vld [vmem:[#allocation10 + $0x794] sm:$0xf] }
 0x382   :  { %v13025_v18 = vor.u32 %v15427_v60, %v13022_v47  ;;  %v12414_v15 = vld [vmem:[#allocation10 + $0x2f0] sm:$0xf0]  ;;  %v12737_v47 = vor.u32 %v15355_v49, %v12734_v8 }
 0x383   :  { %v5813_v2 = vpop.f32.mrf.mxu3  ;;  %v16322_v43 = vadd.f32 %v5767_v12, %v5740_v24  ;;  %v12417_v16 = vor.u32 %v15275_v31, %v12414_v15  ;;  %v15267_v29 = vld [vmem:[#allocation10 + $0x294] sm:$0xf] }
 0x384   :  { %6195 = vmatpush.bf16.msra.mxu1 %v13025_v18  ;;  %v12382_v31 = vld [vmem:[#allocation10 + $0x2b0] sm:$0xf0]  ;;  %6168 = vmatpush.bf16.msra.mxu0 %v12737_v47 }
 0x385   :  { %v5770_v27 = vpop.f32.mrf.mxu1  ;;  %17552 = vst [vmem:[#allocation27_spill] sm:$0xff] %v16322_v43  ;;  %6142 = vmatpush.bf16.msrb.mxu3 %v12417_v16  ;;  %v12385_v18 = vor.u32 %v15267_v29, %v12382_v31  ;;  %v15259_v16 = vld [vmem:[#allocation10 + $0x254] sm:$0xf] }
 0x386   :  { %v5785_v56 = vpop.f32.mrf.mxu2  ;;  %v12350_v52 = vld [vmem:[#allocation10 + $0x270] sm:$0xf0] }
 0x387   :  { %v16327_v24 = vadd.f32 %v5813_v2, %v5785_v56  ;;  %v12990_v2 = vld [vmem:[#allocation10 + $0x770] sm:$0xf0] }
 0x388   :  { %5993 = vmatmul.bf16.gmra.mxu1 %v17548_v55  ;;  %v5742_v14 = vpop.f32.mrf.mxu0  ;;  %6039 = vmatmul.bf16.gmra.mxu3 %v16129_v25  ;;  %v12158_v56 = vld [vmem:[#allocation10 + $0xf0] sm:$0xf0] }
 0x389   :  { %v5743_v12 = vadd.f32 %v5742_v14, %v16309_v48  ;;  %v15419_v48 = vld [vmem:[#allocation10 + $0x754] sm:$0xf]  ;;  %6143 = vmatpush.bf16.msrb.mxu3 %v12385_v18 }
 0x38a   :  { %v12993_v15 = vor.u32 %v15419_v48, %v12990_v2  ;;  %v15211_v14 = vld [vmem:[#allocation10 + $0xd4] sm:$0xf] }
 0x38b   :  { %v5816_v7 = vpop.f32.mrf.mxu3  ;;  %5965 = vmatmul.bf16.gmra.mxu0 %v17548_v55  ;;  %v16330_v60 = vadd.f32 %v5770_v27, %v5743_v12  ;;  %6011 = vmatmul.bf16.gmra.mxu2 %v16133_v38  ;;  %v12161_v35 = vor.u32 %v15211_v14, %v12158_v56  ;;  %v12353_v12 = vor.u32 %v15259_v16, %v12350_v52  ;;  %v15203_v49 = vld [vmem:[#allocation10 + $0x94] sm:$0xf] }
 0x38c   :  { %6196 = vmatpush.bf16.msra.mxu1 %v12993_v15  ;;  %v12126_v8 = vld [vmem:[#allocation10 + $0xb0] sm:$0xf0] }
 0x38d   :  { %v5772_v45 = vpop.f32.mrf.mxu1  ;;  %17553 = vst [vmem:[#allocation28_spill] sm:$0xff] %v16330_v60  ;;  %6114 = vmatpush.bf16.msrb.mxu2 %v12161_v35  ;;  %v12129_v60 = vor.u32 %v15203_v49, %v12126_v8  ;;  %6144 = vmatpush.bf16.msrb.mxu3 %v12353_v12  ;;  %v15347_v31 = vld [vmem:[#allocation10 + $0x514] sm:$0xf] }
 0x38e   :  { %v5788_v27 = vpop.f32.mrf.mxu2  ;;  %v12702_v48 = vld [vmem:[#allocation10 + $0x530] sm:$0xf0] }
 0x38f   :  { %v16333_v42 = vadd.f32 %v5816_v7, %v5788_v27  ;;  %v15251_v47 = vld [vmem:[#allocation10 + $0x214] sm:$0xf]  ;;  %v12705_v2 = vor.u32 %v15347_v31, %v12702_v48 }
 0x390   :  { %v5744_v45 = vpop.f32.mrf.mxu0  ;;  %v12318_v18 = vld [vmem:[#allocation10 + $0x230] sm:$0xf0] }
 0x391   :  { %6115 = vmatpush.bf16.msrb.mxu2 %v12129_v60  ;;  %v12321_v15 = vor.u32 %v15251_v47, %v12318_v18  ;;  %v15195_v14 = vld [vmem:[#allocation10 + $0x54] sm:$0xf]  ;;  %6169 = vmatpush.bf16.msra.mxu0 %v12705_v2 }
 0x392   :  { %v12094_v56 = vld [vmem:[#allocation10 + $0x70] sm:$0xf0] }
 0x393   :  { %v5818_v29 = vpop.f32.mrf.mxu3  ;;  %v15411_v7 = vld [vmem:[#allocation10 + $0x714] sm:$0xf]  ;;  %v12097_v16 = vor.u32 %v15195_v14, %v12094_v56  ;;  %6145 = vmatpush.bf16.msrb.mxu3 %v12321_v15 }
 0x394   :  { %v12958_v35 = vld [vmem:[#allocation10 + $0x730] sm:$0xf0] }
 0x395   :  { %v5867_v43 = vpop.f32.mrf.mxu1  ;;  %v12961_v52 = vor.u32 %v15411_v7, %v12958_v35  ;;  %6116 = vmatpush.bf16.msrb.mxu2 %v12097_v16  ;;  %v15187_v49 = vld [vmem:[#allocation10 + $0x14] sm:$0xf] }
 0x396   :  { %v5790_v27 = vpop.f32.mrf.mxu2  ;;  %v12062_v8 = vld [vmem:[#allocation10 + $0x30] sm:$0xf0] }
 0x397   :  { %v5819_v12 = vadd.f32 %v5818_v29, %v5790_v27  ;;  %6197 = vmatpush.bf16.msra.mxu1 %v12961_v52  ;;  %v12065_v31 = vor.u32 %v15187_v49, %v12062_v8  ;;  %v15339_v2 = vld [vmem:[#allocation10 + $0x4d4] sm:$0xf] }
 0x398   :  { %6090 = vmatmul.bf16.vlgmr.msrb.gmra.mxu1 %v16021_v39  ;;  %v5839_v45 = vpop.f32.mrf.mxu0  ;;  %6044 = vmatmul.bf16.gmra.mxu3 %v16183_v53  ;;  %v12670_v18 = vld [vmem:[#allocation10 + $0x4f0] sm:$0xf0] }
 0x399   :  { %v5840_v60 = vadd.f32 %v5839_v45, %v16320_v6  ;;  %v15403_v15 = vld [vmem:[#allocation10 + $0x6d4] sm:$0xf]  ;;  %6117 = vmatpush.bf16.msrb.mxu2 %v12065_v31  ;;  %v12673_v56 = vor.u32 %v15339_v2, %v12670_v18 }
 0x39a   :  { %v12926_v7 = vld [vmem:[#allocation10 + $0x6f0] sm:$0xf0] }
 0x39b   :  { %v5821_v47 = vpop.f32.mrf.mxu3  ;;  %6062 = vmatmul.bf16.vlgmr.msrb.gmra.mxu0 %v16030_v59  ;;  %v16339_v14 = vadd.f32 %v5867_v43, %v5840_v60  ;;  %6016 = vmatmul.bf16.gmra.mxu2 %v16191_v10  ;;  %v12929_v6 = vor.u32 %v15403_v15, %v12926_v7  ;;  %v15331_v49 = vld [vmem:[#allocation10 + $0x494] sm:$0xf] }
 0x39c   :  { %6170 = vmatpush.bf16.msra.mxu0 %v12673_v56  ;;  %v12638_v8 = vld [vmem:[#allocation10 + $0x4b0] sm:$0xf0] }
 0x39d   :  { %v5869_v48 = vpop.f32.mrf.mxu1  ;;  %17554 = vst [vmem:[#allocation29_spill] sm:$0xff] %v16339_v14  ;;  %6198 = vmatpush.bf16.msra.mxu1 %v12929_v6  ;;  %v12641_v43 = vor.u32 %v15331_v49, %v12638_v8  ;;  %v15395_v60 = vld [vmem:[#allocation10 + $0x694] sm:$0xf] }
 0x39e   :  { %v5793_v35 = vpop.f32.mrf.mxu2  ;;  %v12894_v31 = vld [vmem:[#allocation10 + $0x6b0] sm:$0xf0] }
 0x39f   :  { %v5822_v52 = vadd.f32 %v5821_v47, %v5793_v35  ;;  %v12897_v2 = vor.u32 %v15395_v60, %v12894_v31  ;;  %v12606_v6 = vld [vmem:[#allocation10 + $0x470] sm:$0xf0] }
 0x3a0   :  { %v5841_v29 = vpop.f32.mrf.mxu0  ;;  %6171 = vmatpush.bf16.msra.mxu0 %v12641_v43  ;;  %v12862_v49 = vld [vmem:[#allocation10 + $0x670] sm:$0xf0] }
 0x3a1   :  { %v5842_v16 = vadd.f32 %v5841_v29, %v16327_v24  ;;  %6199 = vmatpush.bf16.msra.mxu1 %v12897_v2  ;;  %v15387_v29 = vld [vmem:[#allocation10 + $0x654] sm:$0xf] }
 0x3a2   :  { %v12865_v8 = vor.u32 %v15387_v29, %v12862_v49  ;;  %v15379_v43 = vld [vmem:[#allocation10 + $0x614] sm:$0xf]  ;;  %v15312_v49 = vld [vmem:[#allocation10 + $0x3f4] sm:$0xf0] }
 0x3a3   :  { %v5823_v27 = vpop.f32.mrf.mxu3  ;;  %v16343_v13 = vadd.f32 %v5869_v48, %v5842_v16  ;;  %v15323_v48 = vld [vmem:[#allocation10 + $0x454] sm:$0xf] }
 0x3a4   :  { %v12609_v16 = vor.u32 %v15323_v48, %v12606_v6  ;;  %v12830_v60 = vld [vmem:[#allocation10 + $0x630] sm:$0xf0] }
 0x3a5   :  { %v5872_v45 = vpop.f32.mrf.mxu1  ;;  %17555 = vst [vmem:[#allocation30_spill] sm:$0xff] %v16343_v13  ;;  %6200 = vmatpush.bf16.msra.mxu1 %v12865_v8  ;;  %v12833_v13 = vor.u32 %v15379_v43, %v12830_v60  ;;  %v15315_v48 = vld [vmem:[#allocation10 + $0x414] sm:$0xf] }
 0x3a6   :  { %v5795_v15 = vpop.f32.mrf.mxu2  ;;  %6172 = vmatpush.bf16.msra.mxu0 %v12609_v16  ;;  %v12574_v6 = vld [vmem:[#allocation10 + $0x430] sm:$0xf0] }
 0x3a7   :  { %v16348_v47 = vadd.f32 %v5823_v27, %v5795_v15  ;;  %v15248_v15 = vld [vmem:[#allocation10 + $0x1f4] sm:$0xf0]  ;;  %v12577_v16 = vor.u32 %v15315_v48, %v12574_v6 }
 0x3a8   :  { %6095 = vmatmul.bf16.gmra.mxu1 %v16141_v40  ;;  %v5844_v18 = vpop.f32.mrf.mxu0  ;;  %6049 = vmatmul.bf16.gmra.mxu3 %v17548_v55  ;;  %v13060_v48 = vld [vmem:[#allocation10 + $0x7d8] sm:$0xf] }
 0x3a9   :  { %v5845_v24 = vadd.f32 %v5844_v18, %v16333_v42  ;;  %v12292_v18 = vld [vmem:[#allocation10 + $0x1d8] sm:$0xf]  ;;  %6201 = vmatpush.bf16.msra.mxu1 %v12833_v13 }
 0x3aa   :  { %v12293_v14 = vor.u32 %v15248_v15, %v12292_v18  ;;  %6173 = vmatpush.bf16.msra.mxu0 %v12577_v16  ;;  %v15240_v13 = vld [vmem:[#allocation10 + $0x1b4] sm:$0xf0] }
 0x3ab   :  { %v5826_v7 = vpop.f32.mrf.mxu3  ;;  %6067 = vmatmul.bf16.gmra.mxu0 %v16145_v58  ;;  %v16351_v35 = vadd.f32 %v5872_v45, %v5845_v24  ;;  %6021 = vmatmul.bf16.gmra.mxu2 %v17548_v55  ;;  %v15440_v6 = vld [vmem:[#allocation10 + $0x7f4] sm:$0xf0] }
 0x3ac   :  { %6222 = vmatpush.bf16.msra.mxu2 %v12293_v14  ;;  %v12516_v14 = vld [vmem:[#allocation10 + $0x398] sm:$0xf]  ;;  %v13061_v16 = vor.u32 %v15440_v6, %v13060_v48 }
 0x3ad   :  { %v5874_v56 = vpop.f32.mrf.mxu1  ;;  %17556 = vst [vmem:[#allocation31_spill] sm:$0xff] %v16351_v35  ;;  %v12548_v35 = vld [vmem:[#allocation10 + $0x3d8] sm:$0xf] }
 0x3ae   :  { %v5798_v27 = vpop.f32.mrf.mxu2  ;;  %v12549_v8 = vor.u32 %v15312_v49, %v12548_v35  ;;  %6306 = vmatpush.bf16.msrb.mxu1 %v13061_v16  ;;  %v12484_v49 = vld [vmem:[#allocation10 + $0x358] sm:$0xf] }
 0x3af   :  { %v16354_v2 = vadd.f32 %v5826_v7, %v5798_v27  ;;  %v12260_v27 = vld [vmem:[#allocation10 + $0x198] sm:$0xf] }
 0x3b0   :  { %v5846_v42 = vpop.f32.mrf.mxu0  ;;  %6250 = vmatpush.bf16.msra.mxu3 %v12549_v8  ;;  %v12261_v43 = vor.u32 %v15240_v13, %v12260_v27  ;;  %v15296_v8 = vld [vmem:[#allocation10 + $0x374] sm:$0xf0] }
 0x3b1   :  { %v5847_v31 = vadd.f32 %v5846_v42, %v5819_v12  ;;  %v12485_v27 = vor.u32 %v15296_v8, %v12484_v49  ;;  %v12228_v13 = vld [vmem:[#allocation10 + $0x158] sm:$0xf] }
 0x3b2   :  { %6223 = vmatpush.bf16.msra.mxu2 %v12261_v43  ;;  %v15232_v43 = vld [vmem:[#allocation10 + $0x174] sm:$0xf0] }
 0x3b3   :  { %v5828_v24 = vpop.f32.mrf.mxu3  ;;  %v16356_v29 = vadd.f32 %v5874_v56, %v5847_v31  ;;  %v15304_v56 = vld [vmem:[#allocation10 + $0x3b4] sm:$0xf0] }
 0x3b4   :  { %v12804_v31 = vld [vmem:[#allocation10 + $0x5d8] sm:$0xf]  ;;  %v12517_v15 = vor.u32 %v15304_v56, %v12516_v14  ;;  %v12229_v14 = vor.u32 %v15232_v43, %v12228_v13 }
 0x3b5   :  { %v5877_v45 = vpop.f32.mrf.mxu1  ;;  %17557 = vst [vmem:[#allocation32_spill] sm:$0xff] %v16356_v29  ;;  %v15376_v24 = vld [vmem:[#allocation10 + $0x5f4] sm:$0xf0] }
 0x3b6   :  { %v5800_v7 = vpop.f32.mrf.mxu2  ;;  %6251 = vmatpush.bf16.msra.mxu3 %v12517_v15  ;;  %v12452_v15 = vld [vmem:[#allocation10 + $0x318] sm:$0xf]  ;;  %6224 = vmatpush.bf16.msra.mxu2 %v12229_v14 }
 0x3b7   :  { %v12420_v8 = vld [vmem:[#allocation10 + $0x2d8] sm:$0xf] }
 0x3b8   :  { %6100 = vmatmul.bf16.gmra.mxu1 %v16203_v54  ;;  %v5849_v12 = vpop.f32.mrf.mxu0  ;;  %6146 = vmatmul.bf16.vlgmr.msrb.gmra.mxu3 %v15997_v17  ;;  %v12196_v43 = vld [vmem:[#allocation10 + $0x118] sm:$0xf] }
 0x3b9   :  { %v5850_v42 = vadd.f32 %v5849_v12, %v5822_v52  ;;  %v12805_v52 = vor.u32 %v15376_v24, %v12804_v31  ;;  %v12772_v31 = vld [vmem:[#allocation10 + $0x598] sm:$0xf] }
 0x3ba   :  { %6252 = vmatpush.bf16.msra.mxu3 %v12485_v27  ;;  %v15368_v24 = vld [vmem:[#allocation10 + $0x5b4] sm:$0xf0] }
 0x3bb   :  { %v5923_v18 = vpop.f32.mrf.mxu3  ;;  %6072 = vmatmul.bf16.gmra.mxu0 %v16212_v28  ;;  %v16361_v35 = vadd.f32 %v5877_v45, %v5850_v42  ;;  %6118 = vmatmul.bf16.vlgmr.msrb.gmra.mxu2 %v16006_v36  ;;  %v12773_v6 = vor.u32 %v15368_v24, %v12772_v31  ;;  %v15224_v14 = vld [vmem:[#allocation10 + $0x134] sm:$0xf0] }
 0x3bc   :  { %6278 = vmatpush.bf16.msrb.mxu0 %v12805_v52  ;;  %v15288_v52 = vld [vmem:[#allocation10 + $0x334] sm:$0xf0]  ;;  %v12197_v31 = vor.u32 %v15224_v14, %v12196_v43 }
 0x3bd   :  { %v5879_v60 = vpop.f32.mrf.mxu1  ;;  %17558 = vst [vmem:[#allocation33_spill] sm:$0xff] %v16361_v35  ;;  %v12453_v16 = vor.u32 %v15288_v52, %v12452_v15  ;;  %v15360_v52 = vld [vmem:[#allocation10 + $0x574] sm:$0xf0] }
 0x3be   :  { %v5895_v7 = vpop.f32.mrf.mxu2  ;;  %6225 = vmatpush.bf16.msra.mxu2 %v12197_v31  ;;  %v15264_v14 = vld [vmem:[#allocation10 + $0x274] sm:$0xf0] }
 0x3bf   :  { %v16365_v42 = vadd.f32 %v5923_v18, %v5895_v7  ;;  %v15432_v18 = vld [vmem:[#allocation10 + $0x7b4] sm:$0xf0]  ;;  %6253 = vmatpush.bf16.msra.mxu3 %v12453_v16 }
 0x3c0   :  { %v5851_v12 = vpop.f32.mrf.mxu0  ;;  %6279 = vmatpush.bf16.msrb.mxu0 %v12773_v6  ;;  %v12740_v6 = vld [vmem:[#allocation10 + $0x558] sm:$0xf] }
 0x3c1   :  { %v5852_v45 = vadd.f32 %v5851_v12, %v16348_v47  ;;  %v13028_v47 = vld [vmem:[#allocation10 + $0x798] sm:$0xf] }
 0x3c2   :  { %v13029_v49 = vor.u32 %v15432_v18, %v13028_v47  ;;  %v15280_v12 = vld [vmem:[#allocation10 + $0x2f4] sm:$0xf0]  ;;  %v12741_v18 = vor.u32 %v15360_v52, %v12740_v6 }
 0x3c3   :  { %v5925_v35 = vpop.f32.mrf.mxu3  ;;  %v16367_v48 = vadd.f32 %v5879_v60, %v5852_v45  ;;  %v12421_v13 = vor.u32 %v15280_v12, %v12420_v8  ;;  %v12388_v16 = vld [vmem:[#allocation10 + $0x298] sm:$0xf] }
 0x3c4   :  { %6307 = vmatpush.bf16.msrb.mxu1 %v13029_v49  ;;  %v15272_v8 = vld [vmem:[#allocation10 + $0x2b4] sm:$0xf0]  ;;  %6280 = vmatpush.bf16.msrb.mxu0 %v12741_v18 }
 0x3c5   :  { %v5882_v56 = vpop.f32.mrf.mxu1  ;;  %17559 = vst [vmem:[#allocation34_spill] sm:$0xff] %v16367_v48  ;;  %6254 = vmatpush.bf16.msra.mxu3 %v12421_v13  ;;  %v12389_v49 = vor.u32 %v15272_v8, %v12388_v16  ;;  %v12356_v13 = vld [vmem:[#allocation10 + $0x258] sm:$0xf] }
 0x3c6   :  { %v5897_v27 = vpop.f32.mrf.mxu2  ;;  %v12132_v6 = vld [vmem:[#allocation10 + $0x98] sm:$0xf] }
 0x3c7   :  { %v16372_v45 = vadd.f32 %v5925_v35, %v5897_v27  ;;  %v15424_v35 = vld [vmem:[#allocation10 + $0x774] sm:$0xf0] }
 0x3c8   :  { %6105 = vmatmul.bf16.gmra.mxu1 %v17548_v55  ;;  %v5854_v7 = vpop.f32.mrf.mxu0  ;;  %6151 = vmatmul.bf16.gmra.mxu3 %v16129_v25  ;;  %v15216_v27 = vld [vmem:[#allocation10 + $0xf4] sm:$0xf0] }
 0x3c9   :  { %v5855_v60 = vadd.f32 %v5854_v7, %v16354_v2  ;;  %v12996_v2 = vld [vmem:[#allocation10 + $0x758] sm:$0xf]  ;;  %6255 = vmatpush.bf16.msra.mxu3 %v12389_v49 }
 0x3ca   :  { %v12997_v12 = vor.u32 %v15424_v35, %v12996_v2  ;;  %v12164_v7 = vld [vmem:[#allocation10 + $0xd8] sm:$0xf] }
 0x3cb   :  { %v5928_v15 = vpop.f32.mrf.mxu3  ;;  %6077 = vmatmul.bf16.gmra.mxu0 %v17548_v55  ;;  %v16375_v47 = vadd.f32 %v5882_v56, %v5855_v60  ;;  %6123 = vmatmul.bf16.gmra.mxu2 %v16133_v38  ;;  %v12165_v43 = vor.u32 %v15216_v27, %v12164_v7  ;;  %v12357_v60 = vor.u32 %v15264_v14, %v12356_v13  ;;  %v15208_v52 = vld [vmem:[#allocation10 + $0xb4] sm:$0xf0] }
 0x3cc   :  { %6308 = vmatpush.bf16.msrb.mxu1 %v12997_v12  ;;  %v12708_v8 = vld [vmem:[#allocation10 + $0x518] sm:$0xf] }
 0x3cd   :  { %v5884_v24 = vpop.f32.mrf.mxu1  ;;  %17560 = vst [vmem:[#allocation35_spill] sm:$0xff] %v16375_v47  ;;  %6226 = vmatpush.bf16.msra.mxu2 %v12165_v43  ;;  %v12133_v47 = vor.u32 %v15208_v52, %v12132_v6  ;;  %6256 = vmatpush.bf16.msra.mxu3 %v12357_v60  ;;  %v15352_v2 = vld [vmem:[#allocation10 + $0x534] sm:$0xf0] }
 0x3ce   :  { %v5900_v56 = vpop.f32.mrf.mxu2  ;;  %v12324_v18 = vld [vmem:[#allocation10 + $0x218] sm:$0xf]  ;;  %v12709_v35 = vor.u32 %v15352_v2, %v12708_v8 }
 0x3cf   :  { %v16378_v31 = vadd.f32 %v5928_v15, %v5900_v56  ;;  %v15256_v49 = vld [vmem:[#allocation10 + $0x234] sm:$0xf0] }
 0x3d0   :  { %v5856_v24 = vpop.f32.mrf.mxu0  ;;  %v12325_v12 = vor.u32 %v15256_v49, %v12324_v18  ;;  %v12100_v7 = vld [vmem:[#allocation10 + $0x58] sm:$0xf]  ;;  %6281 = vmatpush.bf16.msrb.mxu0 %v12709_v35 }
 0x3d1   :  { %6227 = vmatpush.bf16.msra.mxu2 %v12133_v47  ;;  %v15200_v27 = vld [vmem:[#allocation10 + $0x74] sm:$0xf0] }
 0x3d2   :  { %v12964_v15 = vld [vmem:[#allocation10 + $0x718] sm:$0xf]  ;;  %v12101_v13 = vor.u32 %v15200_v27, %v12100_v7  ;;  %6257 = vmatpush.bf16.msra.mxu3 %v12325_v12 }
 0x3d3   :  { %v5930_v16 = vpop.f32.mrf.mxu3  ;;  %v15416_v43 = vld [vmem:[#allocation10 + $0x734] sm:$0xf0] }
 0x3d4   :  { %v12965_v14 = vor.u32 %v15416_v43, %v12964_v15  ;;  %v12068_v6 = vld [vmem:[#allocation10 + $0x18] sm:$0xf] }
 0x3d5   :  { %v5979_v48 = vpop.f32.mrf.mxu1  ;;  %6228 = vmatpush.bf16.msra.mxu2 %v12101_v13  ;;  %v15192_v52 = vld [vmem:[#allocation10 + $0x34] sm:$0xf0] }
 0x3d6   :  { %v5902_v56 = vpop.f32.mrf.mxu2  ;;  %6309 = vmatpush.bf16.msrb.mxu1 %v12965_v14  ;;  %v12069_v8 = vor.u32 %v15192_v52, %v12068_v6  ;;  %v12676_v35 = vld [vmem:[#allocation10 + $0x4d8] sm:$0xf] }
 0x3d7   :  { %v5931_v60 = vadd.f32 %v5930_v16, %v5902_v56  ;;  %v15344_v49 = vld [vmem:[#allocation10 + $0x4f4] sm:$0xf0] }
 0x3d8   :  { %6202 = vmatmul.bf16.vlgmr.msra.gmra.mxu1 %v16021_v39  ;;  %v5951_v24 = vpop.f32.mrf.mxu0  ;;  %6156 = vmatmul.bf16.gmra.mxu3 %v16183_v53  ;;  %v12932_v12 = vld [vmem:[#allocation10 + $0x6d8] sm:$0xf]  ;;  %v12677_v27 = vor.u32 %v15344_v49, %v12676_v35 }
 0x3d9   :  { %v5952_v47 = vadd.f32 %v5951_v24, %v16365_v42  ;;  %6229 = vmatpush.bf16.msra.mxu2 %v12069_v8  ;;  %v15408_v15 = vld [vmem:[#allocation10 + $0x6f4] sm:$0xf0] }
 0x3da   :  { %v12933_v42 = vor.u32 %v15408_v15, %v12932_v12  ;;  %6282 = vmatpush.bf16.msrb.mxu0 %v12677_v27  ;;  %v12644_v6 = vld [vmem:[#allocation10 + $0x498] sm:$0xf] }
 0x3db   :  { %v5933_v18 = vpop.f32.mrf.mxu3  ;;  %6174 = vmatmul.bf16.vlgmr.msra.gmra.mxu0 %v16030_v59  ;;  %v16384_v7 = vadd.f32 %v5979_v48, %v5952_v47  ;;  %6128 = vmatmul.bf16.gmra.mxu2 %v16191_v10  ;;  %v15336_v52 = vld [vmem:[#allocation10 + $0x4b4] sm:$0xf0] }
 0x3dc   :  { %6310 = vmatpush.bf16.msrb.mxu1 %v12933_v42  ;;  %v12645_v48 = vor.u32 %v15336_v52, %v12644_v6  ;;  %v12900_v47 = vld [vmem:[#allocation10 + $0x698] sm:$0xf] }
 0x3dd   :  { %v5981_v2 = vpop.f32.mrf.mxu1  ;;  %17561 = vst [vmem:[#allocation36_spill] sm:$0xff] %v16384_v7  ;;  %v15400_v8 = vld [vmem:[#allocation10 + $0x6b4] sm:$0xf0] }
 0x3de   :  { %v5905_v43 = vpop.f32.mrf.mxu2  ;;  %6283 = vmatpush.bf16.msrb.mxu0 %v12645_v48  ;;  %v12901_v35 = vor.u32 %v15400_v8, %v12900_v47  ;;  %v15328_v42 = vld [vmem:[#allocation10 + $0x474] sm:$0xf0] }
 0x3df   :  { %v5934_v14 = vadd.f32 %v5933_v18, %v5905_v43  ;;  %v15392_v6 = vld [vmem:[#allocation10 + $0x674] sm:$0xf0] }
 0x3e0   :  { %v5953_v16 = vpop.f32.mrf.mxu0  ;;  %6311 = vmatpush.bf16.msrb.mxu1 %v12901_v35  ;;  %v12836_v48 = vld [vmem:[#allocation10 + $0x618] sm:$0xf] }
 0x3e1   :  { %v5954_v13 = vadd.f32 %v5953_v16, %v16372_v45  ;;  %v12868_v16 = vld [vmem:[#allocation10 + $0x658] sm:$0xf] }
 0x3e2   :  { %v12869_v52 = vor.u32 %v15392_v6, %v12868_v16  ;;  %v15384_v47 = vld [vmem:[#allocation10 + $0x634] sm:$0xf0]  ;;  %v12550_v6 = vld [vmem:[#allocation10 + $0x3f8] sm:$0xf0] }
 0x3e3   :  { %v5935_v56 = vpop.f32.mrf.mxu3  ;;  %v16388_v29 = vadd.f32 %v5981_v2, %v5954_v13  ;;  %v12612_v2 = vld [vmem:[#allocation10 + $0x458] sm:$0xf] }
 0x3e4   :  { %v12613_v13 = vor.u32 %v15328_v42, %v12612_v2  ;;  %6312 = vmatpush.bf16.msrb.mxu1 %v12869_v52  ;;  %v12580_v2 = vld [vmem:[#allocation10 + $0x418] sm:$0xf] }
 0x3e5   :  { %v5984_v24 = vpop.f32.mrf.mxu1  ;;  %17562 = vst [vmem:[#allocation37_spill] sm:$0xff] %v16388_v29  ;;  %v12837_v29 = vor.u32 %v15384_v47, %v12836_v48  ;;  %v15320_v42 = vld [vmem:[#allocation10 + $0x434] sm:$0xf0] }
 0x3e6   :  { %v5907_v12 = vpop.f32.mrf.mxu2  ;;  %6284 = vmatpush.bf16.msrb.mxu0 %v12613_v13  ;;  %v12581_v13 = vor.u32 %v15320_v42, %v12580_v2  ;;  %v15436_v2 = vld [vmem:[#allocation10 + $0x7dc] sm:$0xf] }
 0x3e7   :  { %v16393_v18 = vadd.f32 %v5935_v56, %v5907_v12  ;;  %v12294_v12 = vld [vmem:[#allocation10 + $0x1f8] sm:$0xf0] }
 0x3e8   :  { %6207 = vmatmul.bf16.gmra.mxu1 %v16141_v40  ;;  %v5956_v49 = vpop.f32.mrf.mxu0  ;;  %6161 = vmatmul.bf16.gmra.mxu3 %v17548_v55  ;;  %v13062_v42 = vld [vmem:[#allocation10 + $0x7f8] sm:$0xf0] }
 0x3e9   :  { %v5957_v45 = vadd.f32 %v5956_v49, %v16378_v31  ;;  %v15244_v49 = vld [vmem:[#allocation10 + $0x1dc] sm:$0xf]  ;;  %6313 = vmatpush.bf16.msrb.mxu1 %v12837_v29 }
 0x3ea   :  { %v12297_v7 = vor.u32 %v15244_v49, %v12294_v12  ;;  %6285 = vmatpush.bf16.msrb.mxu0 %v12581_v13  ;;  %v12262_v29 = vld [vmem:[#allocation10 + $0x1b8] sm:$0xf0]  ;;  %v13065_v13 = vor.u32 %v15436_v2, %v13062_v42 }
 0x3eb   :  { %v5938_v15 = vpop.f32.mrf.mxu3  ;;  %6179 = vmatmul.bf16.gmra.mxu0 %v16145_v58  ;;  %v16396_v43 = vadd.f32 %v5984_v24, %v5957_v45  ;;  %6133 = vmatmul.bf16.gmra.mxu2 %v17548_v55 }
 0x3ec   :  { %6334 = vmatpush.bf16.msrb.mxu2 %v12297_v7  ;;  %v15300_v7 = vld [vmem:[#allocation10 + $0x39c] sm:$0xf] }
 0x3ed   :  { %v5986_v27 = vpop.f32.mrf.mxu1  ;;  %17563 = vst [vmem:[#allocation38_spill] sm:$0xff] %v16396_v43  ;;  %v15308_v43 = vld [vmem:[#allocation10 + $0x3dc] sm:$0xf]  ;;  %6418 = vmatpush.bf16.msra.mxu1 %v13065_v13 }
 0x3ee   :  { %v5910_v56 = vpop.f32.mrf.mxu2  ;;  %v12553_v52 = vor.u32 %v15308_v43, %v12550_v6  ;;  %v15292_v6 = vld [vmem:[#allocation10 + $0x35c] sm:$0xf] }
 0x3ef   :  { %v16399_v35 = vadd.f32 %v5938_v15, %v5910_v56  ;;  %v15236_v56 = vld [vmem:[#allocation10 + $0x19c] sm:$0xf] }
 0x3f0   :  { %v5958_v31 = vpop.f32.mrf.mxu0  ;;  %6362 = vmatpush.bf16.msrb.mxu3 %v12553_v52  ;;  %v12265_v48 = vor.u32 %v15236_v56, %v12262_v29  ;;  %v12486_v52 = vld [vmem:[#allocation10 + $0x378] sm:$0xf0] }
 0x3f1   :  { %v5959_v8 = vadd.f32 %v5958_v31, %v5931_v60  ;;  %v12489_v56 = vor.u32 %v15292_v6, %v12486_v52  ;;  %v15228_v29 = vld [vmem:[#allocation10 + $0x15c] sm:$0xf] }
 0x3f2   :  { %6335 = vmatpush.bf16.msrb.mxu2 %v12265_v48  ;;  %v12230_v48 = vld [vmem:[#allocation10 + $0x178] sm:$0xf0] }
 0x3f3   :  { %v5940_v45 = vpop.f32.mrf.mxu3  ;;  %v16401_v16 = vadd.f32 %v5986_v27, %v5959_v8  ;;  %v12518_v27 = vld [vmem:[#allocation10 + $0x3b8] sm:$0xf0] }
 0x3f4   :  { %v15372_v8 = vld [vmem:[#allocation10 + $0x5dc] sm:$0xf]  ;;  %v12521_v12 = vor.u32 %v15300_v7, %v12518_v27  ;;  %v12233_v7 = vor.u32 %v15228_v29, %v12230_v48 }
 0x3f5   :  { %v5989_v24 = vpop.f32.mrf.mxu1  ;;  %17564 = vst [vmem:[#allocation39_spill] sm:$0xff] %v16401_v16  ;;  %v12806_v45 = vld [vmem:[#allocation10 + $0x5f8] sm:$0xf0] }
 0x3f6   :  { %v5912_v15 = vpop.f32.mrf.mxu2  ;;  %6363 = vmatpush.bf16.msrb.mxu3 %v12521_v12  ;;  %v15284_v12 = vld [vmem:[#allocation10 + $0x31c] sm:$0xf]  ;;  %6336 = vmatpush.bf16.msrb.mxu2 %v12233_v7 }
 0x3f7   :  { %v15276_v52 = vld [vmem:[#allocation10 + $0x2dc] sm:$0xf] }
 0x3f8   :  { %6212 = vmatmul.bf16.gmra.mxu1 %v16203_v54  ;;  %v5961_v60 = vpop.f32.mrf.mxu0  ;;  %6258 = vmatmul.bf16.vlgmr.msra.gmra.mxu3 %v15997_v17  ;;  %v15220_v48 = vld [vmem:[#allocation10 + $0x11c] sm:$0xf] }
 0x3f9   :  { %v5962_v31 = vadd.f32 %v5961_v60, %v5934_v14  ;;  %v12809_v14 = vor.u32 %v15372_v8, %v12806_v45  ;;  %v15364_v8 = vld [vmem:[#allocation10 + $0x59c] sm:$0xf] }
 0x3fa   :  { %6364 = vmatpush.bf16.msrb.mxu3 %v12489_v56  ;;  %v12774_v45 = vld [vmem:[#allocation10 + $0x5b8] sm:$0xf0] }
 0x3fb   :  { %v6035_v49 = vpop.f32.mrf.mxu3  ;;  %6184 = vmatmul.bf16.gmra.mxu0 %v16212_v28  ;;  %v16406_v43 = vadd.f32 %v5989_v24, %v5962_v31  ;;  %6230 = vmatmul.bf16.vlgmr.msra.gmra.mxu2 %v16006_v36  ;;  %v12777_v42 = vor.u32 %v15364_v8, %v12774_v45  ;;  %v12198_v7 = vld [vmem:[#allocation10 + $0x138] sm:$0xf0] }
 0x3fc   :  { %6390 = vmatpush.bf16.msra.mxu0 %v12809_v14  ;;  %v12454_v14 = vld [vmem:[#allocation10 + $0x338] sm:$0xf0]  ;;  %v12201_v8 = vor.u32 %v15220_v48, %v12198_v7 }
 0x3fd   :  { %v5991_v47 = vpop.f32.mrf.mxu1  ;;  %17565 = vst [vmem:[#allocation40_spill] sm:$0xff] %v16406_v43  ;;  %v12457_v13 = vor.u32 %v15284_v12, %v12454_v14  ;;  %v12742_v14 = vld [vmem:[#allocation10 + $0x578] sm:$0xf0] }
 0x3fe   :  { %v6007_v15 = vpop.f32.mrf.mxu2  ;;  %6337 = vmatpush.bf16.msrb.mxu2 %v12201_v8  ;;  %v12358_v7 = vld [vmem:[#allocation10 + $0x278] sm:$0xf0] }
 0x3ff   :  { %v16410_v31 = vadd.f32 %v6035_v49, %v6007_v15  ;;  %v13030_v49 = vld [vmem:[#allocation10 + $0x7b8] sm:$0xf0]  ;;  %6365 = vmatpush.bf16.msrb.mxu3 %v12457_v13 }
 0x400   :  { %v5963_v60 = vpop.f32.mrf.mxu0  ;;  %6391 = vmatpush.bf16.msra.mxu0 %v12777_v42  ;;  %v15356_v42 = vld [vmem:[#allocation10 + $0x55c] sm:$0xf] }
 0x401   :  { %v5964_v24 = vadd.f32 %v5963_v60, %v16393_v18  ;;  %v15428_v18 = vld [vmem:[#allocation10 + $0x79c] sm:$0xf] }
 0x402   :  { %v13033_v6 = vor.u32 %v15428_v18, %v13030_v49  ;;  %v12422_v60 = vld [vmem:[#allocation10 + $0x2f8] sm:$0xf0]  ;;  %v12745_v49 = vor.u32 %v15356_v42, %v12742_v14 }
 0x403   :  { %v6037_v43 = vpop.f32.mrf.mxu3  ;;  %v16412_v2 = vadd.f32 %v5991_v47, %v5964_v24  ;;  %v12425_v29 = vor.u32 %v15276_v52, %v12422_v60  ;;  %v15268_v13 = vld [vmem:[#allocation10 + $0x29c] sm:$0xf] }
 0x404   :  { %6419 = vmatpush.bf16.msra.mxu1 %v13033_v6  ;;  %v12390_v52 = vld [vmem:[#allocation10 + $0x2b8] sm:$0xf0]  ;;  %6392 = vmatpush.bf16.msra.mxu0 %v12745_v49 }
 0x405   :  { %v5994_v27 = vpop.f32.mrf.mxu1  ;;  %17566 = vst [vmem:[#allocation41_spill] sm:$0xff] %v16412_v2  ;;  %6366 = vmatpush.bf16.msrb.mxu3 %v12425_v29  ;;  %v12393_v6 = vor.u32 %v15268_v13, %v12390_v52  ;;  %v15260_v29 = vld [vmem:[#allocation10 + $0x25c] sm:$0xf] }
 0x406   :  { %v6009_v56 = vpop.f32.mrf.mxu2  ;;  %v15204_v42 = vld [vmem:[#allocation10 + $0x9c] sm:$0xf] }
 0x407   :  { %v16417_v24 = vadd.f32 %v6037_v43, %v6009_v56  ;;  %v12998_v43 = vld [vmem:[#allocation10 + $0x778] sm:$0xf0] }
 0x408   :  { %6217 = vmatmul.bf16.gmra.mxu1 %v17548_v55  ;;  %v5966_v15 = vpop.f32.mrf.mxu0  ;;  %6263 = vmatmul.bf16.gmra.mxu3 %v16129_v25  ;;  %v12166_v56 = vld [vmem:[#allocation10 + $0xf8] sm:$0xf0] }
 0x409   :  { %v5967_v47 = vadd.f32 %v5966_v15, %v16399_v35  ;;  %v15420_v35 = vld [vmem:[#allocation10 + $0x75c] sm:$0xf]  ;;  %6367 = vmatpush.bf16.msrb.mxu3 %v12393_v6 }
 0x40a   :  { %v13001_v60 = vor.u32 %v15420_v35, %v12998_v43  ;;  %v15212_v15 = vld [vmem:[#allocation10 + $0xdc] sm:$0xf] }
 0x40b   :  { %v6040_v12 = vpop.f32.mrf.mxu3  ;;  %6189 = vmatmul.bf16.gmra.mxu0 %v17548_v55  ;;  %v16420_v18 = vadd.f32 %v5994_v27, %v5967_v47  ;;  %6235 = vmatmul.bf16.gmra.mxu2 %v16133_v38  ;;  %v12169_v48 = vor.u32 %v15212_v15, %v12166_v56  ;;  %v12361_v47 = vor.u32 %v15260_v29, %v12358_v7  ;;  %v12134_v14 = vld [vmem:[#allocation10 + $0xb8] sm:$0xf0] }
 0x40c   :  { %6420 = vmatpush.bf16.msra.mxu1 %v13001_v60  ;;  %v15348_v52 = vld [vmem:[#allocation10 + $0x51c] sm:$0xf] }
 0x40d   :  { %v5996_v45 = vpop.f32.mrf.mxu1  ;;  %17567 = vst [vmem:[#allocation42_spill] sm:$0xff] %v16420_v18  ;;  %6338 = vmatpush.bf16.msrb.mxu2 %v12169_v48  ;;  %v12137_v18 = vor.u32 %v15204_v42, %v12134_v14  ;;  %6368 = vmatpush.bf16.msrb.mxu3 %v12361_v47  ;;  %v12710_v35 = vld [vmem:[#allocation10 + $0x538] sm:$0xf0] }
 0x40e   :  { %v6012_v27 = vpop.f32.mrf.mxu2  ;;  %v15252_v49 = vld [vmem:[#allocation10 + $0x21c] sm:$0xf]  ;;  %v12713_v43 = vor.u32 %v15348_v52, %v12710_v35 }
 0x40f   :  { %v16423_v8 = vadd.f32 %v6040_v12, %v6012_v27  ;;  %v12326_v6 = vld [vmem:[#allocation10 + $0x238] sm:$0xf0] }
 0x410   :  { %v5968_v45 = vpop.f32.mrf.mxu0  ;;  %v12329_v60 = vor.u32 %v15252_v49, %v12326_v6  ;;  %v15196_v15 = vld [vmem:[#allocation10 + $0x5c] sm:$0xf]  ;;  %6393 = vmatpush.bf16.msra.mxu0 %v12713_v43 }
 0x411   :  { %6339 = vmatpush.bf16.msrb.mxu2 %v12137_v18  ;;  %v12102_v56 = vld [vmem:[#allocation10 + $0x78] sm:$0xf0] }
 0x412   :  { %v15412_v12 = vld [vmem:[#allocation10 + $0x71c] sm:$0xf]  ;;  %v12105_v29 = vor.u32 %v15196_v15, %v12102_v56  ;;  %6369 = vmatpush.bf16.msrb.mxu3 %v12329_v60 }
 0x413   :  { %v6042_v13 = vpop.f32.mrf.mxu3  ;;  %v12966_v48 = vld [vmem:[#allocation10 + $0x738] sm:$0xf0] }
 0x414   :  { %v12969_v7 = vor.u32 %v15412_v12, %v12966_v48  ;;  %v15188_v42 = vld [vmem:[#allocation10 + $0x1c] sm:$0xf] }
 0x415   :  { %v6091_v2 = vpop.f32.mrf.mxu1  ;;  %6340 = vmatpush.bf16.msrb.mxu2 %v12105_v29  ;;  %v12070_v14 = vld [vmem:[#allocation10 + $0x38] sm:$0xf0] }
 0x416   :  { %v6014_v27 = vpop.f32.mrf.mxu2  ;;  %6421 = vmatpush.bf16.msra.mxu1 %v12969_v7  ;;  %v12073_v52 = vor.u32 %v15188_v42, %v12070_v14  ;;  %v15340_v43 = vld [vmem:[#allocation10 + $0x4dc] sm:$0xf] }
 0x417   :  { %v6043_v47 = vadd.f32 %v6042_v13, %v6014_v27  ;;  %v12678_v6 = vld [vmem:[#allocation10 + $0x4f8] sm:$0xf0] }
 0x418   :  { %6314 = vmatmul.bf16.vlgmr.msrb.gmra.mxu1 %v16021_v39  ;;  %v6063_v45 = vpop.f32.mrf.mxu0  ;;  %6268 = vmatmul.bf16.gmra.mxu3 %v16183_v53  ;;  %v15404_v60 = vld [vmem:[#allocation10 + $0x6dc] sm:$0xf]  ;;  %v12681_v56 = vor.u32 %v15340_v43, %v12678_v6 }
 0x419   :  { %v6064_v18 = vadd.f32 %v6063_v45, %v16410_v31  ;;  %6341 = vmatpush.bf16.msrb.mxu2 %v12073_v52  ;;  %v12934_v12 = vld [vmem:[#allocation10 + $0x6f8] sm:$0xf0] }
 0x41a   :  { %v12937_v31 = vor.u32 %v15404_v60, %v12934_v12  ;;  %6394 = vmatpush.bf16.msra.mxu0 %v12681_v56  ;;  %v15332_v42 = vld [vmem:[#allocation10 + $0x49c] sm:$0xf] }
 0x41b   :  { %v6045_v49 = vpop.f32.mrf.mxu3  ;;  %6286 = vmatmul.bf16.vlgmr.msrb.gmra.mxu0 %v16030_v59  ;;  %v16429_v15 = vadd.f32 %v6091_v2, %v6064_v18  ;;  %6240 = vmatmul.bf16.gmra.mxu2 %v16191_v10  ;;  %v12646_v14 = vld [vmem:[#allocation10 + $0x4b8] sm:$0xf0] }
 0x41c   :  { %6422 = vmatpush.bf16.msra.mxu1 %v12937_v31  ;;  %v12649_v2 = vor.u32 %v15332_v42, %v12646_v14  ;;  %v15396_v18 = vld [vmem:[#allocation10 + $0x69c] sm:$0xf] }
 0x41d   :  { %v6093_v35 = vpop.f32.mrf.mxu1  ;;  %17568 = vst [vmem:[#allocation43_spill] sm:$0xff] %v16429_v15  ;;  %v12902_v52 = vld [vmem:[#allocation10 + $0x6b8] sm:$0xf0] }
 0x41e   :  { %v6017_v48 = vpop.f32.mrf.mxu2  ;;  %6395 = vmatpush.bf16.msra.mxu0 %v12649_v2  ;;  %v12905_v43 = vor.u32 %v15396_v18, %v12902_v52  ;;  %v12614_v31 = vld [vmem:[#allocation10 + $0x478] sm:$0xf0] }
 0x41f   :  { %v6046_v7 = vadd.f32 %v6045_v49, %v6017_v48  ;;  %v12870_v42 = vld [vmem:[#allocation10 + $0x678] sm:$0xf0] }
 0x420   :  { %v6065_v13 = vpop.f32.mrf.mxu0  ;;  %6423 = vmatpush.bf16.msra.mxu1 %v12905_v43  ;;  %v15380_v2 = vld [vmem:[#allocation10 + $0x61c] sm:$0xf] }
 0x421   :  { %v6066_v29 = vadd.f32 %v6065_v13, %v16417_v24  ;;  %v15388_v13 = vld [vmem:[#allocation10 + $0x65c] sm:$0xf] }
 0x422   :  { %v12873_v14 = vor.u32 %v15388_v13, %v12870_v42  ;;  %v12838_v18 = vld [vmem:[#allocation10 + $0x638] sm:$0xf0]  ;;  %v15053_v42 = vld [vmem:[#allocation9 + $0x3dc] sm:$0xf0] }
 0x423   :  { %v6047_v27 = vpop.f32.mrf.mxu3  ;;  %v16433_v16 = vadd.f32 %v6093_v35, %v6066_v29  ;;  %v15324_v35 = vld [vmem:[#allocation10 + $0x45c] sm:$0xf] }
 0x424   :  { %v12617_v29 = vor.u32 %v15324_v35, %v12614_v31  ;;  %6424 = vmatpush.bf16.msra.mxu1 %v12873_v14  ;;  %v15316_v35 = vld [vmem:[#allocation10 + $0x41c] sm:$0xf] }
 0x425   :  { %v6096_v45 = vpop.f32.mrf.mxu1  ;;  %17569 = vst [vmem:[#allocation44_spill] sm:$0xff] %v16433_v16  ;;  %v12841_v16 = vor.u32 %v15380_v2, %v12838_v18  ;;  %v12582_v31 = vld [vmem:[#allocation10 + $0x438] sm:$0xf0] }
 0x426   :  { %v6019_v60 = vpop.f32.mrf.mxu2  ;;  %6396 = vmatpush.bf16.msra.mxu0 %v12617_v29  ;;  %v12585_v29 = vor.u32 %v15316_v35, %v12582_v31  ;;  %v14060_v35 = vld [vmem:[#allocation9 + $0x7c0] sm:$0xf] }
 0x427   :  { %v16438_v49 = vadd.f32 %v6047_v27, %v6019_v60  ;;  %v14989_v60 = vld [vmem:[#allocation9 + $0x1dc] sm:$0xf0] }
 0x428   :  { %6319 = vmatmul.bf16.gmra.mxu1 %v16141_v40  ;;  %v6068_v6 = vpop.f32.mrf.mxu0  ;;  %6273 = vmatmul.bf16.gmra.mxu3 %v17548_v55  ;;  %v15181_v31 = vld [vmem:[#allocation9 + $0x7dc] sm:$0xf0] }
 0x429   :  { %v6069_v24 = vadd.f32 %v6068_v6, %v16423_v8  ;;  %v13292_v6 = vld [vmem:[#allocation9 + $0x1c0] sm:$0xf]  ;;  %6425 = vmatpush.bf16.msra.mxu1 %v12841_v16 }
 0x42a   :  { %v13293_v15 = vor.u32 %v14989_v60, %v13292_v6  ;;  %6397 = vmatpush.bf16.msra.mxu0 %v12585_v29  ;;  %v14981_v16 = vld [vmem:[#allocation9 + $0x19c] sm:$0xf0] }
 0x42b   :  { %v6050_v12 = vpop.f32.mrf.mxu3  ;;  %6291 = vmatmul.bf16.gmra.mxu0 %v16145_v58  ;;  %v16441_v48 = vadd.f32 %v6096_v45, %v6069_v24  ;;  %6245 = vmatmul.bf16.gmra.mxu2 %v17548_v55  ;;  %v13484_v29 = vld [vmem:[#allocation9 + $0x340] sm:$0xf] }
 0x42c   :  { %7726 = vmatpush.bf16.msra.mxu2 %v13293_v15  ;;  %v13516_v15 = vld [vmem:[#allocation9 + $0x380] sm:$0xf] }
 0x42d   :  { %v6098_v56 = vpop.f32.mrf.mxu1  ;;  %17570 = vst [vmem:[#allocation45_spill] sm:$0xff] %v16441_v48  ;;  %v13548_v48 = vld [vmem:[#allocation9 + $0x3c0] sm:$0xf] }
 0x42e   :  { %v6022_v27 = vpop.f32.mrf.mxu2  ;;  %v13549_v14 = vor.u32 %v15053_v42, %v13548_v48  ;;  %v15037_v42 = vld [vmem:[#allocation9 + $0x35c] sm:$0xf0] }
 0x42f   :  { %v16444_v43 = vadd.f32 %v6050_v12, %v6022_v27  ;;  %v13260_v27 = vld [vmem:[#allocation9 + $0x180] sm:$0xf] }
 0x430   :  { %v6070_v8 = vpop.f32.mrf.mxu0  ;;  %7754 = vmatpush.bf16.msra.mxu3 %v13549_v14  ;;  %v13261_v2 = vor.u32 %v14981_v16, %v13260_v27  ;;  %v13228_v27 = vld [vmem:[#allocation9 + $0x140] sm:$0xf] }
 0x431   :  { %v6071_v52 = vadd.f32 %v6070_v8, %v6043_v47  ;;  %v14973_v16 = vld [vmem:[#allocation9 + $0x15c] sm:$0xf0] }
 0x432   :  { %7727 = vmatpush.bf16.msra.mxu2 %v13261_v2  ;;  %v13229_v2 = vor.u32 %v14973_v16, %v13228_v27  ;;  %v13196_v27 = vld [vmem:[#allocation9 + $0x100] sm:$0xf] }
 0x433   :  { %v6052_v24 = vpop.f32.mrf.mxu3  ;;  %v16446_v13 = vadd.f32 %v6098_v56, %v6071_v52  ;;  %v15045_v56 = vld [vmem:[#allocation9 + $0x39c] sm:$0xf0] }
 0x434   :  { %v13804_v52 = vld [vmem:[#allocation9 + $0x5c0] sm:$0xf]  ;;  %v13517_v60 = vor.u32 %v15045_v56, %v13516_v15 }
 0x435   :  { %v6101_v45 = vpop.f32.mrf.mxu1  ;;  %v15117_v24 = vld [vmem:[#allocation9 + $0x5dc] sm:$0xf0] }
 0x436   :  { %v6024_v12 = vpop.f32.mrf.mxu2  ;;  %7755 = vmatpush.bf16.msra.mxu3 %v13517_v60  ;;  %v13772_v56 = vld [vmem:[#allocation9 + $0x580] sm:$0xf]  ;;  %7728 = vmatpush.bf16.msra.mxu2 %v13229_v2 }
 0x437   :  { %v13485_v12 = vor.u32 %v15037_v42, %v13484_v29  ;;  %v13452_v60 = vld [vmem:[#allocation9 + $0x300] sm:$0xf] }
 0x438   :  { %6324 = vmatmul.bf16.gmra.mxu1 %v16203_v54  ;;  %v6073_v47 = vpop.f32.mrf.mxu0  ;;  %6370 = vmatmul.bf16.vlgmr.msrb.gmra.mxu3 %v15997_v17  ;;  %v13805_v17 = vor.u32 %v15117_v24, %v13804_v52  ;;  %v15109_v52 = vld [vmem:[#allocation9 + $0x59c] sm:$0xf0] }
 0x439   :  { %v6074_v8 = vadd.f32 %v6073_v47, %v6046_v7  ;;  %v14061_v7 = vor.u32 %v15181_v31, %v14060_v35  ;;  %v13773_v35 = vor.u32 %v15109_v52, %v13772_v56  ;;  %v15029_v31 = vld [vmem:[#allocation9 + $0x31c] sm:$0xf0] }
 0x43a   :  { %7782 = vmatpush.bf16.msrb.mxu0 %v13805_v17  ;;  %7756 = vmatpush.bf16.msra.mxu3 %v13485_v12  ;;  %v13453_v17 = vor.u32 %v15029_v31, %v13452_v60  ;;  %v13420_v29 = vld [vmem:[#allocation9 + $0x2c0] sm:$0xf] }
 0x43b   :  { %v6147_v6 = vpop.f32.mrf.mxu3  ;;  %6296 = vmatmul.bf16.gmra.mxu0 %v16212_v28  ;;  %v16451_v48 = vadd.f32 %v6101_v45, %v6074_v8  ;;  %6342 = vmatmul.bf16.vlgmr.msrb.gmra.mxu2 %v16006_v36  ;;  %v15021_v42 = vld [vmem:[#allocation9 + $0x2dc] sm:$0xf0] }
 0x43c   :  { %7810 = vmatpush.bf16.msrb.mxu1 %v14061_v7  ;;  %v13421_v12 = vor.u32 %v15021_v42, %v13420_v29  ;;  %v14965_v16 = vld [vmem:[#allocation9 + $0x11c] sm:$0xf0] }
 0x43d   :  { %v6103_v18 = vpop.f32.mrf.mxu1  ;;  %v13197_v2 = vor.u32 %v14965_v16, %v13196_v27  ;;  %v13740_v60 = vld [vmem:[#allocation9 + $0x540] sm:$0xf] }
 0x43e   :  { %v6119_v47 = vpop.f32.mrf.mxu2  ;;  %7783 = vmatpush.bf16.msrb.mxu0 %v13773_v35  ;;  %7757 = vmatpush.bf16.msra.mxu3 %v13453_v17  ;;  %v15101_v35 = vld [vmem:[#allocation9 + $0x55c] sm:$0xf0] }
 0x43f   :  { %v16455_v8 = vadd.f32 %v6147_v6, %v6119_v47  ;;  %v15173_v6 = vld [vmem:[#allocation9 + $0x79c] sm:$0xf0]  ;;  %7729 = vmatpush.bf16.msra.mxu2 %v13197_v2 }
 0x440   :  { %v6075_v14 = vpop.f32.mrf.mxu0  ;;  %v13388_v31 = vld [vmem:[#allocation9 + $0x280] sm:$0xf] }
 0x441   :  { %v6076_v45 = vadd.f32 %v6075_v14, %v16438_v49  ;;  %v14028_v49 = vld [vmem:[#allocation9 + $0x780] sm:$0xf] }
 0x442   :  { %v14029_v7 = vor.u32 %v15173_v6, %v14028_v49  ;;  %7758 = vmatpush.bf16.msra.mxu3 %v13421_v12  ;;  %v15013_v49 = vld [vmem:[#allocation9 + $0x29c] sm:$0xf0] }
 0x443   :  { %v6149_v36 = vpop.f32.mrf.mxu3  ;;  %v16457_v24 = vadd.f32 %v6103_v18, %v6076_v45  ;;  %v13389_v6 = vor.u32 %v15013_v49, %v13388_v31  ;;  %v13164_v29 = vld [vmem:[#allocation9 + $0xc0] sm:$0xf] }
 0x444   :  { %7811 = vmatpush.bf16.msrb.mxu1 %v14029_v7  ;;  %v14957_v42 = vld [vmem:[#allocation9 + $0xdc] sm:$0xf0] }
 0x445   :  { %v6106_v15 = vpop.f32.mrf.mxu1  ;;  %v15005_v12 = vld [vmem:[#allocation9 + $0x25c] sm:$0xf0] }
 0x446   :  { %v6121_v47 = vpop.f32.mrf.mxu2  ;;  %7759 = vmatpush.bf16.msra.mxu3 %v13389_v6  ;;  %v13132_v2 = vld [vmem:[#allocation9 + $0x80] sm:$0xf] }
 0x447   :  { %v16462_v45 = vadd.f32 %v6149_v36, %v6121_v47  ;;  %v15165_v36 = vld [vmem:[#allocation9 + $0x75c] sm:$0xf0] }
 0x448   :  { %6329 = vmatmul.bf16.gmra.mxu1 %v17548_v55  ;;  %v6078_v14 = vpop.f32.mrf.mxu0  ;;  %6375 = vmatmul.bf16.gmra.mxu3 %v16129_v25  ;;  %v13741_v25 = vor.u32 %v15101_v35, %v13740_v60  ;;  %v13356_v47 = vld [vmem:[#allocation9 + $0x240] sm:$0xf] }
 0x449   :  { %v6079_v18 = vadd.f32 %v6078_v14, %v16444_v43  ;;  %v13996_v43 = vld [vmem:[#allocation9 + $0x740] sm:$0xf]  ;;  %v13165_v14 = vor.u32 %v14957_v42, %v13164_v29 }
 0x44a   :  { %v13997_v7 = vor.u32 %v15165_v36, %v13996_v43  ;;  %7784 = vmatpush.bf16.msrb.mxu0 %v13741_v25  ;;  %v13708_v31 = vld [vmem:[#allocation9 + $0x500] sm:$0xf] }
 0x44b   :  { %v6152_v52 = vpop.f32.mrf.mxu3  ;;  %6301 = vmatmul.bf16.gmra.mxu0 %v17548_v55  ;;  %v16465_v17 = vadd.f32 %v6106_v15, %v6079_v18  ;;  %6347 = vmatmul.bf16.gmra.mxu2 %v16133_v38  ;;  %v13357_v18 = vor.u32 %v15005_v12, %v13356_v47  ;;  %v15093_v49 = vld [vmem:[#allocation9 + $0x51c] sm:$0xf0] }
 0x44c   :  { %7812 = vmatpush.bf16.msrb.mxu1 %v13997_v7  ;;  %7730 = vmatpush.bf16.msra.mxu2 %v13165_v14  ;;  %v13324_v25 = vld [vmem:[#allocation9 + $0x200] sm:$0xf]  ;;  %v13709_v43 = vor.u32 %v15093_v49, %v13708_v31 }
 0x44d   :  { %v6108_v56 = vpop.f32.mrf.mxu1  ;;  %7760 = vmatpush.bf16.msra.mxu3 %v13357_v18  ;;  %v14997_v36 = vld [vmem:[#allocation9 + $0x21c] sm:$0xf0] }
 0x44e   :  { %v6124_v15 = vpop.f32.mrf.mxu2  ;;  %v14949_v56 = vld [vmem:[#allocation9 + $0x9c] sm:$0xf0]  ;;  %v13325_v6 = vor.u32 %v14997_v36, %v13324_v25  ;;  %7785 = vmatpush.bf16.msrb.mxu0 %v13709_v43 }
 0x44f   :  { %v16468_v16 = vadd.f32 %v6152_v52, %v6124_v15  ;;  %v13133_v60 = vor.u32 %v14949_v56, %v13132_v2  ;;  %v13100_v7 = vld [vmem:[#allocation9 + $0x40] sm:$0xf] }
 0x450   :  { %v6080_v27 = vpop.f32.mrf.mxu0  ;;  %v14941_v29 = vld [vmem:[#allocation9 + $0x5c] sm:$0xf0] }
 0x451   :  { %7731 = vmatpush.bf16.msra.mxu2 %v13133_v60  ;;  %v13964_v52 = vld [vmem:[#allocation9 + $0x700] sm:$0xf]  ;;  %v13101_v14 = vor.u32 %v14941_v29, %v13100_v7  ;;  %7761 = vmatpush.bf16.msra.mxu3 %v13325_v6 }
 0x452   :  { %v15157_v42 = vld [vmem:[#allocation9 + $0x71c] sm:$0xf0] }
 0x453   :  { %v6154_v35 = vpop.f32.mrf.mxu3  ;;  %v13965_v47 = vor.u32 %v15157_v42, %v13964_v52  ;;  %v13068_v2 = vld [vmem:[#allocation9] sm:$0xf] }
 0x454   :  { %v14933_v56 = vld [vmem:[#allocation9 + $0x1c] sm:$0xf0] }
 0x455   :  { %v6203_v38 = vpop.f32.mrf.mxu1  ;;  %7732 = vmatpush.bf16.msra.mxu2 %v13101_v14  ;;  %7813 = vmatpush.bf16.msrb.mxu1 %v13965_v47  ;;  %v13069_v60 = vor.u32 %v14933_v56, %v13068_v2  ;;  %v13676_v49 = vld [vmem:[#allocation9 + $0x4c0] sm:$0xf] }
 0x456   :  { %v6126_v27 = vpop.f32.mrf.mxu2  ;;  %v15085_v25 = vld [vmem:[#allocation9 + $0x4dc] sm:$0xf0] }
 0x457   :  { %v6155_v18 = vadd.f32 %v6154_v35, %v6126_v27  ;;  %v13932_v43 = vld [vmem:[#allocation9 + $0x6c0] sm:$0xf] }
 0x458   :  { %6426 = vmatmul.bf16.vlgmr.msra.gmra.mxu1 %v16021_v39  ;;  %v6175_v12 = vpop.f32.mrf.mxu0  ;;  %6380 = vmatmul.bf16.gmra.mxu3 %v16183_v53  ;;  %v13677_v53 = vor.u32 %v15085_v25, %v13676_v49  ;;  %v15149_v6 = vld [vmem:[#allocation9 + $0x6dc] sm:$0xf0] }
 0x459   :  { %v6176_v15 = vadd.f32 %v6175_v12, %v16455_v8  ;;  %7733 = vmatpush.bf16.msra.mxu2 %v13069_v60  ;;  %v13933_v8 = vor.u32 %v15149_v6, %v13932_v43  ;;  %v13644_v14 = vld [vmem:[#allocation9 + $0x480] sm:$0xf] }
 0x45a   :  { %7786 = vmatpush.bf16.msrb.mxu0 %v13677_v53  ;;  %v15077_v47 = vld [vmem:[#allocation9 + $0x49c] sm:$0xf0] }
 0x45b   :  { %v6157_v39 = vpop.f32.mrf.mxu3  ;;  %6398 = vmatmul.bf16.vlgmr.msra.gmra.mxu0 %v16030_v59  ;;  %v16474_v36 = vadd.f32 %v6203_v38, %v6176_v15  ;;  %6352 = vmatmul.bf16.gmra.mxu2 %v16191_v10  ;;  %v13645_v38 = vor.u32 %v15077_v47, %v13644_v14  ;;  %v13900_v27 = vld [vmem:[#allocation9 + $0x680] sm:$0xf]  ;;  %v13294_v47 = vld [vmem:[#allocation9 + $0x1e0] sm:$0xf0] }
 0x45c   :  { %7814 = vmatpush.bf16.msrb.mxu1 %v13933_v8  ;;  %v15141_v10 = vld [vmem:[#allocation9 + $0x69c] sm:$0xf0] }
 0x45d   :  { %v6205_v31 = vpop.f32.mrf.mxu1  ;;  %v13901_v15 = vor.u32 %v15141_v10, %v13900_v27  ;;  %v15069_v25 = vld [vmem:[#allocation9 + $0x45c] sm:$0xf0] }
 0x45e   :  { %v6129_v7 = vpop.f32.mrf.mxu2  ;;  %7787 = vmatpush.bf16.msrb.mxu0 %v13645_v38  ;;  %v15133_v6 = vld [vmem:[#allocation9 + $0x65c] sm:$0xf0] }
 0x45f   :  { %v6158_v52 = vadd.f32 %v6157_v39, %v6129_v7  ;;  %v13836_v7 = vld [vmem:[#allocation9 + $0x600] sm:$0xf] }
 0x460   :  { %v6177_v35 = vpop.f32.mrf.mxu0  ;;  %7815 = vmatpush.bf16.msrb.mxu1 %v13901_v15  ;;  %v13580_v15 = vld [vmem:[#allocation9 + $0x400] sm:$0xf] }
 0x461   :  { %v6178_v29 = vadd.f32 %v6177_v35, %v16462_v45 }
 0x463   :  { %v6159_v59 = vpop.f32.mrf.mxu3  ;;  %v16478_v12 = vadd.f32 %v6205_v31, %v6178_v29  ;;  %v13612_v31 = vld [vmem:[#allocation9 + $0x440] sm:$0xf] }
 0x464   :  { %v13613_v53 = vor.u32 %v15069_v25, %v13612_v31  ;;  %v15125_v29 = vld [vmem:[#allocation9 + $0x61c] sm:$0xf0]  ;;  %v13550_v25 = vld [vmem:[#allocation9 + $0x3e0] sm:$0xf0] }
 0x465   :  { %v6208_v42 = vpop.f32.mrf.mxu1  ;;  %v13837_v38 = vor.u32 %v15125_v29, %v13836_v7  ;;  %v13518_v29 = vld [vmem:[#allocation9 + $0x3a0] sm:$0xf0] }
 0x466   :  { %v6131_v56 = vpop.f32.mrf.mxu2  ;;  %7788 = vmatpush.bf16.msrb.mxu0 %v13613_v53 }
 0x467   :  { %v16483_v60 = vadd.f32 %v6159_v59, %v6131_v56  ;;  %v15049_v56 = vld [vmem:[#allocation9 + $0x3c4] sm:$0xf] }
 0x468   :  { %6431 = vmatmul.bf16.gmra.mxu1 %v16141_v40  ;;  %v6180_v2 = vpop.f32.mrf.mxu0  ;;  %6385 = vmatmul.bf16.gmra.mxu3 %v17548_v55  ;;  %v13868_v40 = vld [vmem:[#allocation9 + $0x640] sm:$0xf] }
 0x469   :  { %v6181_v45 = vadd.f32 %v6180_v2, %v16468_v16  ;;  %v13869_v8 = vor.u32 %v15133_v6, %v13868_v40  ;;  %v15061_v2 = vld [vmem:[#allocation9 + $0x41c] sm:$0xf0]  ;;  %v13553_v40 = vor.u32 %v15049_v56, %v13550_v25  ;;  %v14977_v6 = vld [vmem:[#allocation9 + $0x184] sm:$0xf] }
 0x46a   :  { %v13581_v31 = vor.u32 %v15061_v2, %v13580_v15  ;;  %v15033_v15 = vld [vmem:[#allocation9 + $0x344] sm:$0xf] }
 0x46b   :  { %v6162_v49 = vpop.f32.mrf.mxu3  ;;  %6403 = vmatmul.bf16.gmra.mxu0 %v16145_v58  ;;  %v16486_v43 = vadd.f32 %v6208_v42, %v6181_v45  ;;  %6357 = vmatmul.bf16.gmra.mxu2 %v17548_v55  ;;  %v14985_v58 = vld [vmem:[#allocation9 + $0x1c4] sm:$0xf] }
 0x46c   :  { %7816 = vmatpush.bf16.msrb.mxu1 %v13869_v8  ;;  %v13297_v27 = vor.u32 %v14985_v58, %v13294_v47  ;;  %7789 = vmatpush.bf16.msrb.mxu0 %v13581_v31  ;;  %v13262_v8 = vld [vmem:[#allocation9 + $0x1a0] sm:$0xf0] }
 0x46d   :  { %v6210_v39 = vpop.f32.mrf.mxu1  ;;  %7866 = vmatpush.bf16.msrb.mxu3 %v13553_v40  ;;  %v13806_v47 = vld [vmem:[#allocation9 + $0x5e0] sm:$0xf0] }
 0x46e   :  { %v6134_v35 = vpop.f32.mrf.mxu2  ;;  %7838 = vmatpush.bf16.msrb.mxu2 %v13297_v27  ;;  %v14062_v27 = vld [vmem:[#allocation9 + $0x7e0] sm:$0xf0] }
 0x46f   :  { %v16489_v14 = vadd.f32 %v6162_v49, %v6134_v35  ;;  %v13486_v2 = vld [vmem:[#allocation9 + $0x360] sm:$0xf0] }
 0x470   :  { %v6182_v16 = vpop.f32.mrf.mxu0  ;;  %7817 = vmatpush.bf16.msrb.mxu1 %v13837_v38  ;;  %v15177_v38 = vld [vmem:[#allocation9 + $0x7c4] sm:$0xf]  ;;  %v13489_v31 = vor.u32 %v15033_v15, %v13486_v2 }
 0x471   :  { %v6183_v59 = vadd.f32 %v6182_v16, %v6155_v18  ;;  %v13265_v16 = vor.u32 %v14977_v6, %v13262_v8  ;;  %v14969_v40 = vld [vmem:[#allocation9 + $0x144] sm:$0xf] }
 0x472   :  { %v15105_v8 = vld [vmem:[#allocation9 + $0x584] sm:$0xf] }
 0x473   :  { %v6164_v10 = vpop.f32.mrf.mxu3  ;;  %v16491_v45 = vadd.f32 %v6210_v39, %v6183_v59  ;;  %v15041_v39 = vld [vmem:[#allocation9 + $0x384] sm:$0xf]  ;;  %7839 = vmatpush.bf16.msrb.mxu2 %v13265_v16 }
 0x474   :  { %v15113_v59 = vld [vmem:[#allocation9 + $0x5c4] sm:$0xf]  ;;  %v14065_v10 = vor.u32 %v15177_v38, %v14062_v27 }
 0x475   :  { %v6213_v42 = vpop.f32.mrf.mxu1  ;;  %v13774_v16 = vld [vmem:[#allocation9 + $0x5a0] sm:$0xf0] }
 0x476   :  { %v6136_v49 = vpop.f32.mrf.mxu2  ;;  %7922 = vmatpush.bf16.msra.mxu1 %v14065_v10  ;;  %v15017_v27 = vld [vmem:[#allocation9 + $0x2c4] sm:$0xf] }
 0x478   :  { %6436 = vmatmul.bf16.gmra.mxu1 %v16203_v54  ;;  %v6185_v18 = vpop.f32.mrf.mxu0  ;;  %7762 = vmatmul.bf16.vlgmr.msra.gmra.mxu3 %v15950_v57  ;;  %v13521_v54 = vor.u32 %v15041_v39, %v13518_v29  ;;  %v15025_v39 = vld [vmem:[#allocation9 + $0x304] sm:$0xf] }
 0x479   :  { %v6186_v53 = vadd.f32 %v6185_v18, %v6158_v52  ;;  %v13809_v52 = vor.u32 %v15113_v59, %v13806_v47  ;;  %v13230_v18 = vld [vmem:[#allocation9 + $0x160] sm:$0xf0]  ;;  %v13777_v59 = vor.u32 %v15105_v8, %v13774_v16 }
 0x47a   :  { %7867 = vmatpush.bf16.msrb.mxu3 %v13521_v54  ;;  %v13233_v49 = vor.u32 %v14969_v40, %v13230_v18  ;;  %v13454_v54 = vld [vmem:[#allocation9 + $0x320] sm:$0xf0] }
 0x47b   :  { %v6259_v7 = vpop.f32.mrf.mxu3  ;;  %6408 = vmatmul.bf16.gmra.mxu0 %v16212_v28  ;;  %v16496_v58 = vadd.f32 %v6213_v42, %v6186_v53  ;;  %7734 = vmatmul.bf16.vlgmr.msra.gmra.mxu2 %v15958_v11  ;;  %v13457_v47 = vor.u32 %v15025_v39, %v13454_v54  ;;  %v13742_v8 = vld [vmem:[#allocation9 + $0x560] sm:$0xf0] }
 0x47c   :  { %7894 = vmatpush.bf16.msra.mxu0 %v13809_v52  ;;  %7840 = vmatpush.bf16.msrb.mxu2 %v13233_v49  ;;  %v13422_v52 = vld [vmem:[#allocation9 + $0x2e0] sm:$0xf0] }
 0x47d   :  { %v6215_v35 = vpop.f32.mrf.mxu1  ;;  %v13425_v2 = vor.u32 %v15017_v27, %v13422_v52  ;;  %v15097_v49 = vld [vmem:[#allocation9 + $0x544] sm:$0xf] }
 0x47e   :  { %v6231_v56 = vpop.f32.mrf.mxu2  ;;  %7868 = vmatpush.bf16.msrb.mxu3 %v13489_v31  ;;  %v13198_v31 = vld [vmem:[#allocation9 + $0x120] sm:$0xf0] }
 0x47f   :  { %v16500_v25 = vadd.f32 %v6259_v7, %v6231_v56  ;;  %v14030_v7 = vld [vmem:[#allocation9 + $0x7a0] sm:$0xf0] }
 0x480   :  { %v6187_v28 = vpop.f32.mrf.mxu0  ;;  %7895 = vmatpush.bf16.msra.mxu0 %v13777_v59  ;;  %v14961_v56 = vld [vmem:[#allocation9 + $0x104] sm:$0xf]  ;;  %v13745_v59 = vor.u32 %v15097_v49, %v13742_v8 }
 0x481   :  { %v6188_v42 = vadd.f32 %v6187_v28, %v16483_v60  ;;  %v15169_v60 = vld [vmem:[#allocation9 + $0x784] sm:$0xf] }
 0x482   :  { %7869 = vmatpush.bf16.msrb.mxu3 %v13457_v47  ;;  %v14033_v38 = vor.u32 %v15169_v60, %v14030_v7  ;;  %v15009_v16 = vld [vmem:[#allocation9 + $0x284] sm:$0xf] }
 0x483   :  { %v6261_v6 = vpop.f32.mrf.mxu3  ;;  %v16502_v29 = vadd.f32 %v6215_v35, %v6188_v42  ;;  %v13201_v42 = vor.u32 %v14961_v56, %v13198_v31  ;;  %v13390_v54 = vld [vmem:[#allocation9 + $0x2a0] sm:$0xf0] }
 0x484   :  { %7923 = vmatpush.bf16.msra.mxu1 %v14033_v38  ;;  %v13393_v47 = vor.u32 %v15009_v16, %v13390_v54  ;;  %v14953_v7 = vld [vmem:[#allocation9 + $0xc4] sm:$0xf]  ;;  %7896 = vmatpush.bf16.msra.mxu0 %v13745_v59 }
 0x485   :  { %v6218_v53 = vpop.f32.mrf.mxu1  ;;  %7841 = vmatpush.bf16.msrb.mxu2 %v13201_v42  ;;  %v13166_v38 = vld [vmem:[#allocation9 + $0xe0] sm:$0xf0] }
 0x486   :  { %v6233_v15 = vpop.f32.mrf.mxu2  ;;  %7870 = vmatpush.bf16.msrb.mxu3 %v13425_v2  ;;  %v13169_v27 = vor.u32 %v14953_v7, %v13166_v38  ;;  %v13358_v52 = vld [vmem:[#allocation9 + $0x260] sm:$0xf0] }
 0x487   :  { %v16507_v28 = vadd.f32 %v6261_v6, %v6233_v15  ;;  %v13998_v6 = vld [vmem:[#allocation9 + $0x760] sm:$0xf0] }
 0x488   :  { %6441 = vmatmul.bf16.gmra.mxu1 %v17548_v55  ;;  %v6190_v10 = vpop.f32.mrf.mxu0  ;;  %7767 = vmatmul.bf16.gmra.mxu3 %v16045_v3  ;;  %v13134_v56 = vld [vmem:[#allocation9 + $0xa0] sm:$0xf0] }
 0x489   :  { %v6191_v35 = vadd.f32 %v6190_v10, %v16489_v14  ;;  %v15161_v14 = vld [vmem:[#allocation9 + $0x744] sm:$0xf]  ;;  %7842 = vmatpush.bf16.msrb.mxu2 %v13169_v27 }
 0x48a   :  { %v14001_v60 = vor.u32 %v15161_v14, %v13998_v6  ;;  %7871 = vmatpush.bf16.msrb.mxu3 %v13393_v47  ;;  %v15089_v49 = vld [vmem:[#allocation9 + $0x504] sm:$0xf] }
 0x48b   :  { %v6264_v18 = vpop.f32.mrf.mxu3  ;;  %6413 = vmatmul.bf16.gmra.mxu0 %v17548_v55  ;;  %v16510_v39 = vadd.f32 %v6218_v53, %v6191_v35  ;;  %7739 = vmatmul.bf16.gmra.mxu2 %v16054_v46  ;;  %v15001_v55 = vld [vmem:[#allocation9 + $0x244] sm:$0xf] }
 0x48c   :  { %7924 = vmatpush.bf16.msra.mxu1 %v14001_v60  ;;  %v13361_v15 = vor.u32 %v15001_v55, %v13358_v52  ;;  %v14945_v35 = vld [vmem:[#allocation9 + $0x84] sm:$0xf] }
 0x48d   :  { %v6220_v40 = vpop.f32.mrf.mxu1  ;;  %v13137_v31 = vor.u32 %v14945_v35, %v13134_v56  ;;  %v13710_v8 = vld [vmem:[#allocation9 + $0x520] sm:$0xf0] }
 0x48e   :  { %v6236_v53 = vpop.f32.mrf.mxu2  ;;  %7872 = vmatpush.bf16.msrb.mxu3 %v13361_v15  ;;  %v14993_v16 = vld [vmem:[#allocation9 + $0x204] sm:$0xf]  ;;  %v13713_v59 = vor.u32 %v15089_v49, %v13710_v8 }
 0x48f   :  { %v16513_v2 = vadd.f32 %v6264_v18, %v6236_v53  ;;  %7843 = vmatpush.bf16.msrb.mxu2 %v13137_v31  ;;  %v13326_v54 = vld [vmem:[#allocation9 + $0x220] sm:$0xf0] }
 0x490   :  { %v6192_v10 = vpop.f32.mrf.mxu0  ;;  %v13329_v14 = vor.u32 %v14993_v16, %v13326_v54  ;;  %v14937_v6 = vld [vmem:[#allocation9 + $0x44] sm:$0xf]  ;;  %7897 = vmatpush.bf16.msra.mxu0 %v13713_v59 }
 0x491   :  { %v13102_v47 = vld [vmem:[#allocation9 + $0x60] sm:$0xf0] }
 0x492   :  { %v15153_v18 = vld [vmem:[#allocation9 + $0x704] sm:$0xf]  ;;  %v13105_v7 = vor.u32 %v14937_v6, %v13102_v47  ;;  %7873 = vmatpush.bf16.msrb.mxu3 %v13329_v14 }
 0x493   :  { %v6266_v40 = vpop.f32.mrf.mxu3  ;;  %v13966_v60 = vld [vmem:[#allocation9 + $0x720] sm:$0xf0] }
 0x494   :  { %v13969_v38 = vor.u32 %v15153_v18, %v13966_v60  ;;  %7844 = vmatpush.bf16.msrb.mxu2 %v13105_v7  ;;  %v14929_v53 = vld [vmem:[#allocation9 + $0x4] sm:$0xf] }
 0x495   :  { %v6315_v42 = vpop.f32.mrf.mxu1  ;;  %v13070_v15 = vld [vmem:[#allocation9 + $0x20] sm:$0xf0] }
 0x496   :  { %v6238_v55 = vpop.f32.mrf.mxu2  ;;  %7925 = vmatpush.bf16.msra.mxu1 %v13969_v38  ;;  %v13073_v35 = vor.u32 %v14929_v53, %v13070_v15  ;;  %v15081_v49 = vld [vmem:[#allocation9 + $0x4c4] sm:$0xf] }
 0x497   :  { %v6267_v10 = vadd.f32 %v6266_v40, %v6238_v55  ;;  %v13678_v8 = vld [vmem:[#allocation9 + $0x4e0] sm:$0xf0] }
 0x498   :  { %7818 = vmatmul.bf16.vlgmr.msrb.gmra.mxu1 %v15972_v63  ;;  %v6287_v27 = vpop.f32.mrf.mxu0  ;;  %7772 = vmatmul.bf16.gmra.mxu3 %v16137_v34  ;;  %v15145_v16 = vld [vmem:[#allocation9 + $0x6c4] sm:$0xf]  ;;  %v13681_v54 = vor.u32 %v15081_v49, %v13678_v8 }
 0x499   :  { %v6288_v52 = vadd.f32 %v6287_v27, %v16500_v25  ;;  %7845 = vmatpush.bf16.msrb.mxu2 %v13073_v35  ;;  %v13934_v14 = vld [vmem:[#allocation9 + $0x6e0] sm:$0xf0] }
 0x49a   :  { %v13937_v25 = vor.u32 %v15145_v16, %v13934_v14  ;;  %7898 = vmatpush.bf16.msra.mxu0 %v13681_v54  ;;  %v15073_v38 = vld [vmem:[#allocation9 + $0x484] sm:$0xf] }
 0x49b   :  { %v6269_v31 = vpop.f32.mrf.mxu3  ;;  %7790 = vmatmul.bf16.vlgmr.msrb.gmra.mxu0 %v15980_v19  ;;  %v16519_v59 = vadd.f32 %v6315_v42, %v6288_v52  ;;  %7744 = vmatmul.bf16.gmra.mxu2 %v16156_v1  ;;  %v13646_v27 = vld [vmem:[#allocation9 + $0x4a0] sm:$0xf0]  ;;  %v16527_v52 = vpack.c.bf16 %v16178_v22, %v16178_v22 }
 0x49c   :  { %7926 = vmatpush.bf16.msra.mxu1 %v13937_v25  ;;  %v13649_v42 = vor.u32 %v15073_v38, %v13646_v27  ;;  %v15137_v53 = vld [vmem:[#allocation9 + $0x684] sm:$0xf] }
 0x49d   :  { %v6317_v56 = vpop.f32.mrf.mxu1  ;;  %17571 = vst [vmem:[#allocation46_spill] sm:$0xff] %v16519_v59  ;;  %v13902_v15 = vld [vmem:[#allocation9 + $0x6a0] sm:$0xf0] }
 0x49e   :  { %v6241_v6 = vpop.f32.mrf.mxu2  ;;  %7899 = vmatpush.bf16.msra.mxu0 %v13649_v42  ;;  %v13905_v35 = vor.u32 %v15137_v53, %v13902_v15  ;;  %v15065_v54 = vld [vmem:[#allocation9 + $0x444] sm:$0xf]  ;;  %v13300_v15 = vld [vmem:[#allocation9 + $0x1c8] sm:$0xf] }
 0x49f   :  { %v6270_v18 = vadd.f32 %v6269_v31, %v6241_v6  ;;  %v13614_v14 = vld [vmem:[#allocation9 + $0x460] sm:$0xf0] }
 0x4a0   :  { %v6289_v40 = vpop.f32.mrf.mxu0  ;;  %7927 = vmatpush.bf16.msra.mxu1 %v13905_v35  ;;  %v15129_v25 = vld [vmem:[#allocation9 + $0x644] sm:$0xf]  ;;  %v13617_v6 = vor.u32 %v15065_v54, %v13614_v14  ;;  %v14990_v35 = vld [vmem:[#allocation9 + $0x1e4] sm:$0xf0] }
 0x4a1   :  { %v6290_v47 = vadd.f32 %v6289_v40, %v16507_v28  ;;  %v13838_v27 = vld [vmem:[#allocation9 + $0x620] sm:$0xf0] }
 0x4a2   :  { %7900 = vmatpush.bf16.msra.mxu0 %v13617_v6  ;;  %v15057_v54 = vld [vmem:[#allocation9 + $0x404] sm:$0xf] }
 0x4a3   :  { %v6271_v7 = vpop.f32.mrf.mxu3  ;;  %v16523_v55 = vadd.f32 %v6317_v56, %v6290_v47  ;;  %v16536_v56 = vpack.c.bf16 %v16186_v62, %v16186_v62  ;;  %v13870_v47 = vld [vmem:[#allocation9 + $0x660] sm:$0xf0] }
 0x4a4   :  { %v15121_v62 = vld [vmem:[#allocation9 + $0x604] sm:$0xf] }
 0x4a5   :  { %v6320_v60 = vpop.f32.mrf.mxu1  ;;  %17572 = vst [vmem:[#allocation47_spill] sm:$0xff] %v16523_v55  ;;  %v13582_v14 = vld [vmem:[#allocation9 + $0x420] sm:$0xf0] }
 0x4a6   :  { %v6243_v28 = vpop.f32.mrf.mxu2  ;;  %v13585_v6 = vor.u32 %v15057_v54, %v13582_v14  ;;  %v14068_v54 = vld [vmem:[#allocation9 + $0x7c8] sm:$0xf] }
 0x4a7   :  { %v16532_v8 = vadd.f32 %v6271_v7, %v6243_v28  ;;  %v13301_v28 = vor.u32 %v14990_v35, %v13300_v15  ;;  %v15182_v14 = vld [vmem:[#allocation9 + $0x7e4] sm:$0xf0] }
 0x4a8   :  { %7823 = vmatmul.bf16.gmra.mxu1 %v16069_v41  ;;  %v6292_v49 = vpop.f32.mrf.mxu0  ;;  %7777 = vmatmul.bf16.gmra.mxu3 %v16527_v52 }
 0x4a9   :  { %v6293_v31 = vadd.f32 %v6292_v49, %v16513_v2  ;;  %v13873_v2 = vor.u32 %v15129_v25, %v13870_v47  ;;  %v13841_v49 = vor.u32 %v15121_v62, %v13838_v27  ;;  %7950 = vmatpush.bf16.msra.mxu2 %v13301_v28  ;;  %v15054_v47 = vld [vmem:[#allocation9 + $0x3e4] sm:$0xf0]  ;;  %7901 = vmatpush.bf16.msra.mxu0 %v13585_v6 }
 0x4aa   :  { %v14982_v62 = vld [vmem:[#allocation9 + $0x1a4] sm:$0xf0]  ;;  %v14069_v6 = vor.u32 %v15182_v14, %v14068_v54  ;;  %v16559_v14 = vpack.c.bf16 %v16198_v37, %v16198_v37  ;;  %v16565_v37 = vpack.c.bf16 %v16206_v20, %v16206_v20 }
 0x4ab   :  { %v6274_v16 = vpop.f32.mrf.mxu3  ;;  %7795 = vmatmul.bf16.gmra.mxu0 %v16078_v61  ;;  %v16539_v40 = vadd.f32 %v6320_v60, %v6293_v31  ;;  %7749 = vmatmul.bf16.gmra.mxu2 %v16536_v56 }
 0x4ac   :  { %7928 = vmatpush.bf16.msra.mxu1 %v13873_v2 }
 0x4ad   :  { %v6322_v22 = vpop.f32.mrf.mxu1  ;;  %17573 = vst [vmem:[#allocation48_spill] sm:$0xff] %v16539_v40  ;;  %v13556_v40 = vld [vmem:[#allocation9 + $0x3c8] sm:$0xf] }
 0x4ae   :  { %v6246_v38 = vpop.f32.mrf.mxu2  ;;  %v13557_v2 = vor.u32 %v15054_v47, %v13556_v40  ;;  %v13492_v47 = vld [vmem:[#allocation9 + $0x348] sm:$0xf] }
 0x4af   :  { %v16542_v53 = vadd.f32 %v6274_v16, %v6246_v38  ;;  %v13268_v38 = vld [vmem:[#allocation9 + $0x188] sm:$0xf] }
 0x4b0   :  { %v6294_v7 = vpop.f32.mrf.mxu0  ;;  %7929 = vmatpush.bf16.msra.mxu1 %v13841_v49  ;;  %7978 = vmatpush.bf16.msra.mxu3 %v13557_v2  ;;  %v13269_v27 = vor.u32 %v14982_v62, %v13268_v38  ;;  %v13812_v49 = vld [vmem:[#allocation9 + $0x5c8] sm:$0xf] }
 0x4b1   :  { %v6295_v42 = vadd.f32 %v6294_v7, %v6267_v10  ;;  %v15038_v2 = vld [vmem:[#allocation9 + $0x364] sm:$0xf0] }
 0x4b2   :  { %7951 = vmatpush.bf16.msra.mxu2 %v13269_v27  ;;  %v13493_v38 = vor.u32 %v15038_v2, %v13492_v47  ;;  %v13236_v62 = vld [vmem:[#allocation9 + $0x148] sm:$0xf] }
 0x4b3   :  { %v6276_v31 = vpop.f32.mrf.mxu3  ;;  %v16544_v25 = vadd.f32 %v6322_v22, %v6295_v42  ;;  %v13524_v22 = vld [vmem:[#allocation9 + $0x388] sm:$0xf] }
 0x4b4   :  { %v15046_v42 = vld [vmem:[#allocation9 + $0x3a4] sm:$0xf0]  ;;  %8034 = vmatpush.bf16.msrb.mxu1 %v14069_v6 }
 0x4b5   :  { %v6325_v60 = vpop.f32.mrf.mxu1  ;;  %17574 = vst [vmem:[#allocation49_spill] sm:$0xff] %v16544_v25  ;;  %v13525_v28 = vor.u32 %v15046_v42, %v13524_v22  ;;  %v15118_v31 = vld [vmem:[#allocation9 + $0x5e4] sm:$0xf0] }
 0x4b6   :  { %v6248_v16 = vpop.f32.mrf.mxu2  ;;  %v14974_v27 = vld [vmem:[#allocation9 + $0x164] sm:$0xf0] }
 0x4b7   :  { %7979 = vmatpush.bf16.msra.mxu3 %v13525_v28  ;;  %v13237_v22 = vor.u32 %v14974_v27, %v13236_v62  ;;  %v13460_v28 = vld [vmem:[#allocation9 + $0x308] sm:$0xf] }
 0x4b8   :  { %7828 = vmatmul.bf16.gmra.mxu1 %v16165_v51  ;;  %v6297_v10 = vpop.f32.mrf.mxu0  ;;  %7874 = vmatmul.bf16.vlgmr.msrb.gmra.mxu3 %v15950_v57  ;;  %v14036_v6 = vld [vmem:[#allocation9 + $0x788] sm:$0xf] }
 0x4b9   :  { %v6298_v7 = vadd.f32 %v6297_v10, %v6270_v18  ;;  %v13813_v18 = vor.u32 %v15118_v31, %v13812_v49  ;;  %v13780_v49 = vld [vmem:[#allocation9 + $0x588] sm:$0xf]  ;;  %7952 = vmatpush.bf16.msra.mxu2 %v13237_v22 }
 0x4ba   :  { %v15110_v31 = vld [vmem:[#allocation9 + $0x5a4] sm:$0xf0] }
 0x4bb   :  { %v6371_v35 = vpop.f32.mrf.mxu3  ;;  %7800 = vmatmul.bf16.gmra.mxu0 %v16172_v5  ;;  %v16549_v40 = vadd.f32 %v6325_v60, %v6298_v7  ;;  %7846 = vmatmul.bf16.vlgmr.msrb.gmra.mxu2 %v15958_v11  ;;  %v15174_v47 = vld [vmem:[#allocation9 + $0x7a4] sm:$0xf0] }
 0x4bc   :  { %8006 = vmatpush.bf16.msrb.mxu0 %v13813_v18  ;;  %7980 = vmatpush.bf16.msra.mxu3 %v13493_v38  ;;  %v13781_v18 = vor.u32 %v15110_v31, %v13780_v49  ;;  %v14037_v2 = vor.u32 %v15174_v47, %v14036_v6  ;;  %v13204_v22 = vld [vmem:[#allocation9 + $0x108] sm:$0xf] }
 0x4bd   :  { %v6327_v15 = vpop.f32.mrf.mxu1  ;;  %17575 = vst [vmem:[#allocation50_spill] sm:$0xff] %v16549_v40  ;;  %v14966_v49 = vld [vmem:[#allocation9 + $0x124] sm:$0xf0] }
 0x4be   :  { %v6343_v16 = vpop.f32.mrf.mxu2  ;;  %8035 = vmatpush.bf16.msrb.mxu1 %v14037_v2  ;;  %v13205_v31 = vor.u32 %v14966_v49, %v13204_v22  ;;  %v13396_v6 = vld [vmem:[#allocation9 + $0x288] sm:$0xf] }
 0x4bf   :  { %v16553_v7 = vadd.f32 %v6371_v35, %v6343_v16  ;;  %v15022_v16 = vld [vmem:[#allocation9 + $0x2e4] sm:$0xf0] }
 0x4c0   :  { %v6299_v10 = vpop.f32.mrf.mxu0  ;;  %8007 = vmatpush.bf16.msrb.mxu0 %v13781_v18  ;;  %7953 = vmatpush.bf16.msra.mxu2 %v13205_v31  ;;  %v15006_v49 = vld [vmem:[#allocation9 + $0x264] sm:$0xf0] }
 0x4c1   :  { %v6300_v60 = vadd.f32 %v6299_v10, %v16532_v8  ;;  %v15030_v8 = vld [vmem:[#allocation9 + $0x324] sm:$0xf0] }
 0x4c2   :  { %v13461_v35 = vor.u32 %v15030_v8, %v13460_v28  ;;  %v13428_v10 = vld [vmem:[#allocation9 + $0x2c8] sm:$0xf] }
 0x4c3   :  { %v6373_v40 = vpop.f32.mrf.mxu3  ;;  %v16555_v54 = vadd.f32 %v6327_v15, %v6300_v60  ;;  %v13429_v60 = vor.u32 %v15022_v16, %v13428_v10  ;;  %v13748_v8 = vld [vmem:[#allocation9 + $0x548] sm:$0xf] }
 0x4c4   :  { %7981 = vmatpush.bf16.msra.mxu3 %v13461_v35  ;;  %v15102_v35 = vld [vmem:[#allocation9 + $0x564] sm:$0xf0] }
 0x4c5   :  { %v6330_v42 = vpop.f32.mrf.mxu1  ;;  %17576 = vst [vmem:[#allocation51_spill] sm:$0xff] %v16555_v54  ;;  %v13749_v20 = vor.u32 %v15102_v35, %v13748_v8  ;;  %v15014_v10 = vld [vmem:[#allocation9 + $0x2a4] sm:$0xf0] }
 0x4c6   :  { %v6345_v15 = vpop.f32.mrf.mxu2  ;;  %v13397_v2 = vor.u32 %v15014_v10, %v13396_v6  ;;  %v13140_v8 = vld [vmem:[#allocation9 + $0x88] sm:$0xf] }
 0x4c7   :  { %v16568_v27 = vadd.f32 %v6373_v40, %v6345_v15  ;;  %v15166_v40 = vld [vmem:[#allocation9 + $0x764] sm:$0xf0]  ;;  %8008 = vmatpush.bf16.msrb.mxu0 %v13749_v20 }
 0x4c8   :  { %7833 = vmatmul.bf16.gmra.mxu1 %v16559_v14  ;;  %v6302_v38 = vpop.f32.mrf.mxu0  ;;  %7879 = vmatmul.bf16.gmra.mxu3 %v16045_v3  ;;  %v14958_v15 = vld [vmem:[#allocation9 + $0xe4] sm:$0xf0] }
 0x4c9   :  { %v6303_v62 = vadd.f32 %v6302_v38, %v16542_v53  ;;  %7982 = vmatpush.bf16.msra.mxu3 %v13429_v60  ;;  %v14004_v53 = vld [vmem:[#allocation9 + $0x748] sm:$0xf] }
 0x4ca   :  { %v14005_v16 = vor.u32 %v15166_v40, %v14004_v53  ;;  %v13172_v38 = vld [vmem:[#allocation9 + $0xc8] sm:$0xf] }
 0x4cb   :  { %v6376_v18 = vpop.f32.mrf.mxu3  ;;  %7805 = vmatmul.bf16.gmra.mxu0 %v16565_v37  ;;  %v16571_v47 = vadd.f32 %v6330_v42, %v6303_v62  ;;  %7851 = vmatmul.bf16.gmra.mxu2 %v16054_v46  ;;  %v13173_v22 = vor.u32 %v14958_v15, %v13172_v38  ;;  %v13364_v60 = vld [vmem:[#allocation9 + $0x248] sm:$0xf] }
 0x4cc   :  { %8036 = vmatpush.bf16.msrb.mxu1 %v14005_v16  ;;  %v13365_v62 = vor.u32 %v15006_v49, %v13364_v60  ;;  %v14950_v35 = vld [vmem:[#allocation9 + $0xa4] sm:$0xf0] }
 0x4cd   :  { %v6332_v28 = vpop.f32.mrf.mxu1  ;;  %17577 = vst [vmem:[#allocation52_spill] sm:$0xff] %v16571_v47  ;;  %7983 = vmatpush.bf16.msra.mxu3 %v13397_v2  ;;  %7954 = vmatpush.bf16.msra.mxu2 %v13173_v22  ;;  %v13141_v47 = vor.u32 %v14950_v35, %v13140_v8  ;;  %v13716_v10 = vld [vmem:[#allocation9 + $0x508] sm:$0xf] }
 0x4ce   :  { %v6348_v42 = vpop.f32.mrf.mxu2  ;;  %v15094_v53 = vld [vmem:[#allocation9 + $0x524] sm:$0xf0] }
 0x4cf   :  { %v16574_v31 = vadd.f32 %v6376_v18, %v6348_v42  ;;  %v13332_v20 = vld [vmem:[#allocation9 + $0x208] sm:$0xf]  ;;  %v13717_v40 = vor.u32 %v15094_v53, %v13716_v10 }
 0x4d0   :  { %v6304_v28 = vpop.f32.mrf.mxu0  ;;  %v14998_v2 = vld [vmem:[#allocation9 + $0x224] sm:$0xf0] }
 0x4d1   :  { %7984 = vmatpush.bf16.msra.mxu3 %v13365_v62  ;;  %7955 = vmatpush.bf16.msra.mxu2 %v13141_v47  ;;  %v13333_v16 = vor.u32 %v14998_v2, %v13332_v20  ;;  %v13108_v38 = vld [vmem:[#allocation9 + $0x48] sm:$0xf] }
 0x4d2   :  { %v14942_v15 = vld [vmem:[#allocation9 + $0x64] sm:$0xf0]  ;;  %8009 = vmatpush.bf16.msrb.mxu0 %v13717_v40 }
 0x4d3   :  { %v6378_v6 = vpop.f32.mrf.mxu3  ;;  %v13972_v18 = vld [vmem:[#allocation9 + $0x708] sm:$0xf]  ;;  %v13109_v60 = vor.u32 %v14942_v15, %v13108_v38 }
 0x4d4   :  { %v15158_v22 = vld [vmem:[#allocation9 + $0x724] sm:$0xf0] }
 0x4d5   :  { %v6427_v54 = vpop.f32.mrf.mxu1  ;;  %7985 = vmatpush.bf16.msra.mxu3 %v13333_v16  ;;  %v13973_v49 = vor.u32 %v15158_v22, %v13972_v18  ;;  %7956 = vmatpush.bf16.msra.mxu2 %v13109_v60  ;;  %v13076_v8 = vld [vmem:[#allocation9 + $0x8] sm:$0xf] }
 0x4d6   :  { %v6350_v42 = vpop.f32.mrf.mxu2  ;;  %v14934_v35 = vld [vmem:[#allocation9 + $0x24] sm:$0xf0] }
 0x4d7   :  { %v6379_v62 = vadd.f32 %v6378_v6, %v6350_v42  ;;  %8037 = vmatpush.bf16.msrb.mxu1 %v13973_v49  ;;  %v13077_v10 = vor.u32 %v14934_v35, %v13076_v8  ;;  %v13684_v40 = vld [vmem:[#allocation9 + $0x4c8] sm:$0xf] }
 0x4d8   :  { %7930 = vmatmul.bf16.vlgmr.msra.gmra.mxu1 %v15972_v63  ;;  %v6399_v28 = vpop.f32.mrf.mxu0  ;;  %7884 = vmatmul.bf16.gmra.mxu3 %v16137_v34  ;;  %v15086_v2 = vld [vmem:[#allocation9 + $0x4e4] sm:$0xf0] }
 0x4d9   :  { %v6400_v47 = vadd.f32 %v6399_v28, %v16553_v7  ;;  %v13940_v16 = vld [vmem:[#allocation9 + $0x6c8] sm:$0xf]  ;;  %7957 = vmatpush.bf16.msra.mxu2 %v13077_v10  ;;  %v13685_v15 = vor.u32 %v15086_v2, %v13684_v40 }
 0x4da   :  { %v15150_v18 = vld [vmem:[#allocation9 + $0x6e4] sm:$0xf0] }
 0x4db   :  { %v6381_v20 = vpop.f32.mrf.mxu3  ;;  %7902 = vmatmul.bf16.vlgmr.msra.gmra.mxu0 %v15980_v19  ;;  %v16580_v38 = vadd.f32 %v6427_v54, %v6400_v47  ;;  %7856 = vmatmul.bf16.gmra.mxu2 %v16156_v1  ;;  %v13941_v7 = vor.u32 %v15150_v18, %v13940_v16  ;;  %v13652_v8 = vld [vmem:[#allocation9 + $0x488] sm:$0xf] }
 0x4dc   :  { %8010 = vmatpush.bf16.msrb.mxu0 %v13685_v15  ;;  %v15078_v35 = vld [vmem:[#allocation9 + $0x4a4] sm:$0xf0] }
 0x4dd   :  { %v6429_v53 = vpop.f32.mrf.mxu1  ;;  %17578 = vst [vmem:[#allocation53_spill] sm:$0xff] %v16580_v38  ;;  %8038 = vmatpush.bf16.msrb.mxu1 %v13941_v7  ;;  %v13653_v54 = vor.u32 %v15078_v35, %v13652_v8  ;;  %v13908_v47 = vld [vmem:[#allocation9 + $0x688] sm:$0xf] }
 0x4de   :  { %v6353_v22 = vpop.f32.mrf.mxu2  ;;  %v15142_v10 = vld [vmem:[#allocation9 + $0x6a4] sm:$0xf0] }
 0x4df   :  { %v6382_v49 = vadd.f32 %v6381_v20, %v6353_v22  ;;  %v13909_v40 = vor.u32 %v15142_v10, %v13908_v47  ;;  %v15070_v7 = vld [vmem:[#allocation9 + $0x464] sm:$0xf0] }
 0x4e0   :  { %v6401_v6 = vpop.f32.mrf.mxu0  ;;  %8011 = vmatpush.bf16.msrb.mxu0 %v13653_v54  ;;  %v15134_v8 = vld [vmem:[#allocation9 + $0x664] sm:$0xf0] }
 0x4e1   :  { %v6402_v60 = vadd.f32 %v6401_v6, %v16568_v27  ;;  %8039 = vmatpush.bf16.msrb.mxu1 %v13909_v40  ;;  %v13876_v6 = vld [vmem:[#allocation9 + $0x648] sm:$0xf] }
 0x4e2   :  { %v13877_v35 = vor.u32 %v15134_v8, %v13876_v6  ;;  %v15126_v47 = vld [vmem:[#allocation9 + $0x624] sm:$0xf0]  ;;  %v13558_v8 = vld [vmem:[#allocation9 + $0x3e8] sm:$0xf0] }
 0x4e3   :  { %v6383_v42 = vpop.f32.mrf.mxu3  ;;  %v16584_v25 = vadd.f32 %v6429_v53, %v6402_v60  ;;  %v13620_v53 = vld [vmem:[#allocation9 + $0x448] sm:$0xf] }
 0x4e4   :  { %v13621_v60 = vor.u32 %v15070_v7, %v13620_v53  ;;  %v13588_v53 = vld [vmem:[#allocation9 + $0x408] sm:$0xf] }
 0x4e5   :  { %v6432_v28 = vpop.f32.mrf.mxu1  ;;  %17579 = vst [vmem:[#allocation54_spill] sm:$0xff] %v16584_v25  ;;  %8040 = vmatpush.bf16.msrb.mxu1 %v13877_v35  ;;  %v15062_v7 = vld [vmem:[#allocation9 + $0x424] sm:$0xf0] }
 0x4e6   :  { %v6355_v16 = vpop.f32.mrf.mxu2  ;;  %8012 = vmatpush.bf16.msrb.mxu0 %v13621_v60  ;;  %v13589_v60 = vor.u32 %v15062_v7, %v13588_v53  ;;  %v13814_v7 = vld [vmem:[#allocation9 + $0x5e8] sm:$0xf0] }
 0x4e7   :  { %v6384_v20 = vadd.f32 %v6383_v42, %v6355_v16  ;;  %v13844_v42 = vld [vmem:[#allocation9 + $0x608] sm:$0xf]  ;;  %v13302_v16 = vld [vmem:[#allocation9 + $0x1e8] sm:$0xf0] }
 0x4e8   :  { %7935 = vmatmul.bf16.gmra.mxu1 %v16069_v41  ;;  %v6404_v2 = vpop.f32.mrf.mxu0  ;;  %7889 = vmatmul.bf16.gmra.mxu3 %v16527_v52  ;;  %v13845_v25 = vor.u32 %v15126_v47, %v13844_v42  ;;  %v15042_v42 = vld [vmem:[#allocation9 + $0x38c] sm:$0xf] }
 0x4e9   :  { %v6405_v27 = vadd.f32 %v6404_v2, %v16574_v31  ;;  %v14986_v2 = vld [vmem:[#allocation9 + $0x1cc] sm:$0xf] }
 0x4ea   :  { %v13305_v38 = vor.u32 %v14986_v2, %v13302_v16  ;;  %8041 = vmatpush.bf16.msrb.mxu1 %v13845_v25  ;;  %8013 = vmatpush.bf16.msrb.mxu0 %v13589_v60  ;;  %v13270_v2 = vld [vmem:[#allocation9 + $0x1a8] sm:$0xf0] }
 0x4eb   :  { %v6386_v18 = vpop.f32.mrf.mxu3  ;;  %7907 = vmatmul.bf16.gmra.mxu0 %v16078_v61  ;;  %v16590_v22 = vadd.f32 %v6432_v28, %v6405_v27  ;;  %7861 = vmatmul.bf16.gmra.mxu2 %v16536_v56  ;;  %v15114_v16 = vld [vmem:[#allocation9 + $0x5cc] sm:$0xf] }
 0x4ec   :  { %8062 = vmatpush.bf16.msrb.mxu2 %v13305_v38  ;;  %v15178_v60 = vld [vmem:[#allocation9 + $0x7cc] sm:$0xf] }
 0x4ed   :  { %v6434_v15 = vpop.f32.mrf.mxu1  ;;  %17580 = vst [vmem:[#allocation55_spill] sm:$0xff] %v16590_v22  ;;  %v15050_v22 = vld [vmem:[#allocation9 + $0x3cc] sm:$0xf] }
 0x4ee   :  { %v6358_v31 = vpop.f32.mrf.mxu2  ;;  %v13561_v35 = vor.u32 %v15050_v22, %v13558_v8  ;;  %v5590_v22 = vadd.f32 %v16227_v32, %v16225_v23  ;;  %v14070_v8 = vld [vmem:[#allocation9 + $0x7e8] sm:$0xf0] }
 0x4ef   :  { %v16593_v40 = vadd.f32 %v6386_v18, %v6358_v31 }
 0x4f0   :  { %v6406_v54 = vpop.f32.mrf.mxu0  ;;  %8090 = vmatpush.bf16.msrb.mxu3 %v13561_v35  ;;  %v5618_v23 = vadd.f32 %v16222_v21, %v5590_v22  ;;  %v15106_v21 = vld [vmem:[#allocation9 + $0x58c] sm:$0xf] }
 0x4f1   :  { %v6407_v10 = vadd.f32 %v6406_v54, %v6379_v62  ;;  %v13782_v22 = vld [vmem:[#allocation9 + $0x5a8] sm:$0xf0] }
 0x4f3   :  { %v6388_v27 = vpop.f32.mrf.mxu3  ;;  %v16595_v6 = vadd.f32 %v6434_v15, %v6407_v10  ;;  %v13526_v15 = vld [vmem:[#allocation9 + $0x3a8] sm:$0xf0] }
 0x4f4   :  { %v13529_v38 = vor.u32 %v15042_v42, %v13526_v15  ;;  %v14978_v10 = vld [vmem:[#allocation9 + $0x18c] sm:$0xf] }
 0x4f5   :  { %v6437_v28 = vpop.f32.mrf.mxu1  ;;  %17581 = vst [vmem:[#allocation56_spill] sm:$0xff] %v16595_v6  ;;  %v13273_v53 = vor.u32 %v14978_v10, %v13270_v2  ;;  %v13494_v42 = vld [vmem:[#allocation9 + $0x368] sm:$0xf0] }
 0x4f6   :  { %v6360_v18 = vpop.f32.mrf.mxu2  ;;  %8091 = vmatpush.bf16.msrb.mxu3 %v13529_v38  ;;  %v15026_v10 = vld [vmem:[#allocation9 + $0x30c] sm:$0xf] }
 0x4f7   :  { %v14073_v18 = vor.u32 %v15178_v60, %v14070_v8  ;;  %8063 = vmatpush.bf16.msrb.mxu2 %v13273_v53  ;;  %v13462_v2 = vld [vmem:[#allocation9 + $0x328] sm:$0xf0]  ;;  %v13785_v60 = vor.u32 %v15106_v21, %v13782_v22  ;;  %v5595_v22 = vadd.f32 %v16248_v44, %v16251_v9 }
 0x4f8   :  { %7940 = vmatmul.bf16.gmra.mxu1 %v16165_v51  ;;  %v6409_v62 = vpop.f32.mrf.mxu0  ;;  %7986 = vmatmul.bf16.vlgmr.msra.gmra.mxu3 %v15950_v57  ;;  %v15170_v53 = vld [vmem:[#allocation9 + $0x78c] sm:$0xf] }
 0x4f9   :  { %v6410_v54 = vadd.f32 %v6409_v62, %v6382_v49  ;;  %v13817_v62 = vor.u32 %v15114_v16, %v13814_v7  ;;  %8146 = vmatpush.bf16.msra.mxu1 %v14073_v18  ;;  %v13465_v16 = vor.u32 %v15026_v10, %v13462_v2  ;;  %v15018_v8 = vld [vmem:[#allocation9 + $0x2cc] sm:$0xf]  ;;  %v5623_v44 = vadd.f32 %v16264_v50, %v5595_v22 }
 0x4fb   :  { %v7763_v25 = vpop.f32.mrf.mxu3  ;;  %7912 = vmatmul.bf16.gmra.mxu0 %v16172_v5  ;;  %v16600_v47 = vadd.f32 %v6437_v28, %v6410_v54  ;;  %7958 = vmatmul.bf16.vlgmr.msra.gmra.mxu2 %v15958_v11  ;;  %v15034_v54 = vld [vmem:[#allocation9 + $0x34c] sm:$0xf] }
 0x4fc   :  { %v13497_v15 = vor.u32 %v15034_v54, %v13494_v42  ;;  %8118 = vmatpush.bf16.msra.mxu0 %v13817_v62  ;;  %v14962_v54 = vld [vmem:[#allocation9 + $0x10c] sm:$0xf] }
 0x4fd   :  { %v6439_v31 = vpop.f32.mrf.mxu1  ;;  %17582 = vst [vmem:[#allocation57_spill] sm:$0xff] %v16600_v47  ;;  %v13206_v42 = vld [vmem:[#allocation9 + $0x128] sm:$0xf0] }
 0x4fe   :  { %v7735_v49 = vpop.f32.mrf.mxu2  ;;  %8092 = vmatpush.bf16.msrb.mxu3 %v13497_v15  ;;  %v13209_v15 = vor.u32 %v14962_v54, %v13206_v42  ;;  %v14946_v54 = vld [vmem:[#allocation9 + $0x8c] sm:$0xf] }
 0x4ff   :  { %v7736_v28 = vadd.f32 %v7735_v49, %v16220_v26  ;;  %v14970_v26 = vld [vmem:[#allocation9 + $0x14c] sm:$0xf]  ;;  %v5646_v49 = vadd.f32 %v16230_v33, %v5618_v23 }
 0x500   :  { %v6411_v27 = vpop.f32.mrf.mxu0  ;;  %8119 = vmatpush.bf16.msra.mxu0 %v13785_v60  ;;  %v13142_v42 = vld [vmem:[#allocation9 + $0xa8] sm:$0xf0] }
 0x501   :  { %v6412_v35 = vadd.f32 %v6411_v27, %v6384_v20  ;;  %v16607_v47 = vadd.f32 %v7763_v25, %v7736_v28  ;;  %v13238_v20 = vld [vmem:[#allocation9 + $0x168] sm:$0xf0] }
 0x502   :  { %v13241_v27 = vor.u32 %v14970_v26, %v13238_v20  ;;  %8093 = vmatpush.bf16.msrb.mxu3 %v13465_v16  ;;  %v15010_v26 = vld [vmem:[#allocation9 + $0x28c] sm:$0xf] }
 0x503   :  { %v7765_v38 = vpop.f32.mrf.mxu3  ;;  %v16609_v6 = vadd.f32 %v6439_v31, %v6412_v35  ;;  %v14038_v31 = vld [vmem:[#allocation9 + $0x7a8] sm:$0xf0] }
 0x504   :  { %8064 = vmatpush.bf16.msrb.mxu2 %v13241_v27  ;;  %v13430_v35 = vld [vmem:[#allocation9 + $0x2e8] sm:$0xf0]  ;;  %v14041_v18 = vor.u32 %v15170_v53, %v14038_v31 }
 0x505   :  { %v6442_v32 = vpop.f32.mrf.mxu1  ;;  %17583 = vst [vmem:[#allocation58_spill] sm:$0xff] %v16609_v6  ;;  %v13433_v33 = vor.u32 %v15018_v8, %v13430_v35  ;;  %v13398_v20 = vld [vmem:[#allocation9 + $0x2a8] sm:$0xf0] }
 0x506   :  { %v7737_v7 = vpop.f32.mrf.mxu2  ;;  %8147 = vmatpush.bf16.msra.mxu1 %v14041_v18  ;;  %v14954_v16 = vld [vmem:[#allocation9 + $0xcc] sm:$0xf] }
 0x507   :  { %v7738_v62 = vadd.f32 %v7737_v7, %v5646_v49  ;;  %8094 = vmatpush.bf16.msrb.mxu3 %v13433_v33  ;;  %v13174_v49 = vld [vmem:[#allocation9 + $0xe8] sm:$0xf0]  ;;  %v13145_v33 = vor.u32 %v14946_v54, %v13142_v42 }
 0x508   :  { %7945 = vmatmul.bf16.gmra.mxu1 %v16559_v14  ;;  %v6414_v25 = vpop.f32.mrf.mxu0  ;;  %7991 = vmatmul.bf16.gmra.mxu3 %v16045_v3  ;;  %v13177_v21 = vor.u32 %v14954_v16, %v13174_v49  ;;  %v15098_v53 = vld [vmem:[#allocation9 + $0x54c] sm:$0xf] }
 0x509   :  { %v6415_v28 = vadd.f32 %v6414_v25, %v16593_v40  ;;  %v16616_v2 = vadd.f32 %v7765_v38, %v7738_v62  ;;  %8065 = vmatpush.bf16.msrb.mxu2 %v13209_v15  ;;  %v13401_v40 = vor.u32 %v15010_v26, %v13398_v20  ;;  %v13750_v25 = vld [vmem:[#allocation9 + $0x568] sm:$0xf0] }
 0x50a   :  { %v15162_v38 = vld [vmem:[#allocation9 + $0x74c] sm:$0xf]  ;;  %v13753_v31 = vor.u32 %v15098_v53, %v13750_v25 }
 0x50b   :  { %v7768_v10 = vpop.f32.mrf.mxu3  ;;  %7917 = vmatmul.bf16.gmra.mxu0 %v16565_v37  ;;  %v16618_v27 = vadd.f32 %v6442_v32, %v6415_v28  ;;  %7963 = vmatmul.bf16.gmra.mxu2 %v16054_v46  ;;  %v14006_v8 = vld [vmem:[#allocation9 + $0x768] sm:$0xf0] }
 0x50c   :  { %v15002_v32 = vld [vmem:[#allocation9 + $0x24c] sm:$0xf]  ;;  %8095 = vmatpush.bf16.msrb.mxu3 %v13401_v40  ;;  %v14009_v62 = vor.u32 %v15162_v38, %v14006_v8  ;;  %8120 = vmatpush.bf16.msra.mxu0 %v13753_v31 }
 0x50d   :  { %v6444_v23 = vpop.f32.mrf.mxu1  ;;  %17584 = vst [vmem:[#allocation59_spill] sm:$0xff] %v16618_v27  ;;  %8066 = vmatpush.bf16.msrb.mxu2 %v13177_v21  ;;  %v13366_v35 = vld [vmem:[#allocation9 + $0x268] sm:$0xf0]  ;;  %v5651_v21 = vadd.f32 %v16260_v0, %v5623_v44 }
 0x50e   :  { %v7740_v60 = vpop.f32.mrf.mxu2  ;;  %v13369_v18 = vor.u32 %v15002_v32, %v13366_v35  ;;  %8148 = vmatpush.bf16.msra.mxu1 %v14009_v62  ;;  %v14994_v26 = vld [vmem:[#allocation9 + $0x20c] sm:$0xf] }
 0x50f   :  { %v7741_v28 = vadd.f32 %v7740_v60, %v16234_v30  ;;  %v13334_v20 = vld [vmem:[#allocation9 + $0x228] sm:$0xf0] }
 0x510   :  { %v6416_v7 = vpop.f32.mrf.mxu0  ;;  %8096 = vmatpush.bf16.msrb.mxu3 %v13369_v18  ;;  %v13337_v16 = vor.u32 %v14994_v26, %v13334_v20  ;;  %v14938_v49 = vld [vmem:[#allocation9 + $0x4c] sm:$0xf] }
 0x511   :  { %v7769_v23 = vadd.f32 %v7768_v10, %v7741_v28  ;;  %8067 = vmatpush.bf16.msrb.mxu2 %v13145_v33  ;;  %v13110_v30 = vld [vmem:[#allocation9 + $0x68] sm:$0xf0] }
 0x512   :  { %v13113_v40 = vor.u32 %v14938_v49, %v13110_v30  ;;  %v15090_v53 = vld [vmem:[#allocation9 + $0x50c] sm:$0xf] }
 0x513   :  { %v7770_v15 = vpop.f32.mrf.mxu3  ;;  %v13718_v25 = vld [vmem:[#allocation9 + $0x528] sm:$0xf0] }
 0x514   :  { %v15154_v38 = vld [vmem:[#allocation9 + $0x70c] sm:$0xf]  ;;  %v13721_v22 = vor.u32 %v15090_v53, %v13718_v25  ;;  %8097 = vmatpush.bf16.msrb.mxu3 %v13337_v16 }
 0x515   :  { %v7819_v9 = vpop.f32.mrf.mxu1  ;;  %v13974_v7 = vld [vmem:[#allocation9 + $0x728] sm:$0xf0]  ;;  %8068 = vmatpush.bf16.msrb.mxu2 %v13113_v40 }
 0x516   :  { %v7742_v10 = vpop.f32.mrf.mxu2  ;;  %v13977_v8 = vor.u32 %v15154_v38, %v13974_v7  ;;  %v14930_v32 = vld [vmem:[#allocation9 + $0xc] sm:$0xf]  ;;  %8121 = vmatpush.bf16.msra.mxu0 %v13721_v22 }
 0x517   :  { %v7743_v31 = vadd.f32 %v7742_v10, %v5651_v21  ;;  %v13078_v35 = vld [vmem:[#allocation9 + $0x28] sm:$0xf0] }
 0x518   :  { %8042 = vmatmul.bf16.vlgmr.msrb.gmra.mxu1 %v15972_v63  ;;  %v7791_v50 = vpop.f32.mrf.mxu0  ;;  %7996 = vmatmul.bf16.gmra.mxu3 %v16137_v34  ;;  %v13081_v28 = vor.u32 %v14930_v32, %v13078_v35  ;;  %v15082_v42 = vld [vmem:[#allocation9 + $0x4cc] sm:$0xf] }
 0x519   :  { %v7792_v60 = vadd.f32 %v7791_v50, %v16607_v47  ;;  %v7771_v54 = vadd.f32 %v7770_v15, %v7743_v31  ;;  %8149 = vmatpush.bf16.msra.mxu1 %v13977_v8  ;;  %v13686_v47 = vld [vmem:[#allocation9 + $0x4e8] sm:$0xf0] }
 0x51a   :  { %8069 = vmatpush.bf16.msrb.mxu2 %v13081_v28  ;;  %v13689_v26 = vor.u32 %v15082_v42, %v13686_v47  ;;  %v15146_v20 = vld [vmem:[#allocation9 + $0x6cc] sm:$0xf] }
 0x51b   :  { %v16629_v0 = vadd.f32 %v7819_v9, %v7792_v60  ;;  %v7773_v18 = vpop.f32.mrf.mxu3  ;;  %8014 = vmatmul.bf16.vlgmr.msrb.gmra.mxu0 %v15980_v19  ;;  %7968 = vmatmul.bf16.gmra.mxu2 %v16156_v1  ;;  %v13942_v16 = vld [vmem:[#allocation9 + $0x6e8] sm:$0xf0] }
 0x51c   :  { %v13945_v30 = vor.u32 %v15146_v20, %v13942_v16  ;;  %8122 = vmatpush.bf16.msra.mxu0 %v13689_v26  ;;  %v15074_v25 = vld [vmem:[#allocation9 + $0x48c] sm:$0xf] }
 0x51d   :  { %v7821_v62 = vpop.f32.mrf.mxu1  ;;  %v13654_v38 = vld [vmem:[#allocation9 + $0x4a8] sm:$0xf0] }
 0x51e   :  { %v7745_v44 = vpop.f32.mrf.mxu2  ;;  %8150 = vmatpush.bf16.msra.mxu1 %v13945_v30  ;;  %v13657_v22 = vor.u32 %v15074_v25, %v13654_v38  ;;  %v13910_v7 = vld [vmem:[#allocation9 + $0x6a8] sm:$0xf0]  ;;  %v17586_v30 = vld [vmem:[#allocation21_spill] sm:$0xff] }
 0x51f   :  { %v7746_v9 = vadd.f32 %v7745_v44, %v16271_v4  ;;  %v17585_v60 = vld [vmem:[#allocation20_spill] sm:$0xff] }
 0x520   :  { %v7793_v33 = vpop.f32.mrf.mxu0  ;;  %8123 = vmatpush.bf16.msra.mxu0 %v13657_v22  ;;  %v13878_v42 = vld [vmem:[#allocation9 + $0x668] sm:$0xf0]  ;;  %v13308_v25 = vld [vmem:[#allocation9 + $0x1d0] sm:$0xf] }
 0x521   :  { %v7794_v49 = vadd.f32 %v7793_v33, %v16616_v2  ;;  %v7774_v53 = vadd.f32 %v7773_v18, %v7746_v9  ;;  %v15138_v2 = vld [vmem:[#allocation9 + $0x68c] sm:$0xf]  ;;  %v14991_v38 = vld [vmem:[#allocation9 + $0x1ec] sm:$0xf0] }
 0x522   :  { %v13913_v8 = vor.u32 %v15138_v2, %v13910_v7  ;;  %v15130_v18 = vld [vmem:[#allocation9 + $0x64c] sm:$0xf] }
 0x523   :  { %v16635_v40 = vadd.f32 %v7821_v62, %v7794_v49  ;;  %v7775_v21 = vpop.f32.mrf.mxu3  ;;  %v13881_v47 = vor.u32 %v15130_v18, %v13878_v42  ;;  %v15066_v33 = vld [vmem:[#allocation9 + $0x44c] sm:$0xf] }
 0x524   :  { %8151 = vmatpush.bf16.msra.mxu1 %v13913_v8  ;;  %v13622_v44 = vld [vmem:[#allocation9 + $0x468] sm:$0xf0] }
 0x525   :  { %v7824_v15 = vpop.f32.mrf.mxu1  ;;  %v13625_v20 = vor.u32 %v15066_v33, %v13622_v44  ;;  %v15122_v16 = vld [vmem:[#allocation9 + $0x60c] sm:$0xf] }
 0x526   :  { %v7747_v10 = vpop.f32.mrf.mxu2  ;;  %v13846_v49 = vld [vmem:[#allocation9 + $0x628] sm:$0xf0] }
 0x527   :  { %v7748_v31 = vadd.f32 %v7747_v10, %v17585_v60  ;;  %8124 = vmatpush.bf16.msra.mxu0 %v13625_v20  ;;  %v13590_v60 = vld [vmem:[#allocation9 + $0x428] sm:$0xf0] }
 0x528   :  { %8047 = vmatmul.bf16.gmra.mxu1 %v16069_v41  ;;  %v7796_v50 = vpop.f32.mrf.mxu0  ;;  %8001 = vmatmul.bf16.gmra.mxu3 %v16527_v52 }
 0x529   :  { %v7797_v4 = vadd.f32 %v7796_v50, %v7769_v23  ;;  %v7776_v62 = vadd.f32 %v7775_v21, %v7748_v31  ;;  %8152 = vmatpush.bf16.msra.mxu1 %v13881_v47  ;;  %v13849_v21 = vor.u32 %v15122_v16, %v13846_v49  ;;  %v13309_v50 = vor.u32 %v14991_v38, %v13308_v25  ;;  %v13564_v31 = vld [vmem:[#allocation9 + $0x3d0] sm:$0xf]  ;;  %v17587_v38 = vld [vmem:[#allocation22_spill] sm:$0xff] }
 0x52a   :  { %v13500_v16 = vld [vmem:[#allocation9 + $0x350] sm:$0xf] }
 0x52b   :  { %v16640_v32 = vadd.f32 %v7824_v15, %v7797_v4  ;;  %v7778_v28 = vpop.f32.mrf.mxu3  ;;  %8019 = vmatmul.bf16.gmra.mxu0 %v16078_v61  ;;  %7973 = vmatmul.bf16.gmra.mxu2 %v16536_v56  ;;  %v15058_v4 = vld [vmem:[#allocation9 + $0x40c] sm:$0xf]  ;;  %v15039_v49 = vld [vmem:[#allocation9 + $0x36c] sm:$0xf0] }
 0x52c   :  { %8174 = vmatpush.bf16.msra.mxu2 %v13309_v50  ;;  %v13593_v8 = vor.u32 %v15058_v4, %v13590_v60  ;;  %v14983_v50 = vld [vmem:[#allocation9 + $0x1ac] sm:$0xf0] }
 0x52d   :  { %v7826_v35 = vpop.f32.mrf.mxu1  ;;  %8153 = vmatpush.bf16.msra.mxu1 %v13849_v21  ;;  %v13276_v21 = vld [vmem:[#allocation9 + $0x190] sm:$0xf] }
 0x52e   :  { %v7750_v26 = vpop.f32.mrf.mxu2  ;;  %8125 = vmatpush.bf16.msra.mxu0 %v13593_v8  ;;  %v13820_v8 = vld [vmem:[#allocation9 + $0x5d0] sm:$0xf] }
 0x52f   :  { %v7751_v15 = vadd.f32 %v7750_v26, %v17586_v30  ;;  %v15047_v26 = vld [vmem:[#allocation9 + $0x3ac] sm:$0xf0] }
 0x530   :  { %v7798_v23 = vpop.f32.mrf.mxu0 }
 0x531   :  { %v7799_v9 = vadd.f32 %v7798_v23, %v7771_v54  ;;  %v16647_v7 = vadd.f32 %v7778_v28, %v7751_v15  ;;  %v15055_v54 = vld [vmem:[#allocation9 + $0x3ec] sm:$0xf0]  ;;  %v13501_v15 = vor.u32 %v15039_v49, %v13500_v16 }
 0x532   :  { %v13565_v18 = vor.u32 %v15055_v54, %v13564_v31  ;;  %v13532_v23 = vld [vmem:[#allocation9 + $0x390] sm:$0xf] }
 0x533   :  { %v16645_v10 = vadd.f32 %v7826_v35, %v7799_v9  ;;  %v7780_v2 = vpop.f32.mrf.mxu3  ;;  %v13533_v20 = vor.u32 %v15047_v26, %v13532_v23  ;;  %v15119_v54 = vld [vmem:[#allocation9 + $0x5ec] sm:$0xf0] }
 0x534   :  { %8202 = vmatpush.bf16.msra.mxu3 %v13565_v18  ;;  %v14076_v18 = vld [vmem:[#allocation9 + $0x7d0] sm:$0xf] }
 0x535   :  { %v7829_v22 = vpop.f32.mrf.mxu1  ;;  %v13244_v26 = vld [vmem:[#allocation9 + $0x150] sm:$0xf] }
 0x536   :  { %v7752_v35 = vpop.f32.mrf.mxu2  ;;  %v15023_v49 = vld [vmem:[#allocation9 + $0x2ec] sm:$0xf0] }
 0x537   :  { %v15183_v35 = vld [vmem:[#allocation9 + $0x7ec] sm:$0xf0] }
 0x538   :  { %8052 = vmatmul.bf16.gmra.mxu1 %v16165_v51  ;;  %v7801_v42 = vpop.f32.mrf.mxu0  ;;  %8098 = vmatmul.bf16.vlgmr.msrb.gmra.mxu3 %v15950_v57  ;;  %v14077_v23 = vor.u32 %v15183_v35, %v14076_v18  ;;  %v13788_v35 = vld [vmem:[#allocation9 + $0x590] sm:$0xf] }
 0x539   :  { %v7802_v47 = vadd.f32 %v7801_v42, %v7774_v53  ;;  %8203 = vmatpush.bf16.msra.mxu3 %v13533_v20  ;;  %v13821_v42 = vor.u32 %v15119_v54, %v13820_v8  ;;  %v14975_v20 = vld [vmem:[#allocation9 + $0x16c] sm:$0xf0] }
 0x53a   :  { %8258 = vmatpush.bf16.msrb.mxu1 %v14077_v23 }
 0x53b   :  { %v16651_v33 = vadd.f32 %v7829_v22, %v7802_v47  ;;  %v7875_v44 = vpop.f32.mrf.mxu3  ;;  %8024 = vmatmul.bf16.gmra.mxu0 %v16172_v5  ;;  %8070 = vmatmul.bf16.vlgmr.msrb.gmra.mxu2 %v15958_v11  ;;  %v13277_v22 = vor.u32 %v14983_v50, %v13276_v21  ;;  %v13468_v47 = vld [vmem:[#allocation9 + $0x310] sm:$0xf] }
 0x53c   :  { %8230 = vmatpush.bf16.msrb.mxu0 %v13821_v42  ;;  %v13212_v21 = vld [vmem:[#allocation9 + $0x110] sm:$0xf] }
 0x53d   :  { %v7831_v28 = vpop.f32.mrf.mxu1  ;;  %8204 = vmatpush.bf16.msra.mxu3 %v13501_v15  ;;  %8175 = vmatpush.bf16.msra.mxu2 %v13277_v22  ;;  %v14967_v50 = vld [vmem:[#allocation9 + $0x12c] sm:$0xf0] }
 0x53e   :  { %v7847_v30 = vpop.f32.mrf.mxu2  ;;  %v13213_v22 = vor.u32 %v14967_v50, %v13212_v21  ;;  %v13756_v21 = vld [vmem:[#allocation9 + $0x550] sm:$0xf] }
 0x53f   :  { %v7848_v53 = vadd.f32 %v7847_v30, %v17587_v38  ;;  %v17588_v38 = vld [vmem:[#allocation23_spill] sm:$0xff]  ;;  %v15103_v50 = vld [vmem:[#allocation9 + $0x56c] sm:$0xf0] }
 0x540   :  { %v7803_v9 = vpop.f32.mrf.mxu0 }
 0x541   :  { %v7804_v25 = vadd.f32 %v7803_v9, %v7776_v62  ;;  %v16658_v31 = vadd.f32 %v7875_v44, %v7848_v53  ;;  %v15031_v62 = vld [vmem:[#allocation9 + $0x32c] sm:$0xf0] }
 0x542   :  { %v13469_v16 = vor.u32 %v15031_v62, %v13468_v47  ;;  %v13436_v44 = vld [vmem:[#allocation9 + $0x2d0] sm:$0xf] }
 0x543   :  { %v16656_v2 = vadd.f32 %v7831_v28, %v7804_v25  ;;  %v7877_v60 = vpop.f32.mrf.mxu3  ;;  %v13245_v28 = vor.u32 %v14975_v20, %v13244_v26  ;;  %v13437_v15 = vor.u32 %v15023_v49, %v13436_v44  ;;  %v15111_v47 = vld [vmem:[#allocation9 + $0x5ac] sm:$0xf0] }
 0x544   :  { %8205 = vmatpush.bf16.msra.mxu3 %v13469_v16  ;;  %v14044_v62 = vld [vmem:[#allocation9 + $0x790] sm:$0xf]  ;;  %v13789_v23 = vor.u32 %v15111_v47, %v13788_v35 }
 0x545   :  { %v7834_v4 = vpop.f32.mrf.mxu1  ;;  %8176 = vmatpush.bf16.msra.mxu2 %v13245_v28  ;;  %v15175_v26 = vld [vmem:[#allocation9 + $0x7ac] sm:$0xf0] }
 0x546   :  { %v7849_v30 = vpop.f32.mrf.mxu2  ;;  %v15015_v20 = vld [vmem:[#allocation9 + $0x2ac] sm:$0xf0]  ;;  %v14045_v16 = vor.u32 %v15175_v26, %v14044_v62  ;;  %8231 = vmatpush.bf16.msrb.mxu0 %v13789_v23  ;;  %v16671_v26 = vld [vmem:[#allocation12] sm:$0xff] }
 0x547   :  { %v7850_v53 = vadd.f32 %v7849_v30, %v17588_v38  ;;  %v13180_v28 = vld [vmem:[#allocation9 + $0xd0] sm:$0xf] }
 0x548   :  { %8057 = vmatmul.bf16.gmra.mxu1 %v16559_v14  ;;  %v7806_v9 = vpop.f32.mrf.mxu0  ;;  %8103 = vmatmul.bf16.gmra.mxu3 %v16045_v3  ;;  %v14959_v44 = vld [vmem:[#allocation9 + $0xec] sm:$0xf0] }
 0x549   :  { %v7807_v25 = vadd.f32 %v7806_v9, %v16647_v7  ;;  %v16667_v42 = vadd.f32 %v7877_v60, %v7850_v53  ;;  %8206 = vmatpush.bf16.msra.mxu3 %v13437_v15  ;;  %8177 = vmatpush.bf16.msra.mxu2 %v13213_v22  ;;  %v13404_v7 = vld [vmem:[#allocation9 + $0x290] sm:$0xf]  ;;  %v13181_v49 = vor.u32 %v14959_v44, %v13180_v28 }
 0x54a   :  { %8259 = vmatpush.bf16.msrb.mxu1 %v14045_v16  ;;  %v13372_v60 = vld [vmem:[#allocation9 + $0x250] sm:$0xf] }
 0x54b   :  { %v16664_v8 = vadd.f32 %v7834_v4, %v7807_v25  ;;  %v7880_v18 = vpop.f32.mrf.mxu3  ;;  %8029 = vmatmul.bf16.gmra.mxu0 %v16565_v37  ;;  %8075 = vmatmul.bf16.gmra.mxu2 %v16054_v46  ;;  %v13405_v4 = vor.u32 %v15015_v20, %v13404_v7  ;;  %v15007_v9 = vld [vmem:[#allocation9 + $0x26c] sm:$0xf0] }
 0x54c   :  { %v13373_v15 = vor.u32 %v15007_v9, %v13372_v60  ;;  %v17589_v38 = vld [vmem:[#allocation24_spill] sm:$0xff] }
 0x54d   :  { %v7836_v54 = vpop.f32.mrf.mxu1  ;;  %8207 = vmatpush.bf16.msra.mxu3 %v13405_v4  ;;  %8178 = vmatpush.bf16.msra.mxu2 %v13181_v49  ;;  %v14012_v22 = vld [vmem:[#allocation9 + $0x750] sm:$0xf] }
 0x54e   :  { %v7852_v25 = vpop.f32.mrf.mxu2  ;;  %v13757_v54 = vor.u32 %v15103_v50, %v13756_v21  ;;  %v15167_v35 = vld [vmem:[#allocation9 + $0x76c] sm:$0xf0] }
 0x54f   :  { %v7853_v53 = vadd.f32 %v7852_v25, %v17589_v38  ;;  %v13148_v47 = vld [vmem:[#allocation9 + $0x90] sm:$0xf]  ;;  %v14013_v16 = vor.u32 %v15167_v35, %v14012_v22  ;;  %v16682_v35 = vperm.slane %v16671_v26, 1 }
 0x550   :  { %v7808_v30 = vpop.f32.mrf.mxu0  ;;  %v14951_v62 = vld [vmem:[#allocation9 + $0xac] sm:$0xf0]  ;;  %8232 = vmatpush.bf16.msrb.mxu0 %v13757_v54 }
 0x551   :  { %v16673_v20 = vadd.f32 %v7880_v18, %v7853_v53  ;;  %8208 = vmatpush.bf16.msra.mxu3 %v13373_v15  ;;  %v13149_v4 = vor.u32 %v14951_v62, %v13148_v47  ;;  %v13340_v28 = vld [vmem:[#allocation9 + $0x210] sm:$0xf]  ;;  %8260 = vmatpush.bf16.msrb.mxu1 %v14013_v16  ;;  %v16676_v30 = vperm.slane %v16671_v26, 0 }
 0x552   :  { %v14999_v44 = vld [vmem:[#allocation9 + $0x22c] sm:$0xf0] }
 0x553   :  { %v7882_v7 = vpop.f32.mrf.mxu3  ;;  %v13341_v49 = vor.u32 %v14999_v44, %v13340_v28  ;;  %8179 = vmatpush.bf16.msra.mxu2 %v13149_v4  ;;  %v13116_v60 = vld [vmem:[#allocation9 + $0x50] sm:$0xf] }
 0x554   :  { %v14943_v9 = vld [vmem:[#allocation9 + $0x6c] sm:$0xf0] }
 0x555   :  { %v7931_v23 = vpop.f32.mrf.mxu1  ;;  %v13117_v25 = vor.u32 %v14943_v9, %v13116_v60  ;;  %v13724_v38 = vld [vmem:[#allocation9 + $0x510] sm:$0xf]  ;;  %8209 = vmatpush.bf16.msra.mxu3 %v13341_v49  ;;  %v8640_v49 = vadd.f32 %v16676_v30, %v16629_v0 }
 0x556   :  { %v15095_v18 = vld [vmem:[#allocation9 + $0x52c] sm:$0xf0]  ;;  %v7854_v21 = vpop.f32.mrf.mxu2 }
 0x557   :  { %v13980_v53 = vld [vmem:[#allocation9 + $0x710] sm:$0xf]  ;;  %v13725_v50 = vor.u32 %v15095_v18, %v13724_v38  ;;  %8180 = vmatpush.bf16.msra.mxu2 %v13117_v25  ;;  %v8696_v25 = vmax.f32 %v8640_v49, 0.0 }
 0x558   :  { %8154 = vmatmul.bf16.vlgmr.msra.gmra.mxu1 %v15972_v63  ;;  %v7903_v15 = vpop.f32.mrf.mxu0  ;;  %8108 = vmatmul.bf16.gmra.mxu3 %v16137_v34  ;;  %v15159_v22 = vld [vmem:[#allocation9 + $0x72c] sm:$0xf0] }
 0x559   :  { %v7904_v54 = vadd.f32 %v7903_v15, %v16658_v31  ;;  %v17590_v47 = vld [vmem:[#allocation25_spill] sm:$0xff]  ;;  %v13981_v16 = vor.u32 %v15159_v22, %v13980_v53  ;;  %8233 = vmatpush.bf16.msrb.mxu0 %v13725_v50 }
 0x55a   :  { %v7855_v62 = vadd.f32 %v7854_v21, %v17590_v47  ;;  %v13084_v4 = vld [vmem:[#allocation9 + $0x10] sm:$0xf] }
 0x55b   :  { %v14935_v28 = vld [vmem:[#allocation9 + $0x2c] sm:$0xf0]  ;;  %v7932_v60 = vadd.f32 %v7931_v23, %v7904_v54  ;;  %v7885_v38 = vpop.f32.mrf.mxu3  ;;  %8126 = vmatmul.bf16.vlgmr.msra.gmra.mxu0 %v15980_v19  ;;  %8261 = vmatpush.bf16.msrb.mxu1 %v13981_v16  ;;  %v17591_v23 = vld [vmem:[#allocation26_spill] sm:$0xff]  ;;  %v8648_v16 = vadd.f32 %v16676_v30, %v16635_v40 }
 0x55c   :  { %v13085_v44 = vor.u32 %v14935_v28, %v13084_v4  ;;  %v16688_v31 = vadd.f32 %v7882_v7, %v7855_v62  ;;  %8080 = vmatmul.bf16.gmra.mxu2 %v16156_v1  ;;  %v13692_v54 = vld [vmem:[#allocation9 + $0x4d0] sm:$0xf] }
 0x55d   :  { %v7933_v9 = vpop.f32.mrf.mxu1  ;;  %v8641_v18 = vadd.f32 %v16682_v35, %v7932_v60  ;;  %v15087_v47 = vld [vmem:[#allocation9 + $0x4ec] sm:$0xf0] }
 0x55e   :  { %8181 = vmatpush.bf16.msra.mxu2 %v13085_v44  ;;  %v7857_v21 = vpop.f32.mrf.mxu2  ;;  %v13948_v4 = vld [vmem:[#allocation9 + $0x6d0] sm:$0xf]  ;;  %v13693_v7 = vor.u32 %v15087_v47, %v13692_v54  ;;  %v17592_v47 = vld [vmem:[#allocation27_spill] sm:$0xff] }
 0x55f   :  { %v8697_v53 = vmax.f32 %v8641_v18, 0.0  ;;  %v7858_v22 = vadd.f32 %v7857_v21, %v17591_v23  ;;  %v15151_v62 = vld [vmem:[#allocation9 + $0x6ec] sm:$0xf0] }
 0x560   :  { %v7905_v15 = vpop.f32.mrf.mxu0  ;;  %8234 = vmatpush.bf16.msrb.mxu0 %v13693_v7  ;;  %v13949_v18 = vor.u32 %v15151_v62, %v13948_v4  ;;  %v15079_v21 = vld [vmem:[#allocation9 + $0x4ac] sm:$0xf0]  ;;  %v8656_v62 = vadd.f32 %v16676_v30, %v16640_v32 }
 0x561   :  { %v8752_v50 = vpack.c.bf16 %v8697_v53, %v8696_v25  ;;  %v7906_v0 = vadd.f32 %v7905_v15, %v16667_v42  ;;  %v16696_v49 = vadd.f32 %v7885_v38, %v7858_v22  ;;  %v8704_v42 = vmax.f32 %v8648_v16, 0.0  ;;  %v13660_v15 = vld [vmem:[#allocation9 + $0x490] sm:$0xf] }
 0x562   :  { %8262 = vmatpush.bf16.msrb.mxu1 %v13949_v18  ;;  %v15143_v54 = vld [vmem:[#allocation9 + $0x6ac] sm:$0xf0] }
 0x563   :  { %v7934_v28 = vadd.f32 %v7933_v9, %v7906_v0  ;;  %v7887_v44 = vpop.f32.mrf.mxu3  ;;  %v13661_v9 = vor.u32 %v15079_v21, %v13660_v15  ;;  %v13916_v0 = vld [vmem:[#allocation9 + $0x690] sm:$0xf]  ;;  %v8856_v16 = vunpack.c.l.b16 %v8752_v50 }
 0x564   :  { %v13917_v7 = vor.u32 %v15143_v54, %v13916_v0  ;;  %v13852_v0 = vld [vmem:[#allocation9 + $0x610] sm:$0xf] }
 0x565   :  { %v7936_v60 = vpop.f32.mrf.mxu1  ;;  %v8649_v25 = vadd.f32 %v16682_v35, %v7934_v28  ;;  %v8857_v28 = vunpack.c.h.b16 %v8752_v50  ;;  %8235 = vmatpush.bf16.msrb.mxu0 %v13661_v9 }
 0x566   :  { %v7859_v40 = vpop.f32.mrf.mxu2  ;;  %8263 = vmatpush.bf16.msrb.mxu1 %v13917_v7  ;;  %v14987_v7 = vld [vmem:[#allocation9 + $0x1d4] sm:$0xf] }
 0x567   :  { %v8705_v53 = vmax.f32 %v8649_v25, 0.0  ;;  %v7860_v4 = vadd.f32 %v7859_v40, %v17592_v47 }
 0x568   :  { %8159 = vmatmul.bf16.gmra.mxu1 %v16069_v41  ;;  %v7908_v23 = vpop.f32.mrf.mxu0  ;;  %8113 = vmatmul.bf16.gmra.mxu3 %v16527_v52 }
 0x569   :  { %v8756_v38 = vpack.c.bf16 %v8705_v53, %v8704_v42  ;;  %v7909_v22 = vadd.f32 %v7908_v23, %v16673_v20  ;;  %v16706_v15 = vadd.f32 %v7887_v44, %v7860_v4  ;;  %v13884_v20 = vld [vmem:[#allocation9 + $0x650] sm:$0xf]  ;;  %v8712_v23 = vmax.f32 %v8656_v62, 0.0  ;;  %v13310_v62 = vld [vmem:[#allocation9 + $0x1f0] sm:$0xf0] }
 0x56a   :  { %v15135_v42 = vld [vmem:[#allocation9 + $0x66c] sm:$0xf0] }
 0x56b   :  { %v8792_v18 = vunpack.c.l.b16 %v8756_v38  ;;  %v8793_v25 = vunpack.c.h.b16 %v8756_v38  ;;  %v7937_v27 = vadd.f32 %v7936_v60, %v7909_v22  ;;  %v7890_v55 = vpop.f32.mrf.mxu3  ;;  %8131 = vmatmul.bf16.gmra.mxu0 %v16078_v61  ;;  %v13885_v32 = vor.u32 %v15135_v42, %v13884_v20  ;;  %v15127_v44 = vld [vmem:[#allocation9 + $0x62c] sm:$0xf0] }
 0x56c   :  { %8085 = vmatmul.bf16.gmra.mxu2 %v16536_v56  ;;  %v17594_v22 = vld [vmem:[#allocation28_spill] sm:$0xff]  ;;  %v13853_v20 = vor.u32 %v15127_v44, %v13852_v0 }
 0x56d   :  { %v7938_v6 = vpop.f32.mrf.mxu1  ;;  %v8657_v53 = vadd.f32 %v16682_v35, %v7937_v27  ;;  %v16710_v21 = vpack.c.b16 %v8793_v25, %v8857_v28  ;;  %v16712_v50 = vpack.c.b16 %v8792_v18, %v8856_v16  ;;  %8264 = vmatpush.bf16.msrb.mxu1 %v13885_v32  ;;  %v13628_v27 = vld [vmem:[#allocation9 + $0x450] sm:$0xf]  ;;  %v8664_v16 = vadd.f32 %v16676_v30, %v16645_v10 }
 0x56e   :  { %v7862_v9 = vpop.f32.mrf.mxu2  ;;  %v15071_v4 = vld [vmem:[#allocation9 + $0x46c] sm:$0xf0] }
 0x56f   :  { %17593 = vst [vmem:[#allocation20_spill] sm:$0xff] %v16712_v50  ;;  %v8713_v60 = vmax.f32 %v8657_v53, 0.0  ;;  %v7863_v47 = vadd.f32 %v7862_v9, %v17594_v22  ;;  %v13629_v28 = vor.u32 %v15071_v4, %v13628_v27  ;;  %v13313_v50 = vor.u32 %v14987_v7, %v13310_v62  ;;  %v13566_v22 = vld [vmem:[#allocation9 + $0x3f0] sm:$0xf0] }
 0x570   :  { %v7910_v40 = vpop.f32.mrf.mxu0 }
 0x571   :  { %v8760_v54 = vpack.c.bf16 %v8713_v60, %v8712_v23  ;;  %v7911_v38 = vadd.f32 %v7910_v40, %v16688_v31  ;;  %v16718_v59 = vadd.f32 %v7890_v55, %v7863_v47  ;;  %8265 = vmatpush.bf16.msrb.mxu1 %v13853_v20  ;;  %v13596_v23 = vld [vmem:[#allocation9 + $0x410] sm:$0xf]  ;;  %v15051_v60 = vld [vmem:[#allocation9 + $0x3d4] sm:$0xf]  ;;  %8236 = vmatpush.bf16.msrb.mxu0 %v13629_v28 }
 0x572   :  { %v15063_v31 = vld [vmem:[#allocation9 + $0x42c] sm:$0xf0]  ;;  %8286 = vmatpush.bf16.msrb.mxu2 %v13313_v50  ;;  %v13569_v10 = vor.u32 %v15051_v60, %v13566_v22  ;;  %v8672_v50 = vadd.f32 %v16676_v30, %v16651_v33  ;;  %v14979_v60 = vld [vmem:[#allocation9 + $0x194] sm:$0xf] }
 0x573   :  { %v7939_v42 = vadd.f32 %v7938_v6, %v7911_v38  ;;  %v7892_v32 = vpop.f32.mrf.mxu3  ;;  %v8797_v40 = vunpack.c.h.b16 %v8760_v54  ;;  %v13597_v9 = vor.u32 %v15063_v31, %v13596_v23  ;;  %v8796_v0 = vunpack.c.l.b16 %v8760_v54 }
 0x574   :  { %v8720_v6 = vmax.f32 %v8664_v16, 0.0  ;;  %8314 = vmatpush.bf16.msrb.mxu3 %v13569_v10  ;;  %v13534_v16 = vld [vmem:[#allocation9 + $0x3b0] sm:$0xf0]  ;;  %v8728_v33 = vmax.f32 %v8672_v50, 0.0  ;;  %v8680_v50 = vadd.f32 %v16676_v30, %v16656_v2 }
 0x575   :  { %v7941_v53 = vpop.f32.mrf.mxu1  ;;  %v8665_v44 = vadd.f32 %v16682_v35, %v7939_v42  ;;  %v16721_v27 = vpack.c.b16 %v8797_v40, %v8793_v25  ;;  %v16724_v55 = vpack.c.b16 %v8796_v0, %v8792_v18  ;;  %8237 = vmatpush.bf16.msrb.mxu0 %v13597_v9  ;;  %v15043_v18 = vld [vmem:[#allocation9 + $0x394] sm:$0xf] }
 0x576   :  { %v7864_v4 = vpop.f32.mrf.mxu2  ;;  %v13537_v32 = vor.u32 %v15043_v18, %v13534_v16  ;;  %v13278_v9 = vld [vmem:[#allocation9 + $0x1b0] sm:$0xf0] }
 0x577   :  { %17595 = vst [vmem:[#allocation21_spill] sm:$0xff] %v16721_v27  ;;  %v8721_v38 = vmax.f32 %v8665_v44, 0.0  ;;  %v13281_v10 = vor.u32 %v14979_v60, %v13278_v9  ;;  %v15035_v18 = vld [vmem:[#allocation9 + $0x354] sm:$0xf] }
 0x578   :  { %8164 = vmatmul.bf16.gmra.mxu1 %v16165_v51  ;;  %17596 = vst [vmem:[#allocation22_spill] sm:$0xff] %v16724_v55  ;;  %v7913_v47 = vpop.f32.mrf.mxu0  ;;  %8210 = vmatmul.bf16.vlgmr.msra.gmra.mxu3 %v15950_v57  ;;  %v13502_v16 = vld [vmem:[#allocation9 + $0x370] sm:$0xf0] }
 0x579   :  { %v7914_v54 = vadd.f32 %v7913_v47, %v16696_v49  ;;  %v8764_v7 = vpack.c.bf16 %v8721_v38, %v8720_v6  ;;  %8315 = vmatpush.bf16.msrb.mxu3 %v13537_v32  ;;  %v15115_v6 = vld [vmem:[#allocation9 + $0x5d4] sm:$0xf]  ;;  %8287 = vmatpush.bf16.msrb.mxu2 %v13281_v10 }
 0x57a   :  { %v13822_v38 = vld [vmem:[#allocation9 + $0x5f0] sm:$0xf0] }
 0x57b   :  { %v7942_v25 = vadd.f32 %v7941_v53, %v7914_v54  ;;  %v7987_v28 = vpop.f32.mrf.mxu3  ;;  %8136 = vmatmul.bf16.gmra.mxu0 %v16172_v5  ;;  %v8801_v62 = vunpack.c.h.b16 %v8764_v7  ;;  %v8800_v42 = vunpack.c.l.b16 %v8764_v7  ;;  %v15179_v47 = vld [vmem:[#allocation9 + $0x7d4] sm:$0xf] }
 0x57c   :  { %8182 = vmatmul.bf16.vlgmr.msra.gmra.mxu2 %v15958_v11  ;;  %v17598_v7 = vld [vmem:[#allocation29_spill] sm:$0xff] }
 0x57d   :  { %v7943_v20 = vpop.f32.mrf.mxu1  ;;  %v8673_v23 = vadd.f32 %v16682_v35, %v7942_v25  ;;  %v16733_v31 = vpack.c.b16 %v8801_v62, %v8797_v40  ;;  %v16735_v49 = vpack.c.b16 %v8800_v42, %v8796_v0  ;;  %v13825_v25 = vor.u32 %v15115_v6, %v13822_v38  ;;  %v14078_v0 = vld [vmem:[#allocation9 + $0x7f0] sm:$0xf0] }
 0x57e   :  { %v7959_v44 = vpop.f32.mrf.mxu2  ;;  %v14081_v32 = vor.u32 %v15179_v47, %v14078_v0  ;;  %v14971_v2 = vld [vmem:[#allocation9 + $0x154] sm:$0xf]  ;;  %v8736_v47 = vmax.f32 %v8680_v50, 0.0 }
 0x57f   :  { %17597 = vst [vmem:[#allocation23_spill] sm:$0xff] %v16735_v49  ;;  %v8729_v53 = vmax.f32 %v8673_v23, 0.0  ;;  %v7960_v40 = vadd.f32 %v7959_v44, %v17598_v7  ;;  %v13505_v23 = vor.u32 %v15035_v18, %v13502_v16  ;;  %8342 = vmatpush.bf16.msra.mxu0 %v13825_v25  ;;  %v13246_v10 = vld [vmem:[#allocation9 + $0x170] sm:$0xf0] }
 0x580   :  { %v7915_v22 = vpop.f32.mrf.mxu0  ;;  %8370 = vmatpush.bf16.msra.mxu1 %v14081_v32  ;;  %v15107_v7 = vld [vmem:[#allocation9 + $0x594] sm:$0xf] }
 0x581   :  { %v16737_v4 = vpack.c.bf16 %v8729_v53, %v8728_v33  ;;  %v7916_v54 = vadd.f32 %v7915_v22, %v16706_v15  ;;  %v16743_v27 = vadd.f32 %v7987_v28, %v7960_v40  ;;  %v15027_v33 = vld [vmem:[#allocation9 + $0x314] sm:$0xf]  ;;  %8316 = vmatpush.bf16.msrb.mxu3 %v13505_v23  ;;  %v13249_v28 = vor.u32 %v14971_v2, %v13246_v10 }
 0x582   :  { %v13470_v15 = vld [vmem:[#allocation9 + $0x330] sm:$0xf0]  ;;  %v8688_v2 = vadd.f32 %v16676_v30, %v16664_v8 }
 0x583   :  { %v7944_v60 = vadd.f32 %v7943_v20, %v7916_v54  ;;  %v7989_v55 = vpop.f32.mrf.mxu3  ;;  %v8805_v53 = vunpack.c.h.b16 %v16737_v4  ;;  %v8804_v22 = vunpack.c.l.b16 %v16737_v4  ;;  %v13473_v6 = vor.u32 %v15027_v33, %v13470_v15  ;;  %v13790_v40 = vld [vmem:[#allocation9 + $0x5b0] sm:$0xf0]  ;;  %8288 = vmatpush.bf16.msrb.mxu2 %v13249_v28 }
 0x584   :  { %v13793_v0 = vor.u32 %v15107_v7, %v13790_v40  ;;  %v15171_v18 = vld [vmem:[#allocation9 + $0x794] sm:$0xf] }
 0x585   :  { %v7946_v9 = vpop.f32.mrf.mxu1  ;;  %v8681_v44 = vadd.f32 %v16682_v35, %v7944_v60  ;;  %v16748_v38 = vpack.c.b16 %v8805_v53, %v8801_v62  ;;  %v16750_v20 = vpack.c.b16 %v8804_v22, %v8800_v42  ;;  %v14046_v16 = vld [vmem:[#allocation9 + $0x7b0] sm:$0xf0]  ;;  %v17601_v42 = vld [vmem:[#allocation30_spill] sm:$0xff]  ;;  %8317 = vmatpush.bf16.msrb.mxu3 %v13473_v6 }
 0x586   :  { %v7961_v4 = vpop.f32.mrf.mxu2  ;;  %v15019_v32 = vld [vmem:[#allocation9 + $0x2d4] sm:$0xf]  ;;  %v14049_v60 = vor.u32 %v15171_v18, %v14046_v16  ;;  %8343 = vmatpush.bf16.msra.mxu0 %v13793_v0  ;;  %v8744_v16 = vmax.f32 %v8688_v2, 0.0 }
 0x587   :  { %17599 = vst [vmem:[#allocation24_spill] sm:$0xff] %v16748_v38  ;;  %v8737_v54 = vmax.f32 %v8681_v44, 0.0  ;;  %v7962_v23 = vadd.f32 %v7961_v4, %v17601_v42  ;;  %v14963_v33 = vld [vmem:[#allocation9 + $0x114] sm:$0xf]  ;;  %v15184_v38 = vld [vmem:[#allocation9 + $0x7f4] sm:$0xf0] }
 0x588   :  { %17600 = vst [vmem:[#allocation25_spill] sm:$0xff] %v16750_v20  ;;  %8169 = vmatmul.bf16.gmra.mxu1 %v16559_v14  ;;  %v7918_v25 = vpop.f32.mrf.mxu0  ;;  %8215 = vmatmul.bf16.gmra.mxu3 %v16045_v3  ;;  %v13214_v50 = vld [vmem:[#allocation9 + $0x130] sm:$0xf0] }
 0x589   :  { %v7919_v62 = vadd.f32 %v7918_v25, %v16718_v59  ;;  %v13438_v15 = vld [vmem:[#allocation9 + $0x2f0] sm:$0xf0]  ;;  %v8772_v44 = vpack.c.bf16 %v8737_v54, %v8736_v47  ;;  %v13217_v10 = vor.u32 %v14963_v33, %v13214_v50  ;;  %v16759_v59 = vadd.f32 %v7989_v55, %v7962_v23  ;;  %8371 = vmatpush.bf16.msra.mxu1 %v14049_v60 }
 0x58a   :  { %v13441_v28 = vor.u32 %v15019_v32, %v13438_v15  ;;  %v15011_v6 = vld [vmem:[#allocation9 + $0x294] sm:$0xf] }
 0x58b   :  { %v7947_v7 = vadd.f32 %v7946_v9, %v7919_v62  ;;  %v7992_v20 = vpop.f32.mrf.mxu3  ;;  %8141 = vmatmul.bf16.gmra.mxu0 %v16565_v37  ;;  %v13406_v25 = vld [vmem:[#allocation9 + $0x2b0] sm:$0xf0]  ;;  %v8809_v4 = vunpack.c.h.b16 %v8772_v44  ;;  %v8808_v18 = vunpack.c.l.b16 %v8772_v44  ;;  %8289 = vmatpush.bf16.msrb.mxu2 %v13217_v10  ;;  %v17604_v10 = vld [vmem:[#allocation31_spill] sm:$0xff] }
 0x58c   :  { %v13409_v47 = vor.u32 %v15011_v6, %v13406_v25  ;;  %8187 = vmatmul.bf16.gmra.mxu2 %v16054_v46  ;;  %8318 = vmatpush.bf16.msrb.mxu3 %v13441_v28  ;;  %v14955_v8 = vld [vmem:[#allocation9 + $0xd4] sm:$0xf] }
 0x58d   :  { %v7948_v40 = vpop.f32.mrf.mxu1  ;;  %v8689_v54 = vadd.f32 %v16682_v35, %v7947_v7  ;;  %v13182_v30 = vld [vmem:[#allocation9 + $0xf0] sm:$0xf0]  ;;  %v16763_v9 = vpack.c.b16 %v8809_v4, %v8805_v53  ;;  %v16765_v0 = vpack.c.b16 %v8808_v18, %v8804_v22 }
 0x58e   :  { %v13185_v55 = vor.u32 %v14955_v8, %v13182_v30  ;;  %v15099_v62 = vld [vmem:[#allocation9 + $0x554] sm:$0xf]  ;;  %v7964_v60 = vpop.f32.mrf.mxu2 }
 0x58f   :  { %17602 = vst [vmem:[#allocation26_spill] sm:$0xff] %v16763_v9  ;;  %v8745_v32 = vmax.f32 %v8689_v54, 0.0  ;;  %v13758_v42 = vld [vmem:[#allocation9 + $0x570] sm:$0xf0]  ;;  %v7965_v28 = vadd.f32 %v7964_v60, %v17604_v10 }
 0x590   :  { %17603 = vst [vmem:[#allocation27_spill] sm:$0xff] %v16765_v0  ;;  %v7920_v23 = vpop.f32.mrf.mxu0  ;;  %v13761_v33 = vor.u32 %v15099_v62, %v13758_v42  ;;  %v15163_v50 = vld [vmem:[#allocation9 + $0x754] sm:$0xf]  ;;  %8290 = vmatpush.bf16.msrb.mxu2 %v13185_v55  ;;  %8319 = vmatpush.bf16.msrb.mxu3 %v13409_v47 }
 0x591   :  { %v14014_v15 = vld [vmem:[#allocation9 + $0x770] sm:$0xf0]  ;;  %v8776_v44 = vpack.c.bf16 %v8745_v32, %v8744_v16  ;;  %v16768_v8 = vadd.f32 %v7992_v20, %v7965_v28 }
 0x592   :  { %v15003_v35 = vld [vmem:[#allocation9 + $0x254] sm:$0xf]  ;;  %v14017_v53 = vor.u32 %v15163_v50, %v14014_v15  ;;  %8344 = vmatpush.bf16.msra.mxu0 %v13761_v33 }
 0x593   :  { %v13374_v7 = vld [vmem:[#allocation9 + $0x270] sm:$0xf0]  ;;  %v7994_v54 = vpop.f32.mrf.mxu3  ;;  %v16770_v55 = vunpack.c.h.b16 %v8776_v44  ;;  %v16772_v16 = vunpack.c.l.b16 %v8776_v44 }
 0x594   :  { %v14947_v22 = vld [vmem:[#allocation9 + $0x94] sm:$0xf]  ;;  %v13377_v2 = vor.u32 %v15003_v35, %v13374_v7  ;;  %8372 = vmatpush.bf16.msra.mxu1 %v14017_v53 }
 0x595   :  { %v13150_v40 = vld [vmem:[#allocation9 + $0xb0] sm:$0xf0]  ;;  %v8043_v25 = vpop.f32.mrf.mxu1  ;;  %17605 = vst [vmem:[#allocation28_spill] sm:$0xff] %v16770_v55  ;;  %v16775_v23 = vpack.c.b16 %v16770_v55, %v8809_v4  ;;  %v16778_v60 = vpack.c.b16 %v16772_v16, %v8808_v18  ;;  %v17609_v4 = vld [vmem:[#allocation32_spill] sm:$0xff] }
 0x596   :  { %v13153_v6 = vor.u32 %v14947_v22, %v13150_v40  ;;  %v14995_v30 = vld [vmem:[#allocation9 + $0x214] sm:$0xf]  ;;  %17606 = vst [vmem:[#allocation29_spill] sm:$0xff] %v16772_v16  ;;  %8320 = vmatpush.bf16.msrb.mxu3 %v13377_v2  ;;  %v7966_v44 = vpop.f32.mrf.mxu2  ;;  %v14020_v16 = vld [vmem:[#allocation9 + $0x758] sm:$0xf] }
 0x597   :  { %v13342_v62 = vld [vmem:[#allocation9 + $0x230] sm:$0xf0]  ;;  %17607 = vst [vmem:[#allocation30_spill] sm:$0xff] %v16775_v23  ;;  %v7967_v7 = vadd.f32 %v7966_v44, %v17609_v4 }
 0x598   :  { %8291 = vmatpush.bf16.msrb.mxu2 %v13153_v6  ;;  %v13345_v47 = vor.u32 %v14995_v30, %v13342_v62  ;;  %v14939_v32 = vld [vmem:[#allocation9 + $0x54] sm:$0xf]  ;;  %17608 = vst [vmem:[#allocation31_spill] sm:$0xff] %v16778_v60  ;;  %8266 = vmatmul.bf16.vlgmr.msrb.gmra.mxu1 %v15972_v63  ;;  %v8015_v35 = vpop.f32.mrf.mxu0 }
 0x599   :  { %v13118_v42 = vld [vmem:[#allocation9 + $0x70] sm:$0xf0]  ;;  %8220 = vmatmul.bf16.gmra.mxu3 %v16137_v34  ;;  %v8016_v53 = vadd.f32 %v8015_v35, %v16743_v27 }
 0x59a   :  { %v13121_v20 = vor.u32 %v14939_v32, %v13118_v42  ;;  %v15091_v33 = vld [vmem:[#allocation9 + $0x514] sm:$0xf]  ;;  %8321 = vmatpush.bf16.msrb.mxu3 %v13345_v47  ;;  %v7995_v32 = vadd.f32 %v7994_v54, %v7967_v7 }
 0x59b   :  { %v13726_v50 = vld [vmem:[#allocation9 + $0x530] sm:$0xf0]  ;;  %v16784_v6 = vadd.f32 %v8043_v25, %v8016_v53  ;;  %v7997_v62 = vpop.f32.mrf.mxu3  ;;  %8238 = vmatmul.bf16.vlgmr.msrb.gmra.mxu0 %v15980_v19 }
 0x59c   :  { %v15155_v15 = vld [vmem:[#allocation9 + $0x714] sm:$0xf]  ;;  %v13729_v10 = vor.u32 %v15091_v33, %v13726_v50  ;;  %8292 = vmatpush.bf16.msrb.mxu2 %v13121_v20 }
 0x59d   :  { %v13982_v28 = vld [vmem:[#allocation9 + $0x730] sm:$0xf0]  ;;  %v8045_v30 = vpop.f32.mrf.mxu1  ;;  %8192 = vmatmul.bf16.gmra.mxu2 %v16156_v1 }
 0x59e   :  { %v13985_v18 = vor.u32 %v15155_v15, %v13982_v28  ;;  %v14931_v22 = vld [vmem:[#allocation9 + $0x14] sm:$0xf]  ;;  %8345 = vmatpush.bf16.msra.mxu0 %v13729_v10  ;;  %v7969_v47 = vpop.f32.mrf.mxu2 }
 0x59f   :  { %v13086_v40 = vld [vmem:[#allocation9 + $0x30] sm:$0xf0] }
 0x5a0   :  { %v13089_v2 = vor.u32 %v14931_v22, %v13086_v40  ;;  %8373 = vmatpush.bf16.msra.mxu1 %v13985_v18  ;;  %v15083_v27 = vld [vmem:[#allocation9 + $0x4d4] sm:$0xf]  ;;  %v8017_v20 = vpop.f32.mrf.mxu0 }
 0x5a1   :  { %v13694_v42 = vld [vmem:[#allocation9 + $0x4f0] sm:$0xf0]  ;;  %v8018_v35 = vadd.f32 %v8017_v20, %v16759_v59  ;;  %v17611_v20 = vld [vmem:[#allocation34_spill] sm:$0xff] }
 0x5a2   :  { %8293 = vmatpush.bf16.msrb.mxu2 %v13089_v2  ;;  %v13697_v33 = vor.u32 %v15083_v27, %v13694_v42  ;;  %v15147_v50 = vld [vmem:[#allocation9 + $0x6d4] sm:$0xf] }
 0x5a3   :  { %v13950_v15 = vld [vmem:[#allocation9 + $0x6f0] sm:$0xf0]  ;;  %v16790_v28 = vadd.f32 %v8045_v30, %v8018_v35  ;;  %v7999_v53 = vpop.f32.mrf.mxu3 }
 0x5a4   :  { %v17610_v25 = vld [vmem:[#allocation33_spill] sm:$0xff]  ;;  %v13953_v10 = vor.u32 %v15147_v50, %v13950_v15  ;;  %8346 = vmatpush.bf16.msra.mxu0 %v13697_v33 }
 0x5a5   :  { %v7970_v44 = vadd.f32 %v7969_v47, %v17610_v25  ;;  %v8048_v54 = vpop.f32.mrf.mxu1  ;;  %v15075_v7 = vld [vmem:[#allocation9 + $0x494] sm:$0xf] }
 0x5a6   :  { %8374 = vmatpush.bf16.msra.mxu1 %v13953_v10  ;;  %v13662_v18 = vld [vmem:[#allocation9 + $0x4b0] sm:$0xf0]  ;;  %v7971_v40 = vpop.f32.mrf.mxu2 }
 0x5a7   :  { %v7998_v4 = vadd.f32 %v7997_v62, %v7970_v44  ;;  %v13665_v2 = vor.u32 %v15075_v7, %v13662_v18  ;;  %v15139_v59 = vld [vmem:[#allocation9 + $0x694] sm:$0xf]  ;;  %v7972_v30 = vadd.f32 %v7971_v40, %v17611_v20  ;;  %v14992_v20 = vld [vmem:[#allocation9 + $0x1f4] sm:$0xf0] }
 0x5a8   :  { %8271 = vmatmul.bf16.gmra.mxu1 %v16069_v41  ;;  %v8020_v22 = vpop.f32.mrf.mxu0  ;;  %v13918_v27 = vld [vmem:[#allocation9 + $0x6b0] sm:$0xf0] }
 0x5a9   :  { %8225 = vmatmul.bf16.gmra.mxu3 %v16527_v52  ;;  %v8021_v42 = vadd.f32 %v8020_v22, %v16768_v8  ;;  %v13921_v47 = vor.u32 %v15139_v59, %v13918_v27  ;;  %8347 = vmatpush.bf16.msra.mxu0 %v13665_v2  ;;  %v8000_v15 = vadd.f32 %v7999_v53, %v7972_v30  ;;  %v15131_v35 = vld [vmem:[#allocation9 + $0x654] sm:$0xf]  ;;  %v17612_v59 = vld [vmem:[#allocation35_spill] sm:$0xff] }
 0x5aa   :  { %v13886_v25 = vld [vmem:[#allocation9 + $0x670] sm:$0xf0] }
 0x5ab   :  { %v16796_v33 = vadd.f32 %v8048_v54, %v8021_v42  ;;  %v8002_v50 = vpop.f32.mrf.mxu3  ;;  %8243 = vmatmul.bf16.gmra.mxu0 %v16078_v61  ;;  %8375 = vmatpush.bf16.msra.mxu1 %v13921_v47  ;;  %v13889_v44 = vor.u32 %v15131_v35, %v13886_v25  ;;  %v15067_v10 = vld [vmem:[#allocation9 + $0x454] sm:$0xf]  ;;  %v13316_v42 = vld [vmem:[#allocation9 + $0x1d8] sm:$0xf] }
 0x5ac   :  { %v13630_v7 = vld [vmem:[#allocation9 + $0x470] sm:$0xf0]  ;;  %v13317_v30 = vor.u32 %v14992_v20, %v13316_v42  ;;  %v15040_v42 = vld [vmem:[#allocation9 + $0x374] sm:$0xf0] }
 0x5ad   :  { %v8050_v62 = vpop.f32.mrf.mxu1  ;;  %8197 = vmatmul.bf16.gmra.mxu2 %v16536_v56  ;;  %v13633_v22 = vor.u32 %v15067_v10, %v13630_v7  ;;  %v15123_v40 = vld [vmem:[#allocation9 + $0x614] sm:$0xf]  ;;  %v13572_v10 = vld [vmem:[#allocation9 + $0x3d8] sm:$0xf] }
 0x5ae   :  { %v7974_v18 = vpop.f32.mrf.mxu2  ;;  %v13854_v54 = vld [vmem:[#allocation9 + $0x630] sm:$0xf0]  ;;  %8398 = vmatpush.bf16.msra.mxu2 %v13317_v30 }
 0x5af   :  { %8376 = vmatpush.bf16.msra.mxu1 %v13889_v44  ;;  %v7975_v27 = vadd.f32 %v7974_v18, %v17612_v59  ;;  %v13857_v53 = vor.u32 %v15123_v40, %v13854_v54  ;;  %8348 = vmatpush.bf16.msra.mxu0 %v13633_v22  ;;  %v15059_v44 = vld [vmem:[#allocation9 + $0x414] sm:$0xf]  ;;  %v15048_v59 = vld [vmem:[#allocation9 + $0x3b4] sm:$0xf0] }
 0x5b0   :  { %v8022_v8 = vpop.f32.mrf.mxu0  ;;  %v13598_v23 = vld [vmem:[#allocation9 + $0x430] sm:$0xf0] }
 0x5b1   :  { %v8023_v2 = vadd.f32 %v8022_v8, %v7995_v32  ;;  %v16803_v25 = vadd.f32 %v8002_v50, %v7975_v27  ;;  %v13601_v7 = vor.u32 %v15059_v44, %v13598_v23  ;;  %v15056_v32 = vld [vmem:[#allocation9 + $0x3f4] sm:$0xf0]  ;;  %v17613_v44 = vld [vmem:[#allocation36_spill] sm:$0xff] }
 0x5b2   :  { %v13573_v8 = vor.u32 %v15056_v32, %v13572_v10  ;;  %v13508_v27 = vld [vmem:[#allocation9 + $0x358] sm:$0xf] }
 0x5b3   :  { %v16801_v47 = vadd.f32 %v8050_v62, %v8023_v2  ;;  %v8004_v35 = vpop.f32.mrf.mxu3  ;;  %8377 = vmatpush.bf16.msra.mxu1 %v13857_v53  ;;  %8349 = vmatpush.bf16.msra.mxu0 %v13601_v7  ;;  %v13540_v2 = vld [vmem:[#allocation9 + $0x398] sm:$0xf]  ;;  %v13509_v30 = vor.u32 %v15040_v42, %v13508_v27 }
 0x5b4   :  { %8426 = vmatpush.bf16.msra.mxu3 %v13573_v8  ;;  %v13541_v23 = vor.u32 %v15048_v59, %v13540_v2  ;;  %v14984_v10 = vld [vmem:[#allocation9 + $0x1b4] sm:$0xf0] }
 0x5b5   :  { %v8053_v60 = vpop.f32.mrf.mxu1  ;;  %v15120_v2 = vld [vmem:[#allocation9 + $0x5f4] sm:$0xf0] }
 0x5b6   :  { %v7976_v62 = vpop.f32.mrf.mxu2  ;;  %v14084_v59 = vld [vmem:[#allocation9 + $0x7d8] sm:$0xf] }
 0x5b7   :  { %v13476_v27 = vld [vmem:[#allocation9 + $0x318] sm:$0xf]  ;;  %v14085_v42 = vor.u32 %v15184_v38, %v14084_v59 }
 0x5b8   :  { %8276 = vmatmul.bf16.gmra.mxu1 %v16165_v51  ;;  %v8025_v18 = vpop.f32.mrf.mxu0  ;;  %8427 = vmatpush.bf16.msra.mxu3 %v13541_v23  ;;  %v17614_v38 = vld [vmem:[#allocation37_spill] sm:$0xff] }
 0x5b9   :  { %8322 = vmatmul.bf16.vlgmr.msrb.gmra.mxu3 %v15950_v57  ;;  %v8026_v22 = vadd.f32 %v8025_v18, %v7998_v4  ;;  %8482 = vmatpush.bf16.msrb.mxu1 %v14085_v42 }
 0x5bb   :  { %v16807_v40 = vadd.f32 %v8053_v60, %v8026_v22  ;;  %v8099_v54 = vpop.f32.mrf.mxu3  ;;  %8248 = vmatmul.bf16.gmra.mxu0 %v16172_v5  ;;  %v13284_v60 = vld [vmem:[#allocation9 + $0x198] sm:$0xf] }
 0x5bc   :  { %v13285_v7 = vor.u32 %v14984_v10, %v13284_v60  ;;  %8428 = vmatpush.bf16.msra.mxu3 %v13509_v30  ;;  %v13828_v22 = vld [vmem:[#allocation9 + $0x5d8] sm:$0xf] }
 0x5bd   :  { %v8055_v50 = vpop.f32.mrf.mxu1  ;;  %8294 = vmatmul.bf16.vlgmr.msrb.gmra.mxu2 %v15958_v11  ;;  %v13829_v23 = vor.u32 %v15120_v2, %v13828_v22  ;;  %v15024_v30 = vld [vmem:[#allocation9 + $0x2f4] sm:$0xf0] }
 0x5be   :  { %v8071_v53 = vpop.f32.mrf.mxu2  ;;  %8399 = vmatpush.bf16.msra.mxu2 %v13285_v7  ;;  %v13220_v22 = vld [vmem:[#allocation9 + $0x118] sm:$0xf] }
 0x5bf   :  { %v8072_v4 = vadd.f32 %v8071_v53, %v17613_v44  ;;  %v14976_v53 = vld [vmem:[#allocation9 + $0x174] sm:$0xf0]  ;;  %8454 = vmatpush.bf16.msrb.mxu0 %v13829_v23 }
 0x5c0   :  { %v8027_v20 = vpop.f32.mrf.mxu0  ;;  %v14968_v2 = vld [vmem:[#allocation9 + $0x134] sm:$0xf0] }
 0x5c1   :  { %v8028_v35 = vadd.f32 %v8027_v20, %v8000_v15  ;;  %v16814_v62 = vadd.f32 %v8099_v54, %v8072_v4  ;;  %v15032_v15 = vld [vmem:[#allocation9 + $0x334] sm:$0xf0]  ;;  %v13221_v59 = vor.u32 %v14968_v2, %v13220_v22 }
 0x5c2   :  { %v13252_v20 = vld [vmem:[#allocation9 + $0x158] sm:$0xf]  ;;  %v13477_v44 = vor.u32 %v15032_v15, %v13476_v27 }
 0x5c3   :  { %v16812_v32 = vadd.f32 %v8055_v50, %v8028_v35  ;;  %v8101_v18 = vpop.f32.mrf.mxu3  ;;  %v13253_v50 = vor.u32 %v14976_v53, %v13252_v20  ;;  %v13444_v54 = vld [vmem:[#allocation9 + $0x2d8] sm:$0xf] }
 0x5c4   :  { %8429 = vmatpush.bf16.msra.mxu3 %v13477_v44  ;;  %v13445_v60 = vor.u32 %v15024_v30, %v13444_v54  ;;  %v13796_v20 = vld [vmem:[#allocation9 + $0x598] sm:$0xf] }
 0x5c5   :  { %v8058_v8 = vpop.f32.mrf.mxu1  ;;  %8400 = vmatpush.bf16.msra.mxu2 %v13253_v50  ;;  %v15112_v53 = vld [vmem:[#allocation9 + $0x5b4] sm:$0xf0] }
 0x5c6   :  { %v8073_v4 = vpop.f32.mrf.mxu2  ;;  %v14052_v44 = vld [vmem:[#allocation9 + $0x798] sm:$0xf]  ;;  %v13797_v50 = vor.u32 %v15112_v53, %v13796_v20 }
 0x5c7   :  { %v8074_v7 = vadd.f32 %v8073_v4, %v17614_v38  ;;  %v15176_v54 = vld [vmem:[#allocation9 + $0x7b4] sm:$0xf0] }
 0x5c8   :  { %8281 = vmatmul.bf16.gmra.mxu1 %v16559_v14  ;;  %v8030_v35 = vpop.f32.mrf.mxu0  ;;  %8430 = vmatpush.bf16.msra.mxu3 %v13445_v60  ;;  %v15016_v30 = vld [vmem:[#allocation9 + $0x2b4] sm:$0xf0] }
 0x5c9   :  { %8327 = vmatmul.bf16.gmra.mxu3 %v16045_v3  ;;  %v8031_v10 = vadd.f32 %v8030_v35, %v16803_v25  ;;  %v16823_v42 = vadd.f32 %v8101_v18, %v8074_v7  ;;  %8401 = vmatpush.bf16.msra.mxu2 %v13221_v59  ;;  %v13412_v25 = vld [vmem:[#allocation9 + $0x298] sm:$0xf]  ;;  %v14053_v35 = vor.u32 %v15176_v54, %v14052_v44 }
 0x5ca   :  { %v13188_v4 = vld [vmem:[#allocation9 + $0xd8] sm:$0xf]  ;;  %8455 = vmatpush.bf16.msrb.mxu0 %v13797_v50 }
 0x5cb   :  { %v16820_v27 = vadd.f32 %v8058_v8, %v8031_v10  ;;  %v8104_v15 = vpop.f32.mrf.mxu3  ;;  %8253 = vmatmul.bf16.gmra.mxu0 %v16565_v37  ;;  %v13413_v8 = vor.u32 %v15016_v30, %v13412_v25  ;;  %v14960_v10 = vld [vmem:[#allocation9 + $0xf4] sm:$0xf0]  ;;  %8483 = vmatpush.bf16.msrb.mxu1 %v14053_v35 }
 0x5cc   :  { %v13189_v38 = vor.u32 %v14960_v10, %v13188_v4  ;;  %v13380_v18 = vld [vmem:[#allocation9 + $0x258] sm:$0xf] }
 0x5cd   :  { %v8060_v23 = vpop.f32.mrf.mxu1  ;;  %8299 = vmatmul.bf16.gmra.mxu2 %v16054_v46  ;;  %8431 = vmatpush.bf16.msra.mxu3 %v13413_v8  ;;  %v15008_v7 = vld [vmem:[#allocation9 + $0x274] sm:$0xf0] }
 0x5ce   :  { %v8076_v2 = vpop.f32.mrf.mxu2  ;;  %8402 = vmatpush.bf16.msra.mxu2 %v13189_v38  ;;  %v13381_v60 = vor.u32 %v15008_v7, %v13380_v18  ;;  %v17615_v23 = vld [vmem:[#allocation38_spill] sm:$0xff] }
 0x5cf   :  { %v8077_v59 = vadd.f32 %v8076_v2, %v17615_v23  ;;  %v13764_v20 = vld [vmem:[#allocation9 + $0x558] sm:$0xf]  ;;  %v16830_v2 = vperm.slane %v16671_v26, 2 }
 0x5d0   :  { %v8032_v22 = vpop.f32.mrf.mxu0  ;;  %v15104_v53 = vld [vmem:[#allocation9 + $0x574] sm:$0xf0] }
 0x5d1   :  { %v13765_v55 = vor.u32 %v15104_v53, %v13764_v20  ;;  %v15168_v44 = vld [vmem:[#allocation9 + $0x774] sm:$0xf0]  ;;  %v16827_v4 = vadd.f32 %v8104_v15, %v8077_v59  ;;  %8432 = vmatpush.bf16.msra.mxu3 %v13381_v60 }
 0x5d2   :  { %v13156_v54 = vld [vmem:[#allocation9 + $0x98] sm:$0xf]  ;;  %v14021_v35 = vor.u32 %v15168_v44, %v14020_v16 }
 0x5d3   :  { %v14952_v25 = vld [vmem:[#allocation9 + $0xb4] sm:$0xf0]  ;;  %v8106_v50 = vpop.f32.mrf.mxu3  ;;  %8456 = vmatpush.bf16.msrb.mxu0 %v13765_v55 }
 0x5d4   :  { %v13157_v8 = vor.u32 %v14952_v25, %v13156_v54  ;;  %v13348_v10 = vld [vmem:[#allocation9 + $0x218] sm:$0xf]  ;;  %8484 = vmatpush.bf16.msrb.mxu1 %v14021_v35  ;;  %v16836_v54 = vperm.slane %v16671_v26, 3  ;;  %v17616_v25 = vld [vmem:[#allocation39_spill] sm:$0xff] }
 0x5d5   :  { %v8155_v30 = vpop.f32.mrf.mxu1  ;;  %v15000_v22 = vld [vmem:[#allocation9 + $0x234] sm:$0xf0] }
 0x5d6   :  { %v13349_v38 = vor.u32 %v15000_v22, %v13348_v10  ;;  %8403 = vmatpush.bf16.msra.mxu2 %v13157_v8  ;;  %v13124_v18 = vld [vmem:[#allocation9 + $0x58] sm:$0xf]  ;;  %v8078_v59 = vpop.f32.mrf.mxu2 }
 0x5d7   :  { %v14944_v7 = vld [vmem:[#allocation9 + $0x74] sm:$0xf0]  ;;  %v8079_v35 = vadd.f32 %v8078_v59, %v17616_v25 }
 0x5d8   :  { %8378 = vmatmul.bf16.vlgmr.msra.gmra.mxu1 %v15972_v63  ;;  %v13125_v23 = vor.u32 %v14944_v7, %v13124_v18  ;;  %v13732_v20 = vld [vmem:[#allocation9 + $0x518] sm:$0xf]  ;;  %8433 = vmatpush.bf16.msra.mxu3 %v13349_v38  ;;  %v8127_v60 = vpop.f32.mrf.mxu0  ;;  %v8642_v18 = vadd.f32 %v16830_v2, %v16784_v6 }
 0x5d9   :  { %v15096_v15 = vld [vmem:[#allocation9 + $0x534] sm:$0xf0]  ;;  %8332 = vmatmul.bf16.gmra.mxu3 %v16137_v34  ;;  %v8128_v44 = vadd.f32 %v8127_v60, %v16814_v62  ;;  %v16842_v62 = vadd.f32 %v8106_v50, %v8079_v35 }
 0x5da   :  { %v13988_v16 = vld [vmem:[#allocation9 + $0x718] sm:$0xf]  ;;  %v13733_v55 = vor.u32 %v15096_v15, %v13732_v20  ;;  %8404 = vmatpush.bf16.msra.mxu2 %v13125_v23  ;;  %v8698_v23 = vmax.f32 %v8642_v18, 0.0 }
 0x5db   :  { %v15160_v53 = vld [vmem:[#allocation9 + $0x734] sm:$0xf0]  ;;  %v8156_v7 = vadd.f32 %v8155_v30, %v8128_v44  ;;  %v8109_v20 = vpop.f32.mrf.mxu3  ;;  %8350 = vmatmul.bf16.vlgmr.msra.gmra.mxu0 %v15980_v19  ;;  %v17617_v30 = vld [vmem:[#allocation40_spill] sm:$0xff] }
 0x5dc   :  { %v13989_v8 = vor.u32 %v15160_v53, %v13988_v16  ;;  %v13092_v10 = vld [vmem:[#allocation9 + $0x18] sm:$0xf]  ;;  %8457 = vmatpush.bf16.msrb.mxu0 %v13733_v55 }
 0x5dd   :  { %v14936_v22 = vld [vmem:[#allocation9 + $0x34] sm:$0xf0]  ;;  %v8157_v0 = vpop.f32.mrf.mxu1  ;;  %v8643_v26 = vadd.f32 %v16836_v54, %v8156_v7  ;;  %8304 = vmatmul.bf16.gmra.mxu2 %v16156_v1 }
 0x5de   :  { %v13093_v38 = vor.u32 %v14936_v22, %v13092_v10  ;;  %8485 = vmatpush.bf16.msrb.mxu1 %v13989_v8  ;;  %v13700_v53 = vld [vmem:[#allocation9 + $0x4d8] sm:$0xf]  ;;  %v8650_v8 = vadd.f32 %v16830_v2, %v16790_v28 }
 0x5df   :  { %v8699_v15 = vmax.f32 %v8643_v26, 0.0  ;;  %v8081_v60 = vpop.f32.mrf.mxu2  ;;  %v15088_v44 = vld [vmem:[#allocation9 + $0x4f4] sm:$0xf0] }
 0x5e0   :  { %8405 = vmatpush.bf16.msra.mxu2 %v13093_v38  ;;  %v8129_v16 = vpop.f32.mrf.mxu0  ;;  %v8082_v55 = vadd.f32 %v8081_v60, %v17617_v30  ;;  %v13956_v25 = vld [vmem:[#allocation9 + $0x6d8] sm:$0xf]  ;;  %v13701_v50 = vor.u32 %v15088_v44, %v13700_v53 }
 0x5e1   :  { %v8753_v59 = vpack.c.bf16 %v8699_v15, %v8698_v23  ;;  %v8130_v6 = vadd.f32 %v8129_v16, %v16823_v42  ;;  %v15152_v35 = vld [vmem:[#allocation9 + $0x6f4] sm:$0xf0]  ;;  %v8706_v42 = vmax.f32 %v8650_v8, 0.0 }
 0x5e2   :  { %v16850_v18 = vadd.f32 %v8109_v20, %v8082_v55  ;;  %8458 = vmatpush.bf16.msrb.mxu0 %v13701_v50  ;;  %v13957_v7 = vor.u32 %v15152_v35, %v13956_v25  ;;  %v13668_v15 = vld [vmem:[#allocation9 + $0x498] sm:$0xf]  ;;  %v8658_v50 = vadd.f32 %v16830_v2, %v16796_v33 }
 0x5e3   :  { %v8158_v10 = vadd.f32 %v8157_v0, %v8130_v6  ;;  %v8111_v38 = vpop.f32.mrf.mxu3  ;;  %v15080_v16 = vld [vmem:[#allocation9 + $0x4b4] sm:$0xf0]  ;;  %v8858_v35 = vunpack.c.l.b16 %v8753_v59  ;;  %v8859_v8 = vunpack.c.h.b16 %v8753_v59 }
 0x5e4   :  { %8486 = vmatpush.bf16.msrb.mxu1 %v13957_v7  ;;  %v13669_v0 = vor.u32 %v15080_v16, %v13668_v15  ;;  %v13924_v6 = vld [vmem:[#allocation9 + $0x698] sm:$0xf] }
 0x5e5   :  { %v8160_v22 = vpop.f32.mrf.mxu1  ;;  %v8651_v26 = vadd.f32 %v16836_v54, %v8158_v10  ;;  %v15144_v30 = vld [vmem:[#allocation9 + $0x6b4] sm:$0xf0] }
 0x5e6   :  { %v17618_v53 = vld [vmem:[#allocation41_spill] sm:$0xff]  ;;  %v13925_v25 = vor.u32 %v15144_v30, %v13924_v6  ;;  %8459 = vmatpush.bf16.msrb.mxu0 %v13669_v0 }
 0x5e7   :  { %v8707_v23 = vmax.f32 %v8651_v26, 0.0  ;;  %v8083_v28 = vpop.f32.mrf.mxu2  ;;  %v13860_v6 = vld [vmem:[#allocation9 + $0x618] sm:$0xf] }
 0x5e8   :  { %8383 = vmatmul.bf16.gmra.mxu1 %v16069_v41  ;;  %v8132_v60 = vpop.f32.mrf.mxu0  ;;  %v8084_v44 = vadd.f32 %v8083_v28, %v17618_v53 }
 0x5e9   :  { %8337 = vmatmul.bf16.gmra.mxu3 %v16527_v52  ;;  %v8757_v20 = vpack.c.bf16 %v8707_v23, %v8706_v42  ;;  %v8133_v55 = vadd.f32 %v8132_v60, %v16827_v4  ;;  %8487 = vmatpush.bf16.msrb.mxu1 %v13925_v25  ;;  %v13892_v4 = vld [vmem:[#allocation9 + $0x658] sm:$0xf]  ;;  %v8714_v60 = vmax.f32 %v8658_v50, 0.0  ;;  %v13318_v50 = vld [vmem:[#allocation9 + $0x1f8] sm:$0xf0] }
 0x5ea   :  { %v16860_v15 = vadd.f32 %v8111_v38, %v8084_v44  ;;  %v15136_v42 = vld [vmem:[#allocation9 + $0x674] sm:$0xf0] }
 0x5eb   :  { %v8794_v10 = vunpack.c.l.b16 %v8757_v20  ;;  %v8795_v7 = vunpack.c.h.b16 %v8757_v20  ;;  %v8161_v26 = vadd.f32 %v8160_v22, %v8133_v55  ;;  %v8114_v49 = vpop.f32.mrf.mxu3  ;;  %8355 = vmatmul.bf16.gmra.mxu0 %v16078_v61  ;;  %v13893_v33 = vor.u32 %v15136_v42, %v13892_v4  ;;  %v15128_v38 = vld [vmem:[#allocation9 + $0x634] sm:$0xf0] }
 0x5ec   :  { %v17621_v55 = vld [vmem:[#allocation42_spill] sm:$0xff]  ;;  %v13861_v4 = vor.u32 %v15128_v38, %v13860_v6 }
 0x5ed   :  { %v8162_v9 = vpop.f32.mrf.mxu1  ;;  %v8659_v23 = vadd.f32 %v16836_v54, %v8161_v26  ;;  %8309 = vmatmul.bf16.gmra.mxu2 %v16536_v56  ;;  %v16864_v16 = vpack.c.b16 %v8795_v7, %v8859_v8  ;;  %v16866_v59 = vpack.c.b16 %v8794_v10, %v8858_v35  ;;  %8488 = vmatpush.bf16.msrb.mxu1 %v13893_v33  ;;  %v13636_v44 = vld [vmem:[#allocation9 + $0x458] sm:$0xf]  ;;  %v14988_v26 = vld [vmem:[#allocation9 + $0x1dc] sm:$0xf] }
 0x5ee   :  { %v15072_v25 = vld [vmem:[#allocation9 + $0x474] sm:$0xf0]  ;;  %v8666_v35 = vadd.f32 %v16830_v2, %v16801_v47 }
 0x5ef   :  { %17619 = vst [vmem:[#allocation32_spill] sm:$0xff] %v16864_v16  ;;  %v8715_v22 = vmax.f32 %v8659_v23, 0.0  ;;  %v8086_v0 = vpop.f32.mrf.mxu2  ;;  %v13637_v8 = vor.u32 %v15072_v25, %v13636_v44  ;;  %v13321_v16 = vor.u32 %v14988_v26, %v13318_v50 }
 0x5f0   :  { %17620 = vst [vmem:[#allocation33_spill] sm:$0xff] %v16866_v59  ;;  %v8134_v28 = vpop.f32.mrf.mxu0  ;;  %v8087_v53 = vadd.f32 %v8086_v0, %v17621_v55  ;;  %v13574_v55 = vld [vmem:[#allocation9 + $0x3f8] sm:$0xf0] }
 0x5f1   :  { %v8761_v30 = vpack.c.bf16 %v8715_v22, %v8714_v60  ;;  %v8135_v20 = vadd.f32 %v8134_v28, %v16842_v62  ;;  %8489 = vmatpush.bf16.msrb.mxu1 %v13861_v4  ;;  %v13604_v60 = vld [vmem:[#allocation9 + $0x418] sm:$0xf]  ;;  %v15052_v22 = vld [vmem:[#allocation9 + $0x3dc] sm:$0xf]  ;;  %8460 = vmatpush.bf16.msrb.mxu0 %v13637_v8 }
 0x5f2   :  { %v16872_v59 = vadd.f32 %v8114_v49, %v8087_v53  ;;  %v15064_v62 = vld [vmem:[#allocation9 + $0x434] sm:$0xf0]  ;;  %8510 = vmatpush.bf16.msrb.mxu2 %v13321_v16  ;;  %v13577_v47 = vor.u32 %v15052_v22, %v13574_v55  ;;  %v8674_v16 = vadd.f32 %v16830_v2, %v16807_v40  ;;  %v14980_v22 = vld [vmem:[#allocation9 + $0x19c] sm:$0xf] }
 0x5f3   :  { %v8163_v42 = vadd.f32 %v8162_v9, %v8135_v20  ;;  %v8116_v33 = vpop.f32.mrf.mxu3  ;;  %v8799_v28 = vunpack.c.h.b16 %v8761_v30  ;;  %v13605_v0 = vor.u32 %v15064_v62, %v13604_v60  ;;  %v8798_v6 = vunpack.c.l.b16 %v8761_v30 }
 0x5f4   :  { %v8722_v9 = vmax.f32 %v8666_v35, 0.0  ;;  %8538 = vmatpush.bf16.msrb.mxu3 %v13577_v47  ;;  %v13542_v35 = vld [vmem:[#allocation9 + $0x3b8] sm:$0xf0]  ;;  %v8730_v40 = vmax.f32 %v8674_v16, 0.0  ;;  %v8682_v16 = vadd.f32 %v16830_v2, %v16812_v32 }
 0x5f5   :  { %v8165_v23 = vpop.f32.mrf.mxu1  ;;  %v8667_v38 = vadd.f32 %v16836_v54, %v8163_v42  ;;  %v16875_v44 = vpack.c.b16 %v8799_v28, %v8795_v7  ;;  %v16878_v49 = vpack.c.b16 %v8798_v6, %v8794_v10  ;;  %8461 = vmatpush.bf16.msrb.mxu0 %v13605_v0  ;;  %v15044_v10 = vld [vmem:[#allocation9 + $0x39c] sm:$0xf] }
 0x5f6   :  { %v13545_v33 = vor.u32 %v15044_v10, %v13542_v35  ;;  %v13286_v0 = vld [vmem:[#allocation9 + $0x1b8] sm:$0xf0] }
 0x5f7   :  { %17622 = vst [vmem:[#allocation34_spill] sm:$0xff] %v16875_v44  ;;  %v8723_v20 = vmax.f32 %v8667_v38, 0.0  ;;  %v8088_v25 = vpop.f32.mrf.mxu2  ;;  %v13289_v47 = vor.u32 %v14980_v22, %v13286_v0  ;;  %v15036_v10 = vld [vmem:[#allocation9 + $0x35c] sm:$0xf] }
 0x5f8   :  { %8388 = vmatmul.bf16.gmra.mxu1 %v16165_v51  ;;  %17623 = vst [vmem:[#allocation35_spill] sm:$0xff] %v16878_v49  ;;  %v8137_v53 = vpop.f32.mrf.mxu0  ;;  %8539 = vmatpush.bf16.msrb.mxu3 %v13545_v33  ;;  %v13510_v35 = vld [vmem:[#allocation9 + $0x378] sm:$0xf0] }
 0x5f9   :  { %8434 = vmatmul.bf16.vlgmr.msra.gmra.mxu3 %v15950_v57  ;;  %v8138_v30 = vadd.f32 %v8137_v53, %v16850_v18  ;;  %v8765_v26 = vpack.c.bf16 %v8723_v20, %v8722_v9  ;;  %v15116_v9 = vld [vmem:[#allocation9 + $0x5dc] sm:$0xf]  ;;  %8511 = vmatpush.bf16.msrb.mxu2 %v13289_v47 }
 0x5fa   :  { %v13830_v20 = vld [vmem:[#allocation9 + $0x5f8] sm:$0xf0] }
 0x5fb   :  { %v8166_v7 = vadd.f32 %v8165_v23, %v8138_v30  ;;  %v8211_v8 = vpop.f32.mrf.mxu3  ;;  %8360 = vmatmul.bf16.gmra.mxu0 %v16172_v5  ;;  %v8803_v50 = vunpack.c.h.b16 %v8765_v26  ;;  %v8802_v42 = vunpack.c.l.b16 %v8765_v26  ;;  %v15180_v53 = vld [vmem:[#allocation9 + $0x7dc] sm:$0xf]  ;;  %v17624_v26 = vld [vmem:[#allocation43_spill] sm:$0xff] }
 0x5fc   :  { %v14972_v32 = vld [vmem:[#allocation9 + $0x15c] sm:$0xf] }
 0x5fd   :  { %v8167_v4 = vpop.f32.mrf.mxu1  ;;  %v8675_v60 = vadd.f32 %v16836_v54, %v8166_v7  ;;  %8406 = vmatmul.bf16.vlgmr.msra.gmra.mxu2 %v15958_v11  ;;  %v16887_v62 = vpack.c.b16 %v8803_v50, %v8799_v28  ;;  %v16889_v18 = vpack.c.b16 %v8802_v42, %v8798_v6  ;;  %v13833_v7 = vor.u32 %v15116_v9, %v13830_v20  ;;  %v14086_v6 = vld [vmem:[#allocation9 + $0x7f8] sm:$0xf0] }
 0x5fe   :  { %v14089_v33 = vor.u32 %v15180_v53, %v14086_v6  ;;  %v13254_v47 = vld [vmem:[#allocation9 + $0x178] sm:$0xf0]  ;;  %v8738_v53 = vmax.f32 %v8682_v16, 0.0 }
 0x5ff   :  { %v8731_v23 = vmax.f32 %v8675_v60, 0.0  ;;  %v8183_v38 = vpop.f32.mrf.mxu2  ;;  %v13513_v60 = vor.u32 %v15036_v10, %v13510_v35  ;;  %8566 = vmatpush.bf16.msra.mxu0 %v13833_v7  ;;  %v15172_v10 = vld [vmem:[#allocation9 + $0x79c] sm:$0xf] }
 0x600   :  { %v8139_v55 = vpop.f32.mrf.mxu0  ;;  %v8184_v28 = vadd.f32 %v8183_v38, %v17624_v26  ;;  %8594 = vmatpush.bf16.msra.mxu1 %v14089_v33  ;;  %v15108_v26 = vld [vmem:[#allocation9 + $0x59c] sm:$0xf] }
 0x601   :  { %v16891_v25 = vpack.c.bf16 %v8731_v23, %v8730_v40  ;;  %v8140_v30 = vadd.f32 %v8139_v55, %v16860_v15  ;;  %v15028_v40 = vld [vmem:[#allocation9 + $0x31c] sm:$0xf]  ;;  %8540 = vmatpush.bf16.msrb.mxu3 %v13513_v60 }
 0x602   :  { %v16897_v49 = vadd.f32 %v8211_v8, %v8184_v28  ;;  %v13478_v15 = vld [vmem:[#allocation9 + $0x338] sm:$0xf0]  ;;  %v13257_v8 = vor.u32 %v14972_v32, %v13254_v47  ;;  %v8690_v32 = vadd.f32 %v16830_v2, %v16820_v27 }
 0x603   :  { %v8168_v22 = vadd.f32 %v8167_v4, %v8140_v30  ;;  %v8213_v44 = vpop.f32.mrf.mxu3  ;;  %v8807_v23 = vunpack.c.h.b16 %v16891_v25  ;;  %v8806_v55 = vunpack.c.l.b16 %v16891_v25  ;;  %v13481_v9 = vor.u32 %v15028_v40, %v13478_v15  ;;  %v13798_v28 = vld [vmem:[#allocation9 + $0x5b8] sm:$0xf0] }
 0x604   :  { %8512 = vmatpush.bf16.msrb.mxu2 %v13257_v8  ;;  %v13801_v6 = vor.u32 %v15108_v26, %v13798_v28  ;;  %v14054_v35 = vld [vmem:[#allocation9 + $0x7b8] sm:$0xf0] }
 0x605   :  { %v8170_v0 = vpop.f32.mrf.mxu1  ;;  %v8683_v38 = vadd.f32 %v16836_v54, %v8168_v22  ;;  %v16902_v20 = vpack.c.b16 %v8806_v55, %v8802_v42  ;;  %v16904_v4 = vpack.c.b16 %v8807_v23, %v8803_v50  ;;  %v15020_v33 = vld [vmem:[#allocation9 + $0x2dc] sm:$0xf]  ;;  %v17626_v50 = vld [vmem:[#allocation44_spill] sm:$0xff]  ;;  %8541 = vmatpush.bf16.msrb.mxu3 %v13481_v9  ;;  %v14057_v22 = vor.u32 %v15172_v10, %v14054_v35 }
 0x606   :  { %v14964_v40 = vld [vmem:[#allocation9 + $0x11c] sm:$0xf]  ;;  %8567 = vmatpush.bf16.msra.mxu0 %v13801_v6  ;;  %v8746_v35 = vmax.f32 %v8690_v32, 0.0 }
 0x607   :  { %17625 = vst [vmem:[#allocation36_spill] sm:$0xff] %v16904_v4  ;;  %v8739_v30 = vmax.f32 %v8683_v38, 0.0  ;;  %v8185_v25 = vpop.f32.mrf.mxu2  ;;  %v13222_v16 = vld [vmem:[#allocation9 + $0x138] sm:$0xf0]  ;;  %8595 = vmatpush.bf16.msra.mxu1 %v14057_v22 }
 0x608   :  { %8393 = vmatmul.bf16.gmra.mxu1 %v16559_v14  ;;  %v8142_v7 = vpop.f32.mrf.mxu0  ;;  %v8186_v60 = vadd.f32 %v8185_v25, %v17626_v50  ;;  %v13446_v15 = vld [vmem:[#allocation9 + $0x2f8] sm:$0xf0]  ;;  %v13225_v47 = vor.u32 %v14964_v40, %v13222_v16 }
 0x609   :  { %8439 = vmatmul.bf16.gmra.mxu3 %v16045_v3  ;;  %v8143_v42 = vadd.f32 %v8142_v7, %v16872_v59  ;;  %v8773_v38 = vpack.c.bf16 %v8739_v30, %v8738_v53  ;;  %v13449_v8 = vor.u32 %v15020_v33, %v13446_v15  ;;  %v15012_v9 = vld [vmem:[#allocation9 + $0x29c] sm:$0xf] }
 0x60a   :  { %v16913_v59 = vadd.f32 %v8213_v44, %v8186_v60  ;;  %v13414_v7 = vld [vmem:[#allocation9 + $0x2b8] sm:$0xf0]  ;;  %8513 = vmatpush.bf16.msrb.mxu2 %v13225_v47  ;;  %v17627_v47 = vld [vmem:[#allocation45_spill] sm:$0xff] }
 0x60b   :  { %v8171_v26 = vadd.f32 %v8170_v0, %v8143_v42  ;;  %v8216_v4 = vpop.f32.mrf.mxu3  ;;  %8365 = vmatmul.bf16.gmra.mxu0 %v16565_v37  ;;  %v8811_v25 = vunpack.c.h.b16 %v8773_v38  ;;  %v8810_v10 = vunpack.c.l.b16 %v8773_v38  ;;  %v13417_v53 = vor.u32 %v15012_v9, %v13414_v7  ;;  %8542 = vmatpush.bf16.msrb.mxu3 %v13449_v8  ;;  %v14956_v27 = vld [vmem:[#allocation9 + $0xdc] sm:$0xf] }
 0x60c   :  { %v13190_v2 = vld [vmem:[#allocation9 + $0xf8] sm:$0xf0] }
 0x60d   :  { %v8172_v28 = vpop.f32.mrf.mxu1  ;;  %v8691_v30 = vadd.f32 %v16836_v54, %v8171_v26  ;;  %8411 = vmatmul.bf16.gmra.mxu2 %v16054_v46  ;;  %v16917_v0 = vpack.c.b16 %v8811_v25, %v8807_v23  ;;  %v16919_v6 = vpack.c.b16 %v8810_v10, %v8806_v55  ;;  %v13193_v44 = vor.u32 %v14956_v27, %v13190_v2  ;;  %v15100_v42 = vld [vmem:[#allocation9 + $0x55c] sm:$0xf] }
 0x60e   :  { %v13766_v50 = vld [vmem:[#allocation9 + $0x578] sm:$0xf0] }
 0x60f   :  { %v8747_v33 = vmax.f32 %v8691_v30, 0.0  ;;  %v8188_v22 = vpop.f32.mrf.mxu2  ;;  %v13769_v40 = vor.u32 %v15100_v42, %v13766_v50  ;;  %v15164_v16 = vld [vmem:[#allocation9 + $0x75c] sm:$0xf]  ;;  %8514 = vmatpush.bf16.msrb.mxu2 %v13193_v44  ;;  %8543 = vmatpush.bf16.msrb.mxu3 %v13417_v53 }
 0x610   :  { %v8144_v60 = vpop.f32.mrf.mxu0  ;;  %v14022_v15 = vld [vmem:[#allocation9 + $0x778] sm:$0xf0]  ;;  %v8189_v8 = vadd.f32 %v8188_v22, %v17627_v47 }
 0x611   :  { %v15004_v54 = vld [vmem:[#allocation9 + $0x25c] sm:$0xf]  ;;  %v8777_v38 = vpack.c.bf16 %v8747_v33, %v8746_v35  ;;  %v14025_v23 = vor.u32 %v15164_v16, %v14022_v15  ;;  %8568 = vmatpush.bf16.msra.mxu0 %v13769_v40 }
 0x612   :  { %v13382_v26 = vld [vmem:[#allocation9 + $0x278] sm:$0xf0]  ;;  %v16922_v27 = vadd.f32 %v8216_v4, %v8189_v8 }
 0x613   :  { %v14948_v55 = vld [vmem:[#allocation9 + $0x9c] sm:$0xf]  ;;  %v13385_v32 = vor.u32 %v15004_v54, %v13382_v26  ;;  %v8218_v30 = vpop.f32.mrf.mxu3  ;;  %8596 = vmatpush.bf16.msra.mxu1 %v14025_v23  ;;  %v16924_v44 = vunpack.c.h.b16 %v8777_v38  ;;  %v16926_v35 = vunpack.c.l.b16 %v8777_v38 }
 0x614   :  { %v13158_v28 = vld [vmem:[#allocation9 + $0xb8] sm:$0xf0] }
 0x615   :  { %v13161_v9 = vor.u32 %v14948_v55, %v13158_v28  ;;  %v8267_v7 = vpop.f32.mrf.mxu1  ;;  %v14996_v2 = vld [vmem:[#allocation9 + $0x21c] sm:$0xf]  ;;  %8544 = vmatpush.bf16.msrb.mxu3 %v13385_v32  ;;  %v16929_v60 = vpack.c.b16 %v16926_v35, %v8810_v10  ;;  %v16932_v22 = vpack.c.b16 %v16924_v44, %v8811_v25 }
 0x616   :  { %v13350_v42 = vld [vmem:[#allocation9 + $0x238] sm:$0xf0] }
 0x617   :  { %8515 = vmatpush.bf16.msrb.mxu2 %v13161_v9  ;;  %v13353_v53 = vor.u32 %v14996_v2, %v13350_v42  ;;  %v14940_v33 = vld [vmem:[#allocation9 + $0x5c] sm:$0xf]  ;;  %v8190_v38 = vpop.f32.mrf.mxu2 }
 0x618   :  { %v13126_v50 = vld [vmem:[#allocation9 + $0x78] sm:$0xf0]  ;;  %8490 = vmatmul.bf16.vlgmr.msrb.gmra.mxu1 %v15972_v63  ;;  %v8239_v54 = vpop.f32.mrf.mxu0  ;;  %v8191_v10 = vadd.f32 %v8190_v38, %v16446_v13 }
 0x619   :  { %v13129_v4 = vor.u32 %v14940_v33, %v13126_v50  ;;  %v15092_v40 = vld [vmem:[#allocation9 + $0x51c] sm:$0xf]  ;;  %8444 = vmatmul.bf16.gmra.mxu3 %v16137_v34  ;;  %v8240_v23 = vadd.f32 %v8239_v54, %v16897_v49 }
 0x61a   :  { %v13734_v16 = vld [vmem:[#allocation9 + $0x538] sm:$0xf0]  ;;  %8545 = vmatpush.bf16.msrb.mxu3 %v13353_v53  ;;  %v8219_v42 = vadd.f32 %v8218_v30, %v8191_v10 }
 0x61b   :  { %v15156_v15 = vld [vmem:[#allocation9 + $0x71c] sm:$0xf]  ;;  %v13737_v47 = vor.u32 %v15092_v40, %v13734_v16  ;;  %8516 = vmatpush.bf16.msrb.mxu2 %v13129_v4  ;;  %v16938_v32 = vadd.f32 %v8267_v7, %v8240_v23  ;;  %8462 = vmatmul.bf16.vlgmr.msrb.gmra.mxu0 %v15980_v19 }
 0x61c   :  { %v13990_v8 = vld [vmem:[#allocation9 + $0x738] sm:$0xf0]  ;;  %v8221_v2 = vpop.f32.mrf.mxu3 }
 0x61d   :  { %v13993_v25 = vor.u32 %v15156_v15, %v13990_v8  ;;  %v14932_v26 = vld [vmem:[#allocation9 + $0x1c] sm:$0xf]  ;;  %8569 = vmatpush.bf16.msra.mxu0 %v13737_v47  ;;  %v8269_v9 = vpop.f32.mrf.mxu1  ;;  %8416 = vmatmul.bf16.gmra.mxu2 %v16156_v1 }
 0x61e   :  { %v13094_v55 = vld [vmem:[#allocation9 + $0x38] sm:$0xf0] }
 0x61f   :  { %v13097_v28 = vor.u32 %v14932_v26, %v13094_v55  ;;  %8597 = vmatpush.bf16.msra.mxu1 %v13993_v25  ;;  %v15084_v49 = vld [vmem:[#allocation9 + $0x4dc] sm:$0xf] }
 0x620   :  { %v13702_v33 = vld [vmem:[#allocation9 + $0x4f8] sm:$0xf0]  ;;  %v8241_v13 = vpop.f32.mrf.mxu0  ;;  %v8193_v53 = vpop.f32.mrf.mxu2 }
 0x621   :  { %8517 = vmatpush.bf16.msrb.mxu2 %v13097_v28  ;;  %v13705_v50 = vor.u32 %v15084_v49, %v13702_v33  ;;  %v15148_v4 = vld [vmem:[#allocation9 + $0x6dc] sm:$0xf]  ;;  %v8242_v16 = vadd.f32 %v8241_v13, %v16913_v59  ;;  %v8194_v7 = vadd.f32 %v8193_v53, %v16451_v48 }
 0x622   :  { %v13958_v40 = vld [vmem:[#allocation9 + $0x6f8] sm:$0xf0] }
 0x623   :  { %v13961_v15 = vor.u32 %v15148_v4, %v13958_v40  ;;  %8570 = vmatpush.bf16.msra.mxu0 %v13705_v50  ;;  %v16944_v54 = vadd.f32 %v8269_v9, %v8242_v16  ;;  %v8222_v47 = vadd.f32 %v8221_v2, %v8194_v7  ;;  %v15076_v8 = vld [vmem:[#allocation9 + $0x49c] sm:$0xf] }
 0x624   :  { %v8223_v38 = vpop.f32.mrf.mxu3  ;;  %v13670_v23 = vld [vmem:[#allocation9 + $0x4b8] sm:$0xf0] }
 0x625   :  { %v8272_v30 = vpop.f32.mrf.mxu1  ;;  %8598 = vmatpush.bf16.msra.mxu1 %v13961_v15  ;;  %v13673_v26 = vor.u32 %v15076_v8, %v13670_v23  ;;  %v15140_v59 = vld [vmem:[#allocation9 + $0x69c] sm:$0xf] }
 0x626   :  { %v13926_v55 = vld [vmem:[#allocation9 + $0x6b8] sm:$0xf0] }
 0x627   :  { %v13929_v9 = vor.u32 %v15140_v59, %v13926_v55  ;;  %8571 = vmatpush.bf16.msra.mxu0 %v13673_v26  ;;  %v15132_v53 = vld [vmem:[#allocation9 + $0x65c] sm:$0xf] }
 0x628   :  { %8495 = vmatmul.bf16.gmra.mxu1 %v16069_v41  ;;  %v8244_v10 = vpop.f32.mrf.mxu0  ;;  %v8195_v25 = vpop.f32.mrf.mxu2  ;;  %v13894_v50 = vld [vmem:[#allocation9 + $0x678] sm:$0xf0] }
 0x629   :  { %8449 = vmatmul.bf16.gmra.mxu3 %v16527_v52  ;;  %v8245_v48 = vadd.f32 %v8244_v10, %v16922_v27  ;;  %v8196_v28 = vadd.f32 %v8195_v25, %v16457_v24  ;;  %8599 = vmatpush.bf16.msra.mxu1 %v13929_v9  ;;  %v13897_v4 = vor.u32 %v15132_v53, %v13894_v50  ;;  %v15068_v40 = vld [vmem:[#allocation9 + $0x45c] sm:$0xf] }
 0x62a   :  { %v13638_v16 = vld [vmem:[#allocation9 + $0x478] sm:$0xf0] }
 0x62b   :  { %v16950_v49 = vadd.f32 %v8272_v30, %v8245_v48  ;;  %8467 = vmatmul.bf16.gmra.mxu0 %v16078_v61  ;;  %v8224_v13 = vadd.f32 %v8223_v38, %v8196_v28  ;;  %v13641_v7 = vor.u32 %v15068_v40, %v13638_v16  ;;  %v15124_v15 = vld [vmem:[#allocation9 + $0x61c] sm:$0xf] }
 0x62c   :  { %v8226_v33 = vpop.f32.mrf.mxu3  ;;  %v13862_v30 = vld [vmem:[#allocation9 + $0x638] sm:$0xf0] }
 0x62d   :  { %v8274_v2 = vpop.f32.mrf.mxu1  ;;  %8421 = vmatmul.bf16.gmra.mxu2 %v16536_v56  ;;  %8600 = vmatpush.bf16.msra.mxu1 %v13897_v4  ;;  %v13865_v10 = vor.u32 %v15124_v15, %v13862_v30  ;;  %v15060_v55 = vld [vmem:[#allocation9 + $0x41c] sm:$0xf]  ;;  %v15455_v4 = vld [vmem:[%s17537_s8 + $0x70] sm:$0xff] }
 0x62e   :  { %8572 = vmatpush.bf16.msra.mxu0 %v13641_v7  ;;  %v13606_v48 = vld [vmem:[#allocation9 + $0x438] sm:$0xf0] }
 0x62f   :  { %v13609_v28 = vor.u32 %v15060_v55, %v13606_v48  ;;  %v15454_v16 = vld [vmem:[%s17537_s8 + $0x68] sm:$0xff]  ;;  %v15445_v48 = vld [vmem:[%s17537_s8 + $0x20] sm:$0xff] }
 0x630   :  { %v8246_v27 = vpop.f32.mrf.mxu0  ;;  %v8198_v24 = vpop.f32.mrf.mxu2 }
 0x631   :  { %v8247_v8 = vadd.f32 %v8246_v27, %v8219_v42  ;;  %v8199_v23 = vadd.f32 %v8198_v24, %v16465_v17  ;;  %8601 = vmatpush.bf16.msra.mxu1 %v13865_v10  ;;  %v15456_v17 = vld [vmem:[%s17537_s8 + $0x78] sm:$0xff] }
 0x632   :  { %8573 = vmatpush.bf16.msra.mxu0 %v13609_v28  ;;  %9752 = vmatpush.bf16.msra.mxu3 %v15456_v17  ;;  %v15451_v17 = vld [vmem:[%s17537_s8 + $0x50] sm:$0xff] }
 0x633   :  { %v16955_v38 = vadd.f32 %v8274_v2, %v8247_v8  ;;  %v8227_v59 = vadd.f32 %v8226_v33, %v8199_v23  ;;  %v15453_v23 = vld [vmem:[%s17537_s8 + $0x60] sm:$0xff] }
 0x634   :  { %v8228_v26 = vpop.f32.mrf.mxu3 }
 0x635   :  { %v8277_v25 = vpop.f32.mrf.mxu1 }
 0x636   :  { %9753 = vmatpush.bf16.msra.mxu3 %v15455_v4  ;;  %v15464_v4 = vld [vmem:[%s17537_s8 + $0xb8] sm:$0xff] }
 0x637   :  { %9780 = vmatpush.bf16.msrb.mxu0 %v15464_v4 }
 0x638   :  { %8500 = vmatmul.bf16.gmra.mxu1 %v16165_v51  ;;  %v8249_v9 = vpop.f32.mrf.mxu0  ;;  %v8200_v42 = vpop.f32.mrf.mxu2 }
 0x639   :  { %8546 = vmatmul.bf16.vlgmr.msrb.gmra.mxu3 %v15950_v57  ;;  %v8250_v2 = vadd.f32 %v8249_v9, %v8222_v47  ;;  %v15448_v57 = vld [vmem:[%s17537_s8 + $0x38] sm:$0xff] }
 0x63a   :  { %9724 = vmatpush.bf16.msra.mxu2 %v15448_v57  ;;  %9754 = vmatpush.bf16.msra.mxu3 %v15454_v16  ;;  %v15449_v16 = vld [vmem:[%s17537_s8 + $0x40] sm:$0xff] }
 0x63b   :  { %v16962_v53 = vadd.f32 %v8277_v25, %v8250_v2  ;;  %8472 = vmatmul.bf16.gmra.mxu0 %v16172_v5  ;;  %v15452_v25 = vld [vmem:[%s17537_s8 + $0x58] sm:$0xff] }
 0x63c   :  { %v8323_v50 = vpop.f32.mrf.mxu3 }
 0x63d   :  { %v8279_v33 = vpop.f32.mrf.mxu1  ;;  %8518 = vmatmul.bf16.vlgmr.msrb.gmra.mxu2 %v15958_v11  ;;  %v15447_v11 = vld [vmem:[%s17537_s8 + $0x30] sm:$0xff] }
 0x63e   :  { %9725 = vmatpush.bf16.msra.mxu2 %v15447_v11  ;;  %9755 = vmatpush.bf16.msra.mxu3 %v15453_v23 }
 0x640   :  { %v8251_v40 = vpop.f32.mrf.mxu0  ;;  %v8295_v47 = vpop.f32.mrf.mxu2 }
 0x641   :  { %v8252_v27 = vadd.f32 %v8251_v40, %v8224_v13  ;;  %v8296_v24 = vadd.f32 %v8295_v47, %v16474_v36  ;;  %v15446_v36 = vld [vmem:[%s17537_s8 + $0x28] sm:$0xff] }
 0x642   :  { %9726 = vmatpush.bf16.msra.mxu2 %v15446_v36  ;;  %9756 = vmatpush.bf16.msra.mxu3 %v15452_v25  ;;  %v15441_v25 = vld [vmem:[%s17537_s8] sm:$0xff] }
 0x643   :  { %v16979_v7 = vadd.f32 %v8279_v33, %v8252_v27  ;;  %v8324_v8 = vadd.f32 %v8323_v50, %v8296_v24  ;;  %v15450_v33 = vld [vmem:[%s17537_s8 + $0x48] sm:$0xff] }
 0x644   :  { %v8325_v30 = vpop.f32.mrf.mxu3  ;;  %v15442_v27 = vld [vmem:[%s17537_s8 + $0x8] sm:$0xff] }
 0x645   :  { %v8282_v15 = vpop.f32.mrf.mxu1  ;;  %v17026_v24 = vld [vmem:[#allocation12] sm:$0xff] }
 0x646   :  { %9727 = vmatpush.bf16.msra.mxu2 %v15445_v48  ;;  %9757 = vmatpush.bf16.msra.mxu3 %v15451_v17  ;;  %v17029_v11 = vperm.slane %v17026_v24, 4  ;;  %v17036_v36 = vperm.slane %v17026_v24, 5 }
 0x648   :  { %8505 = vmatmul.bf16.gmra.mxu1 %v16559_v14  ;;  %v8254_v13 = vpop.f32.mrf.mxu0  ;;  %v8297_v10 = vpop.f32.mrf.mxu2 }
 0x649   :  { %8551 = vmatmul.bf16.gmra.mxu3 %v16045_v3  ;;  %v8255_v26 = vadd.f32 %v8254_v13, %v8227_v59  ;;  %v8298_v55 = vadd.f32 %v8297_v10, %v16478_v12  ;;  %v15444_v12 = vld [vmem:[%s17537_s8 + $0x18] sm:$0xff]  ;;  %v15471_v10 = vld [vmem:[%s17537_s8 + $0xf0] sm:$0xff] }
 0x64a   :  { %9728 = vmatpush.bf16.msra.mxu2 %v15444_v12  ;;  %9758 = vmatpush.bf16.msra.mxu3 %v15450_v33  ;;  %v15462_v33 = vld [vmem:[%s17537_s8 + $0xa8] sm:$0xff] }
 0x64b   :  { %v16996_v28 = vadd.f32 %v8282_v15, %v8255_v26  ;;  %8477 = vmatmul.bf16.gmra.mxu0 %v16565_v37  ;;  %v8326_v3 = vadd.f32 %v8325_v30, %v8298_v55  ;;  %v15463_v15 = vld [vmem:[%s17537_s8 + $0xb0] sm:$0xff] }
 0x64c   :  { %v8328_v42 = vpop.f32.mrf.mxu3  ;;  %9781 = vmatpush.bf16.msrb.mxu0 %v15463_v15 }
 0x64d   :  { %v8284_v9 = vpop.f32.mrf.mxu1  ;;  %8523 = vmatmul.bf16.gmra.mxu2 %v16054_v46  ;;  %v15443_v46 = vld [vmem:[%s17537_s8 + $0x10] sm:$0xff] }
 0x64e   :  { %9729 = vmatpush.bf16.msra.mxu2 %v15443_v46  ;;  %9759 = vmatpush.bf16.msra.mxu3 %v15449_v16  ;;  %v15470_v9 = vld [vmem:[%s17537_s8 + $0xe8] sm:$0xff] }
 0x650   :  { %v8256_v59 = vpop.f32.mrf.mxu0  ;;  %v8300_v2 = vpop.f32.mrf.mxu2  ;;  %9782 = vmatpush.bf16.msrb.mxu0 %v15462_v33  ;;  %v15465_v33 = vld [vmem:[%s17537_s8 + $0xc0] sm:$0xff] }
 0x651   :  { %v8301_v50 = vadd.f32 %v8300_v2, %v16486_v43  ;;  %v15472_v43 = vld [vmem:[%s17537_s8 + $0xf8] sm:$0xff] }
 0x652   :  { %9808 = vmatpush.bf16.msrb.mxu1 %v15472_v43  ;;  %9730 = vmatpush.bf16.msra.mxu2 %v15442_v27 }
 0x653   :  { %v8329_v47 = vadd.f32 %v8328_v42, %v8301_v50  ;;  %v8652_v50 = vadd.f32 %v17029_v11, %v16944_v54  ;;  %v15461_v54 = vld [vmem:[%s17537_s8 + $0xa0] sm:$0xff] }
 0x654   :  { %v8330_v40 = vpop.f32.mrf.mxu3  ;;  %9783 = vmatpush.bf16.msrb.mxu0 %v15461_v54  ;;  %v15488_v54 = vld [vmem:[%s17537_s8 + $0x178] sm:$0xff] }
 0x655   :  { %v8379_v57 = vpop.f32.mrf.mxu1  ;;  %v8708_v16 = vmax.f32 %v8652_v50, 0.0  ;;  %9864 = vmatpush.bf16.msrb.mxu3 %v15488_v54 }
 0x656   :  { %9809 = vmatpush.bf16.msrb.mxu1 %v15471_v10  ;;  %9731 = vmatpush.bf16.msra.mxu2 %v15441_v25 }
 0x658   :  { %8602 = vmatmul.bf16.vlgmr.msra.gmra.mxu1 %v15972_v63  ;;  %v8351_v30 = vpop.f32.mrf.mxu0  ;;  %v8302_v23 = vpop.f32.mrf.mxu2 }
 0x659   :  { %8556 = vmatmul.bf16.gmra.mxu3 %v16137_v34  ;;  %v8352_v63 = vadd.f32 %v8351_v30, %v8324_v8  ;;  %v8303_v13 = vadd.f32 %v8302_v23, %v16491_v45  ;;  %v8644_v34 = vadd.f32 %v17029_v11, %v16938_v32 }
 0x65a   :  { %9810 = vmatpush.bf16.msrb.mxu1 %v15470_v9 }
 0x65b   :  { %v8380_v26 = vadd.f32 %v8379_v57, %v8352_v63  ;;  %8574 = vmatmul.bf16.vlgmr.msra.gmra.mxu0 %v15980_v19  ;;  %v17048_v48 = vadd.f32 %v8330_v40, %v8303_v13  ;;  %v8700_v42 = vmax.f32 %v8644_v34, 0.0  ;;  %v8660_v13 = vadd.f32 %v17029_v11, %v16950_v49  ;;  %v15466_v49 = vld [vmem:[%s17537_s8 + $0xc8] sm:$0xff] }
 0x65c   :  { %v8333_v8 = vpop.f32.mrf.mxu3 }
 0x65d   :  { %v8381_v55 = vpop.f32.mrf.mxu1  ;;  %v8645_v45 = vadd.f32 %v17036_v36, %v8380_v26  ;;  %8528 = vmatmul.bf16.gmra.mxu2 %v16156_v1  ;;  %v15469_v1 = vld [vmem:[%s17537_s8 + $0xe0] sm:$0xff] }
 0x65e   :  { %9811 = vmatpush.bf16.msrb.mxu1 %v15469_v1  ;;  %v8668_v1 = vadd.f32 %v17029_v11, %v16955_v38  ;;  %v15457_v38 = vld [vmem:[%s17537_s8 + $0x80] sm:$0xff] }
 0x65f   :  { %v8701_v17 = vmax.f32 %v8645_v45, 0.0 }
 0x660   :  { %v8353_v32 = vpop.f32.mrf.mxu0  ;;  %v8305_v12 = vpop.f32.mrf.mxu2 }
 0x661   :  { %v8754_v59 = vpack.c.bf16 %v8701_v17, %v8700_v42  ;;  %v8354_v2 = vadd.f32 %v8353_v32, %v8326_v3  ;;  %v8306_v19 = vadd.f32 %v8305_v12, %v16496_v58  ;;  %v15468_v3 = vld [vmem:[%s17537_s8 + $0xd8] sm:$0xff]  ;;  %v15459_v32 = vld [vmem:[%s17537_s8 + $0x90] sm:$0xff] }
 0x662   :  { %9812 = vmatpush.bf16.msrb.mxu1 %v15468_v3 }
 0x663   :  { %v8382_v4 = vadd.f32 %v8381_v55, %v8354_v2  ;;  %v17064_v40 = vadd.f32 %v8333_v8, %v8306_v19  ;;  %v8860_v10 = vunpack.c.l.b16 %v8754_v59  ;;  %v8861_v25 = vunpack.c.h.b16 %v8754_v59 }
 0x664   :  { %v8335_v57 = vpop.f32.mrf.mxu3 }
 0x665   :  { %v8384_v46 = vpop.f32.mrf.mxu1  ;;  %v8653_v58 = vadd.f32 %v17036_v36, %v8382_v4 }
 0x667   :  { %v8709_v43 = vmax.f32 %v8653_v58, 0.0  ;;  %v15458_v58 = vld [vmem:[%s17537_s8 + $0x88] sm:$0xff] }
 0x668   :  { %8607 = vmatmul.bf16.gmra.mxu1 %v16069_v41  ;;  %v8356_v27 = vpop.f32.mrf.mxu0  ;;  %v8307_v15 = vpop.f32.mrf.mxu2  ;;  %v15467_v41 = vld [vmem:[%s17537_s8 + $0xd0] sm:$0xff] }
 0x669   :  { %8561 = vmatmul.bf16.gmra.mxu3 %v16527_v52  ;;  %v8758_v30 = vpack.c.bf16 %v8709_v43, %v8708_v16  ;;  %v8357_v23 = vadd.f32 %v8356_v27, %v8329_v47  ;;  %v8308_v63 = vadd.f32 %v8307_v15, %v16502_v29  ;;  %9813 = vmatpush.bf16.msrb.mxu1 %v15467_v41  ;;  %v15460_v29 = vld [vmem:[%s17537_s8 + $0x98] sm:$0xff] }
 0x66a   :  { %9784 = vmatpush.bf16.msrb.mxu0 %v15460_v29 }
 0x66b   :  { %v8864_v34 = vunpack.c.l.b16 %v8758_v30  ;;  %v8865_v26 = vunpack.c.h.b16 %v8758_v30  ;;  %v8385_v55 = vadd.f32 %v8384_v46, %v8357_v23  ;;  %8579 = vmatmul.bf16.gmra.mxu0 %v16078_v61  ;;  %v17082_v47 = vadd.f32 %v8335_v57, %v8308_v63 }
 0x66c   :  { %v8338_v52 = vpop.f32.mrf.mxu3  ;;  %v8716_v61 = vmax.f32 %v8660_v13, 0.0 }
 0x66d   :  { %v8386_v8 = vpop.f32.mrf.mxu1  ;;  %v8661_v45 = vadd.f32 %v17036_v36, %v8385_v55  ;;  %8533 = vmatmul.bf16.gmra.mxu2 %v16536_v56  ;;  %v17092_v9 = vpack.c.b16 %v8865_v26, %v8861_v25  ;;  %v17094_v42 = vpack.c.b16 %v8864_v34, %v8860_v10  ;;  %9814 = vmatpush.bf16.msrb.mxu1 %v15466_v49  ;;  %v15487_v25 = vld [vmem:[%s17537_s8 + $0x170] sm:$0xff]  ;;  %v17628_v34 = vld [vmem:[#allocation20_spill] sm:$0xff] }
 0x66e   :  { %9785 = vmatpush.bf16.msrb.mxu0 %v15459_v32  ;;  %9865 = vmatpush.bf16.msrb.mxu3 %v15487_v25  ;;  %v15496_v25 = vld [vmem:[%s17537_s8 + $0x1b8] sm:$0xff] }
 0x66f   :  { %v8717_v17 = vmax.f32 %v8661_v45, 0.0  ;;  %v15486_v45 = vld [vmem:[%s17537_s8 + $0x168] sm:$0xff] }
 0x670   :  { %v8358_v12 = vpop.f32.mrf.mxu0  ;;  %v8310_v59 = vpop.f32.mrf.mxu2 }
 0x671   :  { %v8762_v2 = vpack.c.bf16 %v8717_v17, %v8716_v61  ;;  %v8359_v56 = vadd.f32 %v8358_v12, %v17048_v48  ;;  %v8311_v19 = vadd.f32 %v8310_v59, %v16510_v39  ;;  %9815 = vmatpush.bf16.msrb.mxu1 %v15465_v33  ;;  %v8724_v39 = vmax.f32 %v8668_v1, 0.0  ;;  %v17629_v17 = vld [vmem:[#allocation46_spill] sm:$0xff]  ;;  %v15479_v12 = vld [vmem:[%s17537_s8 + $0x130] sm:$0xff] }
 0x672   :  { %9786 = vmatpush.bf16.msrb.mxu0 %v15458_v58  ;;  %9866 = vmatpush.bf16.msrb.mxu3 %v15486_v45  ;;  %v8684_v59 = vadd.f32 %v17029_v11, %v16979_v7 }
 0x673   :  { %v8387_v50 = vadd.f32 %v8386_v8, %v8359_v56  ;;  %v8339_v57 = vadd.f32 %v8338_v52, %v8311_v19  ;;  %v8869_v30 = vunpack.c.h.b16 %v8762_v2  ;;  %v8868_v13 = vunpack.c.l.b16 %v8762_v2 }
 0x674   :  { %v8340_v46 = vpop.f32.mrf.mxu3  ;;  %v8740_v7 = vmax.f32 %v8684_v59, 0.0  ;;  %v15495_v59 = vld [vmem:[%s17537_s8 + $0x1b0] sm:$0xff] }
 0x675   :  { %v8389_v4 = vpop.f32.mrf.mxu1  ;;  %v8669_v48 = vadd.f32 %v17036_v36, %v8387_v50  ;;  %v15478_v50 = vld [vmem:[%s17537_s8 + $0x128] sm:$0xff] }
 0x676   :  { %9787 = vmatpush.bf16.msrb.mxu0 %v15457_v38 }
 0x677   :  { %v8725_v3 = vmax.f32 %v8669_v48, 0.0  ;;  %v15484_v48 = vld [vmem:[%s17537_s8 + $0x158] sm:$0xff] }
 0x678   :  { %8612 = vmatmul.bf16.gmra.mxu1 %v16165_v51  ;;  %v8361_v16 = vpop.f32.mrf.mxu0  ;;  %v8312_v43 = vpop.f32.mrf.mxu2  ;;  %v8676_v51 = vadd.f32 %v17029_v11, %v16962_v53 }
 0x679   :  { %9760 = vmatmul.bf16.vlgmr.msra.gmra.mxu3 %v16710_v21  ;;  %v8362_v27 = vadd.f32 %v8361_v16, %v17064_v40  ;;  %v8766_v15 = vpack.c.bf16 %v8725_v3, %v8724_v39  ;;  %v17630_v3 = vld [vmem:[#allocation47_spill] sm:$0xff]  ;;  %v8692_v16 = vadd.f32 %v17029_v11, %v16996_v28  ;;  %v15477_v43 = vld [vmem:[%s17537_s8 + $0x120] sm:$0xff] }
 0x67a   :  { %v8732_v55 = vmax.f32 %v8676_v51, 0.0  ;;  %v15483_v28 = vld [vmem:[%s17537_s8 + $0x150] sm:$0xff]  ;;  %9892 = vmatpush.bf16.msra.mxu0 %v15496_v25 }
 0x67b   :  { %v8390_v23 = vadd.f32 %v8389_v4, %v8362_v27  ;;  %8584 = vmatmul.bf16.gmra.mxu0 %v16172_v5  ;;  %v8873_v21 = vunpack.c.h.b16 %v8766_v15  ;;  %v8872_v10 = vunpack.c.l.b16 %v8766_v15  ;;  %v15480_v5 = vld [vmem:[%s17537_s8 + $0x138] sm:$0xff] }
 0x67c   :  { %v8435_v41 = vpop.f32.mrf.mxu3  ;;  %9836 = vmatpush.bf16.msrb.mxu2 %v15480_v5  ;;  %v17632_v5 = vld [vmem:[#allocation48_spill] sm:$0xff] }
 0x67d   :  { %v8391_v63 = vpop.f32.mrf.mxu1  ;;  %v8677_v40 = vadd.f32 %v17036_v36, %v8390_v23  ;;  %9732 = vmatmul.bf16.vlgmr.msra.gmra.mxu2 %v17628_v34  ;;  %v17127_v26 = vpack.c.b16 %v8873_v21, %v8869_v30  ;;  %v17129_v53 = vpack.c.b16 %v8872_v10, %v8868_v13  ;;  %v8748_v13 = vmax.f32 %v8692_v16, 0.0 }
 0x67e   :  { %9893 = vmatpush.bf16.msra.mxu0 %v15495_v59  ;;  %v15491_v59 = vld [vmem:[%s17537_s8 + $0x190] sm:$0xff] }
 0x67f   :  { %v8733_v8 = vmax.f32 %v8677_v40, 0.0 }
 0x680   :  { %v8363_v52 = vpop.f32.mrf.mxu0  ;;  %v8407_v29 = vpop.f32.mrf.mxu2  ;;  %9837 = vmatpush.bf16.msrb.mxu2 %v15479_v12  ;;  %v15504_v12 = vld [vmem:[%s17537_s8 + $0x1f8] sm:$0xff] }
 0x681   :  { %v8770_v49 = vpack.c.bf16 %v8733_v8, %v8732_v55  ;;  %v8364_v61 = vadd.f32 %v8363_v52, %v17082_v47  ;;  %v8408_v32 = vadd.f32 %v8407_v29, %v17629_v17  ;;  %v15485_v47 = vld [vmem:[%s17537_s8 + $0x160] sm:$0xff]  ;;  %v15475_v52 = vld [vmem:[%s17537_s8 + $0x110] sm:$0xff]  ;;  %v17633_v17 = vld [vmem:[#allocation32_spill] sm:$0xff]  ;;  %9920 = vmatpush.bf16.msra.mxu1 %v15504_v12 }
 0x682   :  { %9867 = vmatpush.bf16.msrb.mxu3 %v15485_v47 }
 0x683   :  { %v8392_v2 = vadd.f32 %v8391_v63, %v8364_v61  ;;  %v17144_v33 = vadd.f32 %v8435_v41, %v8408_v32  ;;  %v8877_v54 = vunpack.c.h.b16 %v8770_v49  ;;  %v17631_v63 = vld [vmem:[#allocation23_spill] sm:$0xff]  ;;  %v15481_v61 = vld [vmem:[%s17537_s8 + $0x140] sm:$0xff]  ;;  %v15474_v32 = vld [vmem:[%s17537_s8 + $0x108] sm:$0xff] }
 0x684   :  { %v8437_v19 = vpop.f32.mrf.mxu3  ;;  %9838 = vmatpush.bf16.msrb.mxu2 %v15478_v50 }
 0x685   :  { %v8394_v56 = vpop.f32.mrf.mxu1  ;;  %v8685_v1 = vadd.f32 %v17036_v36, %v8392_v2 }
 0x686   :  { %9868 = vmatpush.bf16.msrb.mxu3 %v15484_v48  ;;  %v17636_v48 = vld [vmem:[#allocation33_spill] sm:$0xff] }
 0x687   :  { %v8741_v4 = vmax.f32 %v8685_v1, 0.0  ;;  %v17635_v1 = vld [vmem:[#allocation49_spill] sm:$0xff] }
 0x688   :  { %8617 = vmatmul.bf16.gmra.mxu1 %v16559_v14  ;;  %v8366_v46 = vpop.f32.mrf.mxu0  ;;  %v8409_v58 = vpop.f32.mrf.mxu2  ;;  %9839 = vmatpush.bf16.msrb.mxu2 %v15477_v43  ;;  %v17638_v43 = vld [vmem:[#allocation50_spill] sm:$0xff] }
 0x689   :  { %9765 = vmatmul.bf16.gmra.mxu3 %v16733_v31  ;;  %v8367_v39 = vadd.f32 %v8366_v46, %v8339_v57  ;;  %v8410_v38 = vadd.f32 %v8409_v58, %v17630_v3  ;;  %v8774_v14 = vpack.c.bf16 %v8741_v4, %v8740_v7  ;;  %v8876_v31 = vunpack.c.l.b16 %v8770_v49  ;;  %v15473_v7 = vld [vmem:[%s17537_s8 + $0x100] sm:$0xff]  ;;  %v17637_v3 = vld [vmem:[#allocation27_spill] sm:$0xff] }
 0x68a   :  { %9869 = vmatpush.bf16.msrb.mxu3 %v15483_v28  ;;  %v15493_v28 = vld [vmem:[%s17537_s8 + $0x1a0] sm:$0xff] }
 0x68b   :  { %v8395_v27 = vadd.f32 %v8394_v56, %v8367_v39  ;;  %8589 = vmatmul.bf16.gmra.mxu0 %v16565_v37  ;;  %v17165_v30 = vadd.f32 %v8437_v19, %v8410_v38  ;;  %v8881_v57 = vunpack.c.h.b16 %v8774_v14  ;;  %v8880_v23 = vunpack.c.l.b16 %v8774_v14  ;;  %v15476_v37 = vld [vmem:[%s17537_s8 + $0x118] sm:$0xff]  ;;  %v17634_v56 = vld [vmem:[#allocation26_spill] sm:$0xff] }
 0x68c   :  { %v8440_v51 = vpop.f32.mrf.mxu3  ;;  %9840 = vmatpush.bf16.msrb.mxu2 %v15476_v37  ;;  %v15494_v38 = vld [vmem:[%s17537_s8 + $0x1a8] sm:$0xff] }
 0x68d   :  { %v8396_v15 = vpop.f32.mrf.mxu1  ;;  %v8693_v11 = vadd.f32 %v17036_v36, %v8395_v27  ;;  %9737 = vmatmul.bf16.gmra.mxu2 %v17631_v63  ;;  %v17172_v41 = vpack.c.b16 %v8881_v57, %v8877_v54  ;;  %v17174_v21 = vpack.c.b16 %v8880_v23, %v8876_v31  ;;  %v15482_v36 = vld [vmem:[%s17537_s8 + $0x148] sm:$0xff]  ;;  %9894 = vmatpush.bf16.msra.mxu0 %v15494_v38  ;;  %v15499_v38 = vld [vmem:[%s17537_s8 + $0x1d0] sm:$0xff] }
 0x68e   :  { %9870 = vmatpush.bf16.msrb.mxu3 %v15482_v36  ;;  %v15502_v23 = vld [vmem:[%s17537_s8 + $0x1e8] sm:$0xff] }
 0x68f   :  { %v8749_v10 = vmax.f32 %v8693_v11, 0.0 }
 0x690   :  { %v8368_v40 = vpop.f32.mrf.mxu0  ;;  %v8412_v34 = vpop.f32.mrf.mxu2  ;;  %9841 = vmatpush.bf16.msrb.mxu2 %v15475_v52  ;;  %v15492_v52 = vld [vmem:[%s17537_s8 + $0x198] sm:$0xff] }
 0x691   :  { %v8413_v55 = vadd.f32 %v8412_v34, %v17632_v5  ;;  %v17186_v8 = vpack.c.bf16 %v8749_v10, %v8748_v13  ;;  %v17640_v13 = vld [vmem:[#allocation51_spill] sm:$0xff]  ;;  %9895 = vmatpush.bf16.msra.mxu0 %v15493_v28  ;;  %v17641_v34 = vld [vmem:[#allocation29_spill] sm:$0xff] }
 0x692   :  { %9871 = vmatpush.bf16.msrb.mxu3 %v15481_v61  ;;  %v8912_v36 = vpack.c.b16 %v17641_v34, %v17641_v34  ;;  %v15509_v28 = vld [vmem:[%s17537_s8 + $0x220] sm:$0xff] }
 0x693   :  { %v8441_v49 = vadd.f32 %v8440_v51, %v8413_v55  ;;  %v17639_v51 = vld [vmem:[#allocation28_spill] sm:$0xff]  ;;  %v15501_v55 = vld [vmem:[%s17537_s8 + $0x1e0] sm:$0xff] }
 0x694   :  { %v8442_v45 = vpop.f32.mrf.mxu3  ;;  %9842 = vmatpush.bf16.msrb.mxu2 %v15474_v32  ;;  %v8913_v57 = vpack.c.b16 %v17639_v51, %v17639_v51  ;;  %v15516_v51 = vld [vmem:[%s17537_s8 + $0x258] sm:$0xff] }
 0x695   :  { %v8491_v29 = vpop.f32.mrf.mxu1  ;;  %9896 = vmatpush.bf16.msra.mxu0 %v15492_v52  ;;  %v17643_v52 = vld [vmem:[#allocation53_spill] sm:$0xff] }
 0x698   :  { %9816 = vmatmul.bf16.vlgmr.msrb.gmra.mxu1 %v17633_v17  ;;  %v8463_v2 = vpop.f32.mrf.mxu0  ;;  %v8414_v19 = vpop.f32.mrf.mxu2  ;;  %9843 = vmatpush.bf16.msrb.mxu2 %v15473_v7 }
 0x699   :  { %9770 = vmatmul.bf16.gmra.mxu3 %v17634_v56  ;;  %v8464_v47 = vadd.f32 %v8463_v2, %v17144_v33  ;;  %v8415_v50 = vadd.f32 %v8414_v19, %v17635_v1  ;;  %v15503_v33 = vld [vmem:[%s17537_s8 + $0x1f0] sm:$0xff]  ;;  %9897 = vmatpush.bf16.msra.mxu0 %v15491_v59  ;;  %v15520_v19 = vld [vmem:[%s17537_s8 + $0x278] sm:$0xff] }
 0x69a   :  { %9921 = vmatpush.bf16.msra.mxu1 %v15503_v33  ;;  %9976 = vmatpush.bf16.msra.mxu3 %v15520_v19  ;;  %v15536_v59 = vld [vmem:[%s17537_s8 + $0x2f8] sm:$0xff] }
 0x69b   :  { %v17210_v4 = vadd.f32 %v8491_v29, %v8464_v47  ;;  %9788 = vmatmul.bf16.vlgmr.msrb.gmra.mxu0 %v17636_v48  ;;  %v17215_v39 = vadd.f32 %v8442_v45, %v8415_v50 }
 0x69c   :  { %v8445_v58 = vpop.f32.mrf.mxu3 }
 0x69d   :  { %v17212_v46 = vpop.f32.mrf.mxu1  ;;  %9742 = vmatmul.bf16.gmra.mxu2 %v17637_v3  ;;  %v15518_v3 = vld [vmem:[%s17537_s8 + $0x268] sm:$0xff] }
 0x69e   :  { %9922 = vmatpush.bf16.msra.mxu1 %v15502_v23  ;;  %v8914_v23 = vpack.c.b16 %v16926_v35, %v16926_v35  ;;  %v15497_v35 = vld [vmem:[%s17537_s8 + $0x1c0] sm:$0xff] }
 0x6a0   :  { %v17224_v14 = vpop.f32.mrf.mxu0  ;;  %v8417_v16 = vpop.f32.mrf.mxu2 }
 0x6a1   :  { %v8418_v54 = vadd.f32 %v8417_v16, %v17638_v43  ;;  %v15490_v16 = vld [vmem:[%s17537_s8 + $0x188] sm:$0xff]  ;;  %v8915_v43 = vpack.c.b16 %v16924_v44, %v16924_v44 }
 0x6a2   :  { %9923 = vmatpush.bf16.msra.mxu1 %v15501_v55  ;;  %9898 = vmatpush.bf16.msra.mxu0 %v15490_v16  ;;  %v15528_v55 = vld [vmem:[%s17537_s8 + $0x2b8] sm:$0xff] }
 0x6a3   :  { %v8446_v15 = vadd.f32 %v8445_v58, %v8418_v54  ;;  %v15517_v54 = vld [vmem:[%s17537_s8 + $0x260] sm:$0xff] }
 0x6a4   :  { %v8447_v27 = vpop.f32.mrf.mxu3 }
 0x6a5   :  { %v8496_v31 = vpop.f32.mrf.mxu1 }
 0x6a8   :  { %9821 = vmatmul.bf16.gmra.mxu1 %v16887_v62  ;;  %v8468_v11 = vpop.f32.mrf.mxu0  ;;  %v8419_v63 = vpop.f32.mrf.mxu2 }
 0x6a9   :  { %9775 = vmatmul.bf16.gmra.mxu3 %v8913_v57  ;;  %v8469_v37 = vadd.f32 %v8468_v11, %v8441_v49  ;;  %v8420_v10 = vadd.f32 %v8419_v63, %v17640_v13  ;;  %v17642_v49 = vld [vmem:[#allocation52_spill] sm:$0xff]  ;;  %v15515_v13 = vld [vmem:[%s17537_s8 + $0x250] sm:$0xff] }
 0x6ab   :  { %v17237_v62 = vadd.f32 %v8496_v31, %v8469_v37  ;;  %9793 = vmatmul.bf16.gmra.mxu0 %v16889_v18  ;;  %v17244_v5 = vadd.f32 %v8447_v27, %v8420_v10  ;;  %v15500_v18 = vld [vmem:[%s17537_s8 + $0x1d8] sm:$0xff]  ;;  %v15510_v31 = vld [vmem:[%s17537_s8 + $0x228] sm:$0xff]  ;;  %v15489_v37 = vld [vmem:[%s17537_s8 + $0x180] sm:$0xff] }
 0x6ac   :  { %v8450_v40 = vpop.f32.mrf.mxu3  ;;  %9924 = vmatpush.bf16.msra.mxu1 %v15500_v18  ;;  %v15498_v27 = vld [vmem:[%s17537_s8 + $0x1c8] sm:$0xff]  ;;  %9899 = vmatpush.bf16.msra.mxu0 %v15489_v37  ;;  %v15508_v10 = vld [vmem:[%s17537_s8 + $0x218] sm:$0xff]  ;;  %v15513_v18 = vld [vmem:[%s17537_s8 + $0x240] sm:$0xff]  ;;  %v8884_v37 = vunpack.c.l.b16 %v17186_v8 }
 0x6ad   :  { %v17239_v25 = vpop.f32.mrf.mxu1  ;;  %9747 = vmatmul.bf16.gmra.mxu2 %v8912_v36  ;;  %v15514_v36 = vld [vmem:[%s17537_s8 + $0x248] sm:$0xff] }
 0x6b0   :  { %v17252_v29 = vpop.f32.mrf.mxu0  ;;  %v8422_v45 = vpop.f32.mrf.mxu2  ;;  %9925 = vmatpush.bf16.msra.mxu1 %v15499_v38  ;;  %10004 = vmatpush.bf16.msrb.mxu0 %v15528_v55 }
 0x6b1   :  { %v8423_v61 = vadd.f32 %v8422_v45, %v17642_v49 }
 0x6b3   :  { %v8451_v12 = vadd.f32 %v8450_v40, %v8423_v61 }
 0x6b4   :  { %v8452_v32 = vpop.f32.mrf.mxu3  ;;  %9926 = vmatpush.bf16.msra.mxu1 %v15498_v27 }
 0x6b5   :  { %v8501_v17 = vpop.f32.mrf.mxu1  ;;  %v17352_v32 = vperm.slane %v17026_v24, 6 }
 0x6b8   :  { %9826 = vmatmul.bf16.gmra.mxu1 %v16917_v0  ;;  %v8473_v2 = vpop.f32.mrf.mxu0  ;;  %v8424_v56 = vpop.f32.mrf.mxu2  ;;  %v15519_v0 = vld [vmem:[%s17537_s8 + $0x270] sm:$0xff] }
 0x6b9   :  { %9872 = vmatmul.bf16.vlgmr.msrb.gmra.mxu3 %v17092_v9  ;;  %v8474_v47 = vadd.f32 %v8473_v2, %v8446_v15  ;;  %v15512_v9 = vld [vmem:[%s17537_s8 + $0x238] sm:$0xff]  ;;  %9927 = vmatpush.bf16.msra.mxu1 %v15497_v35  ;;  %v15527_v2 = vld [vmem:[%s17537_s8 + $0x2b0] sm:$0xff] }
 0x6ba   :  { %9977 = vmatpush.bf16.msra.mxu3 %v15519_v0  ;;  %9948 = vmatpush.bf16.msra.mxu2 %v15512_v9  ;;  %v17363_v0 = vperm.slane %v17026_v24, 7  ;;  %v8646_v9 = vadd.f32 %v17352_v32, %v17210_v4 }
 0x6bb   :  { %v17266_v1 = vadd.f32 %v8501_v17, %v8474_v47  ;;  %9798 = vmatmul.bf16.gmra.mxu0 %v16919_v6  ;;  %v15511_v6 = vld [vmem:[%s17537_s8 + $0x230] sm:$0xff]  ;;  %v15506_v17 = vld [vmem:[%s17537_s8 + $0x208] sm:$0xff] }
 0x6bc   :  { %v17270_v7 = vpop.f32.mrf.mxu3  ;;  %10005 = vmatpush.bf16.msrb.mxu0 %v15527_v2  ;;  %v8702_v16 = vmax.f32 %v8646_v9, 0.0 }
 0x6bd   :  { %v17268_v50 = vpop.f32.mrf.mxu1  ;;  %9844 = vmatmul.bf16.vlgmr.msrb.gmra.mxu2 %v17094_v42  ;;  %10032 = vmatpush.bf16.msrb.mxu1 %v15536_v59 }
 0x6be   :  { %9978 = vmatpush.bf16.msra.mxu3 %v15518_v3  ;;  %9949 = vmatpush.bf16.msra.mxu2 %v15511_v6  ;;  %v17644_v3 = vld [vmem:[#allocation54_spill] sm:$0xff] }
 0x6c0   :  { %v17280_v58 = vpop.f32.mrf.mxu0  ;;  %v8519_v48 = vpop.f32.mrf.mxu2 }
 0x6c1   :  { %v8520_v45 = vadd.f32 %v8519_v48, %v17643_v52  ;;  %v8466_v48 = vadd.f32 %v17224_v14, %v17165_v30 }
 0x6c2   :  { %9979 = vmatpush.bf16.msra.mxu3 %v15517_v54  ;;  %9950 = vmatpush.bf16.msra.mxu2 %v15510_v31 }
 0x6c4   :  { %v17288_v42 = vpop.f32.mrf.mxu3 }
 0x6c5   :  { %v8506_v33 = vpop.f32.mrf.mxu1 }
 0x6c6   :  { %9980 = vmatpush.bf16.msra.mxu3 %v15516_v51  ;;  %9951 = vmatpush.bf16.msra.mxu2 %v15509_v28 }
 0x6c8   :  { %9831 = vmatmul.bf16.gmra.mxu1 %v8915_v43  ;;  %v8478_v15 = vpop.f32.mrf.mxu0  ;;  %v8521_v44 = vpop.f32.mrf.mxu2  ;;  %v8494_v43 = vadd.f32 %v17212_v46, %v8466_v48  ;;  %v17645_v46 = vld [vmem:[#allocation55_spill] sm:$0xff] }
 0x6c9   :  { %9877 = vmatmul.bf16.gmra.mxu3 %v17127_v26  ;;  %v8479_v57 = vadd.f32 %v8478_v15, %v8451_v12  ;;  %v8548_v12 = vadd.f32 %v17270_v7, %v8520_v45  ;;  %v15505_v7 = vld [vmem:[%s17537_s8 + $0x200] sm:$0xff]  ;;  %v15535_v15 = vld [vmem:[%s17537_s8 + $0x2f0] sm:$0xff] }
 0x6ca   :  { %9981 = vmatpush.bf16.msra.mxu3 %v15515_v13  ;;  %9952 = vmatpush.bf16.msra.mxu2 %v15508_v10  ;;  %v8654_v51 = vadd.f32 %v17352_v32, %v8494_v43 }
 0x6cb   :  { %v17316_v11 = vadd.f32 %v8506_v33, %v8479_v57  ;;  %9803 = vmatmul.bf16.gmra.mxu0 %v8914_v23  ;;  %10033 = vmatpush.bf16.msrb.mxu1 %v15535_v15 }
 0x6cc   :  { %v17318_v26 = vpop.f32.mrf.mxu3  ;;  %v8710_v13 = vmax.f32 %v8654_v51, 0.0 }
 0x6cd   :  { %v8508_v63 = vpop.f32.mrf.mxu1  ;;  %9849 = vmatmul.bf16.gmra.mxu2 %v17129_v53  ;;  %v15507_v53 = vld [vmem:[%s17537_s8 + $0x210] sm:$0xff] }
 0x6ce   :  { %9982 = vmatpush.bf16.msra.mxu3 %v15514_v36  ;;  %9953 = vmatpush.bf16.msra.mxu2 %v15507_v53  ;;  %v15534_v36 = vld [vmem:[%s17537_s8 + $0x2e8] sm:$0xff] }
 0x6cf   :  { %10034 = vmatpush.bf16.msrb.mxu1 %v15534_v36 }
 0x6d0   :  { %v8480_v40 = vpop.f32.mrf.mxu0  ;;  %v8524_v34 = vpop.f32.mrf.mxu2 }
 0x6d1   :  { %v8525_v57 = vadd.f32 %v8524_v34, %v17645_v46  ;;  %v15525_v34 = vld [vmem:[%s17537_s8 + $0x2a0] sm:$0xff] }
 0x6d2   :  { %9983 = vmatpush.bf16.msra.mxu3 %v15513_v18  ;;  %9954 = vmatpush.bf16.msra.mxu2 %v15506_v17  ;;  %v17646_v17 = vld [vmem:[#allocation56_spill] sm:$0xff] }
 0x6d3   :  { %v8553_v40 = vadd.f32 %v17318_v26, %v8525_v57  ;;  %v8471_v26 = vadd.f32 %v17252_v29, %v17215_v39  ;;  %v15533_v29 = vld [vmem:[%s17537_s8 + $0x2e0] sm:$0xff] }
 0x6d4   :  { %v17343_v61 = vpop.f32.mrf.mxu3  ;;  %10035 = vmatpush.bf16.msrb.mxu1 %v15533_v29 }
 0x6d5   :  { %v8603_v49 = vpop.f32.mrf.mxu1 }
 0x6d6   :  { %9955 = vmatpush.bf16.msra.mxu2 %v15505_v7 }
 0x6d8   :  { %v8575_v56 = vpop.f32.mrf.mxu0  ;;  %v8526_v19 = vpop.f32.mrf.mxu2 }
 0x6d9   :  { %9882 = vmatmul.bf16.gmra.mxu3 %v17172_v41  ;;  %v8576_v47 = vadd.f32 %v8575_v56, %v8548_v12  ;;  %v8522_v41 = vadd.f32 %v8521_v44, %v17644_v3  ;;  %v15526_v44 = vld [vmem:[%s17537_s8 + $0x2a8] sm:$0xff]  ;;  %v8527_v12 = vadd.f32 %v8526_v19, %v17646_v17  ;;  %v15524_v19 = vld [vmem:[%s17537_s8 + $0x298] sm:$0xff] }
 0x6da   :  { %10006 = vmatpush.bf16.msrb.mxu0 %v15526_v44  ;;  %v15523_v44 = vld [vmem:[%s17537_s8 + $0x290] sm:$0xff] }
 0x6db   :  { %v8604_v6 = vadd.f32 %v8603_v49, %v8576_v47  ;;  %v8550_v4 = vadd.f32 %v17288_v42, %v8522_v41  ;;  %v8916_v49 = vpack.c.b16 %v8884_v37, %v8884_v37  ;;  %v8555_v39 = vadd.f32 %v17343_v61, %v8527_v12 }
 0x6dc   :  { %v17373_v38 = vpop.f32.mrf.mxu3 }
 0x6dd   :  { %v8605_v33 = vpop.f32.mrf.mxu1  ;;  %v8647_v24 = vadd.f32 %v17363_v0, %v8604_v6  ;;  %9854 = vmatmul.bf16.gmra.mxu2 %v17174_v21  ;;  %v8885_v21 = vunpack.c.h.b16 %v17186_v8  ;;  %v8662_v8 = vadd.f32 %v17352_v32, %v17237_v62  ;;  %v8499_v62 = vadd.f32 %v17239_v25, %v8471_v26  ;;  %v15532_v25 = vld [vmem:[%s17537_s8 + $0x2d8] sm:$0xff] }
 0x6de   :  { %10007 = vmatpush.bf16.msrb.mxu0 %v15525_v34  ;;  %10036 = vmatpush.bf16.msrb.mxu1 %v15532_v25 }
 0x6df   :  { %v8703_v54 = vmax.f32 %v8647_v24, 0.0  ;;  %v8917_v35 = vpack.c.b16 %v8885_v21, %v8885_v21  ;;  %v8718_v6 = vmax.f32 %v8662_v8, 0.0  ;;  %v8670_v61 = vadd.f32 %v17352_v32, %v8499_v62 }
 0x6e0   :  { %v8577_v31 = vpop.f32.mrf.mxu0  ;;  %v8529_v27 = vpop.f32.mrf.mxu2 }
 0x6e1   :  { %v8755_v30 = vpack.c.bf16 %v8703_v54, %v8702_v16  ;;  %v8578_v14 = vadd.f32 %v8577_v31, %v8550_v4  ;;  %v17647_v4 = vld [vmem:[#allocation57_spill] sm:$0xff]  ;;  %v8726_v51 = vmax.f32 %v8670_v61, 0.0 }
 0x6e2   :  { %10008 = vmatpush.bf16.msrb.mxu0 %v15524_v19  ;;  %v8530_v31 = vadd.f32 %v8529_v27, %v17647_v4  ;;  %v15521_v19 = vld [vmem:[%s17537_s8 + $0x280] sm:$0xff]  ;;  %v17652_v4 = vld [vmem:[#allocation24_spill] sm:$0xff] }
 0x6e3   :  { %v8606_v23 = vadd.f32 %v8605_v33, %v8578_v14  ;;  %v8862_v18 = vunpack.c.l.b16 %v8755_v30  ;;  %v8863_v59 = vunpack.c.h.b16 %v8755_v30 }
 0x6e4   :  { %v17388_v28 = vpop.f32.mrf.mxu3  ;;  %v8558_v57 = vadd.f32 %v17373_v38, %v8530_v31 }
 0x6e5   :  { %v8608_v42 = vpop.f32.mrf.mxu1  ;;  %v8655_v63 = vadd.f32 %v17363_v0, %v8606_v23 }
 0x6e6   :  { %10009 = vmatpush.bf16.msrb.mxu0 %v15523_v44  ;;  %v8694_v44 = vadd.f32 %v17352_v32, %v17316_v11 }
 0x6e7   :  { %v8711_v10 = vmax.f32 %v8655_v63, 0.0 }
 0x6e8   :  { %v8580_v55 = vpop.f32.mrf.mxu0  ;;  %v8531_v53 = vpop.f32.mrf.mxu2 }
 0x6e9   :  { %9887 = vmatmul.bf16.gmra.mxu3 %v8917_v35  ;;  %v8759_v52 = vpack.c.bf16 %v8711_v10, %v8710_v13  ;;  %v8581_v45 = vadd.f32 %v8580_v55, %v8553_v40  ;;  %v15531_v35 = vld [vmem:[%s17537_s8 + $0x2d0] sm:$0xff]  ;;  %v8678_v13 = vadd.f32 %v17352_v32, %v17266_v1  ;;  %v8476_v10 = vadd.f32 %v17280_v58, %v17244_v5  ;;  %v17649_v40 = vld [vmem:[#allocation58_spill] sm:$0xff] }
 0x6ea   :  { %v8532_v36 = vadd.f32 %v8531_v53, %v17649_v40  ;;  %10037 = vmatpush.bf16.msrb.mxu1 %v15531_v35  ;;  %v17436_v1 = vld [vmem:[#allocation13] ss:$0 sm:$0xff] }
 0x6eb   :  { %v8866_v2 = vunpack.c.l.b16 %v8759_v52  ;;  %v8867_v56 = vunpack.c.h.b16 %v8759_v52  ;;  %v8609_v47 = vadd.f32 %v8608_v42, %v8581_v45  ;;  %v17648_v42 = vld [vmem:[#allocation21_spill] sm:$0xff]  ;;  %v8504_v5 = vadd.f32 %v17268_v50, %v8476_v10  ;;  %v15530_v50 = vld [vmem:[%s17537_s8 + $0x2c8] sm:$0xff] }
 0x6ec   :  { %v17404_v9 = vpop.f32.mrf.mxu3  ;;  %v8560_v53 = vadd.f32 %v17388_v28, %v8532_v36  ;;  %v8750_v10 = vmax.f32 %v8694_v44, 0.0 }
 0x6ed   :  { %v8610_v7 = vpop.f32.mrf.mxu1  ;;  %v8663_v48 = vadd.f32 %v17363_v0, %v8609_v47  ;;  %9859 = vmatmul.bf16.gmra.mxu2 %v8916_v49  ;;  %v8894_v3 = vpack.c.b16 %v8866_v2, %v8862_v18  ;;  %v8895_v41 = vpack.c.b16 %v8867_v56, %v8863_v59  ;;  %v17650_v18 = vld [vmem:[#allocation22_spill] sm:$0xff]  ;;  %v8734_v59 = vmax.f32 %v8678_v13, 0.0 }
 0x6ee   :  { %v15522_v2 = vld [vmem:[%s17537_s8 + $0x288] sm:$0xff]  ;;  %10038 = vmatpush.bf16.msrb.mxu1 %v15530_v50 }
 0x6ef   :  { %v8719_v33 = vmax.f32 %v8663_v48, 0.0  ;;  %9900 = vmatmul.bf16.vlgmr.msra.gmra.mxu0 %v8894_v3  ;;  %9928 = vmatmul.bf16.vlgmr.msra.gmra.mxu1 %v8895_v41  ;;  %v8686_v41 = vadd.f32 %v17352_v32, %v8504_v5 }
 0x6f0   :  { %v8582_v24 = vpop.f32.mrf.mxu0  ;;  %v8534_v16 = vpop.f32.mrf.mxu2  ;;  %10010 = vmatpush.bf16.msrb.mxu0 %v15522_v2 }
 0x6f1   :  { %v8763_v43 = vpack.c.bf16 %v8719_v33, %v8718_v6  ;;  %v8583_v54 = vadd.f32 %v8582_v24, %v8555_v39  ;;  %v17651_v6 = vld [vmem:[#allocation59_spill] sm:$0xff] }
 0x6f2   :  { %v8535_v62 = vadd.f32 %v8534_v16, %v17651_v6 }
 0x6f3   :  { %v8611_v30 = vadd.f32 %v8610_v7, %v8583_v54  ;;  %v8870_v34 = vunpack.c.l.b16 %v8763_v43  ;;  %v8871_v49 = vunpack.c.h.b16 %v8763_v43  ;;  %v8742_v43 = vmax.f32 %v8686_v41, 0.0 }
 0x6f4   :  { %v8564_v15 = vpop.f32.mrf.mxu3  ;;  %10011 = vmatpush.bf16.msrb.mxu0 %v15521_v19  ;;  %v8563_v25 = vadd.f32 %v17404_v9, %v8535_v62 }
 0x6f5   :  { %v8613_v14 = vpop.f32.mrf.mxu1  ;;  %v8671_v21 = vadd.f32 %v17363_v0, %v8611_v30  ;;  %v15529_v15 = vld [vmem:[%s17537_s8 + $0x2c0] sm:$0xff]  ;;  %s15805_s8 = smov 96  }
 0x6f6   :  { %10039 = vmatpush.bf16.msrb.mxu1 %v15529_v15 }
 0x6f7   :  { %v8727_v46 = vmax.f32 %v8671_v21, 0.0 }
 0x6f8   :  { %v8585_v23 = vpop.f32.mrf.mxu0  ;;  %v8536_v63 = vpop.f32.mrf.mxu2 }
 0x6f9   :  { %9984 = vmatmul.bf16.vlgmr.msra.gmra.mxu3 %v17648_v42  ;;  %v8586_v27 = vadd.f32 %v8585_v23, %v8558_v57  ;;  %v8767_v37 = vpack.c.bf16 %v8727_v46, %v8726_v51 }
 0x6fb   :  { %v8614_v38 = vadd.f32 %v8613_v14, %v8586_v27  ;;  %v8874_v45 = vunpack.c.l.b16 %v8767_v37  ;;  %v8875_v8 = vunpack.c.h.b16 %v8767_v37  ;;  %v17653_v37 = vld [vmem:[#allocation25_spill] sm:$0xff] }
 0x6fc   :  { %v9761_v52 = vpop.f32.mrf.mxu3 }
 0x6fd   :  { %v8615_v55 = vpop.f32.mrf.mxu1  ;;  %v8679_v26 = vadd.f32 %v17363_v0, %v8614_v38  ;;  %9956 = vmatmul.bf16.vlgmr.msra.gmra.mxu2 %v17650_v18  ;;  %v8902_v17 = vpack.c.b16 %v8874_v45, %v8870_v34  ;;  %v8903_v12 = vpack.c.b16 %v8875_v8, %v8871_v49  ;;  %v17654_v49 = vld [vmem:[#allocation30_spill] sm:$0xff] }
 0x6ff   :  { %v8735_v58 = vmax.f32 %v8679_v26, 0.0  ;;  %9905 = vmatmul.bf16.gmra.mxu0 %v8902_v17  ;;  %9933 = vmatmul.bf16.gmra.mxu1 %v8903_v12 }
 0x700   :  { %v8587_v56 = vpop.f32.mrf.mxu0  ;;  %v9733_v47 = vpop.f32.mrf.mxu2 }
 0x701   :  { %v8771_v7 = vpack.c.bf16 %v8735_v58, %v8734_v59  ;;  %v8588_v48 = vadd.f32 %v8587_v56, %v8560_v53  ;;  %v9734_v3 = vadd.f32 %v17436_v1, %v9733_v47  ;;  %v17655_v53 = vld [vmem:[#allocation31_spill] sm:$0xff] }
 0x703   :  { %v8616_v28 = vadd.f32 %v8615_v55, %v8588_v48  ;;  %v9762_v29 = vadd.f32 %v9761_v52, %v9734_v3  ;;  %v8878_v21 = vunpack.c.l.b16 %v8771_v7  ;;  %v8879_v51 = vunpack.c.h.b16 %v8771_v7 }
 0x704   :  { %v9763_v39 = vpop.f32.mrf.mxu3 }
 0x705   :  { %v8618_v33 = vpop.f32.mrf.mxu1  ;;  %v8687_v24 = vadd.f32 %v17363_v0, %v8616_v28 }
 0x707   :  { %v8743_v54 = vmax.f32 %v8687_v24, 0.0 }
 0x708   :  { %v8590_v61 = vpop.f32.mrf.mxu0  ;;  %v9735_v16 = vpop.f32.mrf.mxu2 }
 0x709   :  { %9989 = vmatmul.bf16.gmra.mxu3 %v17652_v4  ;;  %v8591_v31 = vadd.f32 %v8590_v61, %v8563_v25  ;;  %v9736_v30 = vadd.f32 %v17436_v1, %v9735_v16  ;;  %v8775_v14 = vpack.c.bf16 %v8743_v54, %v8742_v43  ;;  %v17656_v61 = vld [vmem:[#allocation35_spill] sm:$0xff]  ;;  %v17657_v4 = vld [vmem:[#allocation34_spill] sm:$0xff] }
 0x70b   :  { %v8619_v46 = vadd.f32 %v8618_v33, %v8591_v31  ;;  %v8882_v23 = vunpack.c.l.b16 %v8775_v14  ;;  %v8883_v42 = vunpack.c.h.b16 %v8775_v14  ;;  %v9764_v63 = vadd.f32 %v9763_v39, %v9736_v30 }
 0x70c   :  { %v9766_v9 = vpop.f32.mrf.mxu3  ;;  %v15804_v39 = vmov 0  }
 0x70d   :  { %v8620_v57 = vpop.f32.mrf.mxu1  ;;  %v8695_v27 = vadd.f32 %v17363_v0, %v8619_v46  ;;  %9961 = vmatmul.bf16.gmra.mxu2 %v17653_v37  ;;  %v8910_v35 = vpack.c.b16 %v8882_v23, %v8878_v21  ;;  %v8911_v13 = vpack.c.b16 %v8883_v42, %v8879_v51 }
 0x70f   :  { %v8751_v40 = vmax.f32 %v8695_v27, 0.0  ;;  %9910 = vmatmul.bf16.gmra.mxu0 %v8910_v35  ;;  %9938 = vmatmul.bf16.gmra.mxu1 %v8911_v13  ;;  %v17658_v27 = vld [vmem:[#allocation36_spill] sm:$0xff] }
 0x710   :  { %v8592_v11 = vpop.f32.mrf.mxu0  ;;  %v9738_v32 = vpop.f32.mrf.mxu2 }
 0x711   :  { %v9739_v36 = vadd.f32 %v17436_v1, %v9738_v32  ;;  %v8779_v34 = vpack.c.bf16 %v8751_v40, %v8750_v10 }
 0x713   :  { %v9767_v52 = vadd.f32 %v9766_v9, %v9739_v36  ;;  %v8886_v18 = vunpack.c.l.b16 %v8779_v34  ;;  %v8887_v17 = vunpack.c.h.b16 %v8779_v34 }
 0x714   :  { %v9768_v55 = vpop.f32.mrf.mxu3 }
 0x715   :  { %v9817_v38 = vpop.f32.mrf.mxu1  ;;  %v8918_v2 = vpack.c.b16 %v8886_v18, %v8886_v18  ;;  %v8919_v56 = vpack.c.b16 %v8887_v17, %v8887_v17 }
 0x718   :  { %v9789_v45 = vpop.f32.mrf.mxu0  ;;  %v9740_v0 = vpop.f32.mrf.mxu2 }
 0x719   :  { %9994 = vmatmul.bf16.gmra.mxu3 %v17654_v49  ;;  %v9790_v8 = vadd.f32 %v9789_v45, %v9762_v29  ;;  %v9741_v26 = vadd.f32 %v17436_v1, %v9740_v0 }
 0x71b   :  { %v9769_v5 = vadd.f32 %v9768_v55, %v9741_v26  ;;  %v9818_v58 = vadd.f32 %v9817_v38, %v9790_v8 }
 0x71c   :  { %v9771_v59 = vpop.f32.mrf.mxu3 }
 0x71d   :  { %v9819_v12 = vpop.f32.mrf.mxu1  ;;  %9966 = vmatmul.bf16.gmra.mxu2 %v17655_v53 }
 0x71f   :  { %9915 = vmatmul.bf16.gmra.mxu0 %v8918_v2  ;;  %9943 = vmatmul.bf16.gmra.mxu1 %v8919_v56 }
 0x720   :  { %v9791_v47 = vpop.f32.mrf.mxu0  ;;  %v9743_v7 = vpop.f32.mrf.mxu2 }
 0x721   :  { %v9792_v48 = vadd.f32 %v9791_v47, %v9764_v63  ;;  %v9744_v3 = vadd.f32 %v17436_v1, %v9743_v7 }
 0x723   :  { %v9772_v6 = vadd.f32 %v9771_v59, %v9744_v3  ;;  %v9820_v62 = vadd.f32 %v9819_v12, %v9792_v48 }
 0x724   :  { %v9773_v41 = vpop.f32.mrf.mxu3 }
 0x725   :  { %v9822_v50 = vpop.f32.mrf.mxu1 }
 0x728   :  { %v9794_v28 = vpop.f32.mrf.mxu0  ;;  %v9745_v33 = vpop.f32.mrf.mxu2 }
 0x729   :  { %9999 = vmatmul.bf16.gmra.mxu3 %v15804_v39  ;;  %v9795_v29 = vadd.f32 %v9794_v28, %v9767_v52  ;;  %v9746_v19 = vadd.f32 %v17436_v1, %v9745_v33 }
 0x72b   :  { %v9774_v54 = vadd.f32 %v9773_v41, %v9746_v19  ;;  %v9823_v25 = vadd.f32 %v9822_v50, %v9795_v29 }
 0x72c   :  { %v9776_v43 = vpop.f32.mrf.mxu3 }
 0x72d   :  { %v9824_v24 = vpop.f32.mrf.mxu1  ;;  %9971 = vmatmul.bf16.gmra.mxu2 %v15804_v39 }
 0x72f   :  { %10012 = vmatmul.bf16.vlgmr.msrb.gmra.mxu0 %v17656_v61  ;;  %10040 = vmatmul.bf16.vlgmr.msrb.gmra.mxu1 %v17657_v4 }
 0x730   :  { %v9796_v16 = vpop.f32.mrf.mxu0  ;;  %v9748_v31 = vpop.f32.mrf.mxu2 }
 0x731   :  { %v9797_v30 = vadd.f32 %v9796_v16, %v9769_v5  ;;  %v9749_v14 = vadd.f32 %v17436_v1, %v9748_v31 }
 0x733   :  { %v9777_v21 = vadd.f32 %v9776_v43, %v9749_v14  ;;  %v9825_v51 = vadd.f32 %v9824_v24, %v9797_v30 }
 0x734   :  { %v9778_v44 = vpop.f32.mrf.mxu3 }
 0x735   :  { %v9827_v15 = vpop.f32.mrf.mxu1 }
 0x738   :  { %v9799_v46 = vpop.f32.mrf.mxu0  ;;  %v9750_v57 = vpop.f32.mrf.mxu2 }
 0x739   :  { %v9800_v9 = vadd.f32 %v9799_v46, %v9772_v6 }
 0x73b   :  { %v9828_v63 = vadd.f32 %v9827_v15, %v9800_v9 }
 0x73c   :  { %v9873_v42 = vpop.f32.mrf.mxu3 }
 0x73d   :  { %v9829_v23 = vpop.f32.mrf.mxu1 }
 0x73f   :  { %10017 = vmatmul.bf16.gmra.mxu0 %v16902_v20  ;;  %10045 = vmatmul.bf16.gmra.mxu1 %v17658_v27 }
 0x740   :  { %v9801_v37 = vpop.f32.mrf.mxu0  ;;  %v9845_v35 = vpop.f32.mrf.mxu2 }
 0x741   :  { %v9802_v13 = vadd.f32 %v9801_v37, %v9774_v54  ;;  %v9846_v10 = vadd.f32 %v9845_v35, %v9818_v58 }
 0x743   :  { %v9830_v11 = vadd.f32 %v9829_v23, %v9802_v13  ;;  %v9874_v32 = vadd.f32 %v9873_v42, %v9846_v10 }
 0x744   :  { %v9875_v1 = vpop.f32.mrf.mxu3 }
 0x745   :  { %v9832_v40 = vpop.f32.mrf.mxu1 }
 0x748   :  { %v9804_v36 = vpop.f32.mrf.mxu0  ;;  %v9847_v34 = vpop.f32.mrf.mxu2 }
 0x749   :  { %v9805_v38 = vadd.f32 %v9804_v36, %v9777_v21  ;;  %v9848_v55 = vadd.f32 %v9847_v34, %v9820_v62 }
 0x74b   :  { %v9833_v49 = vadd.f32 %v9832_v40, %v9805_v38  ;;  %v9876_v0 = vadd.f32 %v9875_v1, %v9848_v55 }
 0x74c   :  { %v9878_v45 = vpop.f32.mrf.mxu3 }
 0x74d   :  { %v9834_v52 = vpop.f32.mrf.mxu1 }
 0x74f   :  { %10022 = vmatmul.bf16.gmra.mxu0 %v16929_v60  ;;  %10050 = vmatmul.bf16.gmra.mxu1 %v16932_v22 }
 0x750   :  { %v9806_v20 = vpop.f32.mrf.mxu0  ;;  %v9850_v8 = vpop.f32.mrf.mxu2 }
 0x751   :  { %v9851_v26 = vadd.f32 %v9850_v8, %v9823_v25 }
 0x753   :  { %v9879_v17 = vadd.f32 %v9878_v45, %v9851_v26 }
 0x754   :  { %v9880_v18 = vpop.f32.mrf.mxu3 }
 0x758   :  { %v9852_v12 = vpop.f32.mrf.mxu2 }
 0x759   :  { %v9853_v59 = vadd.f32 %v9852_v12, %v9825_v51 }
 0x75b   :  { %v17476_v58 = vadd.f32 %v9880_v18, %v9853_v59 }
 0x75c   :  { %v9883_v5 = vpop.f32.mrf.mxu3 }
 0x75f   :  { %10027 = vmatmul.bf16.gmra.mxu0 %v15804_v39  ;;  %10055 = vmatmul.bf16.gmra.mxu1 %v15804_v39 }
 0x760   :  { %v9855_v53 = vpop.f32.mrf.mxu2 }
 0x761   :  { %v9856_v2 = vadd.f32 %v9855_v53, %v9828_v63 }
 0x763   :  { %v17478_v47 = vadd.f32 %v9883_v5, %v9856_v2 }
 0x764   :  { %v9885_v56 = vpop.f32.mrf.mxu3 }
 0x768   :  { %v9857_v60 = vpop.f32.mrf.mxu2 }
 0x769   :  { %v9858_v7 = vadd.f32 %v9857_v60, %v9830_v11 }
 0x76b   :  { %v17480_v48 = vadd.f32 %v9885_v56, %v9858_v7 }
 0x76c   :  { %v9888_v22 = vpop.f32.mrf.mxu3  ;;  %v9901_v3 = vpop.f32.mrf.mxu0 }
 0x76d   :  { %v9929_v50 = vpop.f32.mrf.mxu1  ;;  %v9902_v41 = vadd.f32 %v9901_v3, %v9874_v32 }
 0x76f   :  { %v9930_v6 = vadd.f32 %v9929_v50, %v9902_v41 }
 0x770   :  { %v9860_v62 = vpop.f32.mrf.mxu2 }
 0x771   :  { %v9861_v28 = vadd.f32 %v9860_v62, %v9833_v49 }
 0x773   :  { %v17482_v29 = vadd.f32 %v9888_v22, %v9861_v28 }
 0x774   :  { %v9890_v33 = vpop.f32.mrf.mxu3  ;;  %v9903_v39 = vpop.f32.mrf.mxu0 }
 0x775   :  { %v9931_v19 = vpop.f32.mrf.mxu1  ;;  %v9904_v11 = vadd.f32 %v9903_v39, %v9876_v0 }
 0x777   :  { %v9932_v38 = vadd.f32 %v9931_v19, %v9904_v11 }
 0x778   :  { %v9862_v24 = vpop.f32.mrf.mxu2 }
 0x77c   :  { %v9985_v43 = vpop.f32.mrf.mxu3  ;;  %v9906_v54 = vpop.f32.mrf.mxu0 }
 0x77d   :  { %v9934_v25 = vpop.f32.mrf.mxu1  ;;  %v9907_v20 = vadd.f32 %v9906_v54, %v9879_v17 }
 0x77f   :  { %v9935_v59 = vadd.f32 %v9934_v25, %v9907_v20 }
 0x780   :  { %v9957_v61 = vpop.f32.mrf.mxu2 }
 0x781   :  { %v9958_v4 = vadd.f32 %v9957_v61, %v9930_v6 }
 0x783   :  { %v9986_v31 = vadd.f32 %v9985_v43, %v9958_v4 }
 0x784   :  { %v9987_v16 = vpop.f32.mrf.mxu3  ;;  %v9908_v30 = vpop.f32.mrf.mxu0 }
 0x785   :  { %v9936_v14 = vpop.f32.mrf.mxu1  ;;  %v9909_v56 = vadd.f32 %v9908_v30, %v17476_v58 }
 0x787   :  { %v9937_v50 = vadd.f32 %v9936_v14, %v9909_v56 }
 0x788   :  { %v9959_v15 = vpop.f32.mrf.mxu2 }
 0x789   :  { %v9960_v52 = vadd.f32 %v9959_v15, %v9932_v38 }
 0x78b   :  { %v9988_v8 = vadd.f32 %v9987_v16, %v9960_v52 }
 0x78c   :  { %v9990_v44 = vpop.f32.mrf.mxu3  ;;  %v9911_v21 = vpop.f32.mrf.mxu0 }
 0x78d   :  { %v9939_v51 = vpop.f32.mrf.mxu1  ;;  %v9912_v28 = vadd.f32 %v9911_v21, %v17478_v47 }
 0x78f   :  { %v9940_v58 = vadd.f32 %v9939_v51, %v9912_v28 }
 0x790   :  { %v9962_v46 = vpop.f32.mrf.mxu2 }
 0x791   :  { %v9963_v53 = vadd.f32 %v9962_v46, %v9935_v59 }
 0x793   :  { %v9991_v7 = vadd.f32 %v9990_v44, %v9963_v53 }
 0x794   :  { %v9992_v57 = vpop.f32.mrf.mxu3  ;;  %v9913_v9 = vpop.f32.mrf.mxu0 }
 0x795   :  { %v9941_v23 = vpop.f32.mrf.mxu1  ;;  %v9914_v4 = vadd.f32 %v9913_v9, %v17480_v48 }
 0x797   :  { %v9942_v44 = vadd.f32 %v9941_v23, %v9914_v4 }
 0x798   :  { %v9964_v42 = vpop.f32.mrf.mxu2 }
 0x799   :  { %v9965_v6 = vadd.f32 %v9964_v42, %v9937_v50 }
 0x79b   :  { %v9993_v19 = vadd.f32 %v9992_v57, %v9965_v6 }
 0x79c   :  { %v9995_v63 = vpop.f32.mrf.mxu3  ;;  %v17484_v27 = vpop.f32.mrf.mxu0 }
 0x79d   :  { %v17486_v37 = vpop.f32.mrf.mxu1  ;;  %v9917_v48 = vadd.f32 %v17484_v27, %v17482_v29 }
 0x79f   :  { %v9945_v20 = vadd.f32 %v17486_v37, %v9917_v48 }
 0x7a0   :  { %v9967_v35 = vpop.f32.mrf.mxu2 }
 0x7a1   :  { %v9968_v25 = vadd.f32 %v9967_v35, %v9940_v58 }
 0x7a3   :  { %v9996_v15 = vadd.f32 %v9995_v63, %v9968_v25 }
 0x7a4   :  { %v17488_v13 = vpop.f32.mrf.mxu3  ;;  %v9918_v10 = vpop.f32.mrf.mxu0 }
 0x7a5   :  { %v9946_v40 = vpop.f32.mrf.mxu1 }
 0x7a8   :  { %v9969_v1 = vpop.f32.mrf.mxu2 }
 0x7a9   :  { %v9970_v10 = vadd.f32 %v9969_v1, %v9942_v44 }
 0x7ab   :  { %v9998_v38 = vadd.f32 %v17488_v13, %v9970_v10 }
 0x7ac   :  { %v17490_v32 = vpop.f32.mrf.mxu3  ;;  %v10013_v36 = vpop.f32.mrf.mxu0 }
 0x7ad   :  { %v10041_v34 = vpop.f32.mrf.mxu1  ;;  %v10014_v55 = vadd.f32 %v10013_v36, %v9986_v31 }
 0x7af   :  { %v17492_v45 = vadd.f32 %v10041_v34, %v10014_v55 }
 0x7b0   :  { %v17494_v49 = vpop.f32.mrf.mxu2 }
 0x7b4   :  { %v10002_v26 = vpop.f32.mrf.mxu3  ;;  %v10015_v18 = vpop.f32.mrf.mxu0 }
 0x7b5   :  { %v10043_v12 = vpop.f32.mrf.mxu1  ;;  %v10016_v5 = vadd.f32 %v10015_v18, %v9988_v8 }
 0x7b7   :  { %v10044_v0 = vadd.f32 %v10043_v12, %v10016_v5  ;;  %v9973_v12 = vadd.f32 %v17494_v49, %v9945_v20 }
 0x7b8   :  { %v9974_v2 = vpop.f32.mrf.mxu2 }
 0x7b9   :  { %v14475_v60 = vmul.f32 -1.442695, %v10044_v0 }
 0x7bb   :  { %15558 = vpow2.f32 %v14475_v60  ;;  %v10001_v60 = vadd.f32 %v17490_v32, %v9973_v12 }
 0x7bc   :  { %v10018_v22 = vpop.f32.mrf.mxu0 }
 0x7bd   :  { %v10046_v3 = vpop.f32.mrf.mxu1  ;;  %v10019_v41 = vadd.f32 %v10018_v22, %v9991_v7 }
 0x7bf   :  { %v10047_v17 = vadd.f32 %v10046_v3, %v10019_v41 }
 0x7c1   :  { %v15559_v62 = vpop.eup %15558  ;;  %v14476_v33 = vmul.f32 -1.442695, %v10047_v17 }
 0x7c2   :  { %v10082_v39 = vadd.f32 1.0, %v15559_v62 }
 0x7c3   :  { %15560 = vpow2.f32 %v14476_v33 }
 0x7c4   :  { %15562 = vrcp.f32 %v10082_v39  ;;  %v10020_v24 = vpop.f32.mrf.mxu0  ;;  %v10114_v51 = vand.u32 2147483648, %v10082_v39  ;;  %v10112_v11 = vand.u32 2147483647, %v10082_v39  ;;  %vm10108_vm3 = vweird.f32 %v10082_v39 }
 0x7c5   :  { %v10048_v43 = vpop.f32.mrf.mxu1  ;;  %v10021_v54 = vadd.f32 %v10020_v24, %v9993_v19 }
 0x7c6   :  { %v10115_v55 = vor.u32 1.1754944e-38, %v10114_v51  ;;  %vm10113_vm5 = vcmp.eq.f32.partialorder %v10112_v11, 8.507059e+37 }
 0x7c7   :  { %v10049_v61 = vadd.f32 %v10048_v43, %v10021_v54 }
 0x7c9   :  { %v15561_v16 = vpop.eup %15560  ;;  %v14477_v31 = vmul.f32 -1.442695, %v10049_v61 }
 0x7ca   :  { %v15563_v30 = vpop.eup %15562  ;;  %v10083_v14 = vadd.f32 1.0, %v15561_v16 }
 0x7cb   :  { %15564 = vpow2.f32 %v14477_v31  ;;  %v10104_v47 = vmul.f32 %v15563_v30, %v10082_v39  ;;  %vm10109_vm2 = vweird.f32 %v15563_v30 }
 0x7cc   :  { %15566 = vrcp.f32 %v10083_v14  ;;  %v10023_v21 = vpop.f32.mrf.mxu0  ;;  %vm10110_vm4 = vmor %vm10108_vm3, %vm10109_vm2  ;;  %v10129_v59 = vand.u32 2147483648, %v10083_v14  ;;  %v10127_v53 = vand.u32 2147483647, %v10083_v14  ;;  %vm10123_vm7 = vweird.f32 %v10083_v14 }
 0x7cd   :  { %v10051_v46 = vpop.f32.mrf.mxu1  ;;  %v10024_v57 = vadd.f32 %v10023_v21, %v9996_v15  ;;  %v10105_v42 = vsub.f32 1.0, %v10104_v47 }
 0x7ce   :  { %v10130_v22 = vor.u32 1.1754944e-38, %v10129_v59  ;;  %vm10128_vm9 = vcmp.eq.f32.partialorder %v10127_v53, 8.507059e+37  ;;  %v14474_v59 = vmul.f32 -1.442695, %v17492_v45 }
 0x7cf   :  { %v10052_v40 = vadd.f32 %v10051_v46, %v10024_v57  ;;  %v10106_v35 = vmul.f32 %v15563_v30, %v10105_v42 }
 0x7d1   :  { %v15565_v9 = vpop.eup %15564  ;;  %v14478_v36 = vmul.f32 -1.442695, %v10052_v40  ;;  %v10107_v34 = vadd.f32 %v15563_v30, %v10106_v35 }
 0x7d2   :  { %v15567_v63 = vpop.eup %15566  ;;  %v10084_v23 = vadd.f32 1.0, %v15565_v9 }
 0x7d3   :  { %15568 = vpow2.f32 %v14478_v36  ;;  %v10111_v1 = vsel %vm10110_vm4, %v15563_v30, %v10107_v34  ;;  %v10119_v52 = vmul.f32 %v15567_v63, %v10083_v14  ;;  %vm10124_vm6 = vweird.f32 %v15567_v63 }
 0x7d4   :  { %15570 = vrcp.f32 %v10084_v23  ;;  %v10025_v8 = vpop.f32.mrf.mxu0  ;;  %v10116_v29 = vsel %vm10113_vm5, %v10115_v55, %v10111_v1  ;;  %vm10125_vm8 = vmor %vm10123_vm7, %vm10124_vm6  ;;  %v10144_v28 = vand.u32 2147483648, %v10084_v23  ;;  %v10142_v32 = vand.u32 2147483647, %v10084_v23 }
 0x7d5   :  { %v10053_v26 = vpop.f32.mrf.mxu1  ;;  %v10026_v27 = vadd.f32 %v10025_v8, %v9998_v38  ;;  %10194 = vrot.lane.b32.xlu0 %v10116_v29, %s15799_s22  ;;  %v10120_v18 = vsub.f32 1.0, %v10119_v52  ;;  %vm10138_vm11 = vweird.f32 %v10084_v23  ;;  %s15806_s22 = smov 80  }
 0x7d6   :  { %v10145_v25 = vor.u32 1.1754944e-38, %v10144_v28  ;;  %vm10143_vm13 = vcmp.eq.f32.partialorder %v10142_v32, 8.507059e+37 }
 0x7d7   :  { %v10054_v13 = vadd.f32 %v10053_v26, %v10026_v27  ;;  %v10121_v5 = vmul.f32 %v15567_v63, %v10120_v18 }
 0x7d9   :  { %v15569_v0 = vpop.eup %15568  ;;  %v14479_v2 = vmul.f32 -1.442695, %v10054_v13  ;;  %v10122_v56 = vadd.f32 %v15567_v63, %v10121_v5 }
 0x7da   :  { %v15571_v37 = vpop.eup %15570  ;;  %v10085_v7 = vadd.f32 1.0, %v15569_v0 }
 0x7db   :  { %15572 = vpow2.f32 %v14479_v2  ;;  %v10126_v3 = vsel %vm10125_vm8, %v15567_v63, %v10122_v56  ;;  %v10134_v50 = vmul.f32 %v15571_v37, %v10084_v23  ;;  %vm10139_vm10 = vweird.f32 %v15571_v37 }
 0x7dc   :  { %15574 = vrcp.f32 %v10085_v7  ;;  %v10028_v49 = vpop.f32.mrf.mxu0  ;;  %v10131_v41 = vsel %vm10128_vm9, %v10130_v22, %v10126_v3  ;;  %vm10140_vm12 = vmor %vm10138_vm11, %vm10139_vm10  ;;  %v10159_v15 = vand.u32 2147483648, %v10085_v7  ;;  %v10157_v44 = vand.u32 2147483647, %v10085_v7 }
 0x7dd   :  { %v10056_v6 = vpop.f32.mrf.mxu1  ;;  %v10029_v17 = vadd.f32 %v10028_v49, %v10001_v60  ;;  %10198 = vrot.lane.b32.xlu0 %v10131_v41, %s15805_s8  ;;  %v10135_v62 = vsub.f32 1.0, %v10134_v50  ;;  %vm10153_vm15 = vweird.f32 %v10085_v7 }
 0x7de   :  { %v10160_v10 = vor.u32 1.1754944e-38, %v10159_v15  ;;  %vm10158_vm1 = vcmp.eq.f32.partialorder %v10157_v44, 8.507059e+37 }
 0x7df   :  { %v10057_v33 = vadd.f32 %v10056_v6, %v10029_v17  ;;  %v10136_v39 = vmul.f32 %v15571_v37, %v10135_v62 }
 0x7e1   :  { %v15573_v19 = vpop.eup %15572  ;;  %v14480_v24 = vmul.f32 -1.442695, %v10057_v33  ;;  %v10137_v43 = vadd.f32 %v15571_v37, %v10136_v39 }
 0x7e2   :  { %v15575_v58 = vpop.eup %15574  ;;  %v10086_v54 = vadd.f32 1.0, %v15573_v19 }
 0x7e3   :  { %15576 = vpow2.f32 %v14480_v24  ;;  %v10141_v61 = vsel %vm10140_vm12, %v15571_v37, %v10137_v43  ;;  %v10149_v4 = vmul.f32 %v15575_v58, %v10085_v7  ;;  %vm10154_vm14 = vweird.f32 %v15575_v58 }
 0x7e4   :  { %15578 = vrcp.f32 %v10086_v54  ;;  %v10030_v16 = vpop.f32.mrf.mxu0  ;;  %v10146_v31 = vsel %vm10143_vm13, %v10145_v25, %v10141_v61  ;;  %vm10155_vm0 = vmor %vm10153_vm15, %vm10154_vm14  ;;  %v10174_v48 = vand.u32 2147483648, %v10086_v54  ;;  %v10172_v36 = vand.u32 2147483647, %v10086_v54 }
 0x7e5   :  { %v10058_v30 = vpop.f32.mrf.mxu1  ;;  %10202 = vrot.lane.b32.xlu1 %v10146_v31, %s15806_s22  ;;  %v10150_v14 = vsub.f32 1.0, %v10149_v4  ;;  %vm10168_vm3 = vweird.f32 %v10086_v54  ;;  %vm10217_vm13 = vcmask 916480   ;;  %vm10219_vm15 = vcmask 785408  }
 0x7e6   :  { %v10175_v23 = vor.u32 1.1754944e-38, %v10174_v48  ;;  %vm10173_vm5 = vcmp.eq.f32.partialorder %v10172_v36, 8.507059e+37 }
 0x7e7   :  { %v10151_v47 = vmul.f32 %v15575_v58, %v10150_v14 }
 0x7e9   :  { %v15577_v21 = vpop.eup %15576  ;;  %v10152_v46 = vadd.f32 %v15575_v58, %v10151_v47 }
 0x7ea   :  { %v15579_v57 = vpop.eup %15578  ;;  %v10087_v42 = vadd.f32 1.0, %v15577_v21 }
 0x7eb   :  { %v10156_v51 = vsel %vm10155_vm0, %v15575_v58, %v10152_v46  ;;  %v10164_v40 = vmul.f32 %v15579_v57, %v10086_v54  ;;  %vm10169_vm2 = vweird.f32 %v15579_v57  ;;  %vm10227_vm0 = vcmask 261120  }
 0x7ec   :  { %15580 = vrcp.f32 %v10087_v42  ;;  %v10161_v35 = vsel %vm10158_vm1, %v10160_v10, %v10156_v51  ;;  %vm10170_vm4 = vmor %vm10168_vm3, %vm10169_vm2  ;;  %v10189_v20 = vand.u32 2147483648, %v10087_v42  ;;  %v10187_v26 = vand.u32 2147483647, %v10087_v42 }
 0x7ed   :  { %10206 = vrot.lane.b32.xlu1 %v10161_v35, %s15807_s14  ;;  %v10165_v11 = vsub.f32 1.0, %v10164_v40  ;;  %vm10183_vm7 = vweird.f32 %v10087_v42  ;;  %15582 = vpow2.f32 %v14474_v59  ;;  %vm10235_vm1 = vcmask 130048  }
 0x7ee   :  { %v10190_v27 = vor.u32 1.1754944e-38, %v10189_v20  ;;  %vm10188_vm9 = vcmp.eq.f32.partialorder %v10187_v26, 8.507059e+37  ;;  %vm10221_vm2 = vcmask 654336   ;;  %vm10223_vm3 = vcmask 523264  }
 0x7ef   :  { %v10166_v9 = vmul.f32 %v15579_v57, %v10165_v11 }
 0x7f1   :  { %v10167_v34 = vadd.f32 %v15579_v57, %v10166_v9 }
 0x7f2   :  { %v15581_v63 = vpop.eup %15580 }
 0x7f3   :  { %v10171_v38 = vsel %vm10170_vm4, %v15579_v57, %v10167_v34  ;;  %v10179_v55 = vmul.f32 %v15581_v63, %v10087_v42  ;;  %vm10184_vm6 = vweird.f32 %v15581_v63  ;;  %v15583_v13 = vpop.eup %15582  ;;  %vm10225_vm4 = vcmask 392192  }
 0x7f4   :  { %v10176_v1 = vsel %vm10173_vm5, %v10175_v23, %v10171_v38  ;;  %vm10185_vm8 = vmor %vm10183_vm7, %vm10184_vm6  ;;  %v10081_v5 = vadd.f32 1.0, %v15583_v13 }
 0x7f5   :  { %10210 = vrot.lane.b32.xlu2 %v10176_v1, %s15808_s6  ;;  %v10180_v52 = vsub.f32 1.0, %v10179_v55 }
 0x7f6   :  { %15584 = vrcp.f32 %v10081_v5  ;;  %v10099_v60 = vand.u32 2147483648, %v10081_v5  ;;  %vm10093_vm11 = vweird.f32 %v10081_v5  ;;  %v10097_v7 = vand.u32 2147483647, %v10081_v5 }
 0x7f7   :  { %v10181_v8 = vmul.f32 %v15581_v63, %v10180_v52 }
 0x7f8   :  { %v10100_v3 = vor.u32 1.1754944e-38, %v10099_v60  ;;  %vm10098_vm14 = vcmp.eq.f32.partialorder %v10097_v7, 8.507059e+37 }
 0x7f9   :  { %v10182_v29 = vadd.f32 %v15581_v63, %v10181_v8 }
 0x7fb   :  { %v10186_v18 = vsel %vm10185_vm8, %v15581_v63, %v10182_v29 }
 0x7fc   :  { %v10191_v12 = vsel %vm10188_vm9, %v10190_v27, %v10186_v18  ;;  %v15585_v53 = vpop.eup %15584 }
 0x7fd   :  { %10214 = vrot.lane.b32.xlu2 %v10191_v12, %s15793_s4  ;;  %v10089_v0 = vmul.f32 %v15585_v53, %v10081_v5  ;;  %vm10094_vm10 = vweird.f32 %v15585_v53 }
 0x7fe   :  { %vm10095_vm12 = vmor %vm10093_vm11, %vm10094_vm10 }
 0x7ff   :  { %v10090_v2 = vsub.f32 1.0, %v10089_v0 }
 0x801   :  { %v10091_v56 = vmul.f32 %v15585_v53, %v10090_v2 }
 0x803   :  { %v10092_v37 = vadd.f32 %v15585_v53, %v10091_v56 }
 0x805   :  { %v10096_v22 = vsel %vm10095_vm12, %v15585_v53, %v10092_v37 }
 0x806   :  { %v10101_v45 = vsel %vm10098_vm14, %v10100_v3, %v10096_v22 }
 0x847   :  { %v10195_v50 = vpop.permute.xlu0 %10194 }
 0x848   :  { %v10218_v49 = vsel %vm10217_vm13, %v10101_v45, %v10195_v50 }
 0x849   :  { %10229 = vst [vmem:[%s17539_s10] sm:$0xff] %v10218_v49 }
 0x84f   :  { %v10211_v41 = vpop.permute.xlu2 %10210  ;;  %v10199_v6 = vpop.permute.xlu0 %10198 }
 0x850   :  { %v10220_v17 = vsel %vm10219_vm15, %v10195_v50, %v10199_v6 }
 0x851   :  { %10230 = vst [vmem:[%s17539_s10 + $0x8] sm:$0xff] %v10220_v17 }
 0x857   :  { %v10215_v62 = vpop.permute.xlu2 %10214  ;;  %v10203_v28 = vpop.permute.xlu1 %10202 }
 0x858   :  { %v10228_v33 = vsel %vm10227_vm0, %v10211_v41, %v10215_v62  ;;  %10236 = vst.msk [vmem:[%s17539_s10 + $0x30] sm:$0xff] %vm10235_vm1, %v10215_v62  ;;  %v10222_v39 = vsel %vm10221_vm2, %v10199_v6, %v10203_v28 }
 0x859   :  { %10234 = vst [vmem:[%s17539_s10 + $0x28] sm:$0xff] %v10228_v33 }
 0x85a   :  { %10231 = vst [vmem:[%s17539_s10 + $0x10] sm:$0xff] %v10222_v39 }
 0x85f   :  { %v10207_v32 = vpop.permute.xlu1 %10206 }
 0x860   :  { %v10224_v19 = vsel %vm10223_vm3, %v10203_v28, %v10207_v32  ;;  %v10226_v24 = vsel %vm10225_vm4, %v10207_v32, %v10211_v41 }
 0x861   :  { %10232 = vst [vmem:[%s17539_s10 + $0x18] sm:$0xff] %v10224_v19 }
 0x862   :  { %10233 = vst [vmem:[%s17539_s10 + $0x20] sm:$0xff] %v10226_v24 }
 0x863   :  { %10241 = vsyncpa [#allocation3], 1 }
 0x864   :  { %10242 = vsyncpa [#allocation5], 1 }
 0x865   :  { %10243 = vsyncpa [#allocation8], 1 }
 0x866   :  { %10244 = vsyncpa [#allocation11], 1 }
 0x867   :  { %10245 = vsyncpa [#allocation14], 1 }

</bundles_post_ra>
